<compile_context>
chip_gen: v6e
topology: v6e:2x2x1
jax: 0.10.0
libtpu: 0.0.40
codegen_flags: <defaults>
</compile_context>

<pallas_src>
import math
from functools import partial

import jax
import jax.numpy as jnp
import numpy as np
from jax.experimental import pallas as pl
from jax.experimental.pallas import tpu as pltpu


# ----------------------------- in-kernel helpers -----------------------------

def _erf_approx(x):
    # Abramowitz-Stegun 7.1.26 polynomial erf (max abs err ~1.5e-7, far below test tolerance).
    a1, a2, a3, a4, a5 = 0.254829592, -0.284496736, 1.421413741, -1.453152027, 1.061405429
    p = 0.3275911
    sgn = jnp.where(x >= 0.0, 1.0, -1.0)
    ax = jnp.abs(x)
    t = 1.0 / (1.0 + p * ax)
    poly = ((((a5 * t + a4) * t + a3) * t + a2) * t + a1) * t
    return sgn * (1.0 - poly * jnp.exp(-ax * ax))


def _gelu_exact(x):
    # nn.GELU default (exact erf form), with the polynomial erf above.
    return 0.5 * x * (1.0 + _erf_approx(x * 0.7071067811865476))


# ----------------------------- fused kernel -----------------------------

def core_adaptive_fused_kernel(x_ref, wv_ref, bv_ref, cbd_ref, seg_ref, hmat_ref,
                               w1a_ref, w1d_ref, b1_ref, w2_ref, b2_ref, sc_ref, sh_ref,
                               o_ref, *, batch, head, head_dim, core_num, scale):
    # x_ref:    (b, f, L)   channels on sublanes, L = T*N on lanes (lane-dense)
    # wv_ref:   (d_core, f) 1x1 "value" conv weight;   bv_ref: (d_core, 1) bias
    # cbd_ref:  (head*core_num, f)  block-diagonal cores -> all heads' affinity in one matmul
    # seg_ref:  (L, L) f32 0/1, seg[l1, l2] = (l1 // N == l2 // N): same-time-step segment matrix
    # hmat_ref: (HC, HC) f32 0/1, hmat[r1, r2] = (r1 // core_num == r2 // core_num)
    # w1a/w1d:  (d_mid, f) pre-split/folded first conv;  b1: (d_mid, 1)
    # w2:       (d_out, d_mid);  b2/sc/sh: (d_out, 1)   (BatchNorm eval scale/shift)
    # o_ref:    (b, d_out, L)
    f = head * head_dim
    seg = seg_ref[...]
    wv = wv_ref[...]
    bv = bv_ref[...]
    cbd = cbd_ref[...]
    hmat = hmat_ref[...]

    # ---- stage 1: per-batch value conv + core affinities + node<->core mixing (all T at once) ----
    v_blocks = {}                                     # (h, bb) -> (head_dim, L)
    for bb in range(batch):                           # static, fully unrolled (batch is tiny)
        x = x_ref[bb]                                                                  # (f, L)
        q = jnp.dot(wv, x, preferred_element_type=jnp.float32) + bv                    # (f, L)
        aff = jnp.dot(cbd, q, preferred_element_type=jnp.float32) * scale              # (HC, L)

        # Shared-exp softmaxes: one global max shift keeps both directions mathematically exact.
        m = jnp.max(jnp.max(aff, axis=1, keepdims=True), axis=0, keepdims=True)        # (1, 1)
        e = jnp.exp(aff - m)                                                           # (HC, L)
        sum_n = jnp.dot(e, seg, preferred_element_type=jnp.float32)    # per-(row, t) sums, bcast over n
        sum_c = jnp.dot(hmat, e, preferred_element_type=jnp.float32)   # per-(head, lane) sums, bcast over c
        n2c = e * pl.reciprocal(sum_n, approx=True)   # softmax over nodes (torch dim = -1)
        c2n = e * pl.reciprocal(sum_c, approx=True)   # softmax over cores (torch dim = -2)

        for h in range(head):                         # static, fully unrolled
            n2c_h = n2c[h * core_num:(h + 1) * core_num, :]                            # (C, L)
            c2n_h = c2n[h * core_num:(h + 1) * core_num, :]                            # (C, L)
            # mix[l1, l2] = sum_c n2c_h[c, l1] * c2n_h[c, l2], restricted to same time step
            mix = jax.lax.dot_general(n2c_h, c2n_h, (((0,), (0,)), ((), ())),
                                      preferred_element_type=jnp.float32)              # (L, L)
            mix = mix * seg                                                            # block-diag over t
            xh = x[h * head_dim:(h + 1) * head_dim, :]                                 # (hd, L)
            v_blocks[(h, bb)] = jnp.dot(xh, mix, preferred_element_type=jnp.float32)   # (hd, L)

    # ---- stage 2: torch's  v.transpose(0, 1).reshape(b, f, t, n)  (mixes heads across batches) ----
    # Flat (head, batch, head_dim) channel order, re-chunked into groups of f channels per out-batch.
    flat = [v_blocks[(h, bb)] for h in range(head) for bb in range(batch)]
    blocks_per_out = f // head_dim                    # == head

    # ---- stage 3: FFN + residual + BatchNorm (eval) ----
    w1a = w1a_ref[...]
    w1d = w1d_ref[...]
    b1 = b1_ref[...]
    w2 = w2_ref[...]
    b2 = b2_ref[...]
    sc = sc_ref[...]
    sh = sh_ref[...]
    for bo in range(batch):                           # static, fully unrolled
        x = x_ref[bo]                                                                  # (f, L)
        v = jnp.concatenate(flat[bo * blocks_per_out:(bo + 1) * blocks_per_out], axis=0)  # (f, L)
        # concat([x - v, v]) @ W1  ==  W1a @ x + (W1b - W1a) @ v   (weights pre-split in wrapper)
        h1 = (jnp.dot(w1a, x, preferred_element_type=jnp.float32)
              + jnp.dot(w1d, v, preferred_element_type=jnp.float32)
              + b1)                                                                    # (d_mid, L)
        g = _gelu_exact(h1)                 # nn.GELU (exact form); Dropout = identity in eval mode
        y = jnp.dot(w2, g, preferred_element_type=jnp.float32) + b2                    # (d_out, L)
        y = y + x                           # residual with the permuted input
        o_ref[bo] = y * sc + sh             # BatchNorm2d with running stats (eval mode)


# ----------------------------- Wrapper -----------------------------

def core_adaptive_forward(params, x_btnf, ssie=None, adj=None):
    del ssie, adj  # accepted (like the torch forward) but unused
    b, t, n, f = x_btnf.shape
    head, core_num, head_dim = params["cores"].shape
    d_core = head * head_dim
    d_out = params["w2"].shape[0]
    d_mid = params["w1"].shape[0]
    assert f == d_core == d_out, "module only supports d_in == d_core == d_out"
    L = t * n
    hc = head * core_num

    # NCHW layout with (t, n) flattened onto the lane axis: (b, f, L)
    x_bfl = jnp.transpose(x_btnf, (0, 3, 1, 2)).reshape(b, f, L)

    # block-diagonal cores: cbd[h*C + c, h*hd + d] = cores[h, c, d]
    eye_h = jnp.eye(head, dtype=jnp.float32)
    cbd = jnp.einsum("hg,hcd->hcgd", eye_h, params["cores"]).reshape(hc, f)
    # same-time-step segment matrix and same-head group matrix (built once, host/XLA side)
    seg = (jnp.arange(L)[:, None] // n == jnp.arange(L)[None, :] // n).astype(jnp.float32)
    hmat = (jnp.arange(hc)[:, None] // core_num == jnp.arange(hc)[None, :] // core_num).astype(jnp.float32)

    # fold concat([x - v, v]) into pre-split first-conv weights
    w1a = params["w1"][:, :f]                    # multiplies (x - v)  -> contributes W1a @ x
    w1d = params["w1"][:, f:] - w1a              # multiplies v        -> (W1b - W1a) @ v
    bn_scale = params["bn_gamma"] / jnp.sqrt(params["bn_var"] + 1e-5)
    bn_shift = params["bn_beta"] - params["bn_mean"] * bn_scale

    # Single fused kernel, no grid: every operand fits VMEM many times over at these shapes.
    # TODO(synk): for much larger b, T*N or d_mid, reintroduce a batch/L-tile grid so the
    # (d_mid, L) intermediate and the (L, L) segment matrix stay well under VMEM limits.
    out_bfl = pl.pallas_call(
        partial(core_adaptive_fused_kernel, batch=b, head=head, head_dim=head_dim,
                core_num=core_num, scale=1.0 / math.sqrt(head_dim)),
        out_shape=jax.ShapeDtypeStruct((b, d_out, L), jnp.float32),
    )(x_bfl, params["wv"], params["bv"].reshape(d_core, 1), cbd, seg, hmat,
      w1a, w1d, params["b1"].reshape(d_mid, 1), params["w2"],
      params["b2"].reshape(d_out, 1), bn_scale.reshape(d_out, 1), bn_shift.reshape(d_out, 1))

    # == output.permute(0, 2, 3, 1)
    return jnp.transpose(out_bfl.reshape(b, d_out, t, n), (0, 2, 3, 1))


# ----------------------------- pure-JAX reference (mirrors the torch code) -----------------------------

def reference_forward(params, x_btnf):
    xp = jnp.transpose(x_btnf, (0, 3, 1, 2))                          # (b, f, t, n)
    b, f, t, n = xp.shape
    head, core_num, hd = params["cores"].shape
    q = jnp.einsum("of,bftn->botn", params["wv"], xp) + params["bv"][None, :, None, None]
    q = q.reshape(b, head, hd, t, n)                                  # stack(split(...))
    aff = jnp.einsum("hcd,bhdtn->bhctn", params["cores"], q)
    aff = jnp.swapaxes(aff, -2, -3) / math.sqrt(hd)                   # (b, h, t, c, n)
    n2c = jax.nn.softmax(aff, axis=-1)
    c2n = jax.nn.softmax(aff, axis=-2)
    v = xp.reshape(b, head, hd, t, n)
    v = jnp.einsum("bhftn,bhtcn->bhftc", v, n2c)
    v = jnp.einsum("bhftc,bhtcn->bhftn", v, c2n)
    v = jnp.transpose(v, (1, 0, 2, 3, 4)).reshape(b, f, t, n)         # torch .transpose(0,1).reshape
    out = jnp.concatenate([xp - v, v], axis=1)
    h1 = jnp.einsum("of,bftn->botn", params["w1"], out) + params["b1"][None, :, None, None]
    g = 0.5 * h1 * (1.0 + jax.scipy.special.erf(h1 / jnp.sqrt(2.0)))
    y = jnp.einsum("of,bftn->botn", params["w2"], g) + params["b2"][None, :, None, None]
    y = y + xp
    scale = params["bn_gamma"] / jnp.sqrt(params["bn_var"] + 1e-5)
    shift = params["bn_beta"] - params["bn_mean"] * scale
    y = y * scale[None, :, None, None] + shift[None, :, None, None]
    return jnp.transpose(y, (0, 2, 3, 1))


# ----------------------------- main -----------------------------

if __name__ == "__main__":
    B, T, N = 2, 8, 16
    D_IN = D_CORE = D_OUT = 32
    HEAD, CORE_NUM = 4, 4
    HD = D_CORE // HEAD
    D_MID = 4 * (D_IN + D_CORE)

    key = jax.random.PRNGKey(0)
    k = jax.random.split(key, 8)
    params = {
        "cores": jax.random.normal(k[0], (HEAD, CORE_NUM, HD), jnp.float32),
        "wv": jax.random.normal(k[1], (D_CORE, D_IN), jnp.float32) / math.sqrt(D_IN),
        "bv": 0.1 * jax.random.normal(k[2], (D_CORE,), jnp.float32),
        "w1": jax.random.normal(k[3], (D_MID, D_IN + D_CORE), jnp.float32) / math.sqrt(D_IN + D_CORE),
        "b1": 0.1 * jax.random.normal(k[4], (D_MID,), jnp.float32),
        "w2": jax.random.normal(k[5], (D_OUT, D_MID), jnp.float32) / math.sqrt(D_MID),
        "b2": 0.1 * jax.random.normal(k[6], (D_OUT,), jnp.float32),
        "bn_gamma": jnp.ones((D_OUT,), jnp.float32),
        "bn_beta": jnp.zeros((D_OUT,), jnp.float32),
        "bn_mean": jnp.zeros((D_OUT,), jnp.float32),
        "bn_var": jnp.ones((D_OUT,), jnp.float32),
    }
    x = jax.random.normal(k[7], (B, T, N, D_IN), jnp.float32)
    ssie = jnp.zeros((B, T, N, 1), jnp.float32)  # unused by the forward pass (as in the torch code)

    out = core_adaptive_forward(params, x, ssie)
    out = jax.block_until_ready(out)

    ref = reference_forward(params, x)
    assert out.shape == (B, T, N, D_OUT)
    np.testing.assert_allclose(np.asarray(out), np.asarray(ref), rtol=5e-3, atol=5e-3)
    print("KERNEL_OK")
</pallas_src>

<mosaic_0001>
module attributes {stable_mosaic.version = 11 : i64} {
  func.func @core_adaptive_fused_kernel(%arg0: memref<2x32x128xf32, #tpu.memory_space<vmem>>, %arg1: memref<32x32xf32, #tpu.memory_space<vmem>>, %arg2: memref<32x1xf32, #tpu.memory_space<vmem>>, %arg3: memref<16x32xf32, #tpu.memory_space<vmem>>, %arg4: memref<128x128xf32, #tpu.memory_space<vmem>>, %arg5: memref<16x16xf32, #tpu.memory_space<vmem>>, %arg6: memref<256x32xf32, #tpu.memory_space<vmem>>, %arg7: memref<256x32xf32, #tpu.memory_space<vmem>>, %arg8: memref<256x1xf32, #tpu.memory_space<vmem>>, %arg9: memref<32x256xf32, #tpu.memory_space<vmem>>, %arg10: memref<32x1xf32, #tpu.memory_space<vmem>>, %arg11: memref<32x1xf32, #tpu.memory_space<vmem>>, %arg12: memref<32x1xf32, #tpu.memory_space<vmem>>, %arg13: memref<2x32x128xf32, #tpu.memory_space<vmem>>) attributes {dimension_semantics = [], scalar_prefetch = 0 : i64, scratch_operands = 0 : i64, tpu.core_type = #tpu.core_type<tc>} {
    %c0 = arith.constant 0 : index
    %c0_0 = arith.constant 0 : index
    %0 = vector.load %arg4[%c0, %c0_0] : memref<128x128xf32, #tpu.memory_space<vmem>>, vector<128x128xf32>
    %c0_1 = arith.constant 0 : index
    %c0_2 = arith.constant 0 : index
    %1 = vector.load %arg1[%c0_1, %c0_2] : memref<32x32xf32, #tpu.memory_space<vmem>>, vector<32x32xf32>
    %c0_3 = arith.constant 0 : index
    %c0_4 = arith.constant 0 : index
    %2 = vector.load %arg2[%c0_3, %c0_4] : memref<32x1xf32, #tpu.memory_space<vmem>>, vector<32x1xf32>
    %c0_5 = arith.constant 0 : index
    %c0_6 = arith.constant 0 : index
    %3 = vector.load %arg3[%c0_5, %c0_6] : memref<16x32xf32, #tpu.memory_space<vmem>>, vector<16x32xf32>
    %c0_7 = arith.constant 0 : index
    %c0_8 = arith.constant 0 : index
    %4 = vector.load %arg5[%c0_7, %c0_8] : memref<16x16xf32, #tpu.memory_space<vmem>>, vector<16x16xf32>
    %c0_9 = arith.constant 0 : index
    %c0_10 = arith.constant 0 : index
    %c0_11 = arith.constant 0 : index
    %5 = vector.load %arg0[%c0_9, %c0_10, %c0_11] : memref<2x32x128xf32, #tpu.memory_space<vmem>>, vector<1x32x128xf32>
    %6 = vector.shape_cast %5 : vector<1x32x128xf32> to vector<32x128xf32>
    %cst = arith.constant dense<0.000000e+00> : vector<32x128xf32>
    %7 = tpu.matmul %1, %6, %cst {dimension_numbers = #tpu.dot_dimension_numbers<[1], [0], [0], [1], [0, 0, 1, 1], [], []>} : vector<32x32xf32>, vector<32x128xf32>, vector<32x128xf32> -> vector<32x128xf32>
    %8 = vector.broadcast %2 : vector<32x1xf32> to vector<32x128xf32>
    %9 = arith.addf %7, %8 : vector<32x128xf32>
    %cst_12 = arith.constant dense<0.000000e+00> : vector<16x128xf32>
    %10 = tpu.matmul %3, %9, %cst_12 {dimension_numbers = #tpu.dot_dimension_numbers<[1], [0], [0], [1], [0, 0, 1, 1], [], []>} : vector<16x32xf32>, vector<32x128xf32>, vector<16x128xf32> -> vector<16x128xf32>
    %cst_13 = arith.constant 0.353553385 : f32
    %11 = vector.broadcast %cst_13 : f32 to vector<16x128xf32>
    %12 = arith.mulf %10, %11 : vector<16x128xf32>
    %cst_14 = arith.constant dense<0xFF800000> : vector<16xf32>
    %13 = vector.multi_reduction <maximumf>, %12, %cst_14 [1] : vector<16x128xf32> to vector<16xf32>
    %14 = vector.shape_cast %13 : vector<16xf32> to vector<16x1xf32>
    %cst_15 = arith.constant dense<0xFF800000> : vector<1xf32>
    %15 = vector.multi_reduction <maximumf>, %14, %cst_15 [0] : vector<16x1xf32> to vector<1xf32>
    %16 = vector.shape_cast %15 : vector<1xf32> to vector<1x1xf32>
    %17 = vector.broadcast %16 : vector<1x1xf32> to vector<16x128xf32>
    %18 = arith.subf %12, %17 : vector<16x128xf32>
    %19 = math.exp %18 : vector<16x128xf32>
    %cst_16 = arith.constant dense<0.000000e+00> : vector<16x128xf32>
    %20 = tpu.matmul %19, %0, %cst_16 {dimension_numbers = #tpu.dot_dimension_numbers<[1], [0], [0], [1], [0, 0, 1, 1], [], []>} : vector<16x128xf32>, vector<128x128xf32>, vector<16x128xf32> -> vector<16x128xf32>
    %cst_17 = arith.constant dense<0.000000e+00> : vector<16x128xf32>
    %21 = tpu.matmul %4, %19, %cst_17 {dimension_numbers = #tpu.dot_dimension_numbers<[1], [0], [0], [1], [0, 0, 1, 1], [], []>} : vector<16x16xf32>, vector<16x128xf32>, vector<16x128xf32> -> vector<16x128xf32>
    %22 = tpu.reciprocal %20 {approx = true} : vector<16x128xf32> -> vector<16x128xf32>
    %23 = arith.mulf %19, %22 : vector<16x128xf32>
    %24 = tpu.reciprocal %21 {approx = true} : vector<16x128xf32> -> vector<16x128xf32>
    %25 = arith.mulf %19, %24 : vector<16x128xf32>
    %26 = vector.extract_strided_slice %23 {offsets = [0, 0], sizes = [4, 128], strides = [1, 1]} : vector<16x128xf32> to vector<4x128xf32>
    %27 = vector.extract_strided_slice %25 {offsets = [0, 0], sizes = [4, 128], strides = [1, 1]} : vector<16x128xf32> to vector<4x128xf32>
    %cst_18 = arith.constant dense<0.000000e+00> : vector<128x128xf32>
    %28 = tpu.matmul %26, %27, %cst_18 {dimension_numbers = #tpu.dot_dimension_numbers<[0], [0], [1], [1], [0, 1, 1, 1], [], []>} : vector<4x128xf32>, vector<4x128xf32>, vector<128x128xf32> -> vector<128x128xf32>
    %29 = arith.mulf %28, %0 : vector<128x128xf32>
    %30 = vector.extract_strided_slice %6 {offsets = [0, 0], sizes = [8, 128], strides = [1, 1]} : vector<32x128xf32> to vector<8x128xf32>
    %cst_19 = arith.constant dense<0.000000e+00> : vector<8x128xf32>
    %31 = tpu.matmul %30, %29, %cst_19 {dimension_numbers = #tpu.dot_dimension_numbers<[1], [0], [0], [1], [0, 0, 1, 1], [], []>} : vector<8x128xf32>, vector<128x128xf32>, vector<8x128xf32> -> vector<8x128xf32>
    %32 = vector.extract_strided_slice %23 {offsets = [4, 0], sizes = [4, 128], strides = [1, 1]} : vector<16x128xf32> to vector<4x128xf32>
    %33 = vector.extract_strided_slice %25 {offsets = [4, 0], sizes = [4, 128], strides = [1, 1]} : vector<16x128xf32> to vector<4x128xf32>
    %cst_20 = arith.constant dense<0.000000e+00> : vector<128x128xf32>
    %34 = tpu.matmul %32, %33, %cst_20 {dimension_numbers = #tpu.dot_dimension_numbers<[0], [0], [1], [1], [0, 1, 1, 1], [], []>} : vector<4x128xf32>, vector<4x128xf32>, vector<128x128xf32> -> vector<128x128xf32>
    %35 = arith.mulf %34, %0 : vector<128x128xf32>
    %36 = vector.extract_strided_slice %6 {offsets = [8, 0], sizes = [8, 128], strides = [1, 1]} : vector<32x128xf32> to vector<8x128xf32>
    %cst_21 = arith.constant dense<0.000000e+00> : vector<8x128xf32>
    %37 = tpu.matmul %36, %35, %cst_21 {dimension_numbers = #tpu.dot_dimension_numbers<[1], [0], [0], [1], [0, 0, 1, 1], [], []>} : vector<8x128xf32>, vector<128x128xf32>, vector<8x128xf32> -> vector<8x128xf32>
    %38 = vector.extract_strided_slice %23 {offsets = [8, 0], sizes = [4, 128], strides = [1, 1]} : vector<16x128xf32> to vector<4x128xf32>
    %39 = vector.extract_strided_slice %25 {offsets = [8, 0], sizes = [4, 128], strides = [1, 1]} : vector<16x128xf32> to vector<4x128xf32>
    %cst_22 = arith.constant dense<0.000000e+00> : vector<128x128xf32>
    %40 = tpu.matmul %38, %39, %cst_22 {dimension_numbers = #tpu.dot_dimension_numbers<[0], [0], [1], [1], [0, 1, 1, 1], [], []>} : vector<4x128xf32>, vector<4x128xf32>, vector<128x128xf32> -> vector<128x128xf32>
    %41 = arith.mulf %40, %0 : vector<128x128xf32>
    %42 = vector.extract_strided_slice %6 {offsets = [16, 0], sizes = [8, 128], strides = [1, 1]} : vector<32x128xf32> to vector<8x128xf32>
    %cst_23 = arith.constant dense<0.000000e+00> : vector<8x128xf32>
    %43 = tpu.matmul %42, %41, %cst_23 {dimension_numbers = #tpu.dot_dimension_numbers<[1], [0], [0], [1], [0, 0, 1, 1], [], []>} : vector<8x128xf32>, vector<128x128xf32>, vector<8x128xf32> -> vector<8x128xf32>
    %44 = vector.extract_strided_slice %23 {offsets = [12, 0], sizes = [4, 128], strides = [1, 1]} : vector<16x128xf32> to vector<4x128xf32>
    %45 = vector.extract_strided_slice %25 {offsets = [12, 0], sizes = [4, 128], strides = [1, 1]} : vector<16x128xf32> to vector<4x128xf32>
    %cst_24 = arith.constant dense<0.000000e+00> : vector<128x128xf32>
    %46 = tpu.matmul %44, %45, %cst_24 {dimension_numbers = #tpu.dot_dimension_numbers<[0], [0], [1], [1], [0, 1, 1, 1], [], []>} : vector<4x128xf32>, vector<4x128xf32>, vector<128x128xf32> -> vector<128x128xf32>
    %47 = arith.mulf %46, %0 : vector<128x128xf32>
    %48 = vector.extract_strided_slice %6 {offsets = [24, 0], sizes = [8, 128], strides = [1, 1]} : vector<32x128xf32> to vector<8x128xf32>
    %cst_25 = arith.constant dense<0.000000e+00> : vector<8x128xf32>
    %49 = tpu.matmul %48, %47, %cst_25 {dimension_numbers = #tpu.dot_dimension_numbers<[1], [0], [0], [1], [0, 0, 1, 1], [], []>} : vector<8x128xf32>, vector<128x128xf32>, vector<8x128xf32> -> vector<8x128xf32>
    %c1 = arith.constant 1 : index
    %c0_26 = arith.constant 0 : index
    %c0_27 = arith.constant 0 : index
    %50 = vector.load %arg0[%c1, %c0_26, %c0_27] : memref<2x32x128xf32, #tpu.memory_space<vmem>>, vector<1x32x128xf32>
    %51 = vector.shape_cast %50 : vector<1x32x128xf32> to vector<32x128xf32>
    %cst_28 = arith.constant dense<0.000000e+00> : vector<32x128xf32>
    %52 = tpu.matmul %1, %51, %cst_28 {dimension_numbers = #tpu.dot_dimension_numbers<[1], [0], [0], [1], [0, 0, 1, 1], [], []>} : vector<32x32xf32>, vector<32x128xf32>, vector<32x128xf32> -> vector<32x128xf32>
    %53 = vector.broadcast %2 : vector<32x1xf32> to vector<32x128xf32>
    %54 = arith.addf %52, %53 : vector<32x128xf32>
    %cst_29 = arith.constant dense<0.000000e+00> : vector<16x128xf32>
    %55 = tpu.matmul %3, %54, %cst_29 {dimension_numbers = #tpu.dot_dimension_numbers<[1], [0], [0], [1], [0, 0, 1, 1], [], []>} : vector<16x32xf32>, vector<32x128xf32>, vector<16x128xf32> -> vector<16x128xf32>
    %cst_30 = arith.constant 0.353553385 : f32
    %56 = vector.broadcast %cst_30 : f32 to vector<16x128xf32>
    %57 = arith.mulf %55, %56 : vector<16x128xf32>
    %cst_31 = arith.constant dense<0xFF800000> : vector<16xf32>
    %58 = vector.multi_reduction <maximumf>, %57, %cst_31 [1] : vector<16x128xf32> to vector<16xf32>
    %59 = vector.shape_cast %58 : vector<16xf32> to vector<16x1xf32>
    %cst_32 = arith.constant dense<0xFF800000> : vector<1xf32>
    %60 = vector.multi_reduction <maximumf>, %59, %cst_32 [0] : vector<16x1xf32> to vector<1xf32>
    %61 = vector.shape_cast %60 : vector<1xf32> to vector<1x1xf32>
    %62 = vector.broadcast %61 : vector<1x1xf32> to vector<16x128xf32>
    %63 = arith.subf %57, %62 : vector<16x128xf32>
    %64 = math.exp %63 : vector<16x128xf32>
    %cst_33 = arith.constant dense<0.000000e+00> : vector<16x128xf32>
    %65 = tpu.matmul %64, %0, %cst_33 {dimension_numbers = #tpu.dot_dimension_numbers<[1], [0], [0], [1], [0, 0, 1, 1], [], []>} : vector<16x128xf32>, vector<128x128xf32>, vector<16x128xf32> -> vector<16x128xf32>
    %cst_34 = arith.constant dense<0.000000e+00> : vector<16x128xf32>
    %66 = tpu.matmul %4, %64, %cst_34 {dimension_numbers = #tpu.dot_dimension_numbers<[1], [0], [0], [1], [0, 0, 1, 1], [], []>} : vector<16x16xf32>, vector<16x128xf32>, vector<16x128xf32> -> vector<16x128xf32>
    %67 = tpu.reciprocal %65 {approx = true} : vector<16x128xf32> -> vector<16x128xf32>
    %68 = arith.mulf %64, %67 : vector<16x128xf32>
    %69 = tpu.reciprocal %66 {approx = true} : vector<16x128xf32> -> vector<16x128xf32>
    %70 = arith.mulf %64, %69 : vector<16x128xf32>
    %71 = vector.extract_strided_slice %68 {offsets = [0, 0], sizes = [4, 128], strides = [1, 1]} : vector<16x128xf32> to vector<4x128xf32>
    %72 = vector.extract_strided_slice %70 {offsets = [0, 0], sizes = [4, 128], strides = [1, 1]} : vector<16x128xf32> to vector<4x128xf32>
    %cst_35 = arith.constant dense<0.000000e+00> : vector<128x128xf32>
    %73 = tpu.matmul %71, %72, %cst_35 {dimension_numbers = #tpu.dot_dimension_numbers<[0], [0], [1], [1], [0, 1, 1, 1], [], []>} : vector<4x128xf32>, vector<4x128xf32>, vector<128x128xf32> -> vector<128x128xf32>
    %74 = arith.mulf %73, %0 : vector<128x128xf32>
    %75 = vector.extract_strided_slice %51 {offsets = [0, 0], sizes = [8, 128], strides = [1, 1]} : vector<32x128xf32> to vector<8x128xf32>
    %cst_36 = arith.constant dense<0.000000e+00> : vector<8x128xf32>
    %76 = tpu.matmul %75, %74, %cst_36 {dimension_numbers = #tpu.dot_dimension_numbers<[1], [0], [0], [1], [0, 0, 1, 1], [], []>} : vector<8x128xf32>, vector<128x128xf32>, vector<8x128xf32> -> vector<8x128xf32>
    %77 = vector.extract_strided_slice %68 {offsets = [4, 0], sizes = [4, 128], strides = [1, 1]} : vector<16x128xf32> to vector<4x128xf32>
    %78 = vector.extract_strided_slice %70 {offsets = [4, 0], sizes = [4, 128], strides = [1, 1]} : vector<16x128xf32> to vector<4x128xf32>
    %cst_37 = arith.constant dense<0.000000e+00> : vector<128x128xf32>
    %79 = tpu.matmul %77, %78, %cst_37 {dimension_numbers = #tpu.dot_dimension_numbers<[0], [0], [1], [1], [0, 1, 1, 1], [], []>} : vector<4x128xf32>, vector<4x128xf32>, vector<128x128xf32> -> vector<128x128xf32>
    %80 = arith.mulf %79, %0 : vector<128x128xf32>
    %81 = vector.extract_strided_slice %51 {offsets = [8, 0], sizes = [8, 128], strides = [1, 1]} : vector<32x128xf32> to vector<8x128xf32>
    %cst_38 = arith.constant dense<0.000000e+00> : vector<8x128xf32>
    %82 = tpu.matmul %81, %80, %cst_38 {dimension_numbers = #tpu.dot_dimension_numbers<[1], [0], [0], [1], [0, 0, 1, 1], [], []>} : vector<8x128xf32>, vector<128x128xf32>, vector<8x128xf32> -> vector<8x128xf32>
    %83 = vector.extract_strided_slice %68 {offsets = [8, 0], sizes = [4, 128], strides = [1, 1]} : vector<16x128xf32> to vector<4x128xf32>
    %84 = vector.extract_strided_slice %70 {offsets = [8, 0], sizes = [4, 128], strides = [1, 1]} : vector<16x128xf32> to vector<4x128xf32>
    %cst_39 = arith.constant dense<0.000000e+00> : vector<128x128xf32>
    %85 = tpu.matmul %83, %84, %cst_39 {dimension_numbers = #tpu.dot_dimension_numbers<[0], [0], [1], [1], [0, 1, 1, 1], [], []>} : vector<4x128xf32>, vector<4x128xf32>, vector<128x128xf32> -> vector<128x128xf32>
    %86 = arith.mulf %85, %0 : vector<128x128xf32>
    %87 = vector.extract_strided_slice %51 {offsets = [16, 0], sizes = [8, 128], strides = [1, 1]} : vector<32x128xf32> to vector<8x128xf32>
    %cst_40 = arith.constant dense<0.000000e+00> : vector<8x128xf32>
    %88 = tpu.matmul %87, %86, %cst_40 {dimension_numbers = #tpu.dot_dimension_numbers<[1], [0], [0], [1], [0, 0, 1, 1], [], []>} : vector<8x128xf32>, vector<128x128xf32>, vector<8x128xf32> -> vector<8x128xf32>
    %89 = vector.extract_strided_slice %68 {offsets = [12, 0], sizes = [4, 128], strides = [1, 1]} : vector<16x128xf32> to vector<4x128xf32>
    %90 = vector.extract_strided_slice %70 {offsets = [12, 0], sizes = [4, 128], strides = [1, 1]} : vector<16x128xf32> to vector<4x128xf32>
    %cst_41 = arith.constant dense<0.000000e+00> : vector<128x128xf32>
    %91 = tpu.matmul %89, %90, %cst_41 {dimension_numbers = #tpu.dot_dimension_numbers<[0], [0], [1], [1], [0, 1, 1, 1], [], []>} : vector<4x128xf32>, vector<4x128xf32>, vector<128x128xf32> -> vector<128x128xf32>
    %92 = arith.mulf %91, %0 : vector<128x128xf32>
    %93 = vector.extract_strided_slice %51 {offsets = [24, 0], sizes = [8, 128], strides = [1, 1]} : vector<32x128xf32> to vector<8x128xf32>
    %cst_42 = arith.constant dense<0.000000e+00> : vector<8x128xf32>
    %94 = tpu.matmul %93, %92, %cst_42 {dimension_numbers = #tpu.dot_dimension_numbers<[1], [0], [0], [1], [0, 0, 1, 1], [], []>} : vector<8x128xf32>, vector<128x128xf32>, vector<8x128xf32> -> vector<8x128xf32>
    %c0_43 = arith.constant 0 : index
    %c0_44 = arith.constant 0 : index
    %95 = vector.load %arg6[%c0_43, %c0_44] : memref<256x32xf32, #tpu.memory_space<vmem>>, vector<256x32xf32>
    %c0_45 = arith.constant 0 : index
    %c0_46 = arith.constant 0 : index
    %96 = vector.load %arg7[%c0_45, %c0_46] : memref<256x32xf32, #tpu.memory_space<vmem>>, vector<256x32xf32>
    %c0_47 = arith.constant 0 : index
    %c0_48 = arith.constant 0 : index
    %97 = vector.load %arg8[%c0_47, %c0_48] : memref<256x1xf32, #tpu.memory_space<vmem>>, vector<256x1xf32>
    %c0_49 = arith.constant 0 : index
    %c0_50 = arith.constant 0 : index
    %98 = vector.load %arg9[%c0_49, %c0_50] : memref<32x256xf32, #tpu.memory_space<vmem>>, vector<32x256xf32>
    %c0_51 = arith.constant 0 : index
    %c0_52 = arith.constant 0 : index
    %99 = vector.load %arg10[%c0_51, %c0_52] : memref<32x1xf32, #tpu.memory_space<vmem>>, vector<32x1xf32>
    %c0_53 = arith.constant 0 : index
    %c0_54 = arith.constant 0 : index
    %100 = vector.load %arg11[%c0_53, %c0_54] : memref<32x1xf32, #tpu.memory_space<vmem>>, vector<32x1xf32>
    %c0_55 = arith.constant 0 : index
    %c0_56 = arith.constant 0 : index
    %101 = vector.load %arg12[%c0_55, %c0_56] : memref<32x1xf32, #tpu.memory_space<vmem>>, vector<32x1xf32>
    %c0_57 = arith.constant 0 : index
    %c0_58 = arith.constant 0 : index
    %c0_59 = arith.constant 0 : index
    %102 = vector.load %arg0[%c0_57, %c0_58, %c0_59] : memref<2x32x128xf32, #tpu.memory_space<vmem>>, vector<1x32x128xf32>
    %103 = vector.shape_cast %102 : vector<1x32x128xf32> to vector<32x128xf32>
    %104 = tpu.concatenate %31, %76, %37, %82 in 0 : vector<8x128xf32>, vector<8x128xf32>, vector<8x128xf32>, vector<8x128xf32> -> vector<32x128xf32>
    %cst_60 = arith.constant dense<0.000000e+00> : vector<256x128xf32>
    %105 = tpu.matmul %95, %103, %cst_60 {dimension_numbers = #tpu.dot_dimension_numbers<[1], [0], [0], [1], [0, 0, 1, 1], [], []>} : vector<256x32xf32>, vector<32x128xf32>, vector<256x128xf32> -> vector<256x128xf32>
    %cst_61 = arith.constant dense<0.000000e+00> : vector<256x128xf32>
    %106 = tpu.matmul %96, %104, %cst_61 {dimension_numbers = #tpu.dot_dimension_numbers<[1], [0], [0], [1], [0, 0, 1, 1], [], []>} : vector<256x32xf32>, vector<32x128xf32>, vector<256x128xf32> -> vector<256x128xf32>
    %107 = arith.addf %105, %106 : vector<256x128xf32>
    %108 = vector.broadcast %97 : vector<256x1xf32> to vector<256x128xf32>
    %109 = arith.addf %107, %108 : vector<256x128xf32>
    %cst_62 = arith.constant 5.000000e-01 : f32
    %110 = vector.broadcast %cst_62 : f32 to vector<256x128xf32>
    %111 = arith.mulf %110, %109 : vector<256x128xf32>
    %cst_63 = arith.constant 0.707106769 : f32
    %112 = vector.broadcast %cst_63 : f32 to vector<256x128xf32>
    %113 = arith.mulf %109, %112 : vector<256x128xf32>
    %cst_64 = arith.constant 0.000000e+00 : f32
    %114 = vector.broadcast %cst_64 : f32 to vector<256x128xf32>
    %115 = arith.cmpf oge, %113, %114 : vector<256x128xf32>
    %cst_65 = arith.constant 1.000000e+00 : f32
    %cst_66 = arith.constant -1.000000e+00 : f32
    %116 = vector.broadcast %cst_65 : f32 to vector<256x128xf32>
    %117 = vector.broadcast %cst_66 : f32 to vector<256x128xf32>
    %118 = arith.select %115, %116, %117 : vector<256x128xi1>, vector<256x128xf32>
    %119 = math.absf %113 : vector<256x128xf32>
    %cst_67 = arith.constant 0.327591091 : f32
    %120 = vector.broadcast %cst_67 : f32 to vector<256x128xf32>
    %121 = arith.mulf %120, %119 : vector<256x128xf32>
    %cst_68 = arith.constant 1.000000e+00 : f32
    %122 = vector.broadcast %cst_68 : f32 to vector<256x128xf32>
    %123 = arith.addf %122, %121 : vector<256x128xf32>
    %cst_69 = arith.constant 1.000000e+00 : f32
    %124 = vector.broadcast %cst_69 : f32 to vector<256x128xf32>
    %125 = arith.divf %124, %123 : vector<256x128xf32>
    %cst_70 = arith.constant 1.06140542 : f32
    %126 = vector.broadcast %cst_70 : f32 to vector<256x128xf32>
    %127 = arith.mulf %126, %125 : vector<256x128xf32>
    %cst_71 = arith.constant -1.45315206 : f32
    %128 = vector.broadcast %cst_71 : f32 to vector<256x128xf32>
    %129 = arith.addf %127, %128 : vector<256x128xf32>
    %130 = arith.mulf %129, %125 : vector<256x128xf32>
    %cst_72 = arith.constant 1.42141378 : f32
    %131 = vector.broadcast %cst_72 : f32 to vector<256x128xf32>
    %132 = arith.addf %130, %131 : vector<256x128xf32>
    %133 = arith.mulf %132, %125 : vector<256x128xf32>
    %cst_73 = arith.constant -0.284496725 : f32
    %134 = vector.broadcast %cst_73 : f32 to vector<256x128xf32>
    %135 = arith.addf %133, %134 : vector<256x128xf32>
    %136 = arith.mulf %135, %125 : vector<256x128xf32>
    %cst_74 = arith.constant 0.254829586 : f32
    %137 = vector.broadcast %cst_74 : f32 to vector<256x128xf32>
    %138 = arith.addf %136, %137 : vector<256x128xf32>
    %139 = arith.mulf %138, %125 : vector<256x128xf32>
    %cst_75 = arith.constant 0.000000e+00 : f32
    %140 = vector.broadcast %cst_75 : f32 to vector<256x128xf32>
    %141 = arith.subf %140, %119 : vector<256x128xf32>
    %142 = arith.mulf %141, %119 : vector<256x128xf32>
    %143 = math.exp %142 : vector<256x128xf32>
    %144 = arith.mulf %139, %143 : vector<256x128xf32>
    %cst_76 = arith.constant 1.000000e+00 : f32
    %145 = vector.broadcast %cst_76 : f32 to vector<256x128xf32>
    %146 = arith.subf %145, %144 : vector<256x128xf32>
    %147 = arith.mulf %118, %146 : vector<256x128xf32>
    %cst_77 = arith.constant 1.000000e+00 : f32
    %148 = vector.broadcast %cst_77 : f32 to vector<256x128xf32>
    %149 = arith.addf %148, %147 : vector<256x128xf32>
    %150 = arith.mulf %111, %149 : vector<256x128xf32>
    %cst_78 = arith.constant dense<0.000000e+00> : vector<32x128xf32>
    %151 = tpu.matmul %98, %150, %cst_78 {dimension_numbers = #tpu.dot_dimension_numbers<[1], [0], [0], [1], [0, 0, 1, 1], [], []>} : vector<32x256xf32>, vector<256x128xf32>, vector<32x128xf32> -> vector<32x128xf32>
    %152 = vector.broadcast %99 : vector<32x1xf32> to vector<32x128xf32>
    %153 = arith.addf %151, %152 : vector<32x128xf32>
    %154 = arith.addf %153, %103 : vector<32x128xf32>
    %155 = vector.broadcast %100 : vector<32x1xf32> to vector<32x128xf32>
    %156 = arith.mulf %154, %155 : vector<32x128xf32>
    %157 = vector.broadcast %101 : vector<32x1xf32> to vector<32x128xf32>
    %158 = arith.addf %156, %157 : vector<32x128xf32>
    %c0_79 = arith.constant 0 : index
    %c0_80 = arith.constant 0 : index
    %c0_81 = arith.constant 0 : index
    %159 = vector.load %arg13[%c0_79, %c0_80, %c0_81] : memref<2x32x128xf32, #tpu.memory_space<vmem>>, vector<1x32x128xf32>
    %160 = vector.shape_cast %159 : vector<1x32x128xf32> to vector<32x128xf32>
    %161 = vector.shape_cast %158 : vector<32x128xf32> to vector<1x32x128xf32>
    tpu.vector_store %arg13[%c0_79, %c0_80, %c0_81], %161 {strides = array<i32>} : memref<2x32x128xf32, #tpu.memory_space<vmem>>, vector<1x32x128xf32>,
    %c1_82 = arith.constant 1 : index
    %c0_83 = arith.constant 0 : index
    %c0_84 = arith.constant 0 : index
    %162 = vector.load %arg0[%c1_82, %c0_83, %c0_84] : memref<2x32x128xf32, #tpu.memory_space<vmem>>, vector<1x32x128xf32>
    %163 = vector.shape_cast %162 : vector<1x32x128xf32> to vector<32x128xf32>
    %164 = tpu.concatenate %43, %88, %49, %94 in 0 : vector<8x128xf32>, vector<8x128xf32>, vector<8x128xf32>, vector<8x128xf32> -> vector<32x128xf32>
    %cst_85 = arith.constant dense<0.000000e+00> : vector<256x128xf32>
    %165 = tpu.matmul %95, %163, %cst_85 {dimension_numbers = #tpu.dot_dimension_numbers<[1], [0], [0], [1], [0, 0, 1, 1], [], []>} : vector<256x32xf32>, vector<32x128xf32>, vector<256x128xf32> -> vector<256x128xf32>
    %cst_86 = arith.constant dense<0.000000e+00> : vector<256x128xf32>
    %166 = tpu.matmul %96, %164, %cst_86 {dimension_numbers = #tpu.dot_dimension_numbers<[1], [0], [0], [1], [0, 0, 1, 1], [], []>} : vector<256x32xf32>, vector<32x128xf32>, vector<256x128xf32> -> vector<256x128xf32>
    %167 = arith.addf %165, %166 : vector<256x128xf32>
    %168 = vector.broadcast %97 : vector<256x1xf32> to vector<256x128xf32>
    %169 = arith.addf %167, %168 : vector<256x128xf32>
    %cst_87 = arith.constant 5.000000e-01 : f32
    %170 = vector.broadcast %cst_87 : f32 to vector<256x128xf32>
    %171 = arith.mulf %170, %169 : vector<256x128xf32>
    %cst_88 = arith.constant 0.707106769 : f32
    %172 = vector.broadcast %cst_88 : f32 to vector<256x128xf32>
    %173 = arith.mulf %169, %172 : vector<256x128xf32>
    %cst_89 = arith.constant 0.000000e+00 : f32
    %174 = vector.broadcast %cst_89 : f32 to vector<256x128xf32>
    %175 = arith.cmpf oge, %173, %174 : vector<256x128xf32>
    %cst_90 = arith.constant 1.000000e+00 : f32
    %cst_91 = arith.constant -1.000000e+00 : f32
    %176 = vector.broadcast %cst_90 : f32 to vector<256x128xf32>
    %177 = vector.broadcast %cst_91 : f32 to vector<256x128xf32>
    %178 = arith.select %175, %176, %177 : vector<256x128xi1>, vector<256x128xf32>
    %179 = math.absf %173 : vector<256x128xf32>
    %cst_92 = arith.constant 0.327591091 : f32
    %180 = vector.broadcast %cst_92 : f32 to vector<256x128xf32>
    %181 = arith.mulf %180, %179 : vector<256x128xf32>
    %cst_93 = arith.constant 1.000000e+00 : f32
    %182 = vector.broadcast %cst_93 : f32 to vector<256x128xf32>
    %183 = arith.addf %182, %181 : vector<256x128xf32>
    %cst_94 = arith.constant 1.000000e+00 : f32
    %184 = vector.broadcast %cst_94 : f32 to vector<256x128xf32>
    %185 = arith.divf %184, %183 : vector<256x128xf32>
    %cst_95 = arith.constant 1.06140542 : f32
    %186 = vector.broadcast %cst_95 : f32 to vector<256x128xf32>
    %187 = arith.mulf %186, %185 : vector<256x128xf32>
    %cst_96 = arith.constant -1.45315206 : f32
    %188 = vector.broadcast %cst_96 : f32 to vector<256x128xf32>
    %189 = arith.addf %187, %188 : vector<256x128xf32>
    %190 = arith.mulf %189, %185 : vector<256x128xf32>
    %cst_97 = arith.constant 1.42141378 : f32
    %191 = vector.broadcast %cst_97 : f32 to vector<256x128xf32>
    %192 = arith.addf %190, %191 : vector<256x128xf32>
    %193 = arith.mulf %192, %185 : vector<256x128xf32>
    %cst_98 = arith.constant -0.284496725 : f32
    %194 = vector.broadcast %cst_98 : f32 to vector<256x128xf32>
    %195 = arith.addf %193, %194 : vector<256x128xf32>
    %196 = arith.mulf %195, %185 : vector<256x128xf32>
    %cst_99 = arith.constant 0.254829586 : f32
    %197 = vector.broadcast %cst_99 : f32 to vector<256x128xf32>
    %198 = arith.addf %196, %197 : vector<256x128xf32>
    %199 = arith.mulf %198, %185 : vector<256x128xf32>
    %cst_100 = arith.constant 0.000000e+00 : f32
    %200 = vector.broadcast %cst_100 : f32 to vector<256x128xf32>
    %201 = arith.subf %200, %179 : vector<256x128xf32>
    %202 = arith.mulf %201, %179 : vector<256x128xf32>
    %203 = math.exp %202 : vector<256x128xf32>
    %204 = arith.mulf %199, %203 : vector<256x128xf32>
    %cst_101 = arith.constant 1.000000e+00 : f32
    %205 = vector.broadcast %cst_101 : f32 to vector<256x128xf32>
    %206 = arith.subf %205, %204 : vector<256x128xf32>
    %207 = arith.mulf %178, %206 : vector<256x128xf32>
    %cst_102 = arith.constant 1.000000e+00 : f32
    %208 = vector.broadcast %cst_102 : f32 to vector<256x128xf32>
    %209 = arith.addf %208, %207 : vector<256x128xf32>
    %210 = arith.mulf %171, %209 : vector<256x128xf32>
    %cst_103 = arith.constant dense<0.000000e+00> : vector<32x128xf32>
    %211 = tpu.matmul %98, %210, %cst_103 {dimension_numbers = #tpu.dot_dimension_numbers<[1], [0], [0], [1], [0, 0, 1, 1], [], []>} : vector<32x256xf32>, vector<256x128xf32>, vector<32x128xf32> -> vector<32x128xf32>
    %212 = vector.broadcast %99 : vector<32x1xf32> to vector<32x128xf32>
    %213 = arith.addf %211, %212 : vector<32x128xf32>
    %214 = arith.addf %213, %163 : vector<32x128xf32>
    %215 = vector.broadcast %100 : vector<32x1xf32> to vector<32x128xf32>
    %216 = arith.mulf %214, %215 : vector<32x128xf32>
    %217 = vector.broadcast %101 : vector<32x1xf32> to vector<32x128xf32>
    %218 = arith.addf %216, %217 : vector<32x128xf32>
    %c1_104 = arith.constant 1 : index
    %c0_105 = arith.constant 0 : index
    %c0_106 = arith.constant 0 : index
    %219 = vector.load %arg13[%c1_104, %c0_105, %c0_106] : memref<2x32x128xf32, #tpu.memory_space<vmem>>, vector<1x32x128xf32>
    %220 = vector.shape_cast %219 : vector<1x32x128xf32> to vector<32x128xf32>
    %221 = vector.shape_cast %218 : vector<32x128xf32> to vector<1x32x128xf32>
    tpu.vector_store %arg13[%c1_104, %c0_105, %c0_106], %221 {strides = array<i32>} : memref<2x32x128xf32, #tpu.memory_space<vmem>>, vector<1x32x128xf32>,
    return
  }
}

</mosaic_0001>

<bundles_post_ra>
// kernel: tpu_custom_call.1
= control target key start
LH: loop header
LB: loop body
LE: loop exit
PB: predicated region body
PF: predicated region fallthrough
CT: control target
= control target key end

     0   :  { %vm97_vm0 = vcmask 261120   ;;  %v8909_v3 = vmov 0   ;;  %s12745_s0 = inlined_call_operand.vmem [shape: f32[2,32,128], index: 0, kind: input, shape index: {}]   ;;  %s12746_s1 = inlined_call_operand.vmem [shape: f32[32,32], index: 1, kind: input, shape index: {}]   ;;  %s12747_s2 = inlined_call_operand.vmem [shape: f32[32,1], index: 2, kind: input, shape index: {}]   ;;  %s12748_s3 = inlined_call_operand.vmem [shape: f32[16,32], index: 3, kind: input, shape index: {}]   ;;  %s12749_s4 = inlined_call_operand.vmem [shape: f32[128,128], index: 4, kind: input, shape index: {}]   ;;  %s12750_s5 = inlined_call_operand.vmem [shape: f32[16,16], index: 5, kind: input, shape index: {}]   ;;  %s12751_s6 = inlined_call_operand.vmem [shape: f32[256,32], index: 6, kind: input, shape index: {}]   ;;  %s12752_s7 = inlined_call_operand.vmem [shape: f32[256,32], index: 7, kind: input, shape index: {}]   ;;  %s12753_s8 = inlined_call_operand.vmem [shape: f32[256,1], index: 8, kind: input, shape index: {}]   ;;  %s12754_s9 = inlined_call_operand.vmem [shape: f32[32,256], index: 9, kind: input, shape index: {}]   ;;  %s12755_s10 = inlined_call_operand.vmem [shape: f32[32,1], index: 10, kind: input, shape index: {}]   ;;  %s12756_s11 = inlined_call_operand.vmem [shape: f32[32,1], index: 11, kind: input, shape index: {}]   ;;  %s12757_s12 = inlined_call_operand.vmem [shape: f32[32,1], index: 12, kind: input, shape index: {}]   ;;  %s12758_s13 = inlined_call_operand.hbm [shape: f32[2,32,128], index: 13, kind: output, shape index: {}]  }
   0x1   :  { %v76_v0 = vld [vmem:[%s12745_s0 + $0x18] sm:$0xff]  ;;  %v8992_v1 = vld [vmem:[%s12745_s0 + $0x10] sm:$0xff]  ;;  %v8997_v2 = vld [vmem:[%s12746_s1] sm:$0xff]  ;;  %8489 = vset.pattern.permute.xlu1 %v8909_v3  ;;  %8488 = vset.pattern.permute.xlu0 %v8909_v3 }
   0x2   :  { %7635 = vmatprep.subr.mxu1 %v76_v0  ;;  %v9002_v4 = vld [vmem:[%s12745_s0 + $0x8] sm:$0xff]  ;;  %7643 = vmatprep.mubr.msk.f32.mxu1 %vm97_vm0, %v8997_v2  ;;  %v68_v5 = vld [vmem:[%s12747_s2 + $0x18] sm:$0xff]  ;;  %v9017_v7 = vld [vmem:[%s12745_s0] sm:$0xff] }
   0x3   :  { %7636 = vmatpush3.msra.mxu1 %v76_v0  ;;  %v66_v6 = vld [vmem:[%s12747_s2 + $0x8] sm:$0xff]  ;;  %94 = vperm.xlu0 %8488, %v68_v5  }
   0x4   :  { %7637 = vmatprep.subr.mxu1 %v8992_v1 }
   0x5   :  { %7638 = vmatpush3.msra.mxu1 %v8992_v1 }
   0x6   :  { %18 = vsyncpa [#allocation3], 0  ;;  %7639 = vmatprep.subr.mxu1 %v9002_v4  ;;  %84 = vperm.xlu1 %8489, %v66_v6   ;;  %v67_v8 = vld [vmem:[%s12747_s2 + $0x10] sm:$0xff]  ;;  %v9027_v9 = vld [vmem:[%s12746_s1 + $0x8] sm:$0xff]  ;;  %vm370_vm1 = vcmask 130048   ;;  %vm541_vm2 = vcmask 1043456  }
   0x7   :  { %7640 = vmatpush3.msra.mxu1 %v9002_v4  ;;  %v65_v10 = vld [vmem:[%s12747_s2] sm:$0xff]  ;;  %v9036_v11 = vld [vmem:[%s12746_s1 + $0x10] sm:$0xff]  ;;  %89 = vperm.xlu0 %8488, %v67_v8   ;;  %v9046_v12 = vld [vmem:[%s12746_s1 + $0x18] sm:$0xff]  ;;  %vm492_vm3 = vcmask 31744   ;;  %vm8911_vm4 = vmmov 0   ;;  %s8913_s20 = smov [#allocation2]  }
   0x8   :  { %7641 = vmatprep.subr.mxu1 %v9017_v7  ;;  %v9053_v13 = vld [vmem:[%s12748_s3] sm:$0xff]  ;;  %v9072_v26 = vld [vmem:[%s12748_s3 + $0x8] sm:$0xff]  ;;  %v9085_v31 = vld [vmem:[%s12749_s4 + $0x78] sm:$0xff] }
   0x9   :  { %7642 = vmatpush3.msra.mxu1 %v9017_v7  ;;  %7660 = vmatprep.subr.mxu0 %v9085_v31  ;;  %v9092_v32 = vld [vmem:[%s12749_s4 + $0x70] sm:$0xff]  ;;  %v9099_v33 = vld [vmem:[%s12749_s4 + $0x68] sm:$0xff]  ;;  %v9106_v34 = vld [vmem:[%s12749_s4 + $0x60] sm:$0xff] }
   0xa   :  { %7644 = vmatmul.mubr.msk.f32.vlgmr.msra.gmra.mxu1 %vm97_vm0, %v9027_v9  ;;  %79 = vperm.xlu1 %8489, %v65_v10   ;;  %v9113_v35 = vld [vmem:[%s12749_s4 + $0x58] sm:$0xff]  ;;  %v9120_v36 = vld [vmem:[%s12749_s4 + $0x50] sm:$0xff]  ;;  %v9127_v37 = vld [vmem:[%s12749_s4 + $0x48] sm:$0xff] }
   0xb   :  { %7646 = vmatprep.mubr.msk.f32.mxu1 %vm97_vm0, %v9036_v11  ;;  %7661 = vmatpush3.msra.mxu0 %v9085_v31  ;;  %v9134_v38 = vld [vmem:[%s12749_s4 + $0x40] sm:$0xff]  ;;  %v9141_v39 = vld [vmem:[%s12749_s4 + $0x38] sm:$0xff]  ;;  %v9148_v40 = vld [vmem:[%s12749_s4 + $0x30] sm:$0xff] }
   0xc   :  { %7662 = vmatprep.subr.mxu0 %v9092_v32  ;;  %v9153_v41 = vld [vmem:[%s12749_s4 + $0x28] sm:$0xff]  ;;  %v9160_v42 = vld [vmem:[%s12749_s4 + $0x20] sm:$0xff]  ;;  %v9167_v43 = vld [vmem:[%s12749_s4 + $0x18] sm:$0xff] }
   0xd   :  { %7663 = vmatpush3.msra.mxu0 %v9092_v32  ;;  %v9174_v44 = vld [vmem:[%s12749_s4 + $0x10] sm:$0xff]  ;;  %v9181_v45 = vld [vmem:[%s12749_s4 + $0x8] sm:$0xff]  ;;  %v9188_v46 = vld [vmem:[%s12749_s4] sm:$0xff] }
   0xe   :  { %7647 = vmatmul.mubr.msk.f32.gmra.mxu1 %vm97_vm0, %v9046_v12  ;;  %7664 = vmatprep.subr.mxu0 %v9099_v33  ;;  %v71_v47 = vld [vmem:[%s12750_s5] sm:$0xff]  ;;  %v72_v63 = vld [vmem:[%s12750_s5 + $0x8] sm:$0xff] }
   0xf   :  { %7657 = vmatprep.mubr.msk.f32.mxu1 %vm97_vm0, %v9053_v13  ;;  %7665 = vmatpush3.msra.mxu0 %v9099_v33 }
  0x10   :  { %7666 = vmatprep.subr.mxu0 %v9106_v34 }
  0x11   :  { %7667 = vmatpush3.msra.mxu0 %v9106_v34 }
  0x12   :  { %7668 = vmatprep.subr.mxu0 %v9113_v35 }
  0x13   :  { %7669 = vmatpush3.msra.mxu0 %v9113_v35 }
  0x14   :  { %7670 = vmatprep.subr.mxu0 %v9120_v36 }
  0x15   :  { %7671 = vmatpush3.msra.mxu0 %v9120_v36 }
  0x16   :  { %7672 = vmatprep.subr.mxu0 %v9127_v37 }
  0x17   :  { %7673 = vmatpush3.msra.mxu0 %v9127_v37 }
  0x18   :  { %7674 = vmatprep.subr.mxu0 %v9134_v38 }
  0x19   :  { %7675 = vmatpush3.msra.mxu0 %v9134_v38 }
  0x1a   :  { %7676 = vmatprep.subr.mxu0 %v9141_v39 }
  0x1b   :  { %7677 = vmatpush3.msra.mxu0 %v9141_v39 }
  0x1c   :  { %7678 = vmatprep.subr.mxu0 %v9148_v40 }
  0x1d   :  { %7679 = vmatpush3.msra.mxu0 %v9148_v40 }
  0x1e   :  { %7680 = vmatprep.subr.mxu0 %v9153_v41 }
  0x1f   :  { %7681 = vmatpush3.msra.mxu0 %v9153_v41 }
  0x20   :  { %7682 = vmatprep.subr.mxu0 %v9160_v42 }
  0x21   :  { %7683 = vmatpush3.msra.mxu0 %v9160_v42 }
  0x22   :  { %7684 = vmatprep.subr.mxu0 %v9167_v43 }
  0x23   :  { %7685 = vmatpush3.msra.mxu0 %v9167_v43 }
  0x24   :  { %7686 = vmatprep.subr.mxu0 %v9174_v44 }
  0x25   :  { %7687 = vmatpush3.msra.mxu0 %v9174_v44 }
  0x26   :  { %7688 = vmatprep.subr.mxu0 %v9181_v45 }
  0x27   :  { %7689 = vmatpush3.msra.mxu0 %v9181_v45 }
  0x28   :  { %7690 = vmatprep.subr.mxu0 %v9188_v46 }
  0x29   :  { %7691 = vmatpush3.msra.mxu0 %v9188_v46 }
  0x7e   :  { %v9057_v14 = vpop.permute.xlu0 %94 }
  0x81   :  { %v9059_v16 = vpop.permute.xlu1 %84 }
  0x82   :  { %v9062_v20 = vpop.permute.xlu0 %89 }
  0x85   :  { %v9065_v23 = vpop.permute.xlu1 %79 }
  0xca   :  { %v7645_v15 = vpop.f32.mrf.mxu1 }
  0xcb   :  { %v182_v24 = vadd.f32 %v7645_v15, %v9059_v16 }
  0xcc   :  { %v176_v17 = vpop.f32.mrf.mxu1 }
  0xcd   :  { %v177_v25 = vadd.f32 %v176_v17, %v9065_v23 }
  0xce   :  { %v7648_v18 = vpop.f32.mrf.mxu1 }
  0xcf   :  { %v192_v19 = vadd.f32 %v7648_v18, %v9057_v14 }
  0xd0   :  { %v186_v21 = vpop.f32.mrf.mxu1 }
  0xd1   :  { %v187_v22 = vadd.f32 %v186_v21, %v9062_v20  ;;  %7649 = vmatprep.subr.mxu1 %v192_v19 }
  0xd2   :  { %7650 = vmatpush3.msra.mxu1 %v192_v19 }
  0xd3   :  { %7651 = vmatprep.subr.mxu1 %v187_v22 }
  0xd4   :  { %7652 = vmatpush3.msra.mxu1 %v187_v22 }
  0xd5   :  { %7653 = vmatprep.subr.mxu1 %v182_v24 }
  0xd6   :  { %7654 = vmatpush3.msra.mxu1 %v182_v24 }
  0xd7   :  { %7655 = vmatprep.subr.mxu1 %v177_v25 }
  0xd8   :  { %7656 = vmatpush3.msra.mxu1 %v177_v25 }
  0xd9   :  { %7658 = vmatmul.mubr.msk.f32.vlgmr.msra.gmra.mxu1 %vm97_vm0, %v9072_v26 }
  0xda   :  { %7699 = vmatprep.mubr.msk.f32.mxu1 %vm370_vm1, %v71_v47 }
 0x199   :  { %v7659_v27 = vpop.f32.mrf.mxu1 }
 0x19a   :  { %v9076_v28 = vmul.f32 0.35355338, %v7659_v27 }
 0x19b   :  { %v267_v29 = vpop.f32.mrf.mxu1 }
 0x19c   :  { %280 = vmax.xlane.f32.xlu1 %v9076_v28  ;;  %v9079_v30 = vmul.f32 0.35355338, %v267_v29 }
 0x19e   :  { %278 = vmax.xlane.f32.xlu0 %v9079_v30 }
 0x225   :  { %v281_v48 = vpop.xlane.xlu1 %280 }
 0x227   :  { %v279_v49 = vpop.xlane.xlu0 %278 }
 0x228   :  { %v282_v50 = vmax.f32 %v279_v49, %v281_v48 }
 0x22a   :  { %v283_v51 = vrot.slane %v282_v50, 4 }
 0x22c   :  { %v284_v52 = vmax.f32 %v282_v50, %v283_v51 }
 0x22e   :  { %v285_v53 = vrot.slane %v284_v52, 2 }
 0x230   :  { %v286_v54 = vmax.f32 %v284_v52, %v285_v53 }
 0x232   :  { %v287_v55 = vrot.slane %v286_v54, 1 }
 0x234   :  { %v288_v56 = vmax.f32 %v286_v54, %v287_v55 }
 0x236   :  { %v289_v57 = vsub.f32 %v9079_v30, %v288_v56  ;;  %v290_v58 = vsub.f32 %v9076_v28, %v288_v56 }
 0x238   :  { %v291_v59 = vmul.f32 1.442695, %v289_v57  ;;  %v293_v60 = vmul.f32 1.442695, %v290_v58 }
 0x23a   :  { %8490 = vpow2.f32 %v291_v59 }
 0x23b   :  { %8492 = vpow2.f32 %v293_v60 }
 0x247   :  { %v8491_v61 = vpop.eup %8490 }
 0x248   :  { %v9200_v62 = vpop.eup %8492  ;;  %7692 = vmatprep.mubr.f32.mxu0 %v8491_v61 }
 0x249   :  { %7695 = vmatprep.subr.mxu1 %v9200_v62  ;;  %7693 = vmatmul.mubr.f32.vlgmr.msra.gmra.mxu0 %v9200_v62 }
 0x24a   :  { %7696 = vmatpush3.msra.mxu1 %v9200_v62 }
 0x24b   :  { %7697 = vmatprep.subr.mxu1 %v8491_v61 }
 0x24c   :  { %7698 = vmatpush3.msra.mxu1 %v8491_v61 }
 0x24d   :  { %7700 = vmatmul.mubr.msk.f32.vlgmr.msra.gmra.mxu1 %vm370_vm1, %v72_v63 }
 0x309   :  { %v7694_v0 = vpop.f32.mrf.mxu0 }
 0x30a   :  { %8494 = vrcp.f32 %v7694_v0 }
 0x30b   :  { %v361_v3 = vpop.f32.mrf.mxu0 }
 0x30c   :  { %8496 = vrcp.f32 %v361_v3 }
 0x30d   :  { %v9209_v5 = vpop.f32.mrf.mxu1 }
 0x30f   :  { %v443_v6 = vpop.f32.mrf.mxu1 }
 0x310   :  { %8498 = vrcp.f32 %v443_v6 }
 0x311   :  { %8500 = vrcp.f32 %v9209_v5 }
 0x317   :  { %v8495_v8 = vpop.eup %8494 }
 0x318   :  { %v455_v10 = vmul.f32 %v8495_v8, %v9200_v62 }
 0x319   :  { %v8497_v15 = vpop.eup %8496 }
 0x31a   :  { %1093 = vxpose.xlu1.b32.start.end [1/1] (short) %v455_v10, 128  ;;  %v454_v17 = vmul.f32 %v8497_v15, %v8491_v61  ;;  %v1408_v22 = vrot.slane %v455_v10, 4 }
 0x31c   :  { %460 = vxpose.xlu0.b32.start.end [1/1] (short) %v454_v17, 128  ;;  %v777_v24 = vrot.slane %v454_v17, 4 }
 0x31d   :  { %v8499_v18 = vpop.eup %8498 }
 0x31e   :  { %v458_v19 = vmul.f32 %v8499_v18, %v8491_v61 }
 0x320   :  { %7702 = vmatprep.subr.msk.mxu1 %vm541_vm2, %v458_v19  ;;  %v811_v21 = vrot.slane %v458_v19, 4 }
 0x321   :  { %7703 = vmatpush3.msk.msra.mxu1 %vm541_vm2, %v458_v19 }
 0x322   :  { %7763 = vmatprep.subr.msk.mxu0 %vm541_vm2, %v811_v21 }
 0x323   :  { %7764 = vmatpush3.msk.msra.mxu0 %vm541_vm2, %v811_v21 }
 0x357   :  { %1410 = vxpose.xlu1.b32.start.end [1/1] (short) %v1408_v22, 128 }
 0x359   :  { %779 = vxpose.xlu0.b32.start.end [1/1] (short) %v777_v24, 128  ;;  %v12759_v24 = vmov 0.0  }
 0x35a   :  { %7728 = vmatprep.subr.mxu1 %v12759_v24  ;;  %7789 = vmatprep.subr.mxu0 %v12759_v24 }
 0x398   :  { %v476_v25 = vpop.trf.xlu0 }
 0x399   :  { %7704 = vmatprep.mubr.msk.f32.mxu1 %vm492_vm3, %v476_v25 }
 0x39c   :  { %v477_v27 = vpop.trf.xlu0 }
 0x39d   :  { %7705 = vmatmul.mubr.msk.f32.vlgmr.msra.gmra.mxu1 %vm492_vm3, %v477_v27 }
 0x3a0   :  { %v478_v28 = vpop.trf.xlu0 }
 0x3a1   :  { %7707 = vmatprep.mubr.msk.f32.mxu1 %vm492_vm3, %v478_v28 }
 0x3a4   :  { %v479_v29 = vpop.trf.xlu0 }
 0x3a5   :  { %7708 = vmatmul.mubr.msk.f32.gmra.mxu1 %vm492_vm3, %v479_v29 }
 0x3a8   :  { %v480_v30 = vpop.trf.xlu0 }
 0x3a9   :  { %7710 = vmatprep.mubr.msk.f32.mxu1 %vm492_vm3, %v480_v30 }
 0x3ac   :  { %v481_v47 = vpop.trf.xlu0 }
 0x3ad   :  { %7711 = vmatmul.mubr.msk.f32.gmra.mxu1 %vm492_vm3, %v481_v47  ;;  %v9262_v47 = vpop.trf.xlu1 }
 0x3b0   :  { %v482_v48 = vpop.trf.xlu0 }
 0x3b1   :  { %7713 = vmatprep.mubr.msk.f32.mxu1 %vm492_vm3, %v482_v48 }
 0x3b4   :  { %v483_v49 = vpop.trf.xlu0 }
 0x3b5   :  { %7714 = vmatmul.mubr.msk.f32.gmra.mxu1 %vm492_vm3, %v483_v49 }
 0x3b8   :  { %v484_v50 = vpop.trf.xlu0 }
 0x3b9   :  { %7716 = vmatprep.mubr.msk.f32.mxu1 %vm492_vm3, %v484_v50  ;;  %v9264_v50 = vpop.trf.xlu1 }
 0x3bc   :  { %v485_v51 = vpop.trf.xlu0 }
 0x3bd   :  { %7717 = vmatmul.mubr.msk.f32.gmra.mxu1 %vm492_vm3, %v485_v51 }
 0x3c0   :  { %v486_v52 = vpop.trf.xlu0 }
 0x3c1   :  { %7719 = vmatprep.mubr.msk.f32.mxu1 %vm492_vm3, %v486_v52 }
 0x3c4   :  { %v487_v53 = vpop.trf.xlu0 }
 0x3c5   :  { %7720 = vmatmul.mubr.msk.f32.gmra.mxu1 %vm492_vm3, %v487_v53  ;;  %v9266_v53 = vpop.trf.xlu1 }
 0x3c8   :  { %v488_v54 = vpop.trf.xlu0 }
 0x3c9   :  { %7722 = vmatprep.mubr.msk.f32.mxu1 %vm492_vm3, %v488_v54 }
 0x3cc   :  { %v489_v55 = vpop.trf.xlu0 }
 0x3cd   :  { %7723 = vmatmul.mubr.msk.f32.gmra.mxu1 %vm492_vm3, %v489_v55 }
 0x3d0   :  { %v490_v56 = vpop.trf.xlu0 }
 0x3d1   :  { %7725 = vmatprep.mubr.msk.f32.mxu1 %vm492_vm3, %v490_v56  ;;  %v9268_v56 = vpop.trf.xlu1 }
 0x3d4   :  { %v491_v57 = vpop.trf.xlu0 }
 0x3d5   :  { %7726 = vmatmul.mubr.msk.f32.gmra.mxu1 %vm492_vm3, %v491_v57 }
 0x3d6   :  { %7760 = vmatprep.mubr.msk.f32.mxu1 %vm8911_vm4, %v12759_v24 }
 0x3d8   :  { %v795_v58 = vpop.trf.xlu0 }
 0x3d9   :  { %7765 = vmatprep.mubr.msk.f32.mxu0 %vm492_vm3, %v795_v58 }
 0x3dc   :  { %v796_v59 = vpop.trf.xlu0 }
 0x3dd   :  { %7766 = vmatmul.mubr.msk.f32.vlgmr.msra.gmra.mxu0 %vm492_vm3, %v796_v59  ;;  %v9270_v59 = vpop.trf.xlu1 }
 0x3e0   :  { %v797_v60 = vpop.trf.xlu0 }
 0x3e1   :  { %7768 = vmatprep.mubr.msk.f32.mxu0 %vm492_vm3, %v797_v60 }
 0x3e4   :  { %v798_v61 = vpop.trf.xlu0 }
 0x3e5   :  { %7769 = vmatmul.mubr.msk.f32.gmra.mxu0 %vm492_vm3, %v798_v61 }
 0x3e8   :  { %v799_v63 = vpop.trf.xlu0 }
 0x3e9   :  { %7771 = vmatprep.mubr.msk.f32.mxu0 %vm492_vm3, %v799_v63 }
 0x3ec   :  { %v800_v0 = vpop.trf.xlu0 }
 0x3ed   :  { %7772 = vmatmul.mubr.msk.f32.gmra.mxu0 %vm492_vm3, %v800_v0 }
 0x3f0   :  { %v801_v3 = vpop.trf.xlu0 }
 0x3f1   :  { %7774 = vmatprep.mubr.msk.f32.mxu0 %vm492_vm3, %v801_v3 }
 0x3f4   :  { %v802_v6 = vpop.trf.xlu0 }
 0x3f5   :  { %7775 = vmatmul.mubr.msk.f32.gmra.mxu0 %vm492_vm3, %v802_v6  ;;  %v9274_v6 = vpop.trf.xlu1 }
 0x3f8   :  { %v803_v8 = vpop.trf.xlu0 }
 0x3f9   :  { %7777 = vmatprep.mubr.msk.f32.mxu0 %vm492_vm3, %v803_v8 }
 0x3fc   :  { %v804_v10 = vpop.trf.xlu0 }
 0x3fd   :  { %7778 = vmatmul.mubr.msk.f32.gmra.mxu0 %vm492_vm3, %v804_v10 }
 0x400   :  { %v805_v15 = vpop.trf.xlu0 }
 0x401   :  { %7780 = vmatprep.mubr.msk.f32.mxu0 %vm492_vm3, %v805_v15 }
 0x404   :  { %v806_v17 = vpop.trf.xlu0 }
 0x405   :  { %7781 = vmatmul.mubr.msk.f32.gmra.mxu0 %vm492_vm3, %v806_v17 }
 0x408   :  { %v807_v18 = vpop.trf.xlu0 }
 0x409   :  { %7783 = vmatprep.mubr.msk.f32.mxu0 %vm492_vm3, %v807_v18  ;;  %v9284_v18 = vpop.trf.xlu1 }
 0x40c   :  { %v808_v19 = vpop.trf.xlu0 }
 0x40d   :  { %7784 = vmatmul.mubr.msk.f32.gmra.mxu0 %vm492_vm3, %v808_v19 }
 0x410   :  { %v809_v21 = vpop.trf.xlu0 }
 0x411   :  { %7786 = vmatprep.mubr.msk.f32.mxu0 %vm492_vm3, %v809_v21 }
 0x414   :  { %v810_v22 = vpop.trf.xlu0 }
 0x415   :  { %7787 = vmatmul.mubr.msk.f32.gmra.mxu0 %vm492_vm3, %v810_v22 }
 0x416   :  { %7821 = vmatprep.mubr.msk.f32.mxu0 %vm8911_vm4, %v12759_v24 }
 0x45d   :  { %v9254_v25 = vpop.f32.mrf.mxu1 }
 0x45f   :  { %v9256_v27 = vpop.f32.mrf.mxu1 }
 0x465   :  { %v9258_v28 = vpop.f32.mrf.mxu1 }
 0x467   :  { %v9260_v29 = vpop.f32.mrf.mxu1 }
 0x46d   :  { %v7712_v30 = vpop.f32.mrf.mxu1 }
 0x46f   :  { %v631_v48 = vpop.f32.mrf.mxu1 }
 0x475   :  { %v7715_v49 = vpop.f32.mrf.mxu1 }
 0x477   :  { %v641_v51 = vpop.f32.mrf.mxu1 }
 0x47d   :  { %v7718_v52 = vpop.f32.mrf.mxu1 }
 0x47e   :  { %v699_v22 = vmul.f32 %v7718_v52, %v9127_v37  ;;  %v696_v52 = vmul.f32 %v641_v51, %v9148_v40  ;;  %v693_v51 = vmul.f32 %v9258_v28, %v9167_v43  ;;  %v690_v28 = vmul.f32 %v9256_v27, %v9188_v46 }
 0x47f   :  { %v651_v54 = vpop.f32.mrf.mxu1 }
 0x485   :  { %v7721_v55 = vpop.f32.mrf.mxu1 }
 0x486   :  { %v701_v17 = vmul.f32 %v7721_v55, %v9113_v35  ;;  %v1116_v55 = vpop.trf.xlu1 }
 0x487   :  { %v661_v57 = vpop.f32.mrf.mxu1 }
 0x488   :  { %v700_v19 = vmul.f32 %v661_v57, %v9120_v36  ;;  %v697_v57 = vmul.f32 %v7715_v49, %v9141_v39 }
 0x48a   :  { %v1117_v5 = vpop.trf.xlu1 }
 0x48d   :  { %v7724_v58 = vpop.f32.mrf.mxu1 }
 0x48e   :  { %v703_v8 = vmul.f32 %v7724_v58, %v9099_v33  ;;  %v698_v58 = vmul.f32 %v651_v54, %v9134_v38  ;;  %v695_v54 = vmul.f32 %v7712_v30, %v9153_v41  ;;  %v692_v30 = vmul.f32 %v9260_v29, %v9174_v44 }
 0x48f   :  { %v671_v60 = vpop.f32.mrf.mxu1 }
 0x490   :  { %v702_v10 = vmul.f32 %v671_v60, %v9106_v34 }
 0x495   :  { %v7727_v61 = vpop.f32.mrf.mxu1 }
 0x496   :  { %v705_v63 = vmul.f32 %v7727_v61, %v9085_v31 }
 0x497   :  { %v681_v0 = vpop.f32.mrf.mxu1 }
 0x498   :  { %v704_v3 = vmul.f32 %v681_v0, %v9092_v32  ;;  %7729 = vmatpush3.msra.mxu1 %v705_v63  ;;  %v694_v63 = vmul.f32 %v631_v48, %v9160_v42  ;;  %v1118_v0 = vpop.trf.xlu1  ;;  %v8501_v48 = vpop.eup %8500 }
 0x499   :  { %7730 = vmatprep.subr.mxu1 %v12759_v24  ;;  %v9325_v29 = vmul.f32 %v8501_v48, %v9200_v62 }
 0x49a   :  { %7731 = vmatpush3.msra.mxu1 %v704_v3 }
 0x49b   :  { %7732 = vmatprep.subr.mxu1 %v12759_v24 }
 0x49c   :  { %7733 = vmatpush3.msra.mxu1 %v703_v8  ;;  %v691_v8 = vmul.f32 %v9254_v25, %v9181_v45 }
 0x49d   :  { %7734 = vmatprep.subr.mxu1 %v12759_v24  ;;  %v9281_v15 = vpop.f32.mrf.mxu0 }
 0x49e   :  { %7735 = vmatpush3.msra.mxu1 %v702_v10 }
 0x49f   :  { %7736 = vmatprep.subr.mxu1 %v12759_v24  ;;  %v9289_v21 = vpop.f32.mrf.mxu0 }
 0x4a0   :  { %7737 = vmatpush3.msra.mxu1 %v701_v17  ;;  %v1119_v17 = vpop.trf.xlu1 }
 0x4a1   :  { %7738 = vmatprep.subr.mxu1 %v12759_v24 }
 0x4a2   :  { %7739 = vmatpush3.msra.mxu1 %v700_v19 }
 0x4a3   :  { %7740 = vmatprep.subr.mxu1 %v12759_v24 }
 0x4a4   :  { %7741 = vmatpush3.msra.mxu1 %v699_v22  ;;  %v1120_v62 = vpop.trf.xlu1 }
 0x4a5   :  { %7742 = vmatprep.subr.mxu1 %v12759_v24  ;;  %v9296_v60 = vpop.f32.mrf.mxu0 }
 0x4a6   :  { %7743 = vmatpush3.msra.mxu1 %v698_v58 }
 0x4a7   :  { %7744 = vmatprep.subr.mxu1 %v12759_v24  ;;  %v9302_v61 = vpop.f32.mrf.mxu0 }
 0x4a8   :  { %7745 = vmatpush3.msra.mxu1 %v697_v57  ;;  %v1121_v19 = vpop.trf.xlu1 }
 0x4a9   :  { %7746 = vmatprep.subr.mxu1 %v12759_v24 }
 0x4aa   :  { %7747 = vmatpush3.msra.mxu1 %v696_v52 }
 0x4ab   :  { %7748 = vmatprep.subr.mxu1 %v12759_v24 }
 0x4ac   :  { %7749 = vmatpush3.msra.mxu1 %v695_v54 }
 0x4ad   :  { %7750 = vmatprep.subr.mxu1 %v12759_v24  ;;  %v9308_v49 = vpop.f32.mrf.mxu0 }
 0x4ae   :  { %7751 = vmatpush3.msra.mxu1 %v694_v63 }
 0x4af   :  { %7752 = vmatprep.subr.mxu1 %v12759_v24  ;;  %v9316_v3 = vpop.f32.mrf.mxu0 }
 0x4b0   :  { %7753 = vmatpush3.msra.mxu1 %v693_v51 }
 0x4b1   :  { %7754 = vmatprep.subr.mxu1 %v12759_v24 }
 0x4b2   :  { %7755 = vmatpush3.msra.mxu1 %v692_v30 }
 0x4b3   :  { %7756 = vmatprep.subr.mxu1 %v12759_v24 }
 0x4b4   :  { %7757 = vmatpush3.msra.mxu1 %v691_v8  ;;  %v1012_v8 = vmul.f32 %v9308_v49, %v9153_v41  ;;  %v1008_v49 = vmul.f32 %v9281_v15, %v9181_v45 }
 0x4b5   :  { %7758 = vmatprep.subr.mxu1 %v12759_v24  ;;  %v7776_v10 = vpop.f32.mrf.mxu0 }
 0x4b6   :  { %7759 = vmatpush3.msra.mxu1 %v690_v28  ;;  %v1011_v28 = vmul.f32 %v9316_v3, %v9160_v42  ;;  %v1007_v3 = vmul.f32 %v9289_v21, %v9188_v46 }
 0x4b7   :  { %7761 = vmatmul.mubr.f32.vlgmr.msra.gmra.mxu1 %v9017_v7  ;;  %7824 = vmatprep.subr.msk.mxu1 %vm541_vm2, %v9325_v29  ;;  %v958_v25 = vpop.f32.mrf.mxu0 }
 0x4b8   :  { %7825 = vmatpush3.msk.msra.mxu1 %vm541_vm2, %v9325_v29  ;;  %7826 = vmatprep.mubr.msk.f32.mxu1 %vm492_vm3, %v9262_v47  ;;  %v1013_v48 = vmul.f32 %v958_v25, %v9148_v40 }
 0x4b9   :  { %7850 = vmatprep.subr.mxu1 %v12759_v24 }
 0x4bb   :  { %7827 = vmatmul.mubr.msk.f32.vlgmr.msra.gmra.mxu1 %vm492_vm3, %v9264_v50  ;;  %v1122_v50 = vpop.trf.xlu1 }
 0x4bc   :  { %7829 = vmatprep.mubr.msk.f32.mxu1 %vm492_vm3, %v9266_v53 }
 0x4bd   :  { %v7779_v7 = vpop.f32.mrf.mxu0 }
 0x4be   :  { %v1016_v51 = vmul.f32 %v7779_v7, %v9127_v37 }
 0x4bf   :  { %7830 = vmatmul.mubr.msk.f32.gmra.mxu1 %vm492_vm3, %v9268_v56  ;;  %v968_v27 = vpop.f32.mrf.mxu0 }
 0x4c0   :  { %7832 = vmatprep.mubr.msk.f32.mxu1 %vm492_vm3, %v9270_v59  ;;  %v1123_v59 = vpop.trf.xlu1  ;;  %v1015_v30 = vmul.f32 %v968_v27, %v9134_v38 }
 0x4c3   :  { %7833 = vmatmul.mubr.msk.f32.gmra.mxu1 %vm492_vm3, %v9274_v6 }
 0x4c4   :  { %7835 = vmatprep.mubr.msk.f32.mxu1 %vm492_vm3, %v9284_v18  ;;  %v1124_v18 = vpop.trf.xlu1 }
 0x4c5   :  { %v7782_v47 = vpop.f32.mrf.mxu0 }
 0x4c7   :  { %7836 = vmatmul.mubr.msk.f32.gmra.mxu1 %vm492_vm3, %v1116_v55  ;;  %v978_v53 = vpop.f32.mrf.mxu0 }
 0x4c8   :  { %7838 = vmatprep.mubr.msk.f32.mxu1 %vm492_vm3, %v1117_v5  ;;  %v1018_v5 = vmul.f32 %v7782_v47, %v9113_v35  ;;  %v1017_v63 = vmul.f32 %v978_v53, %v9120_v36 }
 0x4cb   :  { %7839 = vmatmul.mubr.msk.f32.gmra.mxu1 %vm492_vm3, %v1118_v0  ;;  %v1014_v0 = vmul.f32 %v7776_v10, %v9141_v39  ;;  %v1010_v10 = vmul.f32 %v9296_v60, %v9167_v43  ;;  %v1442_v60 = vrot.slane %v9325_v29, 4 }
 0x4cc   :  { %7841 = vmatprep.mubr.msk.f32.mxu1 %vm492_vm3, %v1119_v17  ;;  %v1009_v17 = vmul.f32 %v9302_v61, %v9174_v44 }
 0x4cd   :  { %v7785_v56 = vpop.f32.mrf.mxu0 }
 0x4ce   :  { %v1020_v57 = vmul.f32 %v7785_v56, %v9099_v33 }
 0x4cf   :  { %7842 = vmatmul.mubr.msk.f32.gmra.mxu1 %vm492_vm3, %v1120_v62  ;;  %v988_v6 = vpop.f32.mrf.mxu0 }
 0x4d0   :  { %7844 = vmatprep.mubr.msk.f32.mxu1 %vm492_vm3, %v1121_v19  ;;  %v1019_v54 = vmul.f32 %v988_v6, %v9106_v34 }
 0x4d3   :  { %7845 = vmatmul.mubr.msk.f32.gmra.mxu1 %vm492_vm3, %v1122_v50 }
 0x4d4   :  { %7847 = vmatprep.mubr.msk.f32.mxu1 %vm492_vm3, %v1123_v59 }
 0x4d5   :  { %v7788_v22 = vpop.f32.mrf.mxu0 }
 0x4d6   :  { %v1022_v58 = vmul.f32 %v7788_v22, %v9085_v31 }
 0x4d7   :  { %v998_v55 = vpop.f32.mrf.mxu0  ;;  %7848 = vmatmul.mubr.msk.f32.gmra.mxu1 %vm492_vm3, %v1124_v18 }
 0x4d8   :  { %v1021_v52 = vmul.f32 %v998_v55, %v9092_v32  ;;  %7790 = vmatpush3.msra.mxu0 %v1022_v58  ;;  %7882 = vmatprep.mubr.msk.f32.mxu1 %vm8911_vm4, %v12759_v24 }
 0x4d9   :  { %7791 = vmatprep.subr.mxu0 %v12759_v24 }
 0x4da   :  { %7792 = vmatpush3.msra.mxu0 %v1021_v52 }
 0x4db   :  { %7793 = vmatprep.subr.mxu0 %v12759_v24 }
 0x4dc   :  { %7794 = vmatpush3.msra.mxu0 %v1020_v57 }
 0x4dd   :  { %7795 = vmatprep.subr.mxu0 %v12759_v24 }
 0x4de   :  { %7796 = vmatpush3.msra.mxu0 %v1019_v54 }
 0x4df   :  { %7797 = vmatprep.subr.mxu0 %v12759_v24 }
 0x4e0   :  { %7798 = vmatpush3.msra.mxu0 %v1018_v5 }
 0x4e1   :  { %7799 = vmatprep.subr.mxu0 %v12759_v24 }
 0x4e2   :  { %7800 = vmatpush3.msra.mxu0 %v1017_v63 }
 0x4e3   :  { %7801 = vmatprep.subr.mxu0 %v12759_v24 }
 0x4e4   :  { %7802 = vmatpush3.msra.mxu0 %v1016_v51 }
 0x4e5   :  { %7803 = vmatprep.subr.mxu0 %v12759_v24 }
 0x4e6   :  { %7804 = vmatpush3.msra.mxu0 %v1015_v30 }
 0x4e7   :  { %7805 = vmatprep.subr.mxu0 %v12759_v24 }
 0x4e8   :  { %7806 = vmatpush3.msra.mxu0 %v1014_v0 }
 0x4e9   :  { %7807 = vmatprep.subr.mxu0 %v12759_v24 }
 0x4ea   :  { %7808 = vmatpush3.msra.mxu0 %v1013_v48 }
 0x4eb   :  { %7809 = vmatprep.subr.mxu0 %v12759_v24 }
 0x4ec   :  { %7810 = vmatpush3.msra.mxu0 %v1012_v8 }
 0x4ed   :  { %7811 = vmatprep.subr.mxu0 %v12759_v24 }
 0x4ee   :  { %7812 = vmatpush3.msra.mxu0 %v1011_v28 }
 0x4ef   :  { %7813 = vmatprep.subr.mxu0 %v12759_v24 }
 0x4f0   :  { %7814 = vmatpush3.msra.mxu0 %v1010_v10 }
 0x4f1   :  { %7815 = vmatprep.subr.mxu0 %v12759_v24 }
 0x4f2   :  { %7816 = vmatpush3.msra.mxu0 %v1009_v17 }
 0x4f3   :  { %7817 = vmatprep.subr.mxu0 %v12759_v24 }
 0x4f4   :  { %7818 = vmatpush3.msra.mxu0 %v1008_v49 }
 0x4f5   :  { %7819 = vmatprep.subr.mxu0 %v12759_v24 }
 0x4f6   :  { %7820 = vmatpush3.msra.mxu0 %v1007_v3  ;;  %v6850_v3 = vld [vmem:[%s12745_s0 + $0x38] sm:$0xff] }
 0x4f7   :  { %7885 = vmatprep.subr.msk.mxu0 %vm541_vm2, %v1442_v60  ;;  %7822 = vmatmul.mubr.f32.vlgmr.msra.gmra.mxu0 %v9002_v4 }
 0x4f8   :  { %7886 = vmatpush3.msk.msra.mxu0 %vm541_vm2, %v1442_v60  ;;  %v6849_v60 = vld [vmem:[%s12745_s0 + $0x30] sm:$0xff] }
 0x4f9   :  { %7911 = vmatprep.subr.mxu0 %v12759_v24 }
 0x577   :  { %v9400_v15 = vpop.f32.mrf.mxu1 }
 0x578   :  { %12847 = vst [vmem:[#allocation5_spill] sm:$0xff] %v9400_v15  ;;  %v12854_v15 = vmov 0.0  }
 0x579   :  { %v7762_v21 = vpop.f32.mrf.mxu1 }
 0x57a   :  { %v6848_v21 = vld [vmem:[%s12745_s0 + $0x28] sm:$0xff] }
 0x57b   :  { %v7828_v61 = vpop.f32.mrf.mxu1 }
 0x57c   :  { %v1322_v17 = vmul.f32 %v7828_v61, %v9181_v45  ;;  %v6847_v61 = vld [vmem:[%s12745_s0 + $0x20] sm:$0xff] }
 0x57d   :  { %v1242_v25 = vpop.f32.mrf.mxu1 }
 0x57e   :  { %v1321_v49 = vmul.f32 %v1242_v25, %v9188_v46 }
 0x57f   :  { %v7831_v62 = vpop.f32.mrf.mxu1 }
 0x580   :  { %v1324_v28 = vmul.f32 %v7831_v62, %v9167_v43 }
 0x581   :  { %v1252_v7 = vpop.f32.mrf.mxu1 }
 0x582   :  { %v1323_v10 = vmul.f32 %v1252_v7, %v9174_v44 }
 0x583   :  { %v7834_v27 = vpop.f32.mrf.mxu1 }
 0x584   :  { %v1326_v48 = vmul.f32 %v7834_v27, %v9153_v41 }
 0x585   :  { %v1262_v19 = vpop.f32.mrf.mxu1 }
 0x586   :  { %v1325_v8 = vmul.f32 %v1262_v19, %v9160_v42 }
 0x587   :  { %v7837_v47 = vpop.f32.mrf.mxu1 }
 0x588   :  { %v1328_v30 = vmul.f32 %v7837_v47, %v9141_v39 }
 0x589   :  { %v1272_v29 = vpop.f32.mrf.mxu1 }
 0x58a   :  { %v1327_v0 = vmul.f32 %v1272_v29, %v9148_v40 }
 0x58b   :  { %v7840_v50 = vpop.f32.mrf.mxu1 }
 0x58c   :  { %v1330_v63 = vmul.f32 %v7840_v50, %v9127_v37 }
 0x58d   :  { %v1282_v53 = vpop.f32.mrf.mxu1 }
 0x58e   :  { %v1329_v51 = vmul.f32 %v1282_v53, %v9134_v38 }
 0x58f   :  { %v7843_v56 = vpop.f32.mrf.mxu1 }
 0x590   :  { %v1332_v54 = vmul.f32 %v7843_v56, %v9113_v35 }
 0x591   :  { %v1292_v59 = vpop.f32.mrf.mxu1 }
 0x592   :  { %v1331_v5 = vmul.f32 %v1292_v59, %v9120_v36 }
 0x593   :  { %v7846_v4 = vpop.f32.mrf.mxu1 }
 0x594   :  { %v1334_v57 = vmul.f32 %v7846_v4, %v9099_v33 }
 0x595   :  { %v1302_v6 = vpop.f32.mrf.mxu1 }
 0x596   :  { %v1333_v52 = vmul.f32 %v1302_v6, %v9106_v34 }
 0x597   :  { %v7849_v18 = vpop.f32.mrf.mxu1 }
 0x598   :  { %v1336_v22 = vmul.f32 %v7849_v18, %v9085_v31 }
 0x599   :  { %v1312_v58 = vpop.f32.mrf.mxu1 }
 0x59a   :  { %v1335_v55 = vmul.f32 %v1312_v58, %v9092_v32  ;;  %7851 = vmatpush3.msra.mxu1 %v1336_v22 }
 0x59b   :  { %7852 = vmatprep.subr.mxu1 %v12759_v24 }
 0x59c   :  { %7853 = vmatpush3.msra.mxu1 %v1335_v55 }
 0x59d   :  { %7854 = vmatprep.subr.mxu1 %v12759_v24 }
 0x59e   :  { %7855 = vmatpush3.msra.mxu1 %v1334_v57 }
 0x59f   :  { %7856 = vmatprep.subr.mxu1 %v12759_v24 }
 0x5a0   :  { %7857 = vmatpush3.msra.mxu1 %v1333_v52 }
 0x5a1   :  { %7858 = vmatprep.subr.mxu1 %v12759_v24 }
 0x5a2   :  { %7859 = vmatpush3.msra.mxu1 %v1332_v54 }
 0x5a3   :  { %7860 = vmatprep.subr.mxu1 %v12759_v24 }
 0x5a4   :  { %7861 = vmatpush3.msra.mxu1 %v1331_v5  ;;  %v9533_v5 = vld [vmem:[%s12749_s4 + $0x78] sm:$0xff] }
 0x5a5   :  { %7862 = vmatprep.subr.mxu1 %v12759_v24 }
 0x5a6   :  { %7863 = vmatpush3.msra.mxu1 %v1330_v63 }
 0x5a7   :  { %7864 = vmatprep.subr.mxu1 %v12759_v24 }
 0x5a8   :  { %7865 = vmatpush3.msra.mxu1 %v1329_v51 }
 0x5a9   :  { %7866 = vmatprep.subr.mxu1 %v12759_v24 }
 0x5aa   :  { %7867 = vmatpush3.msra.mxu1 %v1328_v30  ;;  %v9540_v30 = vld [vmem:[%s12749_s4 + $0x68] sm:$0xff] }
 0x5ab   :  { %7868 = vmatprep.subr.mxu1 %v12759_v24 }
 0x5ac   :  { %7869 = vmatpush3.msra.mxu1 %v1327_v0 }
 0x5ad   :  { %7870 = vmatprep.subr.mxu1 %v12759_v24 }
 0x5ae   :  { %7871 = vmatpush3.msra.mxu1 %v1326_v48  ;;  %v9546_v48 = vld [vmem:[%s12749_s4 + $0x70] sm:$0xff] }
 0x5af   :  { %7872 = vmatprep.subr.mxu1 %v12759_v24 }
 0x5b0   :  { %7873 = vmatpush3.msra.mxu1 %v1325_v8 }
 0x5b1   :  { %7874 = vmatprep.subr.mxu1 %v12759_v24 }
 0x5b2   :  { %7875 = vmatpush3.msra.mxu1 %v1324_v28  ;;  %v9552_v28 = vld [vmem:[%s12749_s4 + $0x60] sm:$0xff] }
 0x5b3   :  { %7876 = vmatprep.subr.mxu1 %v12759_v24 }
 0x5b4   :  { %7877 = vmatpush3.msra.mxu1 %v1323_v10 }
 0x5b5   :  { %7878 = vmatprep.subr.mxu1 %v12759_v24 }
 0x5b6   :  { %7879 = vmatpush3.msra.mxu1 %v1322_v17  ;;  %v9559_v17 = vld [vmem:[%s12749_s4 + $0x58] sm:$0xff] }
 0x5b7   :  { %7880 = vmatprep.subr.mxu1 %v12759_v24 }
 0x5b8   :  { %7881 = vmatpush3.msra.mxu1 %v1321_v49 }
 0x5b9   :  { %7883 = vmatmul.mubr.f32.vlgmr.msra.gmra.mxu1 %v8992_v1  ;;  %7946 = vmatprep.subr.mxu1 %v6850_v3  ;;  %v1426_v1 = vpop.trf.xlu1 }
 0x5ba   :  { %7947 = vmatpush3.msra.mxu1 %v6850_v3  ;;  %7954 = vmatprep.mubr.msk.f32.mxu1 %vm97_vm0, %v8997_v2  ;;  %v9566_v3 = vld [vmem:[%s12749_s4 + $0x50] sm:$0xff] }
 0x5bb   :  { %7948 = vmatprep.subr.mxu1 %v6849_v60  ;;  %7887 = vmatprep.mubr.msk.f32.mxu0 %vm492_vm3, %v1426_v1  ;;  %v9580_v1 = vld [vmem:[%s12749_s4 + $0x40] sm:$0xff] }
 0x5bc   :  { %7949 = vmatpush3.msra.mxu1 %v6849_v60 }
 0x5bd   :  { %7950 = vmatprep.subr.mxu1 %v6848_v21  ;;  %v1427_v2 = vpop.trf.xlu1 }
 0x5be   :  { %7951 = vmatpush3.msra.mxu1 %v6848_v21  ;;  %7888 = vmatmul.mubr.msk.f32.vlgmr.msra.gmra.mxu0 %vm492_vm3, %v1427_v2  ;;  %v9573_v21 = vld [vmem:[%s12749_s4 + $0x48] sm:$0xff] }
 0x5bf   :  { %7952 = vmatprep.subr.mxu1 %v6847_v61 }
 0x5c0   :  { %7953 = vmatpush3.msra.mxu1 %v6847_v61 }
 0x5c1   :  { %7955 = vmatmul.mubr.msk.f32.vlgmr.msra.gmra.mxu1 %vm97_vm0, %v9027_v9  ;;  %v1428_v25 = vpop.trf.xlu1 }
 0x5c2   :  { %7957 = vmatprep.mubr.msk.f32.mxu1 %vm97_vm0, %v9036_v11  ;;  %7890 = vmatprep.mubr.msk.f32.mxu0 %vm492_vm3, %v1428_v25  ;;  %v9587_v25 = vld [vmem:[%s12749_s4 + $0x38] sm:$0xff] }
 0x5c5   :  { %7958 = vmatmul.mubr.msk.f32.gmra.mxu1 %vm97_vm0, %v9046_v12  ;;  %v1429_v62 = vpop.trf.xlu1 }
 0x5c6   :  { %7968 = vmatprep.mubr.msk.f32.mxu1 %vm97_vm0, %v9053_v13  ;;  %7891 = vmatmul.mubr.msk.f32.gmra.mxu0 %vm492_vm3, %v1429_v62 }
 0x5c9   :  { %v1430_v9 = vpop.trf.xlu1 }
 0x5ca   :  { %7893 = vmatprep.mubr.msk.f32.mxu0 %vm492_vm3, %v1430_v9  ;;  %v9594_v9 = vld [vmem:[%s12749_s4 + $0x30] sm:$0xff] }
 0x5cd   :  { %v1431_v11 = vpop.trf.xlu1 }
 0x5ce   :  { %7894 = vmatmul.mubr.msk.f32.gmra.mxu0 %vm492_vm3, %v1431_v11 }
 0x5d1   :  { %v1432_v12 = vpop.trf.xlu1 }
 0x5d2   :  { %7896 = vmatprep.mubr.msk.f32.mxu0 %vm492_vm3, %v1432_v12  ;;  %v9601_v12 = vld [vmem:[%s12749_s4 + $0x28] sm:$0xff] }
 0x5d5   :  { %v1433_v13 = vpop.trf.xlu1 }
 0x5d6   :  { %7897 = vmatmul.mubr.msk.f32.gmra.mxu0 %vm492_vm3, %v1433_v13 }
 0x5d9   :  { %v1434_v7 = vpop.trf.xlu1 }
 0x5da   :  { %7899 = vmatprep.mubr.msk.f32.mxu0 %vm492_vm3, %v1434_v7  ;;  %v9608_v7 = vld [vmem:[%s12749_s4 + $0x20] sm:$0xff] }
 0x5dd   :  { %v1435_v27 = vpop.trf.xlu1 }
 0x5de   :  { %7900 = vmatmul.mubr.msk.f32.gmra.mxu0 %vm492_vm3, %v1435_v27 }
 0x5e1   :  { %v1436_v19 = vpop.trf.xlu1 }
 0x5e2   :  { %7902 = vmatprep.mubr.msk.f32.mxu0 %vm492_vm3, %v1436_v19  ;;  %v9615_v19 = vld [vmem:[%s12749_s4 + $0x18] sm:$0xff] }
 0x5e5   :  { %v1437_v47 = vpop.trf.xlu1 }
 0x5e6   :  { %7903 = vmatmul.mubr.msk.f32.gmra.mxu0 %vm492_vm3, %v1437_v47 }
 0x5e9   :  { %v1438_v29 = vpop.trf.xlu1 }
 0x5ea   :  { %7905 = vmatprep.mubr.msk.f32.mxu0 %vm492_vm3, %v1438_v29  ;;  %v9623_v29 = vld [vmem:[%s12749_s4 + $0x10] sm:$0xff] }
 0x5ed   :  { %v1439_v50 = vpop.trf.xlu1 }
 0x5ee   :  { %7906 = vmatmul.mubr.msk.f32.gmra.mxu0 %vm492_vm3, %v1439_v50 }
 0x5f1   :  { %v1440_v53 = vpop.trf.xlu1 }
 0x5f2   :  { %7908 = vmatprep.mubr.msk.f32.mxu0 %vm492_vm3, %v1440_v53  ;;  %v9631_v53 = vld [vmem:[%s12749_s4 + $0x8] sm:$0xff] }
 0x5f5   :  { %v1441_v56 = vpop.trf.xlu1 }
 0x5f6   :  { %7909 = vmatmul.mubr.msk.f32.gmra.mxu0 %vm492_vm3, %v1441_v56 }
 0x5f7   :  { %7943 = vmatprep.mubr.msk.f32.mxu0 %vm8911_vm4, %v12759_v24 }
 0x679   :  { %v9474_v59 = vpop.f32.mrf.mxu1 }
 0x67a   :  { %12848 = vst [vmem:[#allocation6_spill] sm:$0xff] %v9474_v59 }
 0x67b   :  { %v7884_v4 = vpop.f32.mrf.mxu1 }
 0x67c   :  { %v9639_v4 = vld [vmem:[%s12749_s4] sm:$0xff] }
 0x681   :  { %v7956_v6 = vpop.f32.mrf.mxu1 }
 0x682   :  { %v1801_v52 = vadd.f32 %v7956_v6, %v9059_v16 }
 0x683   :  { %v1795_v18 = vpop.f32.mrf.mxu1 }
 0x684   :  { %v1796_v54 = vadd.f32 %v1795_v18, %v9065_v23  ;;  %v8786_v18 = vld [vmem:[%s12745_s0 + $0x18] sm:$0xff] }
 0x685   :  { %v7959_v22 = vpop.f32.mrf.mxu1 }
 0x686   :  { %v1811_v58 = vadd.f32 %v7959_v22, %v9057_v14  ;;  %v9514_v14 = vpop.f32.mrf.mxu0  ;;  %v8787_v22 = vld [vmem:[%s12750_s5] sm:$0xff] }
 0x687   :  { %v1805_v55 = vpop.f32.mrf.mxu1  ;;  %12849 = vst [vmem:[#allocation7_spill] sm:$0xff] %v9514_v14 }
 0x688   :  { %v1806_v57 = vadd.f32 %v1805_v55, %v9062_v20  ;;  %7960 = vmatprep.subr.mxu1 %v1811_v58  ;;  %v7823_v16 = vpop.f32.mrf.mxu0 }
 0x689   :  { %7961 = vmatpush3.msra.mxu1 %v1811_v58 }
 0x68a   :  { %7962 = vmatprep.subr.mxu1 %v1806_v57  ;;  %v9516_v20 = vpop.f32.mrf.mxu0 }
 0x68b   :  { %7963 = vmatpush3.msra.mxu1 %v1806_v57  ;;  %v1639_v56 = vmul.f32 %v9631_v53, %v9516_v20 }
 0x68c   :  { %7964 = vmatprep.subr.mxu1 %v1801_v52  ;;  %v9518_v23 = vpop.f32.mrf.mxu0 }
 0x68d   :  { %7965 = vmatpush3.msra.mxu1 %v1801_v52  ;;  %v1638_v6 = vmul.f32 %v9639_v4, %v9518_v23 }
 0x68e   :  { %7966 = vmatprep.subr.mxu1 %v1796_v54 }
 0x68f   :  { %7967 = vmatpush3.msra.mxu1 %v1796_v54 }
 0x690   :  { %7969 = vmatmul.mubr.msk.f32.vlgmr.msra.gmra.mxu1 %vm97_vm0, %v9072_v26  ;;  %7971 = vmatprep.subr.mxu1 %v9085_v31  ;;  %v9520_v26 = vpop.f32.mrf.mxu0 }
 0x691   :  { %7972 = vmatpush3.msra.mxu1 %v9085_v31  ;;  %v1641_v47 = vmul.f32 %v9615_v19, %v9520_v26 }
 0x692   :  { %7973 = vmatprep.subr.mxu1 %v9092_v32  ;;  %v9522_v31 = vpop.f32.mrf.mxu0 }
 0x693   :  { %7974 = vmatpush3.msra.mxu1 %v9092_v32  ;;  %v1640_v50 = vmul.f32 %v9623_v29, %v9522_v31 }
 0x694   :  { %7975 = vmatprep.subr.mxu1 %v9099_v33  ;;  %v7895_v32 = vpop.f32.mrf.mxu0 }
 0x695   :  { %7976 = vmatpush3.msra.mxu1 %v9099_v33  ;;  %v1643_v13 = vmul.f32 %v9601_v12, %v7895_v32 }
 0x696   :  { %7977 = vmatprep.subr.mxu1 %v9106_v34  ;;  %v1579_v33 = vpop.f32.mrf.mxu0 }
 0x697   :  { %7978 = vmatpush3.msra.mxu1 %v9106_v34  ;;  %v1642_v27 = vmul.f32 %v9608_v7, %v1579_v33 }
 0x698   :  { %7979 = vmatprep.subr.mxu1 %v9113_v35  ;;  %v7898_v34 = vpop.f32.mrf.mxu0 }
 0x699   :  { %7980 = vmatpush3.msra.mxu1 %v9113_v35  ;;  %v1645_v62 = vmul.f32 %v9587_v25, %v7898_v34 }
 0x69a   :  { %7981 = vmatprep.subr.mxu1 %v9120_v36  ;;  %v1589_v35 = vpop.f32.mrf.mxu0 }
 0x69b   :  { %7982 = vmatpush3.msra.mxu1 %v9120_v36  ;;  %v1644_v11 = vmul.f32 %v9594_v9, %v1589_v35 }
 0x69c   :  { %7983 = vmatprep.subr.mxu1 %v9127_v37 }
 0x69d   :  { %7984 = vmatpush3.msra.mxu1 %v9127_v37 }
 0x69e   :  { %7985 = vmatprep.subr.mxu1 %v9134_v38  ;;  %v7901_v36 = vpop.f32.mrf.mxu0 }
 0x69f   :  { %7986 = vmatpush3.msra.mxu1 %v9134_v38  ;;  %v1647_v61 = vmul.f32 %v9573_v21, %v7901_v36 }
 0x6a0   :  { %7987 = vmatprep.subr.mxu1 %v9141_v39  ;;  %v1599_v37 = vpop.f32.mrf.mxu0 }
 0x6a1   :  { %7988 = vmatpush3.msra.mxu1 %v9141_v39  ;;  %v1646_v2 = vmul.f32 %v9580_v1, %v1599_v37  ;;  %v8788_v37 = vld [vmem:[%s12750_s5 + $0x8] sm:$0xff] }
 0x6a2   :  { %7989 = vmatprep.subr.mxu1 %v9148_v40 }
 0x6a3   :  { %7990 = vmatpush3.msra.mxu1 %v9148_v40 }
 0x6a4   :  { %7991 = vmatprep.subr.mxu1 %v9153_v41 }
 0x6a5   :  { %7992 = vmatpush3.msra.mxu1 %v9153_v41 }
 0x6a6   :  { %7993 = vmatprep.subr.mxu1 %v9160_v42  ;;  %v7904_v38 = vpop.f32.mrf.mxu0 }
 0x6a7   :  { %7994 = vmatpush3.msra.mxu1 %v9160_v42  ;;  %v1649_v49 = vmul.f32 %v9559_v17, %v7904_v38 }
 0x6a8   :  { %7995 = vmatprep.subr.mxu1 %v9167_v43  ;;  %v1609_v40 = vpop.f32.mrf.mxu0 }
 0x6a9   :  { %7996 = vmatpush3.msra.mxu1 %v9167_v43  ;;  %v1648_v60 = vmul.f32 %v9566_v3, %v1609_v40 }
 0x6aa   :  { %7997 = vmatprep.subr.mxu1 %v9174_v44 }
 0x6ab   :  { %7998 = vmatpush3.msra.mxu1 %v9174_v44 }
 0x6ac   :  { %7999 = vmatprep.subr.mxu1 %v9181_v45 }
 0x6ad   :  { %8000 = vmatpush3.msra.mxu1 %v9181_v45 }
 0x6ae   :  { %8001 = vmatprep.subr.mxu1 %v9188_v46  ;;  %v7907_v44 = vpop.f32.mrf.mxu0 }
 0x6af   :  { %8002 = vmatpush3.msra.mxu1 %v9188_v46  ;;  %v1651_v0 = vmul.f32 %v9540_v30, %v7907_v44 }
 0x6b0   :  { %v1619_v45 = vpop.f32.mrf.mxu0 }
 0x6b1   :  { %v1650_v10 = vmul.f32 %v9552_v28, %v1619_v45 }
 0x6b6   :  { %v7910_v46 = vpop.f32.mrf.mxu0 }
 0x6b7   :  { %v1653_v63 = vmul.f32 %v9533_v5, %v7910_v46 }
 0x6b8   :  { %v1629_v51 = vpop.f32.mrf.mxu0 }
 0x6b9   :  { %7912 = vmatpush3.msra.mxu0 %v1653_v63  ;;  %v1652_v8 = vmul.f32 %v9546_v48, %v1629_v51 }
 0x6ba   :  { %7913 = vmatprep.subr.mxu0 %v12759_v24 }
 0x6bb   :  { %7914 = vmatpush3.msra.mxu0 %v1652_v8 }
 0x6bc   :  { %7915 = vmatprep.subr.mxu0 %v12759_v24 }
 0x6bd   :  { %7916 = vmatpush3.msra.mxu0 %v1651_v0 }
 0x6be   :  { %7917 = vmatprep.subr.mxu0 %v12759_v24 }
 0x6bf   :  { %7918 = vmatpush3.msra.mxu0 %v1650_v10 }
 0x6c0   :  { %7919 = vmatprep.subr.mxu0 %v12759_v24 }
 0x6c1   :  { %7920 = vmatpush3.msra.mxu0 %v1649_v49 }
 0x6c2   :  { %7921 = vmatprep.subr.mxu0 %v12759_v24 }
 0x6c3   :  { %7922 = vmatpush3.msra.mxu0 %v1648_v60 }
 0x6c4   :  { %7923 = vmatprep.subr.mxu0 %v12759_v24 }
 0x6c5   :  { %7924 = vmatpush3.msra.mxu0 %v1647_v61 }
 0x6c6   :  { %7925 = vmatprep.subr.mxu0 %v12759_v24 }
 0x6c7   :  { %7926 = vmatpush3.msra.mxu0 %v1646_v2 }
 0x6c8   :  { %7927 = vmatprep.subr.mxu0 %v12759_v24 }
 0x6c9   :  { %7928 = vmatpush3.msra.mxu0 %v1645_v62 }
 0x6ca   :  { %7929 = vmatprep.subr.mxu0 %v12759_v24 }
 0x6cb   :  { %7930 = vmatpush3.msra.mxu0 %v1644_v11 }
 0x6cc   :  { %7931 = vmatprep.subr.mxu0 %v12759_v24 }
 0x6cd   :  { %7932 = vmatpush3.msra.mxu0 %v1643_v13 }
 0x6ce   :  { %7933 = vmatprep.subr.mxu0 %v12759_v24 }
 0x6cf   :  { %7934 = vmatpush3.msra.mxu0 %v1642_v27 }
 0x6d0   :  { %7935 = vmatprep.subr.mxu0 %v12759_v24 }
 0x6d1   :  { %7936 = vmatpush3.msra.mxu0 %v1641_v47 }
 0x6d2   :  { %7937 = vmatprep.subr.mxu0 %v12759_v24 }
 0x6d3   :  { %7938 = vmatpush3.msra.mxu0 %v1640_v50 }
 0x6d4   :  { %7939 = vmatprep.subr.mxu0 %v12759_v24 }
 0x6d5   :  { %7940 = vmatpush3.msra.mxu0 %v1639_v56 }
 0x6d6   :  { %7941 = vmatprep.subr.mxu0 %v12759_v24 }
 0x6d7   :  { %7942 = vmatpush3.msra.mxu0 %v1638_v6 }
 0x6d8   :  { %7944 = vmatmul.mubr.f32.vlgmr.msra.gmra.mxu0 %v8786_v18 }
 0x6d9   :  { %8010 = vmatprep.mubr.msk.f32.mxu0 %vm370_vm1, %v8787_v22 }
 0x750   :  { %v7970_v39 = vpop.f32.mrf.mxu1 }
 0x751   :  { %v9524_v41 = vmul.f32 0.35355338, %v7970_v39 }
 0x752   :  { %v1880_v42 = vpop.f32.mrf.mxu1 }
 0x753   :  { %v9526_v43 = vmul.f32 0.35355338, %v1880_v42  ;;  %1893 = vmax.xlane.f32.xlu1 %v9524_v41 }
 0x755   :  { %1891 = vmax.xlane.f32.xlu0 %v9526_v43 }
 0x798   :  { %v9663_v38 = vpop.f32.mrf.mxu0 }
 0x799   :  { %12850 = vst [vmem:[#allocation8_spill] sm:$0xff] %v9663_v38 }
 0x79a   :  { %v7945_v39 = vpop.f32.mrf.mxu0 }
 0x79b   :  { %v3403_v39 = vld [vmem:[%s12753_s8 + $0x58] sm:$0xff] }
 0x7dc   :  { %v1894_v58 = vpop.xlane.xlu1 %1893 }
 0x7de   :  { %v1892_v55 = vpop.xlane.xlu0 %1891 }
 0x7df   :  { %v1895_v57 = vmax.f32 %v1892_v55, %v1894_v58  ;;  %v3407_v55 = vld [vmem:[%s12753_s8 + $0x78] sm:$0xff] }
 0x7e1   :  { %v1896_v52 = vrot.slane %v1895_v57, 4 }
 0x7e3   :  { %v1897_v54 = vmax.f32 %v1895_v57, %v1896_v52 }
 0x7e5   :  { %v1898_v16 = vrot.slane %v1897_v54, 2 }
 0x7e7   :  { %v1899_v20 = vmax.f32 %v1897_v54, %v1898_v16  ;;  %v3406_v54 = vld [vmem:[%s12753_s8 + $0x70] sm:$0xff] }
 0x7e9   :  { %v1900_v23 = vrot.slane %v1899_v20, 1 }
 0x7eb   :  { %v1901_v26 = vmax.f32 %v1899_v20, %v1900_v23  ;;  %v3405_v23 = vld [vmem:[%s12753_s8 + $0x68] sm:$0xff] }
 0x7ed   :  { %v1902_v31 = vsub.f32 %v9526_v43, %v1901_v26  ;;  %v1903_v32 = vsub.f32 %v9524_v41, %v1901_v26  ;;  %v3423_v26 = vld [vmem:[%s12753_s8 + $0xf8] sm:$0xff] }
 0x7ef   :  { %v1904_v33 = vmul.f32 1.442695, %v1902_v31  ;;  %v1906_v34 = vmul.f32 1.442695, %v1903_v32 }
 0x7f1   :  { %8502 = vpow2.f32 %v1904_v33  ;;  %v3404_v33 = vld [vmem:[%s12753_s8 + $0x60] sm:$0xff] }
 0x7f2   :  { %8504 = vpow2.f32 %v1906_v34  ;;  %v3422_v34 = vld [vmem:[%s12753_s8 + $0xf0] sm:$0xff] }
 0x7fe   :  { %v8503_v35 = vpop.eup %8502 }
 0x7ff   :  { %v9654_v36 = vpop.eup %8504  ;;  %8003 = vmatprep.mubr.f32.mxu1 %v8503_v35 }
 0x800   :  { %8006 = vmatprep.subr.mxu0 %v9654_v36  ;;  %8004 = vmatmul.mubr.f32.vlgmr.msra.gmra.mxu1 %v9654_v36 }
 0x801   :  { %8007 = vmatpush3.msra.mxu0 %v9654_v36 }
 0x802   :  { %8008 = vmatprep.subr.mxu0 %v8503_v35 }
 0x803   :  { %8009 = vmatpush3.msra.mxu0 %v8503_v35 }
 0x804   :  { %8011 = vmatmul.mubr.msk.f32.vlgmr.msra.gmra.mxu0 %vm370_vm1, %v8788_v37 }
 0x8c0   :  { %v8005_v40 = vpop.f32.mrf.mxu1 }
 0x8c2   :  { %v1974_v41 = vpop.f32.mrf.mxu1 }
 0x8c3   :  { %8506 = vrcp.f32 %v1974_v41 }
 0x8c4   :  { %v9665_v42 = vpop.f32.mrf.mxu0 }
 0x8c6   :  { %v2049_v43 = vpop.f32.mrf.mxu0 }
 0x8c7   :  { %8508 = vrcp.f32 %v2049_v43 }
 0x8c8   :  { %8510 = vrcp.f32 %v8005_v40  ;;  %v3421_v40 = vld [vmem:[%s12753_s8 + $0xe8] sm:$0xff] }
 0x8c9   :  { %8512 = vrcp.f32 %v9665_v42 }
 0x8d0   :  { %v8507_v44 = vpop.eup %8506 }
 0x8d1   :  { %v2060_v45 = vmul.f32 %v8507_v44, %v8503_v35  ;;  %v3402_v44 = vld [vmem:[%s12753_s8 + $0x50] sm:$0xff] }
 0x8d3   :  { %2066 = vxpose.xlu0.b32.start.end [1/1] (short) %v2060_v45, 128  ;;  %v2381_v46 = vrot.slane %v2060_v45, 4  ;;  %v3420_v45 = vld [vmem:[%s12753_s8 + $0xe0] sm:$0xff] }
 0x8d4   :  { %v8509_v63 = vpop.eup %8508 }
 0x8d5   :  { %2383 = vxpose.xlu1.b32.start.end [1/1] (short) %v2381_v46, 128  ;;  %v2064_v51 = vmul.f32 %v8509_v63, %v8503_v35  ;;  %v8511_v8 = vpop.eup %8510 }
 0x8d6   :  { %v2061_v10 = vmul.f32 %v8511_v8, %v9654_v36 }
 0x8d7   :  { %8013 = vmatprep.subr.msk.mxu0 %vm541_vm2, %v2064_v51  ;;  %v2415_v0 = vrot.slane %v2064_v51, 4 }
 0x8d8   :  { %8014 = vmatpush3.msk.msra.mxu0 %vm541_vm2, %v2064_v51  ;;  %v3012_v49 = vrot.slane %v2061_v10, 4  ;;  %v3401_v51 = vld [vmem:[%s12753_s8 + $0x48] sm:$0xff] }
 0x8d9   :  { %8074 = vmatprep.subr.msk.mxu1 %vm541_vm2, %v2415_v0  ;;  %8039 = vmatprep.subr.mxu0 %v12759_v24 }
 0x8da   :  { %8075 = vmatpush3.msk.msra.mxu1 %vm541_vm2, %v2415_v0  ;;  %v3419_v0 = vld [vmem:[%s12753_s8 + $0xd8] sm:$0xff] }
 0x8db   :  { %8100 = vmatprep.subr.mxu1 %v12759_v24 }
 0x910   :  { %2697 = vxpose.xlu0.b32.start.end [1/1] (short) %v2061_v10, 128 }
 0x912   :  { %3014 = vxpose.xlu1.b32.start.end [1/1] (short) %v3012_v49, 128  ;;  %v3400_v49 = vld [vmem:[%s12753_s8 + $0x40] sm:$0xff] }
 0x94f   :  { %v2082_v60 = vpop.trf.xlu0 }
 0x950   :  { %8015 = vmatprep.mubr.msk.f32.mxu0 %vm492_vm3, %v2082_v60  ;;  %v3418_v60 = vld [vmem:[%s12753_s8 + $0xd0] sm:$0xff] }
 0x951   :  { %v2399_v61 = vpop.trf.xlu1 }
 0x952   :  { %8076 = vmatprep.mubr.msk.f32.mxu1 %vm492_vm3, %v2399_v61 }
 0x953   :  { %v2083_v2 = vpop.trf.xlu0 }
 0x954   :  { %8016 = vmatmul.mubr.msk.f32.vlgmr.msra.gmra.mxu0 %vm492_vm3, %v2083_v2 }
 0x955   :  { %v2400_v62 = vpop.trf.xlu1 }
 0x956   :  { %8077 = vmatmul.mubr.msk.f32.vlgmr.msra.gmra.mxu1 %vm492_vm3, %v2400_v62  ;;  %v3399_v62 = vld [vmem:[%s12753_s8 + $0x38] sm:$0xff] }
 0x957   :  { %v2084_v11 = vpop.trf.xlu0 }
 0x958   :  { %8018 = vmatprep.mubr.msk.f32.mxu0 %vm492_vm3, %v2084_v11  ;;  %v3417_v11 = vld [vmem:[%s12753_s8 + $0xc8] sm:$0xff] }
 0x959   :  { %v2401_v13 = vpop.trf.xlu1 }
 0x95a   :  { %8079 = vmatprep.mubr.msk.f32.mxu1 %vm492_vm3, %v2401_v13 }
 0x95b   :  { %v2085_v27 = vpop.trf.xlu0 }
 0x95c   :  { %8019 = vmatmul.mubr.msk.f32.gmra.mxu0 %vm492_vm3, %v2085_v27 }
 0x95d   :  { %v2402_v47 = vpop.trf.xlu1 }
 0x95e   :  { %8080 = vmatmul.mubr.msk.f32.gmra.mxu1 %vm492_vm3, %v2402_v47  ;;  %v3398_v47 = vld [vmem:[%s12753_s8 + $0x30] sm:$0xff] }
 0x95f   :  { %v2086_v50 = vpop.trf.xlu0 }
 0x960   :  { %8021 = vmatprep.mubr.msk.f32.mxu0 %vm492_vm3, %v2086_v50  ;;  %v3416_v50 = vld [vmem:[%s12753_s8 + $0xc0] sm:$0xff] }
 0x961   :  { %v2403_v56 = vpop.trf.xlu1 }
 0x962   :  { %8082 = vmatprep.mubr.msk.f32.mxu1 %vm492_vm3, %v2403_v56  ;;  %v3397_v56 = vld [vmem:[%s12753_s8 + $0x28] sm:$0xff] }
 0x963   :  { %v2087_v6 = vpop.trf.xlu0 }
 0x964   :  { %8022 = vmatmul.mubr.msk.f32.gmra.mxu0 %vm492_vm3, %v2087_v6  ;;  %v3415_v6 = vld [vmem:[%s12753_s8 + $0xb8] sm:$0xff] }
 0x965   :  { %v2404_v18 = vpop.trf.xlu1 }
 0x966   :  { %8083 = vmatmul.mubr.msk.f32.gmra.mxu1 %vm492_vm3, %v2404_v18  ;;  %v3396_v18 = vld [vmem:[%s12753_s8 + $0x20] sm:$0xff] }
 0x967   :  { %v2088_v22 = vpop.trf.xlu0 }
 0x968   :  { %8024 = vmatprep.mubr.msk.f32.mxu0 %vm492_vm3, %v2088_v22  ;;  %v3414_v22 = vld [vmem:[%s12753_s8 + $0xb0] sm:$0xff] }
 0x969   :  { %v2405_v58 = vpop.trf.xlu1 }
 0x96a   :  { %8085 = vmatprep.mubr.msk.f32.mxu1 %vm492_vm3, %v2405_v58  ;;  %v3395_v58 = vld [vmem:[%s12753_s8 + $0x18] sm:$0xff] }
 0x96b   :  { %v2089_v57 = vpop.trf.xlu0 }
 0x96c   :  { %8025 = vmatmul.mubr.msk.f32.gmra.mxu0 %vm492_vm3, %v2089_v57  ;;  %4163 = vperm.xlu1 %8489, %v3407_v55   ;;  %v3413_v55 = vld [vmem:[%s12753_s8 + $0xa8] sm:$0xff]  ;;  %v3394_v57 = vld [vmem:[%s12753_s8 + $0x10] sm:$0xff] }
 0x96d   :  { %v2406_v52 = vpop.trf.xlu1 }
 0x96e   :  { %8086 = vmatmul.mubr.msk.f32.gmra.mxu1 %vm492_vm3, %v2406_v52  ;;  %v3412_v52 = vld [vmem:[%s12753_s8 + $0xa0] sm:$0xff] }
 0x96f   :  { %v2090_v16 = vpop.trf.xlu0 }
 0x970   :  { %4158 = vperm.xlu1 %8489, %v3406_v54   ;;  %8027 = vmatprep.mubr.msk.f32.mxu0 %vm492_vm3, %v2090_v16  ;;  %v3393_v54 = vld [vmem:[%s12753_s8 + $0x8] sm:$0xff]  ;;  %v3411_v16 = vld [vmem:[%s12753_s8 + $0x98] sm:$0xff] }
 0x971   :  { %v2407_v20 = vpop.trf.xlu1 }
 0x972   :  { %8088 = vmatprep.mubr.msk.f32.mxu1 %vm492_vm3, %v2407_v20  ;;  %v3392_v20 = vld [vmem:[%s12753_s8] sm:$0xff] }
 0x973   :  { %v2091_v31 = vpop.trf.xlu0 }
 0x974   :  { %8028 = vmatmul.mubr.msk.f32.gmra.mxu0 %vm492_vm3, %v2091_v31  ;;  %4153 = vperm.xlu1 %8489, %v3405_v23   ;;  %v3410_v23 = vld [vmem:[%s12753_s8 + $0x90] sm:$0xff]  ;;  %v3409_v31 = vld [vmem:[%s12753_s8 + $0x88] sm:$0xff] }
 0x975   :  { %4243 = vperm.xlu0 %8488, %v3423_v26   ;;  %v2408_v32 = vpop.trf.xlu1  ;;  %v3433_v26 = vld [vmem:[%s12755_s10 + $0x8] sm:$0xff] }
 0x976   :  { %8089 = vmatmul.mubr.msk.f32.gmra.mxu1 %vm492_vm3, %v2408_v32  ;;  %v3435_v32 = vld [vmem:[%s12755_s10 + $0x18] sm:$0xff] }
 0x977   :  { %v2092_v35 = vpop.trf.xlu0 }
 0x978   :  { %4148 = vperm.xlu1 %8489, %v3404_v33   ;;  %8030 = vmatprep.mubr.msk.f32.mxu0 %vm492_vm3, %v2092_v35  ;;  %v3408_v33 = vld [vmem:[%s12753_s8 + $0x80] sm:$0xff] }
 0x979   :  { %4238 = vperm.xlu0 %8488, %v3422_v34   ;;  %v2409_v37 = vpop.trf.xlu1  ;;  %v3437_v34 = vld [vmem:[%s12756_s11 + $0x8] sm:$0xff]  ;;  %v3432_v35 = vld [vmem:[%s12755_s10] sm:$0xff] }
 0x97a   :  { %8091 = vmatprep.mubr.msk.f32.mxu1 %vm492_vm3, %v2409_v37  ;;  %v3439_v37 = vld [vmem:[%s12756_s11 + $0x18] sm:$0xff] }
 0x97b   :  { %v2093_v41 = vpop.trf.xlu0 }
 0x97c   :  { %8031 = vmatmul.mubr.msk.f32.gmra.mxu0 %vm492_vm3, %v2093_v41  ;;  %4143 = vperm.xlu1 %8489, %v3403_v39   ;;  %v3434_v39 = vld [vmem:[%s12755_s10 + $0x10] sm:$0xff]  ;;  %v3436_v41 = vld [vmem:[%s12756_s11] sm:$0xff] }
 0x97d   :  { %4233 = vperm.xlu0 %8488, %v3421_v40   ;;  %v2410_v43 = vpop.trf.xlu1  ;;  %v3441_v40 = vld [vmem:[%s12757_s12 + $0x8] sm:$0xff] }
 0x97e   :  { %8092 = vmatmul.mubr.msk.f32.gmra.mxu1 %vm492_vm3, %v2410_v43  ;;  %v3443_v43 = vld [vmem:[%s12757_s12 + $0x18] sm:$0xff] }
 0x97f   :  { %v2094_v46 = vpop.trf.xlu0 }
 0x980   :  { %4138 = vperm.xlu1 %8489, %v3402_v44   ;;  %8033 = vmatprep.mubr.msk.f32.mxu0 %vm492_vm3, %v2094_v46  ;;  %v3438_v44 = vld [vmem:[%s12756_s11 + $0x10] sm:$0xff] }
 0x981   :  { %4228 = vperm.xlu0 %8488, %v3420_v45   ;;  %v2411_v63 = vpop.trf.xlu1  ;;  %v3440_v45 = vld [vmem:[%s12757_s12] sm:$0xff]  ;;  %v3442_v46 = vld [vmem:[%s12757_s12 + $0x10] sm:$0xff] }
 0x982   :  { %8094 = vmatprep.mubr.msk.f32.mxu1 %vm492_vm3, %v2411_v63 }
 0x983   :  { %v2095_v8 = vpop.trf.xlu0 }
 0x984   :  { %8034 = vmatmul.mubr.msk.f32.gmra.mxu0 %vm492_vm3, %v2095_v8  ;;  %4133 = vperm.xlu1 %8489, %v3401_v51  }
 0x985   :  { %4223 = vperm.xlu0 %8488, %v3419_v0   ;;  %v2412_v10 = vpop.trf.xlu1 }
 0x986   :  { %8095 = vmatmul.mubr.msk.f32.gmra.mxu1 %vm492_vm3, %v2412_v10 }
 0x987   :  { %v2096_v61 = vpop.trf.xlu0 }
 0x988   :  { %4128 = vperm.xlu1 %8489, %v3400_v49   ;;  %8036 = vmatprep.mubr.msk.f32.mxu0 %vm492_vm3, %v2096_v61 }
 0x989   :  { %4218 = vperm.xlu0 %8488, %v3418_v60   ;;  %v2413_v2 = vpop.trf.xlu1 }
 0x98a   :  { %8097 = vmatprep.mubr.msk.f32.mxu1 %vm492_vm3, %v2413_v2 }
 0x98b   :  { %v2097_v13 = vpop.trf.xlu0 }
 0x98c   :  { %8037 = vmatmul.mubr.msk.f32.gmra.mxu0 %vm492_vm3, %v2097_v13  ;;  %4123 = vperm.xlu1 %8489, %v3399_v62  }
 0x98d   :  { %4213 = vperm.xlu0 %8488, %v3417_v11   ;;  %v2414_v27 = vpop.trf.xlu1  ;;  %8071 = vmatprep.mubr.msk.f32.mxu0 %vm8911_vm4, %v12759_v24 }
 0x98e   :  { %8098 = vmatmul.mubr.msk.f32.gmra.mxu1 %vm492_vm3, %v2414_v27 }
 0x98f   :  { %8132 = vmatprep.mubr.msk.f32.mxu1 %vm8911_vm4, %v12759_v24  ;;  %v9864_v13 = vpop.trf.xlu0 }
 0x990   :  { %4118 = vperm.xlu1 %8489, %v3398_v47  }
 0x991   :  { %4208 = vperm.xlu0 %8488, %v3416_v50   ;;  %v9870_v50 = vpop.trf.xlu1 }
 0x994   :  { %4113 = vperm.xlu1 %8489, %v3397_v56  }
 0x995   :  { %4203 = vperm.xlu0 %8488, %v3415_v6  }
 0x998   :  { %4108 = vperm.xlu1 %8489, %v3396_v18   ;;  %v9876_v18 = vpop.trf.xlu0 }
 0x999   :  { %4198 = vperm.xlu0 %8488, %v3414_v22  }
 0x99c   :  { %4103 = vperm.xlu1 %8489, %v3395_v58  }
 0x99d   :  { %4193 = vperm.xlu0 %8488, %v3413_v55   ;;  %v9880_v55 = vpop.trf.xlu1 }
 0x9a0   :  { %4098 = vperm.xlu1 %8489, %v3394_v57  }
 0x9a1   :  { %4188 = vperm.xlu0 %8488, %v3412_v52  }
 0x9a4   :  { %4093 = vperm.xlu1 %8489, %v3393_v54   ;;  %v9882_v54 = vpop.trf.xlu0 }
 0x9a5   :  { %4183 = vperm.xlu0 %8488, %v3411_v16  }
 0x9a8   :  { %4088 = vperm.xlu1 %8489, %v3392_v20  }
 0x9a9   :  { %4178 = vperm.xlu0 %8488, %v3410_v23   ;;  %v9886_v23 = vpop.trf.xlu1 }
 0x9ac   :  { %5149 = vperm.xlu1 %8489, %v3433_v26  }
 0x9ad   :  { %4173 = vperm.xlu0 %8488, %v3409_v31  }
 0x9b0   :  { %5159 = vperm.xlu1 %8489, %v3435_v32   ;;  %v9888_v32 = vpop.trf.xlu0 }
 0x9b1   :  { %4168 = vperm.xlu0 %8488, %v3408_v33   ;;  %12851 = vst [vmem:[#allocation9_spill] sm:$0xff] %v9888_v32 }
 0x9b4   :  { %5258 = vperm.xlu1 %8489, %v3437_v34  }
 0x9b5   :  { %5144 = vperm.xlu0 %8488, %v3432_v35   ;;  %v9890_v35 = vpop.trf.xlu1 }
 0x9b6   :  { %12852 = vst [vmem:[#allocation10_spill] sm:$0xff] %v9890_v35 }
 0x9b8   :  { %5268 = vperm.xlu1 %8489, %v3439_v37  }
 0x9b9   :  { %5154 = vperm.xlu0 %8488, %v3434_v39  }
 0x9bc   :  { %5282 = vperm.xlu1 %8489, %v3441_v40   ;;  %v9892_v40 = vpop.trf.xlu0 }
 0x9bd   :  { %5253 = vperm.xlu0 %8488, %v3436_v41   ;;  %12853 = vst [vmem:[#allocation11_spill] sm:$0xff] %v9892_v40 }
 0x9c0   :  { %5292 = vperm.xlu1 %8489, %v3443_v43   ;;  %v9902_v32 = vpop.trf.xlu0 }
 0x9c1   :  { %5263 = vperm.xlu0 %8488, %v3438_v44   ;;  %v9894_v44 = vpop.trf.xlu1 }
 0x9c5   :  { %5277 = vperm.xlu0 %8488, %v3440_v45  }
 0x9c9   :  { %5287 = vperm.xlu0 %8488, %v3442_v46  }
 0xa14   :  { %v9842_v63 = vpop.f32.mrf.mxu0 }
 0xa16   :  { %v9844_v51 = vpop.f32.mrf.mxu1  ;;  %v9846_v0 = vpop.f32.mrf.mxu0 }
 0xa18   :  { %v9848_v8 = vpop.f32.mrf.mxu1 }
 0xa1c   :  { %v9850_v10 = vpop.f32.mrf.mxu0 }
 0xa1e   :  { %v9852_v49 = vpop.f32.mrf.mxu1  ;;  %v9854_v60 = vpop.f32.mrf.mxu0 }
 0xa20   :  { %v9856_v61 = vpop.f32.mrf.mxu1 }
 0xa24   :  { %v9858_v2 = vpop.f32.mrf.mxu0 }
 0xa26   :  { %v9860_v62 = vpop.f32.mrf.mxu1  ;;  %v9862_v11 = vpop.f32.mrf.mxu0 }
 0xa28   :  { %v9866_v27 = vpop.f32.mrf.mxu1 }
 0xa2c   :  { %v9868_v47 = vpop.f32.mrf.mxu0 }
 0xa2e   :  { %v9872_v56 = vpop.f32.mrf.mxu1  ;;  %v9874_v6 = vpop.f32.mrf.mxu0 }
 0xa2f   :  { %v2300_v42 = vmul.f32 %v9594_v9, %v9874_v6 }
 0xa30   :  { %v9878_v22 = vpop.f32.mrf.mxu1 }
 0xa34   :  { %v8029_v58 = vpop.f32.mrf.mxu0 }
 0xa36   :  { %v8090_v57 = vpop.f32.mrf.mxu1  ;;  %v2255_v52 = vpop.f32.mrf.mxu0 }
 0xa38   :  { %v9884_v16 = vpop.f32.mrf.mxu1 }
 0xa3c   :  { %v8032_v20 = vpop.f32.mrf.mxu0 }
 0xa3e   :  { %v8093_v26 = vpop.f32.mrf.mxu1  ;;  %v2265_v31 = vpop.f32.mrf.mxu0 }
 0xa40   :  { %v2582_v33 = vpop.f32.mrf.mxu1 }
 0xa44   :  { %v8035_v34 = vpop.f32.mrf.mxu0 }
 0xa45   :  { %v2307_v35 = vmul.f32 %v9540_v30, %v8035_v34  ;;  %v2622_v34 = vmul.f32 %v9559_v17, %v8093_v26  ;;  %v2302_v26 = vmul.f32 %v9580_v1, %v2255_v52  ;;  %v2617_v52 = vmul.f32 %v9594_v9, %v9878_v22 }
 0xa46   :  { %v8096_v37 = vpop.f32.mrf.mxu1  ;;  %v2275_v39 = vpop.f32.mrf.mxu0  ;;  %v2297_v9 = vmul.f32 %v9615_v19, %v9850_v10 }
 0xa47   :  { %v8513_v10 = vpop.eup %8512 }
 0xa48   :  { %v2592_v41 = vpop.f32.mrf.mxu1 }
 0xa4c   :  { %v8038_v43 = vpop.f32.mrf.mxu0 }
 0xa4d   :  { %v2309_v45 = vmul.f32 %v9533_v5, %v8038_v43  ;;  %v2306_v43 = vmul.f32 %v9552_v28, %v2275_v39 }
 0xa4e   :  { %v2285_v46 = vpop.f32.mrf.mxu0  ;;  %v8099_v24 = vpop.f32.mrf.mxu1 }
 0xa4f   :  { %v2308_v59 = vmul.f32 %v9546_v48, %v2285_v46  ;;  %v2626_v38 = vmul.f32 %v9533_v5, %v8099_v24  ;;  %8040 = vmatpush3.msra.mxu0 %v2309_v45  ;;  %v2624_v24 = vmul.f32 %v9540_v30, %v8096_v37  ;;  %v9908_v45 = vpop.trf.xlu1  ;;  %v2621_v37 = vmul.f32 %v9566_v3, %v2582_v33 }
 0xa50   :  { %8041 = vmatprep.subr.mxu0 %v12854_v15  ;;  %v2602_v14 = vpop.f32.mrf.mxu1  ;;  %v2619_v33 = vmul.f32 %v9580_v1, %v9884_v16  ;;  %v2299_v1 = vmul.f32 %v9601_v12, %v9858_v2  ;;  %v2615_v2 = vmul.f32 %v9608_v7, %v9866_v27  ;;  %v2613_v27 = vmul.f32 %v9623_v29, %v9856_v61  ;;  %v12855_v61 = vld [vmem:[#allocation9_spill] sm:$0xff] }
 0xa51   :  { %v2625_v40 = vmul.f32 %v9546_v48, %v2602_v14  ;;  %8042 = vmatpush3.msra.mxu0 %v2308_v59  ;;  %8101 = vmatpush3.msra.mxu1 %v2626_v38  ;;  %v2305_v59 = vmul.f32 %v9559_v17, %v8032_v20  ;;  %v2623_v14 = vmul.f32 %v9552_v28, %v2592_v41 }
 0xa52   :  { %8043 = vmatprep.subr.mxu0 %v12854_v15  ;;  %8102 = vmatprep.subr.mxu1 %v12854_v15  ;;  %v2304_v38 = vmul.f32 %v9566_v3, %v2265_v31  ;;  %v2303_v20 = vmul.f32 %v9573_v21, %v8029_v58  ;;  %v2620_v31 = vmul.f32 %v9573_v21, %v8090_v57 }
 0xa53   :  { %8044 = vmatpush3.msra.mxu0 %v2307_v35  ;;  %8103 = vmatpush3.msra.mxu1 %v2625_v40  ;;  %v9918_v35 = vpop.trf.xlu0  ;;  %v9924_v39 = vpop.trf.xlu1  ;;  %v2301_v58 = vmul.f32 %v9587_v25, %v9868_v47  ;;  %v2618_v57 = vmul.f32 %v9587_v25, %v9872_v56  ;;  %v2298_v25 = vmul.f32 %v9608_v7, %v9862_v11 }
 0xa54   :  { %8045 = vmatprep.subr.mxu0 %v12854_v15  ;;  %8104 = vmatprep.subr.mxu1 %v12854_v15  ;;  %v2616_v56 = vmul.f32 %v9601_v12, %v9860_v62  ;;  %v2296_v12 = vmul.f32 %v9623_v29, %v9854_v60  ;;  %v2614_v62 = vmul.f32 %v9615_v19, %v9852_v49 }
 0xa55   :  { %8046 = vmatpush3.msra.mxu0 %v2306_v43  ;;  %8105 = vmatpush3.msra.mxu1 %v2624_v24  ;;  %v2295_v7 = vmul.f32 %v9631_v53, %v9842_v63  ;;  %v2294_v19 = vmul.f32 %v9639_v4, %v9846_v0  ;;  %v2612_v49 = vmul.f32 %v9631_v53, %v9844_v51  ;;  %v8789_v0 = vld [vmem:[%s12745_s0 + $0x20] sm:$0xff] }
 0xa56   :  { %8047 = vmatprep.subr.mxu0 %v12854_v15  ;;  %8106 = vmatprep.subr.mxu1 %v12854_v15  ;;  %v2065_v63 = vmul.f32 %v8513_v10, %v9654_v36  ;;  %v2611_v29 = vmul.f32 %v9639_v4, %v9848_v8  ;;  %v8790_v4 = vld [vmem:[%s12745_s0 + $0x28] sm:$0xff] }
 0xa57   :  { %8048 = vmatpush3.msra.mxu0 %v2305_v59  ;;  %8107 = vmatpush3.msra.mxu1 %v2623_v14  ;;  %v9937_v40 = vpop.trf.xlu0  ;;  %v9945_v47 = vpop.trf.xlu1 }
 0xa58   :  { %8049 = vmatprep.subr.mxu0 %v12854_v15  ;;  %8108 = vmatprep.subr.mxu1 %v12854_v15  ;;  %v3046_v53 = vrot.slane %v2065_v63, 4 }
 0xa59   :  { %8050 = vmatpush3.msra.mxu0 %v2304_v38  ;;  %8109 = vmatpush3.msra.mxu1 %v2622_v34 }
 0xa5a   :  { %8051 = vmatprep.subr.mxu0 %v12854_v15  ;;  %8110 = vmatprep.subr.mxu1 %v12854_v15 }
 0xa5b   :  { %8052 = vmatpush3.msra.mxu0 %v2303_v20  ;;  %8111 = vmatpush3.msra.mxu1 %v2621_v37  ;;  %v9959_v6 = vpop.trf.xlu0  ;;  %v9967_v11 = vpop.trf.xlu1 }
 0xa5c   :  { %8053 = vmatprep.subr.mxu0 %v12854_v15  ;;  %8112 = vmatprep.subr.mxu1 %v12854_v15 }
 0xa5d   :  { %8054 = vmatpush3.msra.mxu0 %v2302_v26  ;;  %8113 = vmatpush3.msra.mxu1 %v2620_v31 }
 0xa5e   :  { %8055 = vmatprep.subr.mxu0 %v12854_v15  ;;  %8114 = vmatprep.subr.mxu1 %v12854_v15 }
 0xa5f   :  { %8056 = vmatpush3.msra.mxu0 %v2301_v58  ;;  %8115 = vmatpush3.msra.mxu1 %v2619_v33  ;;  %v2722_v22 = vpop.trf.xlu0  ;;  %v3039_v60 = vpop.trf.xlu1 }
 0xa60   :  { %8057 = vmatprep.subr.mxu0 %v12854_v15  ;;  %8116 = vmatprep.subr.mxu1 %v12854_v15 }
 0xa61   :  { %8058 = vmatpush3.msra.mxu0 %v2300_v42  ;;  %8117 = vmatpush3.msra.mxu1 %v2618_v57 }
 0xa62   :  { %8059 = vmatprep.subr.mxu0 %v12854_v15  ;;  %8118 = vmatprep.subr.mxu1 %v12854_v15 }
 0xa63   :  { %8060 = vmatpush3.msra.mxu0 %v2299_v1  ;;  %8119 = vmatpush3.msra.mxu1 %v2617_v52  ;;  %v2723_v36 = vpop.trf.xlu0  ;;  %v3040_v51 = vpop.trf.xlu1 }
 0xa64   :  { %8061 = vmatprep.subr.mxu0 %v12854_v15  ;;  %8120 = vmatprep.subr.mxu1 %v12854_v15 }
 0xa65   :  { %8062 = vmatpush3.msra.mxu0 %v2298_v25  ;;  %8121 = vmatpush3.msra.mxu1 %v2616_v56 }
 0xa66   :  { %8063 = vmatprep.subr.mxu0 %v12854_v15  ;;  %8122 = vmatprep.subr.mxu1 %v12854_v15 }
 0xa67   :  { %8064 = vmatpush3.msra.mxu0 %v2297_v9  ;;  %8123 = vmatpush3.msra.mxu1 %v2615_v2  ;;  %v2724_v8 = vpop.trf.xlu0 }
 0xa68   :  { %8065 = vmatprep.subr.mxu0 %v12854_v15  ;;  %8124 = vmatprep.subr.mxu1 %v12854_v15 }
 0xa69   :  { %8066 = vmatpush3.msra.mxu0 %v2296_v12  ;;  %8125 = vmatpush3.msra.mxu1 %v2614_v62 }
 0xa6a   :  { %8067 = vmatprep.subr.mxu0 %v12854_v15  ;;  %8126 = vmatprep.subr.mxu1 %v12854_v15 }
 0xa6b   :  { %8068 = vmatpush3.msra.mxu0 %v2295_v7  ;;  %8127 = vmatpush3.msra.mxu1 %v2613_v27 }
 0xa6c   :  { %8069 = vmatprep.subr.mxu0 %v12854_v15  ;;  %8128 = vmatprep.subr.mxu1 %v12854_v15 }
 0xa6d   :  { %8070 = vmatpush3.msra.mxu0 %v2294_v19  ;;  %8129 = vmatpush3.msra.mxu1 %v2612_v49 }
 0xa6e   :  { %8072 = vmatmul.mubr.f32.vlgmr.msra.gmra.mxu0 %v8789_v0  ;;  %8130 = vmatprep.subr.mxu1 %v12854_v15 }
 0xa6f   :  { %8135 = vmatprep.subr.msk.mxu0 %vm541_vm2, %v2065_v63  ;;  %8131 = vmatpush3.msra.mxu1 %v2611_v29 }
 0xa70   :  { %8136 = vmatpush3.msk.msra.mxu0 %vm541_vm2, %v2065_v63  ;;  %8137 = vmatprep.mubr.msk.f32.mxu0 %vm492_vm3, %v9864_v13  ;;  %v3041_v13 = vpop.trf.xlu1 }
 0xa71   :  { %8133 = vmatmul.mubr.f32.vlgmr.msra.gmra.mxu1 %v8790_v4  ;;  %8196 = vmatprep.subr.msk.mxu1 %vm541_vm2, %v3046_v53 }
 0xa72   :  { %8197 = vmatpush3.msk.msra.mxu1 %vm541_vm2, %v3046_v53  ;;  %8198 = vmatprep.mubr.msk.f32.mxu1 %vm492_vm3, %v9870_v50  ;;  %v12856_v50 = vld [vmem:[#allocation11_spill] sm:$0xff] }
 0xa73   :  { %8138 = vmatmul.mubr.msk.f32.vlgmr.msra.gmra.mxu0 %vm492_vm3, %v9876_v18  ;;  %8161 = vmatprep.subr.mxu0 %v12854_v15  ;;  %v12857_v18 = vld [vmem:[#allocation10_spill] sm:$0xff] }
 0xa74   :  { %8140 = vmatprep.mubr.msk.f32.mxu0 %vm492_vm3, %v9882_v54  ;;  %8222 = vmatprep.subr.mxu1 %v12854_v15  ;;  %v3042_v54 = vpop.trf.xlu1 }
 0xa75   :  { %8199 = vmatmul.mubr.msk.f32.vlgmr.msra.gmra.mxu1 %vm492_vm3, %v9880_v55  ;;  %v2725_v55 = vpop.trf.xlu0 }
 0xa76   :  { %8201 = vmatprep.mubr.msk.f32.mxu1 %vm492_vm3, %v9886_v23 }
 0xa77   :  { %8141 = vmatmul.mubr.msk.f32.gmra.mxu0 %vm492_vm3, %v12855_v61 }
 0xa78   :  { %8143 = vmatprep.mubr.msk.f32.mxu0 %vm492_vm3, %v12856_v50  ;;  %v3043_v23 = vpop.trf.xlu1 }
 0xa79   :  { %8202 = vmatmul.mubr.msk.f32.gmra.mxu1 %vm492_vm3, %v12857_v18  ;;  %v2726_v16 = vpop.trf.xlu0  ;;  %v8794_v18 = vld [vmem:[%s12749_s4 + $0x38] sm:$0xff] }
 0xa7a   :  { %8204 = vmatprep.mubr.msk.f32.mxu1 %vm492_vm3, %v9894_v44 }
 0xa7b   :  { %8144 = vmatmul.mubr.msk.f32.gmra.mxu0 %vm492_vm3, %v9902_v32 }
 0xa7c   :  { %8146 = vmatprep.mubr.msk.f32.mxu0 %vm492_vm3, %v9918_v35  ;;  %v3044_v41 = vpop.trf.xlu1 }
 0xa7d   :  { %8205 = vmatmul.mubr.msk.f32.gmra.mxu1 %vm492_vm3, %v9908_v45  ;;  %v2727_v32 = vpop.trf.xlu0 }
 0xa7e   :  { %8207 = vmatprep.mubr.msk.f32.mxu1 %vm492_vm3, %v9924_v39 }
 0xa7f   :  { %8147 = vmatmul.mubr.msk.f32.gmra.mxu0 %vm492_vm3, %v9937_v40 }
 0xa80   :  { %8149 = vmatprep.mubr.msk.f32.mxu0 %vm492_vm3, %v9959_v6  ;;  %v3045_v46 = vpop.trf.xlu1 }
 0xa81   :  { %8208 = vmatmul.mubr.msk.f32.gmra.mxu1 %vm492_vm3, %v9945_v47  ;;  %v2728_v44 = vpop.trf.xlu0 }
 0xa82   :  { %8210 = vmatprep.mubr.msk.f32.mxu1 %vm492_vm3, %v9967_v11 }
 0xa83   :  { %8150 = vmatmul.mubr.msk.f32.gmra.mxu0 %vm492_vm3, %v2722_v22 }
 0xa84   :  { %8152 = vmatprep.mubr.msk.f32.mxu0 %vm492_vm3, %v2723_v36 }
 0xa85   :  { %8211 = vmatmul.mubr.msk.f32.gmra.mxu1 %vm492_vm3, %v3039_v60 }
 0xa86   :  { %8213 = vmatprep.mubr.msk.f32.mxu1 %vm492_vm3, %v3040_v51 }
 0xa87   :  { %8153 = vmatmul.mubr.msk.f32.gmra.mxu0 %vm492_vm3, %v2724_v8 }
 0xa88   :  { %8155 = vmatprep.mubr.msk.f32.mxu0 %vm492_vm3, %v2725_v55 }
 0xa89   :  { %8214 = vmatmul.mubr.msk.f32.gmra.mxu1 %vm492_vm3, %v3041_v13 }
 0xa8a   :  { %8216 = vmatprep.mubr.msk.f32.mxu1 %vm492_vm3, %v3042_v54 }
 0xa8b   :  { %8156 = vmatmul.mubr.msk.f32.gmra.mxu0 %vm492_vm3, %v2726_v16  ;;  %v8795_v16 = vld [vmem:[%s12749_s4 + $0x30] sm:$0xff] }
 0xa8c   :  { %8158 = vmatprep.mubr.msk.f32.mxu0 %vm492_vm3, %v2727_v32 }
 0xa8d   :  { %8217 = vmatmul.mubr.msk.f32.gmra.mxu1 %vm492_vm3, %v3043_v23 }
 0xa8e   :  { %8219 = vmatprep.mubr.msk.f32.mxu1 %vm492_vm3, %v3044_v41  ;;  %v8796_v41 = vld [vmem:[%s12749_s4 + $0x28] sm:$0xff] }
 0xa8f   :  { %8159 = vmatmul.mubr.msk.f32.gmra.mxu0 %vm492_vm3, %v2728_v44 }
 0xa90   :  { %8193 = vmatprep.mubr.msk.f32.mxu0 %vm8911_vm4, %v12854_v15 }
 0xa91   :  { %8220 = vmatmul.mubr.msk.f32.gmra.mxu1 %vm492_vm3, %v3045_v46 }
 0xa92   :  { %8254 = vmatprep.mubr.msk.f32.mxu1 %vm8911_vm4, %v12854_v15 }
 0xb2e   :  { %v10059_v43 = vpop.f32.mrf.mxu0 }
 0xb30   :  { %v8073_v24 = vpop.f32.mrf.mxu0 }
 0xb31   :  { %v10061_v45 = vpop.f32.mrf.mxu1  ;;  %v8797_v24 = vld [vmem:[%s12749_s4 + $0x20] sm:$0xff] }
 0xb33   :  { %v8134_v59 = vpop.f32.mrf.mxu1  ;;  %v10063_v14 = vpop.f32.mrf.mxu0 }
 0xb35   :  { %v10065_v38 = vpop.f32.mrf.mxu0  ;;  %v10067_v34 = vpop.f32.mrf.mxu1 }
 0xb37   :  { %v10069_v35 = vpop.f32.mrf.mxu0  ;;  %v10071_v20 = vpop.f32.mrf.mxu1 }
 0xb39   :  { %v10073_v37 = vpop.f32.mrf.mxu0  ;;  %v10075_v39 = vpop.f32.mrf.mxu1 }
 0xb3b   :  { %v10077_v26 = vpop.f32.mrf.mxu0  ;;  %v10079_v31 = vpop.f32.mrf.mxu1 }
 0xb3c   :  { %v2930_v44 = vmul.f32 %v8796_v41, %v10077_v26  ;;  %v8798_v26 = vld [vmem:[%s12749_s4 + $0x18] sm:$0xff] }
 0xb3d   :  { %v10081_v58 = vpop.f32.mrf.mxu0  ;;  %v10083_v33 = vpop.f32.mrf.mxu1 }
 0xb3e   :  { %v2929_v59 = vmul.f32 %v8797_v24, %v10081_v58  ;;  %v8799_v58 = vld [vmem:[%s12749_s4 + $0x10] sm:$0xff] }
 0xb3f   :  { %v10085_v40 = vpop.f32.mrf.mxu0  ;;  %v10087_v42 = vpop.f32.mrf.mxu1 }
 0xb40   :  { %v2932_v55 = vmul.f32 %v8794_v18, %v10085_v40  ;;  %v3247_v40 = vmul.f32 %v8796_v41, %v10083_v33  ;;  %v2927_v33 = vmul.f32 %v8799_v58, %v10073_v37  ;;  %v8801_v37 = vld [vmem:[%s12749_s4] sm:$0xff]  ;;  %v3379_v41 = vld [vmem:[%s12752_s7 + $0x98] sm:$0xff] }
 0xb41   :  { %v10089_v57 = vpop.f32.mrf.mxu0  ;;  %v10091_v47 = vpop.f32.mrf.mxu1 }
 0xb42   :  { %v2931_v23 = vmul.f32 %v8795_v16, %v10089_v57  ;;  %v3249_v32 = vmul.f32 %v8794_v18, %v10091_v47  ;;  %v2928_v57 = vmul.f32 %v8798_v26, %v10069_v35  ;;  %v3246_v47 = vmul.f32 %v8797_v24, %v10087_v42  ;;  %v8800_v35 = vld [vmem:[%s12749_s4 + $0x8] sm:$0xff]  ;;  %v3376_v18 = vld [vmem:[%s12752_s7 + $0x80] sm:$0xff]  ;;  %v3347_v24 = vld [vmem:[%s12751_s6 + $0x98] sm:$0xff] }
 0xb43   :  { %v8151_v1 = vpop.f32.mrf.mxu0  ;;  %v10093_v52 = vpop.f32.mrf.mxu1  ;;  %v2926_v42 = vmul.f32 %v8800_v35, %v10063_v14  ;;  %v3242_v14 = vmul.f32 %v8801_v37, %v10071_v20  ;;  %v12858_v20 = vld [vmem:[#allocation7_spill] sm:$0xff] }
 0xb44   :  { %v2934_v61 = vmul.f32 %v9573_v21, %v8151_v1  ;;  %v8793_v21 = vld [vmem:[%s12749_s4 + $0x48] sm:$0xff]  ;;  %v3248_v46 = vmul.f32 %v8795_v16, %v10093_v52  ;;  %v3245_v1 = vmul.f32 %v8798_v26, %v10075_v39  ;;  %v3244_v52 = vmul.f32 %v8799_v58, %v10079_v31  ;;  %v3360_v31 = vld [vmem:[%s12752_s7] sm:$0xff]  ;;  %v3382_v26 = vld [vmem:[%s12752_s7 + $0xb0] sm:$0xff] }
 0xb45   :  { %v2886_v25 = vpop.f32.mrf.mxu0  ;;  %v8212_v56 = vpop.f32.mrf.mxu1  ;;  %v2925_v39 = vmul.f32 %v8801_v37, %v10065_v38  ;;  %v8802_v38 = vld [vmem:[%s12745_s0 + $0x30] sm:$0xff]  ;;  %v3344_v16 = vld [vmem:[%s12751_s6 + $0x80] sm:$0xff]  ;;  %v3353_v37 = vld [vmem:[%s12751_s6 + $0xc8] sm:$0xff] }
 0xb46   :  { %v3251_v50 = vmul.f32 %v8793_v21, %v8212_v56  ;;  %v3361_v56 = vld [vmem:[%s12752_s7 + $0x8] sm:$0xff]  ;;  %v3375_v21 = vld [vmem:[%s12752_s7 + $0x78] sm:$0xff]  ;;  %v3350_v58 = vld [vmem:[%s12751_s6 + $0xb0] sm:$0xff] }
 0xb47   :  { %v8154_v6 = vpop.f32.mrf.mxu0  ;;  %v3203_v9 = vpop.f32.mrf.mxu1 }
 0xb49   :  { %v2896_v2 = vpop.f32.mrf.mxu0  ;;  %v8215_v11 = vpop.f32.mrf.mxu1 }
 0xb4a   :  { %v2935_v8 = vmul.f32 %v9566_v3, %v2896_v2  ;;  %v10217_v2 = vld [vmem:[%s12751_s6] sm:$0xff] }
 0xb4b   :  { %v8157_v12 = vpop.f32.mrf.mxu0  ;;  %v3213_v62 = vpop.f32.mrf.mxu1 }
 0xb4c   :  { %v2938_v53 = vmul.f32 %v9540_v30, %v8157_v12  ;;  %v8807_v12 = vld [vmem:[%s12745_s0] sm:$0xff] }
 0xb4d   :  { %v2906_v10 = vpop.f32.mrf.mxu0  ;;  %v8218_v7 = vpop.f32.mrf.mxu1 }
 0xb4e   :  { %v2937_v4 = vmul.f32 %v9552_v28, %v2906_v10  ;;  %v3255_v51 = vmul.f32 %v9540_v30, %v8218_v7  ;;  %v3253_v30 = vmul.f32 %v9559_v17, %v8215_v11  ;;  %v3329_v11 = vld [vmem:[%s12751_s6 + $0x8] sm:$0xff]  ;;  %v3330_v10 = vld [vmem:[%s12751_s6 + $0x10] sm:$0xff]  ;;  %v3364_v7 = vld [vmem:[%s12752_s7 + $0x20] sm:$0xff] }
 0xb4f   :  { %v8160_v27 = vpop.f32.mrf.mxu0  ;;  %v3223_v22 = vpop.f32.mrf.mxu1 }
 0xb50   :  { %v2940_v19 = vmul.f32 %v9533_v5, %v8160_v27  ;;  %v3331_v27 = vld [vmem:[%s12751_s6 + $0x18] sm:$0xff] }
 0xb51   :  { %v2916_v49 = vpop.f32.mrf.mxu0  ;;  %v8221_v63 = vpop.f32.mrf.mxu1 }
 0xb52   :  { %v2939_v60 = vmul.f32 %v9546_v48, %v2916_v49  ;;  %v3257_v29 = vmul.f32 %v9533_v5, %v8221_v63  ;;  %8162 = vmatpush3.msra.mxu0 %v2940_v19  ;;  %v2936_v5 = vmul.f32 %v9559_v17, %v8154_v6  ;;  %v8792_v17 = vld [vmem:[%s12749_s4 + $0x40] sm:$0xff]  ;;  %v3366_v49 = vld [vmem:[%s12752_s7 + $0x30] sm:$0xff]  ;;  %v3333_v63 = vld [vmem:[%s12751_s6 + $0x28] sm:$0xff] }
 0xb53   :  { %8163 = vmatprep.subr.mxu0 %v12854_v15  ;;  %v3233_v0 = vpop.f32.mrf.mxu1  ;;  %v2933_v3 = vmul.f32 %v8792_v17, %v2886_v25  ;;  %v3250_v54 = vmul.f32 %v8792_v17, %v3203_v9  ;;  %v3243_v25 = vmul.f32 %v8800_v35, %v10067_v34  ;;  %v8803_v34 = vld [vmem:[%s12745_s0 + $0x38] sm:$0xff]  ;;  %v12859_v6 = vld [vmem:[#allocation5_spill] sm:$0xff]  ;;  %v8806_v9 = vld [vmem:[%s12745_s0 + $0x8] sm:$0xff] }
 0xb54   :  { %v3256_v36 = vmul.f32 %v9546_v48, %v3233_v0  ;;  %8164 = vmatpush3.msra.mxu0 %v2939_v60  ;;  %8223 = vmatpush3.msra.mxu1 %v3257_v29  ;;  %v3254_v48 = vmul.f32 %v9552_v28, %v3223_v22  ;;  %v8791_v28 = vld [vmem:[%s12749_s4 + $0x50] sm:$0xff]  ;;  %v3365_v22 = vld [vmem:[%s12752_s7 + $0x28] sm:$0xff]  ;;  %v3332_v19 = vld [vmem:[%s12751_s6 + $0x20] sm:$0xff] }
 0xb55   :  { %8165 = vmatprep.subr.mxu0 %v12854_v15  ;;  %8224 = vmatprep.subr.mxu1 %v12854_v15  ;;  %v3252_v13 = vmul.f32 %v8791_v28, %v3213_v62  ;;  %v3363_v62 = vld [vmem:[%s12752_s7 + $0x18] sm:$0xff]  ;;  %v3334_v29 = vld [vmem:[%s12751_s6 + $0x30] sm:$0xff]  ;;  %v3368_v0 = vld [vmem:[%s12752_s7 + $0x40] sm:$0xff] }
 0xb56   :  { %8166 = vmatpush3.msra.mxu0 %v2938_v53  ;;  %8225 = vmatpush3.msra.mxu1 %v3256_v36  ;;  %v3367_v60 = vld [vmem:[%s12752_s7 + $0x38] sm:$0xff]  ;;  %v3369_v36 = vld [vmem:[%s12752_s7 + $0x48] sm:$0xff]  ;;  %v3374_v17 = vld [vmem:[%s12752_s7 + $0x70] sm:$0xff] }
 0xb57   :  { %8167 = vmatprep.subr.mxu0 %v12854_v15  ;;  %8226 = vmatprep.subr.mxu1 %v12854_v15  ;;  %v3335_v53 = vld [vmem:[%s12751_s6 + $0x38] sm:$0xff]  ;;  %v3373_v28 = vld [vmem:[%s12752_s7 + $0x68] sm:$0xff] }
 0xb58   :  { %8168 = vmatpush3.msra.mxu0 %v2937_v4  ;;  %8227 = vmatpush3.msra.mxu1 %v3255_v51  ;;  %v3336_v4 = vld [vmem:[%s12751_s6 + $0x40] sm:$0xff]  ;;  %v3370_v51 = vld [vmem:[%s12752_s7 + $0x50] sm:$0xff]  ;;  %v3385_v35 = vld [vmem:[%s12752_s7 + $0xc8] sm:$0xff] }
 0xb59   :  { %8169 = vmatprep.subr.mxu0 %v12854_v15  ;;  %8228 = vmatprep.subr.mxu1 %v12854_v15 }
 0xb5a   :  { %8170 = vmatpush3.msra.mxu0 %v2936_v5  ;;  %8229 = vmatpush3.msra.mxu1 %v3254_v48  ;;  %v3337_v5 = vld [vmem:[%s12751_s6 + $0x48] sm:$0xff]  ;;  %v3371_v48 = vld [vmem:[%s12752_s7 + $0x58] sm:$0xff] }
 0xb5b   :  { %8171 = vmatprep.subr.mxu0 %v12854_v15  ;;  %8230 = vmatprep.subr.mxu1 %v12854_v15 }
 0xb5c   :  { %8172 = vmatpush3.msra.mxu0 %v2935_v8  ;;  %8231 = vmatpush3.msra.mxu1 %v3253_v30  ;;  %v3338_v8 = vld [vmem:[%s12751_s6 + $0x50] sm:$0xff]  ;;  %v3372_v30 = vld [vmem:[%s12752_s7 + $0x60] sm:$0xff] }
 0xb5d   :  { %8173 = vmatprep.subr.mxu0 %v12854_v15  ;;  %8232 = vmatprep.subr.mxu1 %v12854_v15 }
 0xb5e   :  { %8174 = vmatpush3.msra.mxu0 %v2934_v61  ;;  %8233 = vmatpush3.msra.mxu1 %v3252_v13  ;;  %v3339_v61 = vld [vmem:[%s12751_s6 + $0x58] sm:$0xff]  ;;  %v3340_v13 = vld [vmem:[%s12751_s6 + $0x60] sm:$0xff] }
 0xb5f   :  { %8175 = vmatprep.subr.mxu0 %v12854_v15  ;;  %8234 = vmatprep.subr.mxu1 %v12854_v15 }
 0xb60   :  { %8176 = vmatpush3.msra.mxu0 %v2933_v3  ;;  %8235 = vmatpush3.msra.mxu1 %v3251_v50  ;;  %v3341_v3 = vld [vmem:[%s12751_s6 + $0x68] sm:$0xff]  ;;  %v3342_v50 = vld [vmem:[%s12751_s6 + $0x70] sm:$0xff] }
 0xb61   :  { %8177 = vmatprep.subr.mxu0 %v12854_v15  ;;  %8236 = vmatprep.subr.mxu1 %v12854_v15 }
 0xb62   :  { %8178 = vmatpush3.msra.mxu0 %v2932_v55  ;;  %8237 = vmatpush3.msra.mxu1 %v3250_v54  ;;  %v3343_v55 = vld [vmem:[%s12751_s6 + $0x78] sm:$0xff]  ;;  %v3377_v54 = vld [vmem:[%s12752_s7 + $0x88] sm:$0xff] }
 0xb63   :  { %8179 = vmatprep.subr.mxu0 %v12854_v15  ;;  %8238 = vmatprep.subr.mxu1 %v12854_v15 }
 0xb64   :  { %8180 = vmatpush3.msra.mxu0 %v2931_v23  ;;  %8239 = vmatpush3.msra.mxu1 %v3249_v32  ;;  %v3378_v23 = vld [vmem:[%s12752_s7 + $0x90] sm:$0xff]  ;;  %v3345_v32 = vld [vmem:[%s12751_s6 + $0x88] sm:$0xff] }
 0xb65   :  { %8181 = vmatprep.subr.mxu0 %v12854_v15  ;;  %8240 = vmatprep.subr.mxu1 %v12854_v15 }
 0xb66   :  { %8182 = vmatpush3.msra.mxu0 %v2930_v44  ;;  %8241 = vmatpush3.msra.mxu1 %v3248_v46  ;;  %v3346_v44 = vld [vmem:[%s12751_s6 + $0x90] sm:$0xff]  ;;  %v3380_v46 = vld [vmem:[%s12752_s7 + $0xa0] sm:$0xff] }
 0xb67   :  { %8183 = vmatprep.subr.mxu0 %v12854_v15  ;;  %8242 = vmatprep.subr.mxu1 %v12854_v15 }
 0xb68   :  { %8184 = vmatpush3.msra.mxu0 %v2929_v59  ;;  %8243 = vmatpush3.msra.mxu1 %v3247_v40  ;;  %v3381_v59 = vld [vmem:[%s12752_s7 + $0xa8] sm:$0xff]  ;;  %v3348_v40 = vld [vmem:[%s12751_s6 + $0xa0] sm:$0xff] }
 0xb69   :  { %8185 = vmatprep.subr.mxu0 %v12854_v15  ;;  %8244 = vmatprep.subr.mxu1 %v12854_v15 }
 0xb6a   :  { %8186 = vmatpush3.msra.mxu0 %v2928_v57  ;;  %8245 = vmatpush3.msra.mxu1 %v3246_v47  ;;  %v3349_v57 = vld [vmem:[%s12751_s6 + $0xa8] sm:$0xff]  ;;  %v3383_v47 = vld [vmem:[%s12752_s7 + $0xb8] sm:$0xff] }
 0xb6b   :  { %8187 = vmatprep.subr.mxu0 %v12854_v15  ;;  %8246 = vmatprep.subr.mxu1 %v12854_v15 }
 0xb6c   :  { %8188 = vmatpush3.msra.mxu0 %v2927_v33  ;;  %8247 = vmatpush3.msra.mxu1 %v3245_v1  ;;  %v3384_v33 = vld [vmem:[%s12752_s7 + $0xc0] sm:$0xff]  ;;  %v3351_v1 = vld [vmem:[%s12751_s6 + $0xb8] sm:$0xff] }
 0xb6d   :  { %8189 = vmatprep.subr.mxu0 %v12854_v15  ;;  %8248 = vmatprep.subr.mxu1 %v12854_v15 }
 0xb6e   :  { %8190 = vmatpush3.msra.mxu0 %v2926_v42  ;;  %8249 = vmatpush3.msra.mxu1 %v3244_v52  ;;  %v3352_v42 = vld [vmem:[%s12751_s6 + $0xc0] sm:$0xff]  ;;  %v3386_v52 = vld [vmem:[%s12752_s7 + $0xd0] sm:$0xff] }
 0xb6f   :  { %8191 = vmatprep.subr.mxu0 %v12854_v15  ;;  %8250 = vmatprep.subr.mxu1 %v12854_v15 }
 0xb70   :  { %8192 = vmatpush3.msra.mxu0 %v2925_v39  ;;  %8251 = vmatpush3.msra.mxu1 %v3243_v25  ;;  %v3387_v39 = vld [vmem:[%s12752_s7 + $0xd8] sm:$0xff]  ;;  %v3354_v25 = vld [vmem:[%s12751_s6 + $0xd0] sm:$0xff] }
 0xb71   :  { %8252 = vmatprep.subr.mxu1 %v12854_v15  ;;  %8257 = vmatprep.subr.mxu0 %v10061_v45  ;;  %v8804_v15 = vld [vmem:[%s12745_s0 + $0x18] sm:$0xff] }
 0xb72   :  { %8194 = vmatmul.mubr.f32.vlgmr.msra.gmra.mxu0 %v8802_v38  ;;  %8253 = vmatpush3.msra.mxu1 %v3242_v14  ;;  %v3388_v14 = vld [vmem:[%s12752_s7 + $0xe0] sm:$0xff]  ;;  %v3355_v38 = vld [vmem:[%s12751_s6 + $0xd8] sm:$0xff] }
 0xb73   :  { %8258 = vmatpush3.msra.mxu0 %v10061_v45  ;;  %8255 = vmatmul.mubr.f32.vlgmr.msra.gmra.mxu1 %v8803_v34  ;;  %v8805_v45 = vld [vmem:[%s12745_s0 + $0x10] sm:$0xff]  ;;  %v3389_v34 = vld [vmem:[%s12752_s7 + $0xe8] sm:$0xff] }
 0xb74   :  { %8259 = vmatprep.subr.mxu0 %v12858_v20  ;;  %8313 = vmatprep.subr.mxu1 %v8804_v15 }
 0xb75   :  { %8260 = vmatpush3.msra.mxu0 %v12858_v20  ;;  %8314 = vmatpush3.msra.mxu1 %v8804_v15  ;;  %v3356_v20 = vld [vmem:[%s12751_s6 + $0xe0] sm:$0xff]  ;;  %v3390_v15 = vld [vmem:[%s12752_s7 + $0xf0] sm:$0xff] }
 0xb76   :  { %8261 = vmatprep.subr.mxu0 %v10059_v43  ;;  %8315 = vmatprep.subr.mxu1 %v8805_v45 }
 0xb77   :  { %8262 = vmatpush3.msra.mxu0 %v10059_v43  ;;  %8316 = vmatpush3.msra.mxu1 %v8805_v45  ;;  %v3362_v43 = vld [vmem:[%s12752_s7 + $0x10] sm:$0xff]  ;;  %v3357_v45 = vld [vmem:[%s12751_s6 + $0xe8] sm:$0xff] }
 0xb78   :  { %8263 = vmatprep.subr.mxu0 %v12859_v6  ;;  %8317 = vmatprep.subr.mxu1 %v8806_v9 }
 0xb79   :  { %8264 = vmatpush3.msra.mxu0 %v12859_v6  ;;  %8265 = vmatprep.mubr.msk.f32.mxu0 %vm97_vm0, %v3360_v31  ;;  %v3391_v31 = vld [vmem:[%s12752_s7 + $0xf8] sm:$0xff] }
 0xb7a   :  { %8318 = vmatpush3.msra.mxu1 %v8806_v9  ;;  %8266 = vmatmul.mubr.msk.f32.vlgmr.msra.gmra.mxu0 %vm97_vm0, %v3361_v56  ;;  %v3358_v56 = vld [vmem:[%s12751_s6 + $0xf0] sm:$0xff]  ;;  %v3359_v6 = vld [vmem:[%s12751_s6 + $0xf8] sm:$0xff]  ;;  %v10473_v9 = vpop.permute.xlu1 %4163 }
 0xb7b   :  { %8319 = vmatprep.subr.mxu1 %v8807_v12  ;;  %8321 = vmatprep.mubr.msk.f32.mxu1 %vm97_vm0, %v10217_v2  ;;  %12860 = vst [vmem:[#allocation9_spill] sm:$0xff] %v10473_v9 }
 0xb7c   :  { %8320 = vmatpush3.msra.mxu1 %v8807_v12  ;;  %8268 = vmatprep.mubr.msk.f32.mxu0 %vm97_vm0, %v3362_v43 }
 0xb7d   :  { %8322 = vmatmul.mubr.msk.f32.vlgmr.msra.gmra.mxu1 %vm97_vm0, %v3329_v11 }
 0xb7e   :  { %8269 = vmatmul.mubr.msk.f32.gmra.mxu0 %vm97_vm0, %v3363_v62  ;;  %8324 = vmatprep.mubr.msk.f32.mxu1 %vm97_vm0, %v3330_v10  ;;  %v10475_v43 = vpop.permute.xlu1 %4158 }
 0xb7f   :  { %8271 = vmatprep.mubr.msk.f32.mxu0 %vm97_vm0, %v3364_v7  ;;  %12861 = vst [vmem:[#allocation11_spill] sm:$0xff] %v10475_v43 }
 0xb81   :  { %8325 = vmatmul.mubr.msk.f32.gmra.mxu1 %vm97_vm0, %v3331_v27 }
 0xb82   :  { %8272 = vmatmul.mubr.msk.f32.gmra.mxu0 %vm97_vm0, %v3365_v22  ;;  %8327 = vmatprep.mubr.msk.f32.mxu1 %vm97_vm0, %v3332_v19  ;;  %v10477_v11 = vpop.permute.xlu1 %4153 }
 0xb83   :  { %8274 = vmatprep.mubr.msk.f32.mxu0 %vm97_vm0, %v3366_v49  ;;  %12862 = vst [vmem:[#allocation10_spill] sm:$0xff] %v10477_v11 }
 0xb85   :  { %8328 = vmatmul.mubr.msk.f32.gmra.mxu1 %vm97_vm0, %v3333_v63 }
 0xb86   :  { %8275 = vmatmul.mubr.msk.f32.gmra.mxu0 %vm97_vm0, %v3367_v60  ;;  %8330 = vmatprep.mubr.msk.f32.mxu1 %vm97_vm0, %v3334_v29  ;;  %v10479_v12 = vpop.permute.xlu1 %4148 }
 0xb87   :  { %8277 = vmatprep.mubr.msk.f32.mxu0 %vm97_vm0, %v3368_v0  ;;  %12863 = vst [vmem:[#allocation7_spill] sm:$0xff] %v10479_v12 }
 0xb89   :  { %8331 = vmatmul.mubr.msk.f32.gmra.mxu1 %vm97_vm0, %v3335_v53 }
 0xb8a   :  { %8278 = vmatmul.mubr.msk.f32.gmra.mxu0 %vm97_vm0, %v3369_v36  ;;  %8333 = vmatprep.mubr.msk.f32.mxu1 %vm97_vm0, %v3336_v4  ;;  %v10481_v62 = vpop.permute.xlu1 %4143 }
 0xb8b   :  { %8280 = vmatprep.mubr.msk.f32.mxu0 %vm97_vm0, %v3370_v51  ;;  %12864 = vst [vmem:[#allocation5_spill] sm:$0xff] %v10481_v62 }
 0xb8d   :  { %8334 = vmatmul.mubr.msk.f32.gmra.mxu1 %vm97_vm0, %v3337_v5 }
 0xb8e   :  { %8281 = vmatmul.mubr.msk.f32.gmra.mxu0 %vm97_vm0, %v3371_v48  ;;  %8336 = vmatprep.mubr.msk.f32.mxu1 %vm97_vm0, %v3338_v8  ;;  %v10483_v10 = vpop.permute.xlu1 %4138 }
 0xb8f   :  { %8283 = vmatprep.mubr.msk.f32.mxu0 %vm97_vm0, %v3372_v30  ;;  %12865 = vst [vmem:[#allocation12_spill] sm:$0xff] %v10483_v10 }
 0xb91   :  { %8337 = vmatmul.mubr.msk.f32.gmra.mxu1 %vm97_vm0, %v3339_v61 }
 0xb92   :  { %8284 = vmatmul.mubr.msk.f32.gmra.mxu0 %vm97_vm0, %v3373_v28  ;;  %8339 = vmatprep.mubr.msk.f32.mxu1 %vm97_vm0, %v3340_v13  ;;  %v10485_v7 = vpop.permute.xlu1 %4133 }
 0xb93   :  { %8286 = vmatprep.mubr.msk.f32.mxu0 %vm97_vm0, %v3374_v17  ;;  %12866 = vst [vmem:[#allocation13_spill] sm:$0xff] %v10485_v7 }
 0xb95   :  { %8340 = vmatmul.mubr.msk.f32.gmra.mxu1 %vm97_vm0, %v3341_v3 }
 0xb96   :  { %8287 = vmatmul.mubr.msk.f32.gmra.mxu0 %vm97_vm0, %v3375_v21  ;;  %8342 = vmatprep.mubr.msk.f32.mxu1 %vm97_vm0, %v3342_v50  ;;  %v10487_v27 = vpop.permute.xlu1 %4128 }
 0xb97   :  { %8289 = vmatprep.mubr.msk.f32.mxu0 %vm97_vm0, %v3376_v18  ;;  %12867 = vst [vmem:[#allocation14_spill] sm:$0xff] %v10487_v27 }
 0xb99   :  { %8343 = vmatmul.mubr.msk.f32.gmra.mxu1 %vm97_vm0, %v3343_v55 }
 0xb9a   :  { %8290 = vmatmul.mubr.msk.f32.gmra.mxu0 %vm97_vm0, %v3377_v54  ;;  %8345 = vmatprep.mubr.msk.f32.mxu1 %vm97_vm0, %v3344_v16  ;;  %v10489_v22 = vpop.permute.xlu1 %4123 }
 0xb9b   :  { %8292 = vmatprep.mubr.msk.f32.mxu0 %vm97_vm0, %v3378_v23  ;;  %12868 = vst [vmem:[#allocation15_spill] sm:$0xff] %v10489_v22 }
 0xb9d   :  { %8346 = vmatmul.mubr.msk.f32.gmra.mxu1 %vm97_vm0, %v3345_v32 }
 0xb9e   :  { %8293 = vmatmul.mubr.msk.f32.gmra.mxu0 %vm97_vm0, %v3379_v41  ;;  %8348 = vmatprep.mubr.msk.f32.mxu1 %vm97_vm0, %v3346_v44  ;;  %v10491_v19 = vpop.permute.xlu1 %4118 }
 0xb9f   :  { %8295 = vmatprep.mubr.msk.f32.mxu0 %vm97_vm0, %v3380_v46  ;;  %12869 = vst [vmem:[#allocation16_spill] sm:$0xff] %v10491_v19 }
 0xba1   :  { %8349 = vmatmul.mubr.msk.f32.gmra.mxu1 %vm97_vm0, %v3347_v24 }
 0xba2   :  { %8296 = vmatmul.mubr.msk.f32.gmra.mxu0 %vm97_vm0, %v3381_v59  ;;  %8351 = vmatprep.mubr.msk.f32.mxu1 %vm97_vm0, %v3348_v40 }
 0xba3   :  { %8298 = vmatprep.mubr.msk.f32.mxu0 %vm97_vm0, %v3382_v26 }
 0xba5   :  { %8352 = vmatmul.mubr.msk.f32.gmra.mxu1 %vm97_vm0, %v3349_v57 }
 0xba6   :  { %8299 = vmatmul.mubr.msk.f32.gmra.mxu0 %vm97_vm0, %v3383_v47  ;;  %8354 = vmatprep.mubr.msk.f32.mxu1 %vm97_vm0, %v3350_v58 }
 0xba7   :  { %8301 = vmatprep.mubr.msk.f32.mxu0 %vm97_vm0, %v3384_v33 }
 0xba9   :  { %8355 = vmatmul.mubr.msk.f32.gmra.mxu1 %vm97_vm0, %v3351_v1 }
 0xbaa   :  { %8302 = vmatmul.mubr.msk.f32.gmra.mxu0 %vm97_vm0, %v3385_v35  ;;  %8357 = vmatprep.mubr.msk.f32.mxu1 %vm97_vm0, %v3352_v42 }
 0xbab   :  { %8304 = vmatprep.mubr.msk.f32.mxu0 %vm97_vm0, %v3386_v52 }
 0xbad   :  { %8358 = vmatmul.mubr.msk.f32.gmra.mxu1 %vm97_vm0, %v3353_v37 }
 0xbae   :  { %8305 = vmatmul.mubr.msk.f32.gmra.mxu0 %vm97_vm0, %v3387_v39  ;;  %8360 = vmatprep.mubr.msk.f32.mxu1 %vm97_vm0, %v3354_v25 }
 0xbaf   :  { %8307 = vmatprep.mubr.msk.f32.mxu0 %vm97_vm0, %v3388_v14 }
 0xbb1   :  { %8361 = vmatmul.mubr.msk.f32.gmra.mxu1 %vm97_vm0, %v3355_v38 }
 0xbb2   :  { %8308 = vmatmul.mubr.msk.f32.gmra.mxu0 %vm97_vm0, %v3389_v34  ;;  %8363 = vmatprep.mubr.msk.f32.mxu1 %vm97_vm0, %v3356_v20 }
 0xbb3   :  { %8310 = vmatprep.mubr.msk.f32.mxu0 %vm97_vm0, %v3390_v15 }
 0xbb5   :  { %8364 = vmatmul.mubr.msk.f32.gmra.mxu1 %vm97_vm0, %v3357_v45 }
 0xbb6   :  { %8311 = vmatmul.mubr.msk.f32.gmra.mxu0 %vm97_vm0, %v3391_v31  ;;  %8366 = vmatprep.mubr.msk.f32.mxu1 %vm97_vm0, %v3358_v56 }
 0xbb9   :  { %8367 = vmatmul.mubr.msk.f32.gmra.mxu1 %vm97_vm0, %v3359_v6  ;;  %v10546_v6 = vpop.permute.xlu0 %4243 }
 0xbba   :  { %8433 = vmatprep.mubr.msk.f32.mxu1 %vm97_vm0, %v10217_v2  ;;  %v10493_v2 = vpop.permute.xlu1 %4113  ;;  %12880 = vst [vmem:[#allocation27_spill] sm:$0xff] %v10546_v6 }
 0xbbb   :  { %12870 = vst [vmem:[#allocation17_spill] sm:$0xff] %v10493_v2 }
 0xbbe   :  { %v10495_v49 = vpop.permute.xlu1 %4108 }
 0xbbf   :  { %12871 = vst [vmem:[#allocation18_spill] sm:$0xff] %v10495_v49 }
 0xbc2   :  { %v10497_v63 = vpop.permute.xlu1 %4103 }
 0xbc3   :  { %12872 = vst [vmem:[#allocation19_spill] sm:$0xff] %v10497_v63 }
 0xbc6   :  { %v10503_v53 = vpop.permute.xlu1 %4098 }
 0xbc7   :  { %12875 = vst [vmem:[#allocation22_spill] sm:$0xff] %v10503_v53 }
 0xbca   :  { %v10505_v51 = vpop.permute.xlu1 %4093 }
 0xbcb   :  { %12876 = vst [vmem:[#allocation23_spill] sm:$0xff] %v10505_v51 }
 0xbce   :  { %v10510_v3 = vpop.permute.xlu1 %4088 }
 0xbcf   :  { %12878 = vst [vmem:[#allocation25_spill] sm:$0xff] %v10510_v3 }
 0xc32   :  { %v10499_v60 = vpop.f32.mrf.mxu0 }
 0xc33   :  { %12873 = vst [vmem:[#allocation20_spill] sm:$0xff] %v10499_v60  ;;  %v10501_v29 = vpop.f32.mrf.mxu1 }
 0xc34   :  { %12874 = vst [vmem:[#allocation21_spill] sm:$0xff] %v10501_v29  ;;  %v8195_v0 = vpop.f32.mrf.mxu0 }
 0xc35   :  { %v8256_v36 = vpop.f32.mrf.mxu1 }
 0xc3a   :  { %v8267_v4 = vpop.f32.mrf.mxu0 }
 0xc3c   :  { %v3606_v5 = vpop.f32.mrf.mxu0 }
 0xc3d   :  { %v8323_v48 = vpop.f32.mrf.mxu1 }
 0xc3e   :  { %v3933_v8 = vadd.f32 %v8323_v48, %v8267_v4  ;;  %v8270_v30 = vpop.f32.mrf.mxu0 }
 0xc3f   :  { %v3927_v61 = vpop.f32.mrf.mxu1 }
 0xc40   :  { %v10508_v28 = vadd.f32 %v10505_v51, %v3933_v8  ;;  %v3928_v13 = vadd.f32 %v3927_v61, %v3606_v5  ;;  %v3616_v17 = vpop.f32.mrf.mxu0 }
 0xc41   :  { %v8326_v21 = vpop.f32.mrf.mxu1 }
 0xc42   :  { %12877 = vst [vmem:[#allocation24_spill] sm:$0xff] %v10508_v28  ;;  %v10513_v50 = vmul.f32 0.70710677, %v10508_v28  ;;  %v10516_v18 = vadd.f32 %v10510_v3, %v3928_v13  ;;  %v3943_v55 = vadd.f32 %v8326_v21, %v8270_v30  ;;  %v8273_v54 = vpop.f32.mrf.mxu0  ;;  %v10570_v21 = vpop.permute.xlu0 %4238 }
 0xc43   :  { %v3937_v16 = vpop.f32.mrf.mxu1  ;;  %12881 = vst [vmem:[#allocation28_spill] sm:$0xff] %v10570_v21 }
 0xc44   :  { %12879 = vst [vmem:[#allocation26_spill] sm:$0xff] %v10516_v18  ;;  %v10519_v23 = vand.u32 2147483647, %v10513_v50  ;;  %v10522_v32 = vmul.f32 0.70710677, %v10516_v18  ;;  %v10525_v41 = vadd.f32 %v10497_v63, %v3943_v55  ;;  %v3938_v44 = vadd.f32 %v3937_v16, %v3616_v17  ;;  %v3626_v57 = vpop.f32.mrf.mxu0 }
 0xc45   :  { %v8329_v46 = vpop.f32.mrf.mxu1  ;;  %vm4343_vm5 = vcmp.ge.f32.partialorder %v10513_v50, 0.0  ;;  %v12765_v50 = vmov -1.0  }
 0xc46   :  { %v4439_v24 = vmul.f32 0.3275911, %v10519_v23  ;;  %v4406_v59 = vand.u32 2147483647, %v10522_v32  ;;  %v10530_v40 = vmul.f32 0.70710677, %v10525_v41  ;;  %v10533_v26 = vadd.f32 %v10503_v53, %v3938_v44  ;;  %v8276_v39 = vpop.f32.mrf.mxu0 }
 0xc47   :  { %v3947_v47 = vpop.f32.mrf.mxu1  ;;  %v3953_v38 = vadd.f32 %v8329_v46, %v8273_v54  ;;  %v4855_v44 = vsub.f32 0.0, %v10519_v23  ;;  %vm4342_vm6 = vcmp.ge.f32.partialorder %v10522_v32, 0.0 }
 0xc48   :  { %v4471_v58 = vadd.f32 1.0, %v4439_v24  ;;  %v4438_v33 = vmul.f32 0.3275911, %v4406_v59  ;;  %v4409_v1 = vand.u32 2147483647, %v10530_v40  ;;  %v3948_v15 = vadd.f32 %v3947_v47, %v3626_v57  ;;  %v3636_v31 = vpop.f32.mrf.mxu0 }
 0xc49   :  { %v10537_v35 = vmul.f32 0.70710677, %v10533_v26  ;;  %v8332_v42 = vpop.f32.mrf.mxu1  ;;  %v10544_v45 = vadd.f32 %v10493_v2, %v3953_v38  ;;  %vm4345_vm7 = vcmp.ge.f32.partialorder %v10530_v40, 0.0 }
 0xc4a   :  { %v4470_v52 = vadd.f32 1.0, %v4438_v33  ;;  %8514 = vrcp.f32 %v4471_v58  ;;  %v4441_v37 = vmul.f32 0.3275911, %v4409_v1  ;;  %v3963_v56 = vadd.f32 %v8332_v42, %v8276_v39  ;;  %v8279_v33 = vpop.f32.mrf.mxu0 }
 0xc4b   :  { %v10540_v25 = vand.u32 2147483647, %v10537_v35  ;;  %v3957_v34 = vpop.f32.mrf.mxu1  ;;  %v10549_v36 = vadd.f32 %v10495_v49, %v3948_v15  ;;  %v10552_v5 = vmul.f32 0.70710677, %v10544_v45  ;;  %v4854_v42 = vsub.f32 0.0, %v4406_v59 }
 0xc4c   :  { %v4473_v14 = vadd.f32 1.0, %v4441_v37  ;;  %8516 = vrcp.f32 %v4470_v52  ;;  %v3958_v4 = vadd.f32 %v3957_v34, %v3636_v31  ;;  %v10555_v48 = vadd.f32 %v10489_v22, %v3963_v56  ;;  %v10593_v31 = vpop.permute.xlu0 %4233  ;;  %v3646_v60 = vpop.f32.mrf.mxu0 }
 0xc4d   :  { %v4440_v20 = vmul.f32 0.3275911, %v10540_v25  ;;  %v10558_v8 = vmul.f32 0.70710677, %v10549_v36  ;;  %v10561_v30 = vand.u32 2147483647, %v10552_v5  ;;  %v8335_v16 = vpop.f32.mrf.mxu1  ;;  %v4887_v34 = vmul.f32 %v4855_v44, %v10519_v23 }
 0xc4e   :  { %8518 = vrcp.f32 %v4473_v14  ;;  %v10564_v61 = vmul.f32 0.70710677, %v10555_v48  ;;  %v10578_v24 = vadd.f32 %v10491_v19, %v3958_v4  ;;  %v3973_v52 = vadd.f32 %v8335_v16, %v8279_v33  ;;  %12882 = vst [vmem:[#allocation29_spill] sm:$0xff] %v10593_v31 }
 0xc4f   :  { %v4472_v0 = vadd.f32 1.0, %v4440_v20  ;;  %v10567_v13 = vand.u32 2147483647, %v10558_v8  ;;  %v4443_v17 = vmul.f32 0.3275911, %v10561_v30  ;;  %v4857_v37 = vsub.f32 0.0, %v4409_v1 }
 0xc50   :  { %v10574_v54 = vand.u32 2147483647, %v10564_v61  ;;  %v10589_v20 = vmul.f32 0.70710677, %v10578_v24  ;;  %v4886_v56 = vmul.f32 %v4854_v42, %v4406_v59  ;;  %v10598_v4 = vadd.f32 %v10485_v7, %v3973_v52 }
 0xc51   :  { %8520 = vrcp.f32 %v4472_v0  ;;  %v4442_v55 = vmul.f32 0.3275911, %v10567_v13  ;;  %v4475_v46 = vadd.f32 1.0, %v4443_v17  ;;  %v10601_v17 = vsel %vm4343_vm5, 1.0, %v12765_v50 }
 0xc52   :  { %v4445_v58 = vmul.f32 0.3275911, %v10574_v54  ;;  %v4889_v23 = vmul.f32 %v4857_v37, %v4409_v1  ;;  %v10605_v16 = vand.u32 2147483647, %v10589_v20  ;;  %v10609_v59 = vsel %vm4342_vm6, 1.0, %v12765_v50  ;;  %v10621_v37 = vpop.permute.xlu0 %4228 }
 0xc53   :  { %v4474_v47 = vadd.f32 1.0, %v4442_v55  ;;  %8522 = vrcp.f32 %v4475_v46  ;;  %v4856_v55 = vsub.f32 0.0, %v10540_v25  ;;  %v4920_v46 = vmul.f32 1.442695, %v4887_v34  ;;  %12883 = vst [vmem:[#allocation30_spill] sm:$0xff] %v10609_v59  ;;  %12885 = vst [vmem:[#allocation32_spill] sm:$0xff] %v10621_v37 }
 0xc54   :  { %v4477_v39 = vadd.f32 1.0, %v4445_v58  ;;  %v4444_v58 = vmul.f32 0.3275911, %v10605_v16  ;;  %v4918_v33 = vmul.f32 1.442695, %v4886_v56  ;;  %vm4344_vm8 = vcmp.ge.f32.partialorder %v10537_v35, 0.0 }
 0xc55   :  { %8524 = vrcp.f32 %v4474_v47  ;;  %v10612_v47 = vmul.f32 0.5, %v10525_v41  ;;  %v10619_v52 = vmul.f32 0.70710677, %v10598_v4  ;;  %v12886_v56 = vmov -1.0  }
 0xc56   :  { %8526 = vrcp.f32 %v4477_v39  ;;  %v4924_v39 = vmul.f32 1.442695, %v4889_v23  ;;  %v4476_v41 = vadd.f32 1.0, %v4444_v58  ;;  %v10633_v7 = vmul.f32 0.5, %v10533_v26  ;;  %v10651_v22 = vpop.permute.xlu0 %4223 }
 0xc57   :  { %v10580_v57 = vpop.eup %8514  ;;  %12884 = vst [vmem:[#allocation31_spill] sm:$0xff] %v10612_v47  ;;  %8528 = vpow2.f32 %v4920_v46  ;;  %v10627_v50 = vand.u32 2147483647, %v10619_v52  ;;  %v4859_v26 = vsub.f32 0.0, %v10561_v30  ;;  %12888 = vst [vmem:[#allocation34_spill] sm:$0xff] %v10651_v22  ;;  %vm4347_vm9 = vcmp.ge.f32.partialorder %v10552_v5, 0.0 }
 0xc58   :  { %v4567_v38 = vmul.f32 1.0614054, %v10580_v57  ;;  %12887 = vst [vmem:[#allocation33_spill] sm:$0xff] %v10633_v7  ;;  %8530 = vrcp.f32 %v4476_v41  ;;  %v4858_v53 = vsub.f32 0.0, %v10567_v13  ;;  %v4861_v3 = vsub.f32 0.0, %v10574_v54 }
 0xc59   :  { %v10583_v14 = vpop.eup %8516  ;;  %8532 = vpow2.f32 %v4918_v33  ;;  %vm4346_vm10 = vcmp.ge.f32.partialorder %v10558_v8, 0.0  ;;  %vm4349_vm11 = vcmp.ge.f32.partialorder %v10564_v61, 0.0  ;;  %vm4348_vm12 = vcmp.ge.f32.partialorder %v10589_v20, 0.0 }
 0xc5a   :  { %v4599_v44 = vadd.f32 -1.4531521, %v4567_v38  ;;  %v4566_v32 = vmul.f32 1.0614054, %v10583_v14  ;;  %v4888_v38 = vmul.f32 %v4856_v55, %v10540_v25  ;;  %v10638_v25 = vsel %vm4344_vm8, 1.0, %v12886_v56  ;;  %v10673_v7 = vpop.permute.xlu0 %4218 }
 0xc5b   :  { %v10591_v15 = vpop.eup %8518  ;;  %v4447_v55 = vmul.f32 0.3275911, %v10627_v50  ;;  %8534 = vpow2.f32 %v4924_v39  ;;  %v10655_v39 = vmul.f32 0.5, %v10549_v36  ;;  %12890 = vst [vmem:[#allocation36_spill] sm:$0xff] %v10673_v7  ;;  %vm4351_vm13 = vcmp.ge.f32.partialorder %v10619_v52, 0.0 }
 0xc5c   :  { %v4569_v0 = vmul.f32 1.0614054, %v10591_v15  ;;  %v4631_v34 = vmul.f32 %v10580_v57, %v4599_v44  ;;  %v4598_v40 = vadd.f32 -1.4531521, %v4566_v32  ;;  %v4922_v46 = vmul.f32 1.442695, %v4888_v38 }
 0xc5d   :  { %v10644_v32 = vmul.f32 0.5, %v10544_v45  ;;  %v4479_v19 = vadd.f32 1.0, %v4447_v55  ;;  %12889 = vst [vmem:[#allocation35_spill] sm:$0xff] %v10655_v39  ;;  %v4891_v55 = vmul.f32 %v4859_v26, %v10561_v30  ;;  %v8282_v39 = vpop.f32.mrf.mxu0 }
 0xc5e   :  { %v10616_v1 = vpop.eup %8520  ;;  %v4601_v42 = vadd.f32 -1.4531521, %v4569_v0  ;;  %v10630_v0 = vsel %vm4345_vm7, 1.0, %v12886_v56  ;;  %v4663_v41 = vadd.f32 1.4214138, %v4631_v34  ;;  %v4630_v33 = vmul.f32 %v10583_v14, %v4598_v40  ;;  %v3967_v34 = vpop.f32.mrf.mxu1 }
 0xc5f   :  { %v4568_v23 = vmul.f32 1.0614054, %v10616_v1  ;;  %8536 = vrcp.f32 %v4479_v19  ;;  %v3968_v30 = vadd.f32 %v3967_v34, %v3646_v60  ;;  %v4893_v60 = vmul.f32 %v4861_v3, %v10574_v54 }
 0xc60   :  { %v4633_v35 = vmul.f32 %v10591_v15, %v4601_v42  ;;  %v10641_v44 = vpop.eup %8522  ;;  %v4695_v36 = vmul.f32 %v10580_v57, %v4663_v41  ;;  %v4662_v51 = vadd.f32 1.4214138, %v4630_v33  ;;  %8538 = vpow2.f32 %v4922_v46 }
 0xc61   :  { %v4571_v42 = vmul.f32 1.0614054, %v10641_v44  ;;  %v4600_v49 = vadd.f32 -1.4531521, %v4568_v23  ;;  %v10663_v23 = vmul.f32 0.5, %v10555_v48 }
 0xc62   :  { %v10647_v58 = vpop.eup %8524  ;;  %v4665_v38 = vadd.f32 1.4214138, %v4633_v35  ;;  %v4928_v41 = vmul.f32 1.442695, %v4891_v55  ;;  %v4727_v33 = vadd.f32 -0.28449672, %v4695_v36 }
 0xc63   :  { %v4570_v45 = vmul.f32 1.0614054, %v10647_v58  ;;  %v4603_v2 = vadd.f32 -1.4531521, %v4571_v42  ;;  %v10659_v40 = vpop.eup %8526  ;;  %v4632_v19 = vmul.f32 %v10616_v1, %v4600_v49  ;;  %v4694_v49 = vmul.f32 %v10583_v14, %v4662_v51 }
 0xc64   :  { %v4573_v42 = vmul.f32 1.0614054, %v10659_v40  ;;  %v4697_v26 = vmul.f32 %v10591_v15, %v4665_v38  ;;  %v10680_v46 = vpop.eup %8528  ;;  %v10703_v55 = vmul.f32 0.5, %v10578_v24  ;;  %8540 = vpow2.f32 %v4928_v41 }
 0xc65   :  { %v4602_v63 = vadd.f32 -1.4531521, %v4570_v45  ;;  %v4635_v35 = vmul.f32 %v10641_v44, %v4603_v2  ;;  %v4890_v45 = vmul.f32 %v4858_v53, %v10567_v13  ;;  %v4664_v38 = vadd.f32 1.4214138, %v4632_v19  ;;  %v10691_v61 = vpop.eup %8530 }
 0xc66   :  { %v4605_v18 = vadd.f32 -1.4531521, %v4573_v42  ;;  %v10685_v53 = vsel %vm4347_vm9, 1.0, %v12886_v56  ;;  %v4729_v51 = vadd.f32 -0.28449672, %v4697_v26  ;;  %v10697_v13 = vsel %vm4349_vm11, 1.0, %v12886_v56  ;;  %v10699_v54 = vpop.eup %8532  ;;  %v10709_v26 = vpop.permute.xlu0 %4213 }
 0xc67   :  { %v4634_v29 = vmul.f32 %v10647_v58, %v4602_v63  ;;  %v4667_v48 = vadd.f32 1.4214138, %v4635_v35  ;;  %v4926_v3 = vmul.f32 1.442695, %v4890_v45  ;;  %12891 = vst [vmem:[#allocation37_spill] sm:$0xff] %v10703_v55  ;;  %v4759_v42 = vmul.f32 %v10580_v57, %v4727_v33  ;;  %12892 = vst [vmem:[#allocation38_spill] sm:$0xff] %v10709_v26 }
 0xc68   :  { %v4637_v63 = vmul.f32 %v10659_v40, %v4605_v18  ;;  %v10694_v18 = vsel %vm4346_vm10, 1.0, %v12886_v56  ;;  %v4572_v36 = vmul.f32 1.0614054, %v10691_v61  ;;  %v10706_v35 = vpop.eup %8534  ;;  %v4726_v19 = vadd.f32 -0.28449672, %v4694_v49 }
 0xc69   :  { %v4666_v2 = vadd.f32 1.4214138, %v4634_v29  ;;  %v4699_v8 = vmul.f32 %v10641_v44, %v4667_v48  ;;  %v10689_v29 = vadd.f32 %v10487_v27, %v3968_v30  ;;  %v4932_v30 = vmul.f32 1.442695, %v4893_v60 }
 0xc6a   :  { %v4669_v34 = vadd.f32 1.4214138, %v4637_v63  ;;  %v4696_v48 = vmul.f32 %v10616_v1, %v4664_v38  ;;  %v4604_v27 = vadd.f32 -1.4531521, %v4572_v36  ;;  %v4761_v24 = vmul.f32 %v10591_v15, %v4729_v51 }
 0xc6b   :  { %v4698_v5 = vmul.f32 %v10647_v58, %v4666_v2  ;;  %v4731_v45 = vadd.f32 -0.28449672, %v4699_v8  ;;  %v10713_v2 = vmul.f32 0.70710677, %v10689_v29  ;;  %8542 = vpow2.f32 %v4926_v3  ;;  %v8338_v8 = vpop.f32.mrf.mxu1 }
 0xc6c   :  { %v10718_v63 = vmul.f32 0.5, %v10598_v4  ;;  %v10720_v33 = vpop.eup %8536  ;;  %v4701_v49 = vmul.f32 %v10659_v40, %v4669_v34  ;;  %v4636_v60 = vmul.f32 %v10691_v61, %v4604_v27  ;;  %v4860_v38 = vsub.f32 0.0, %v10605_v16 }
 0xc6d   :  { %v4730_v41 = vadd.f32 -0.28449672, %v4698_v5  ;;  %v4791_v36 = vadd.f32 0.2548296, %v4759_v42  ;;  %8544 = vpow2.f32 %v4932_v30  ;;  %v4575_v51 = vmul.f32 1.0614054, %v10720_v33  ;;  %v10732_v34 = vpop.eup %8538  ;;  %v10734_v30 = vpop.permute.xlu0 %4208 }
 0xc6e   :  { %v4863_v3 = vsub.f32 0.0, %v10627_v50  ;;  %v4758_v28 = vmul.f32 %v10583_v14, %v4726_v19  ;;  %v4728_v4 = vadd.f32 -0.28449672, %v4696_v48  ;;  %v4763_v47 = vmul.f32 %v10641_v44, %v4731_v45  ;;  %12893 = vst [vmem:[#allocation39_spill] sm:$0xff] %v10734_v30 }
 0xc6f   :  { %v10730_v5 = vand.u32 2147483647, %v10713_v2  ;;  %v4793_v27 = vadd.f32 0.2548296, %v4761_v24  ;;  %v4668_v59 = vadd.f32 1.4214138, %v4636_v60  ;;  %v3983_v42 = vadd.f32 %v8338_v8, %v8282_v39 }
 0xc70   :  { %v4607_v55 = vadd.f32 -1.4531521, %v4575_v51  ;;  %v4762_v21 = vmul.f32 %v10647_v58, %v4730_v41  ;;  %v4733_v6 = vadd.f32 -0.28449672, %v4701_v49  ;;  %v4892_v19 = vmul.f32 %v4860_v38, %v10605_v16  ;;  %v3977_v41 = vpop.f32.mrf.mxu1 }
 0xc71   :  { %v4446_v48 = vmul.f32 0.3275911, %v10730_v5  ;;  %v4823_v45 = vmul.f32 %v10580_v57, %v4791_v36  ;;  %v4895_v24 = vmul.f32 %v4863_v3, %v10627_v50  ;;  %v4760_v60 = vmul.f32 %v10616_v1, %v4728_v4  ;;  %v3656_v50 = vpop.f32.mrf.mxu0 }
 0xc72   :  { %v4639_v37 = vmul.f32 %v10720_v33, %v4607_v55  ;;  %v4795_v39 = vadd.f32 0.2548296, %v4763_v47  ;;  %v10745_v51 = vadd.f32 %v10481_v62, %v3983_v42  ;;  %v4790_v49 = vadd.f32 0.2548296, %v4758_v28  ;;  %v8341_v42 = vpop.f32.mrf.mxu1 }
 0xc73   :  { %v4478_v8 = vadd.f32 1.0, %v4446_v48  ;;  %v4825_v16 = vmul.f32 %v10591_v15, %v4793_v27  ;;  %v4700_v38 = vmul.f32 %v10691_v61, %v4668_v59  ;;  %v4794_v36 = vadd.f32 0.2548296, %v4762_v21  ;;  %v8541_v15 = vpop.eup %8540  ;;  %v10757_v27 = vpop.permute.xlu0 %4203 }
 0xc74   :  { %v4671_v57 = vadd.f32 1.4214138, %v4639_v37  ;;  %v4765_v31 = vmul.f32 %v10659_v40, %v4733_v6  ;;  %v4930_v55 = vmul.f32 1.442695, %v4892_v19  ;;  %v4983_v3 = vmul.f32 %v10680_v46, %v4823_v45  ;;  %12894 = vst [vmem:[#allocation40_spill] sm:$0xff] %v10757_v27 }
 0xc75   :  { %8546 = vrcp.f32 %v4478_v8  ;;  %v10754_v47 = vsel %vm4348_vm12, 1.0, %v12886_v56  ;;  %v4936_v4 = vmul.f32 1.442695, %v4895_v24  ;;  %v4792_v59 = vadd.f32 0.2548296, %v4760_v60 }
 0xc76   :  { %v4703_v28 = vmul.f32 %v10720_v33, %v4671_v57  ;;  %v4827_v21 = vmul.f32 %v10641_v44, %v4795_v39  ;;  %v10761_v6 = vmul.f32 0.70710677, %v10745_v51  ;;  %v3978_v37 = vadd.f32 %v3977_v41, %v3656_v50  ;;  %v8285_v39 = vpop.f32.mrf.mxu0 }
 0xc77   :  { %v4822_v46 = vmul.f32 %v10583_v14, %v4790_v49  ;;  %v4985_v20 = vmul.f32 %v10706_v35, %v4825_v16  ;;  %v4732_v19 = vadd.f32 -0.28449672, %v4700_v38  ;;  %v10768_v48 = vsel %vm4351_vm13, 1.0, %v12886_v56  ;;  %v10786_v50 = vpop.permute.xlu0 %4198 }
 0xc78   :  { %v8543_v45 = vpop.eup %8542  ;;  %v4826_v24 = vmul.f32 %v10647_v58, %v4794_v36  ;;  %v4797_v60 = vadd.f32 0.2548296, %v4765_v31  ;;  %8548 = vpow2.f32 %v4930_v55  ;;  %v10772_v44 = vand.u32 2147483647, %v10761_v6  ;;  %v3987_v58 = vpop.f32.mrf.mxu1  ;;  %12896 = vst [vmem:[#allocation42_spill] sm:$0xff] %v10786_v50 }
 0xc79   :  { %v5015_v8 = vsub.f32 1.0, %v4983_v3  ;;  %v4735_v41 = vadd.f32 -0.28449672, %v4703_v28  ;;  %8550 = vpow2.f32 %v4936_v4  ;;  %v10775_v14 = vadd.f32 %v10483_v10, %v3978_v37  ;;  %v3666_v4 = vpop.f32.mrf.mxu0 }
 0xc7a   :  { %v8545_v35 = vpop.eup %8544  ;;  %v4824_v52 = vmul.f32 %v10616_v1, %v4792_v59  ;;  %v4987_v49 = vmul.f32 %v8541_v15, %v4827_v21  ;;  %v4449_v16 = vmul.f32 0.3275911, %v10772_v44  ;;  %v3993_v38 = vadd.f32 %v8341_v42, %v8285_v39 }
 0xc7b   :  { %v10780_v31 = vmul.f32 %v10699_v54, %v4822_v46  ;;  %v5017_v57 = vsub.f32 1.0, %v4985_v20  ;;  %v4764_v36 = vmul.f32 %v10691_v61, %v4732_v19  ;;  %v10784_v55 = vmul.f32 0.70710677, %v10775_v14 }
 0xc7c   :  { %v4986_v3 = vmul.f32 %v8543_v45, %v4826_v24  ;;  %v4829_v28 = vmul.f32 %v10659_v40, %v4797_v60  ;;  %v4481_v1 = vadd.f32 1.0, %v4449_v16  ;;  %v10790_v15 = vadd.f32 %v10477_v11, %v3993_v38  ;;  %v8344_v40 = vpop.f32.mrf.mxu1 }
 0xc7d   :  { %12895 = vst [vmem:[#allocation41_spill] sm:$0xff] %v10780_v31  ;;  %v10793_v59 = vmul.f32 %v5015_v8, %v10601_v17  ;;  %v4767_v54 = vmul.f32 %v10720_v33, %v4735_v41  ;;  %v10797_v21 = vand.u32 2147483647, %v10784_v55  ;;  %v3988_v37 = vadd.f32 %v3987_v58, %v3666_v4 }
 0xc7e   :  { %v4984_v42 = vmul.f32 %v10732_v34, %v4824_v52  ;;  %v5019_v46 = vsub.f32 1.0, %v4987_v49  ;;  %v10801_v20 = vmul.f32 0.5, %v10689_v29  ;;  %8552 = vrcp.f32 %v4481_v1  ;;  %v8288_v34 = vpop.f32.mrf.mxu0  ;;  %v3997_v1 = vpop.f32.mrf.mxu1 }
 0xc7f   :  { %12897 = vst [vmem:[#allocation43_spill] sm:$0xff] %v10793_v59  ;;  %v5049_v45 = vmul.f32 %v5017_v57, %v10630_v0  ;;  %v4796_v17 = vadd.f32 0.2548296, %v4764_v36  ;;  %v4448_v24 = vmul.f32 0.3275911, %v10797_v21  ;;  %v5018_v60 = vsub.f32 1.0, %v4986_v3  ;;  %v10815_v0 = vpop.permute.xlu0 %4193 }
 0xc80   :  { %v4989_v39 = vmul.f32 %v8545_v35, %v4829_v28  ;;  %v4862_v8 = vsub.f32 0.0, %v10730_v5  ;;  %v10808_v41 = vmul.f32 0.70710677, %v10790_v15  ;;  %v4799_v29 = vadd.f32 0.2548296, %v4767_v54  ;;  %12898 = vst [vmem:[#allocation44_spill] sm:$0xff] %v10815_v0 }
 0xc81   :  { %v4480_v49 = vadd.f32 1.0, %v4448_v24  ;;  %v10813_v16 = vadd.f32 %v10479_v12, %v3988_v37  ;;  %v4003_v38 = vadd.f32 %v8344_v40, %v8288_v34  ;;  %v5016_v58 = vsub.f32 1.0, %v4984_v42  ;;  %v3676_v24 = vpop.f32.mrf.mxu0 }
 0xc82   :  { %v10810_v52 = vpop.eup %8546  ;;  %v5051_v57 = vmul.f32 %v5019_v46, %v10685_v53  ;;  %v10820_v36 = vand.u32 2147483647, %v10808_v41  ;;  %v10822_v3 = vadd.f32 1.0, %v5049_v45  ;;  %v4828_v28 = vmul.f32 %v10691_v61, %v4796_v17 }
 0xc83   :  { %v4574_v35 = vmul.f32 1.0614054, %v10810_v52  ;;  %vm4350_vm14 = vcmp.ge.f32.partialorder %v10713_v2, 0.0  ;;  %8554 = vrcp.f32 %v4480_v49  ;;  %v5050_v4 = vmul.f32 %v5018_v60, %v10694_v18 }
 0xc84   :  { %12899 = vst [vmem:[#allocation45_spill] sm:$0xff] %v10822_v3  ;;  %v4894_v37 = vmul.f32 %v4862_v8, %v10730_v5  ;;  %v4451_v53 = vmul.f32 0.3275911, %v10820_v36  ;;  %v5021_v46 = vsub.f32 1.0, %v4989_v39  ;;  %v4831_v40 = vmul.f32 %v10720_v33, %v4799_v29  ;;  %v10848_v29 = vpop.permute.xlu0 %4188 }
 0xc85   :  { %v4606_v54 = vadd.f32 -1.4531521, %v4574_v35  ;;  %v8549_v42 = vpop.eup %8548  ;;  %v10831_v45 = vmul.f32 0.70710677, %v10813_v16  ;;  %v10834_v61 = vadd.f32 %v10473_v9, %v4003_v38  ;;  %v5083_v34 = vadd.f32 1.0, %v5051_v57  ;;  %12901 = vst [vmem:[#allocation47_spill] sm:$0xff] %v10848_v29 }
 0xc86   :  { %v8551_v17 = vpop.eup %8550  ;;  %v4483_v60 = vadd.f32 1.0, %v4451_v53  ;;  %v3998_v49 = vadd.f32 %v3997_v1, %v3676_v24  ;;  %v10838_v5 = vmul.f32 %v5016_v58, %v10638_v25  ;;  %v4988_v8 = vmul.f32 %v8549_v42, %v4828_v28 }
 0xc87   :  { %v4638_v18 = vmul.f32 %v10810_v52, %v4606_v54  ;;  %v10843_v33 = vsel %vm4350_vm14, 1.0, %v12886_v56  ;;  %v10846_v39 = vand.u32 2147483647, %v10831_v45  ;;  %v4934_v38 = vmul.f32 1.442695, %v4894_v37 }
 0xc88   :  { %12900 = vst [vmem:[#allocation46_spill] sm:$0xff] %v10838_v5  ;;  %v10851_v57 = vmul.f32 0.5, %v10745_v51  ;;  %v4865_v35 = vsub.f32 0.0, %v10772_v44  ;;  %8556 = vrcp.f32 %v4483_v60  ;;  %v5053_v25 = vmul.f32 %v5021_v46, %v10697_v13 }
 0xc89   :  { %v4991_v58 = vmul.f32 %v8551_v17, %v4831_v40  ;;  %v4450_v28 = vmul.f32 0.3275911, %v10846_v39  ;;  %v10857_v2 = vmul.f32 0.70710677, %v10834_v61  ;;  %v10860_v1 = vmul.f32 %v5083_v34, %v10644_v32 }
 0xc8a   :  { %v10862_v54 = vadd.f32 1.0, %v5050_v4  ;;  %v4670_v37 = vadd.f32 1.4214138, %v4638_v18  ;;  %v10865_v51 = vadd.f32 %v10475_v43, %v3998_v49  ;;  %v5020_v42 = vsub.f32 1.0, %v4988_v8  ;;  %v10877_v18 = vpop.permute.xlu0 %4183 }
 0xc8b   :  { %12902 = vst [vmem:[#allocation48_spill] sm:$0xff] %v10860_v1  ;;  %v10867_v53 = vpop.eup %8552  ;;  %vm4353_vm15 = vcmp.ge.f32.partialorder %v10761_v6, 0.0  ;;  %v4482_v13 = vadd.f32 1.0, %v4450_v28  ;;  %v10871_v46 = vand.u32 2147483647, %v10857_v2  ;;  %8558 = vpow2.f32 %v4934_v38  ;;  %12904 = vst [vmem:[#allocation50_spill] sm:$0xff] %v10877_v18 }
 0xc8c   :  { %12903 = vst [vmem:[#allocation49_spill] sm:$0xff] %v10862_v54  ;;  %v4577_v40 = vmul.f32 1.0614054, %v10867_v53  ;;  %v4897_v32 = vmul.f32 %v4865_v35, %v10772_v44  ;;  %v4864_v4 = vsub.f32 0.0, %v10797_v21  ;;  %v5085_v24 = vadd.f32 1.0, %v5053_v25 }
 0xc8d   :  { %v5023_v17 = vsub.f32 1.0, %v4991_v58  ;;  %8560 = vrcp.f32 %v4482_v13  ;;  %v4453_v34 = vmul.f32 0.3275911, %v10871_v46  ;;  %v4702_v6 = vmul.f32 %v10810_v52, %v4670_v37 }
 0xc8e   :  { %v10881_v60 = vsel %vm4353_vm15, 1.0, %v12886_v56  ;;  %v4609_v49 = vadd.f32 -1.4531521, %v4577_v40  ;;  %v10884_v8 = vmul.f32 0.70710677, %v10865_v51  ;;  %v5052_v44 = vmul.f32 %v5020_v42, %v10754_v47 }
 0xc8f   :  { %v10888_v38 = vmul.f32 0.5, %v10775_v14  ;;  %vm4352_vm1 = vcmp.ge.f32.partialorder %v10784_v55, 0.0  ;;  %v4485_v35 = vadd.f32 1.0, %v4453_v34  ;;  %v4940_v28 = vmul.f32 1.442695, %v4897_v32 }
 0xc90   :  { %v10891_v25 = vpop.eup %8554  ;;  %v4641_v58 = vmul.f32 %v10867_v53, %v4609_v49  ;;  %v4896_v37 = vmul.f32 %v4864_v4, %v10797_v21  ;;  %v10896_v13 = vand.u32 2147483647, %v10884_v8  ;;  %v5055_v40 = vmul.f32 %v5023_v17, %v10768_v48  ;;  %v8347_v17 = vpop.f32.mrf.mxu1 }
 0xc91   :  { %v4576_v47 = vmul.f32 1.0614054, %v10891_v25  ;;  %v4867_v14 = vsub.f32 0.0, %v10820_v36  ;;  %8562 = vrcp.f32 %v4485_v35  ;;  %v10902_v42 = vmul.f32 %v5085_v24, %v10663_v23  ;;  %v10915_v35 = vpop.permute.xlu0 %4178 }
 0xc92   :  { %v4734_v34 = vadd.f32 -0.28449672, %v4702_v6  ;;  %v4673_v19 = vadd.f32 1.4214138, %v4641_v58  ;;  %v4452_v49 = vmul.f32 0.3275911, %v10896_v13 }
 0xc93   :  { %12905 = vst [vmem:[#allocation51_spill] sm:$0xff] %v10902_v42  ;;  %v10905_v32 = vadd.f32 1.0, %v5052_v44  ;;  %v10910_v21 = vsel %vm4352_vm1, 1.0, %v12886_v56  ;;  %v4608_v48 = vadd.f32 -1.4531521, %v4576_v47  ;;  %v10913_v4 = vmul.f32 0.5, %v10790_v15  ;;  %v8291_v15 = vpop.f32.mrf.mxu0 }
 0xc94   :  { %12907 = vst [vmem:[#allocation53_spill] sm:$0xff] %v10915_v35  ;;  %v4705_v23 = vmul.f32 %v10867_v53, %v4673_v19  ;;  %v4938_v24 = vmul.f32 1.442695, %v4896_v37  ;;  %vm4355_vm2 = vcmp.ge.f32.partialorder %v10808_v41, 0.0  ;;  %v4484_v6 = vadd.f32 1.0, %v4452_v49 }
 0xc95   :  { %12906 = vst [vmem:[#allocation52_spill] sm:$0xff] %v10905_v32  ;;  %v10919_v44 = vpop.eup %8556  ;;  %v5087_v58 = vadd.f32 1.0, %v5055_v40  ;;  %v4640_v55 = vmul.f32 %v10891_v25, %v4608_v48  ;;  %v4899_v43 = vmul.f32 %v4867_v14, %v10820_v36  ;;  %v4866_v47 = vsub.f32 0.0, %v10846_v39  ;;  %v4007_v40 = vpop.f32.mrf.mxu1 }
 0xc96   :  { %v4766_v9 = vmul.f32 %v10810_v52, %v4734_v34  ;;  %v4737_v12 = vadd.f32 -0.28449672, %v4705_v23  ;;  %v4579_v11 = vmul.f32 1.0614054, %v10919_v44  ;;  %8564 = vrcp.f32 %v4484_v6  ;;  %v6994_v34 = vld [vmem:[%s12745_s0 + $0x38] sm:$0xff] }
 0xc97   :  { %8566 = vpow2.f32 %v4940_v28  ;;  %v4672_v19 = vadd.f32 1.4214138, %v4640_v55  ;;  %v10927_v41 = vsel %vm4355_vm2, 1.0, %v12886_v56  ;;  %v4013_v37 = vadd.f32 %v8347_v17, %v8291_v15  ;;  %v3686_v17 = vpop.f32.mrf.mxu0  ;;  %8425 = vmatprep.subr.mxu1 %v6994_v34  ;;  %v8350_v62 = vpop.f32.mrf.mxu1 }
 0xc98   :  { %8568 = vpow2.f32 %v4938_v24  ;;  %v4611_v49 = vadd.f32 -1.4531521, %v4579_v11  ;;  %v10930_v36 = vmul.f32 0.5, %v10813_v16  ;;  %v4869_v14 = vsub.f32 0.0, %v10871_v46  ;;  %v8559_v48 = vpop.eup %8558  ;;  %v10941_v16 = vpop.permute.xlu0 %4173  ;;  %8426 = vmatpush3.msra.mxu1 %v6994_v34 }
 0xc99   :  { %v4769_v28 = vmul.f32 %v10867_v53, %v4737_v12  ;;  %v4704_v23 = vmul.f32 %v10891_v25, %v4672_v19  ;;  %v4944_v6 = vmul.f32 1.442695, %v4899_v43  ;;  %vm4354_vm3 = vcmp.ge.f32.partialorder %v10831_v45, 0.0  ;;  %12908 = vst [vmem:[#allocation54_spill] sm:$0xff] %v10941_v16 }
 0xc9a   :  { %v10939_v11 = vpop.eup %8560  ;;  %v10944_v24 = vmul.f32 %v5087_v58, %v10718_v63  ;;  %v4798_v55 = vadd.f32 0.2548296, %v4766_v9  ;;  %v4643_v15 = vmul.f32 %v10919_v44, %v4611_v49  ;;  %v4898_v10 = vmul.f32 %v4866_v47, %v10846_v39  ;;  %v8294_v49 = vpop.f32.mrf.mxu0 }
 0xc9b   :  { %v4736_v12 = vadd.f32 -0.28449672, %v4704_v23  ;;  %v4578_v43 = vmul.f32 1.0614054, %v10939_v11  ;;  %vm4357_vm4 = vcmp.ge.f32.partialorder %v10857_v2, 0.0  ;;  %v10951_v19 = vadd.f32 %v10941_v16, %v4013_v37 }
 0xc9c   :  { %12909 = vst [vmem:[#allocation55_spill] sm:$0xff] %v10944_v24  ;;  %v4675_v3 = vadd.f32 1.4214138, %v4643_v15  ;;  %v10956_v63 = vsel %vm4354_vm3, 1.0, %v12886_v56  ;;  %v10959_v9 = vmul.f32 0.5, %v10834_v61  ;;  %v4901_v39 = vmul.f32 %v4869_v14, %v10871_v46 }
 0xc9d   :  { %12910 = vst [vmem:[#allocation56_spill] sm:$0xff] %v10951_v19  ;;  %v4801_v58 = vadd.f32 0.2548296, %v4769_v28  ;;  %8570 = vpow2.f32 %v4944_v6  ;;  %v4610_v47 = vadd.f32 -1.4531521, %v4578_v43  ;;  %v4008_v34 = vadd.f32 %v4007_v40, %v3686_v17  ;;  %v4017_v6 = vpop.f32.mrf.mxu1  ;;  %v10977_v17 = vpop.permute.xlu0 %4168 }
 0xc9e   :  { %v10962_v23 = vpop.eup %8562  ;;  %v4830_v37 = vmul.f32 %v10810_v52, %v4798_v55  ;;  %v4768_v15 = vmul.f32 %v10891_v25, %v4736_v12  ;;  %v4707_v45 = vmul.f32 %v10919_v44, %v4675_v3  ;;  %v10970_v61 = vsel %vm4357_vm4, 1.0, %v12886_v56  ;;  %12912 = vst [vmem:[#allocation58_spill] sm:$0xff] %v10977_v17 }
 0xc9f   :  { %v4642_v46 = vmul.f32 %v10939_v11, %v4610_v47  ;;  %v4942_v14 = vmul.f32 1.442695, %v4898_v10  ;;  %v4581_v28 = vmul.f32 1.0614054, %v10962_v23  ;;  %v10975_v40 = vmul.f32 0.70710677, %v10951_v19  ;;  %v3696_v10 = vpop.f32.mrf.mxu0 }
 0xca0   :  { %v4739_v52 = vadd.f32 -0.28449672, %v4707_v45  ;;  %v4948_v55 = vmul.f32 1.442695, %v4901_v39  ;;  %v4868_v3 = vsub.f32 0.0, %v10896_v13  ;;  %v4023_v12 = vadd.f32 %v8350_v62, %v8294_v49 }
 0xca1   :  { %12911 = vst [vmem:[#allocation57_spill] sm:$0xff] %v10975_v40  ;;  %v4833_v2 = vmul.f32 %v10867_v53, %v4801_v58  ;;  %v4674_v43 = vadd.f32 1.4214138, %v4642_v46  ;;  %v4613_v16 = vadd.f32 -1.4531521, %v4581_v28  ;;  %v10982_v47 = vadd.f32 %v10977_v17, %v4008_v34  ;;  %v8353_v58 = vpop.f32.mrf.mxu1 }
 0xca2   :  { %v4990_v59 = vmul.f32 %v8559_v48, %v4830_v37  ;;  %v4800_v1 = vadd.f32 0.2548296, %v4768_v15  ;;  %v4771_v19 = vmul.f32 %v10919_v44, %v4739_v52  ;;  %v10986_v54 = vmul.f32 0.5, %v10865_v51 }
 0xca3   :  { %12913 = vst [vmem:[#allocation59_spill] sm:$0xff] %v10982_v47  ;;  %v10988_v45 = vpop.eup %8564  ;;  %v4706_v39 = vmul.f32 %v10939_v11, %v4674_v43  ;;  %8572 = vpow2.f32 %v4942_v14  ;;  %v4645_v62 = vmul.f32 %v10962_v23, %v4613_v16  ;;  %v4423_v53 = vand.u32 2147483647, %v10975_v40  ;;  %v8297_v16 = vpop.f32.mrf.mxu0 }
 0xca4   :  { %v8567_v49 = vpop.eup %8566  ;;  %8574 = vpow2.f32 %v4948_v55  ;;  %v4580_v48 = vmul.f32 1.0614054, %v10988_v45  ;;  %v4900_v34 = vmul.f32 %v4868_v3, %v10896_v13  ;;  %v10996_v37 = vadd.f32 %v10877_v18, %v4023_v12  ;;  %v3425_v13 = vld [vmem:[%s12754_s9 + $0x8] sm:$0xff] }
 0xca5   :  { %v8569_v51 = vpop.eup %8568  ;;  %v4993_v15 = vmul.f32 %v8567_v49, %v4833_v2  ;;  %v4738_v46 = vadd.f32 -0.28449672, %v4706_v39  ;;  %v4677_v28 = vadd.f32 1.4214138, %v4645_v62  ;;  %v10999_v14 = vmul.f32 0.70710677, %v10982_v47  ;;  %v4027_v62 = vpop.f32.mrf.mxu1  ;;  %5226 = vmatprep.mubr.f32.mxu0 %v3425_v13 }
 0xca6   :  { %12914 = vst [vmem:[#allocation60_spill] sm:$0xff] %v10996_v37  ;;  %v5022_v52 = vsub.f32 1.0, %v4990_v59  ;;  %v4832_v43 = vmul.f32 %v10891_v25, %v4800_v1  ;;  %v4803_v17 = vadd.f32 0.2548296, %v4771_v19  ;;  %v4612_v55 = vadd.f32 -1.4531521, %v4580_v48 }
 0xca7   :  { %12915 = vst [vmem:[#allocation61_spill] sm:$0xff] %v10999_v14  ;;  %v4770_v3 = vmul.f32 %v10939_v11, %v4738_v46  ;;  %v4709_v12 = vmul.f32 %v10962_v23, %v4677_v28  ;;  %v4871_v2 = vsub.f32 0.0, %v4423_v53  ;;  %v4018_v39 = vadd.f32 %v4017_v6, %v3696_v10  ;;  %v6993_v59 = vld [vmem:[%s12745_s0 + $0x30] sm:$0xff]  ;;  %v3706_v10 = vpop.f32.mrf.mxu0 }
 0xca8   :  { %v4644_v1 = vmul.f32 %v10988_v45, %v4612_v55  ;;  %v4946_v25 = vmul.f32 1.442695, %v4900_v34  ;;  %v4455_v19 = vmul.f32 0.3275911, %v4423_v53  ;;  %v11012_v49 = vmul.f32 0.70710677, %v10996_v37  ;;  %8427 = vmatprep.subr.mxu1 %v6993_v59 }
 0xca9   :  { %v5025_v48 = vsub.f32 1.0, %v4993_v15  ;;  %v4741_v46 = vadd.f32 -0.28449672, %v4709_v12  ;;  %vm4356_vm5 = vcmp.ge.f32.partialorder %v10884_v8, 0.0  ;;  %v4422_v6 = vand.u32 2147483647, %v10999_v14  ;;  %8428 = vmatpush3.msra.mxu1 %v6993_v59  ;;  %v11021_v15 = vpop.f32.mrf.mxu1 }
 0xcaa   :  { %v8571_v28 = vpop.eup %8570  ;;  %v4992_v13 = vmul.f32 %v8569_v51, %v4832_v43  ;;  %v4835_v18 = vmul.f32 %v10919_v44, %v4803_v17  ;;  %v4676_v47 = vadd.f32 1.4214138, %v4644_v1  ;;  %v4033_v55 = vadd.f32 %v8353_v58, %v8297_v16  ;;  %v8300_v16 = vpop.f32.mrf.mxu0 }
 0xcab   :  { %v4802_v34 = vadd.f32 0.2548296, %v4770_v3  ;;  %v4773_v5 = vmul.f32 %v10962_v23, %v4741_v46  ;;  %v4903_v31 = vmul.f32 %v4871_v2, %v4423_v53  ;;  %v11019_v37 = vadd.f32 %v10915_v35, %v4018_v39 }
 0xcac   :  { %v5054_v12 = vmul.f32 %v5022_v52, %v10843_v33  ;;  %v4708_v14 = vmul.f32 %v10988_v45, %v4676_v47  ;;  %v4487_v59 = vadd.f32 1.0, %v4455_v19  ;;  %v4425_v51 = vand.u32 2147483647, %v11012_v49  ;;  %v4037_v52 = vpop.f32.mrf.mxu1 }
 0xcad   :  { %12916 = vst [vmem:[#allocation62_spill] sm:$0xff] %v11019_v37  ;;  %v4805_v43 = vadd.f32 0.2548296, %v4773_v5  ;;  %v4454_v44 = vmul.f32 0.3275911, %v4422_v6  ;;  %v4870_v17 = vsub.f32 0.0, %v4422_v6  ;;  %v11027_v58 = vadd.f32 %v10815_v0, %v4033_v55 }
 0xcae   :  { %v5057_v53 = vmul.f32 %v5025_v48, %v10881_v60  ;;  %v5024_v3 = vsub.f32 1.0, %v4992_v13  ;;  %v4995_v2 = vmul.f32 %v8571_v28, %v4835_v18  ;;  %v4740_v39 = vadd.f32 -0.28449672, %v4708_v14  ;;  %v6992_v5 = vld [vmem:[%s12745_s0 + $0x28] sm:$0xff]  ;;  %v3716_v48 = vpop.f32.mrf.mxu0 }
 0xcaf   :  { %12917 = vst [vmem:[#allocation63_spill] sm:$0xff] %v11027_v58  ;;  %v4834_v1 = vmul.f32 %v10939_v11, %v4802_v34  ;;  %8576 = vpow2.f32 %v4946_v25  ;;  %v4952_v33 = vmul.f32 1.442695, %v4903_v31  ;;  %v11032_v47 = vmul.f32 0.70710677, %v11019_v37  ;;  %8429 = vmatprep.subr.mxu1 %v6992_v5 }
 0xcb0   :  { %v8573_v19 = vpop.eup %8572  ;;  %v5086_v46 = vadd.f32 1.0, %v5054_v12  ;;  %v4837_v55 = vmul.f32 %v10962_v23, %v4805_v43  ;;  %8578 = vrcp.f32 %v4487_v59  ;;  %v4873_v60 = vsub.f32 0.0, %v4425_v51  ;;  %8430 = vmatpush3.msra.mxu1 %v6992_v5  ;;  %v6991_v43 = vld [vmem:[%s12745_s0 + $0x20] sm:$0xff] }
 0xcb1   :  { %12918 = vst [vmem:[#allocation64_spill] sm:$0xff] %v11032_v47  ;;  %v8575_v18 = vpop.eup %8574  ;;  %v4772_v11 = vmul.f32 %v10988_v45, %v4740_v39  ;;  %v4486_v14 = vadd.f32 1.0, %v4454_v44  ;;  %v4902_v31 = vmul.f32 %v4870_v17, %v4422_v6  ;;  %v11040_v25 = vmul.f32 0.70710677, %v11027_v58  ;;  %v8359_v6 = vpop.f32.mrf.mxu1  ;;  %8431 = vmatprep.subr.mxu1 %v6991_v43 }
 0xcb2   :  { %v5089_v28 = vadd.f32 1.0, %v5057_v53  ;;  %v5056_v13 = vmul.f32 %v5024_v3, %v10910_v21  ;;  %v5027_v34 = vsub.f32 1.0, %v4995_v2  ;;  %v4028_v12 = vadd.f32 %v4027_v62, %v3706_v10  ;;  %v8303_v3 = vpop.f32.mrf.mxu0  ;;  %8432 = vmatpush3.msra.mxu1 %v6991_v43  ;;  %v8810_v43 = vld [vmem:[%s12751_s6 + $0x18] sm:$0xff] }
 0xcb3   :  { %v4994_v0 = vmul.f32 %v8573_v19, %v4834_v1  ;;  %v11046_v23 = vsel %vm4356_vm5, 1.0, %v12886_v56  ;;  %8580 = vpow2.f32 %v4952_v33  ;;  %v4424_v59 = vand.u32 2147483647, %v11032_v47  ;;  %v8808_v33 = vld [vmem:[%s12751_s6 + $0x8] sm:$0xff] }
 0xcb4   :  { %v4997_v44 = vmul.f32 %v8575_v18, %v4837_v55  ;;  %v4457_v17 = vmul.f32 0.3275911, %v4425_v51  ;;  %v4905_v53 = vmul.f32 %v4873_v60, %v4425_v51  ;;  %v11053_v21 = vadd.f32 %v10848_v29, %v4028_v12  ;;  %8434 = vmatmul.mubr.msk.f32.vlgmr.msra.gmra.mxu1 %vm97_vm0, %v8808_v33  ;;  %v4047_v55 = vpop.f32.mrf.mxu1 }
 0xcb5   :  { %v11056_v62 = vmul.f32 %v5086_v46, %v10801_v20  ;;  %v4804_v8 = vadd.f32 0.2548296, %v4772_v11  ;;  %8582 = vrcp.f32 %v4486_v14  ;;  %v4427_v10 = vand.u32 2147483647, %v11040_v25 }
 0xcb6   :  { %12919 = vst [vmem:[#allocation65_spill] sm:$0xff] %v11053_v21  ;;  %v11060_v2 = vmul.f32 %v5089_v28, %v10851_v57  ;;  %v5088_v39 = vadd.f32 1.0, %v5056_v13  ;;  %v5059_v1 = vmul.f32 %v5027_v34, %v10927_v41  ;;  %v4950_v51 = vmul.f32 1.442695, %v4902_v31  ;;  %v8809_v57 = vld [vmem:[%s12751_s6 + $0x10] sm:$0xff] }
 0xcb7   :  { %12920 = vst [vmem:[#allocation66_spill] sm:$0xff] %v11056_v62  ;;  %v5026_v20 = vsub.f32 1.0, %v4994_v0  ;;  %v4872_v5 = vsub.f32 0.0, %v4424_v59  ;;  %v11068_v19 = vmul.f32 0.70710677, %v11053_v21  ;;  %v4043_v46 = vadd.f32 %v11021_v15, %v8300_v16  ;;  %8436 = vmatprep.mubr.msk.f32.mxu1 %vm97_vm0, %v8809_v57  ;;  %v3726_v15 = vpop.f32.mrf.mxu0 }
 0xcb8   :  { %12921 = vst [vmem:[#allocation67_spill] sm:$0xff] %v11060_v2  ;;  %v5029_v41 = vsub.f32 1.0, %v4997_v44  ;;  %v4489_v60 = vadd.f32 1.0, %v4457_v17  ;;  %v4956_v18 = vmul.f32 1.442695, %v4905_v53  ;;  %v4038_v11 = vadd.f32 %v4037_v52, %v3716_v48  ;;  %8437 = vmatmul.mubr.msk.f32.gmra.mxu1 %vm97_vm0, %v8810_v43  ;;  %v8362_v17 = vpop.f32.mrf.mxu1  ;;  %v8811_v53 = vld [vmem:[%s12751_s6 + $0x20] sm:$0xff] }
 0xcb9   :  { %v4836_v14 = vmul.f32 %v10988_v45, %v4804_v8  ;;  %v4875_v0 = vsub.f32 0.0, %v4427_v10  ;;  %v4426_v31 = vand.u32 2147483647, %v11068_v19  ;;  %v11078_v28 = vadd.f32 %v10757_v27, %v4043_v46  ;;  %8439 = vmatprep.mubr.msk.f32.mxu1 %vm97_vm0, %v8811_v53 }
 0xcba   :  { %v5091_v16 = vadd.f32 1.0, %v5059_v1  ;;  %v4456_v13 = vmul.f32 0.3275911, %v4424_v59  ;;  %v11081_v34 = vadd.f32 %v10786_v50, %v4038_v11  ;;  %v4053_v12 = vadd.f32 %v8359_v6, %v8303_v3 }
 0xcbb   :  { %v5058_v45 = vmul.f32 %v5026_v20, %v10956_v63  ;;  %v4904_v52 = vmul.f32 %v4872_v5, %v4424_v59  ;;  %v4459_v48 = vmul.f32 0.3275911, %v4427_v10  ;;  %v11089_v44 = vmul.f32 0.70710677, %v11078_v28  ;;  %v8306_v5 = vpop.f32.mrf.mxu0 }
 0xcbc   :  { %12922 = vst [vmem:[#allocation68_spill] sm:$0xff] %v11081_v34  ;;  %v8577_v6 = vpop.eup %8576  ;;  %v11096_v8 = vmul.f32 %v5088_v39, %v10888_v38  ;;  %v5061_v3 = vmul.f32 %v5029_v41, %v10970_v61  ;;  %8584 = vpow2.f32 %v4950_v51  ;;  %v11100_v63 = vadd.f32 %v10709_v26, %v4053_v12  ;;  %v8812_v61 = vld [vmem:[%s12751_s6 + $0x28] sm:$0xff] }
 0xcbd   :  { %v11102_v59 = vpop.eup %8578  ;;  %v4996_v1 = vmul.f32 %v8577_v6, %v4836_v14  ;;  %8586 = vrcp.f32 %v4489_v60  ;;  %v4907_v33 = vmul.f32 %v4875_v0, %v4427_v10  ;;  %v4874_v20 = vsub.f32 0.0, %v4426_v31  ;;  %8440 = vmatmul.mubr.msk.f32.gmra.mxu1 %vm97_vm0, %v8812_v61  ;;  %v4057_v60 = vpop.f32.mrf.mxu1 }
 0xcbe   :  { %12923 = vst [vmem:[#allocation69_spill] sm:$0xff] %v11096_v8  ;;  %8588 = vpow2.f32 %v4956_v18  ;;  %v4488_v46 = vadd.f32 1.0, %v4456_v13  ;;  %v11105_v57 = vand.u32 2147483647, %v11089_v44  ;;  %v11108_v38 = vmul.f32 0.70710677, %v11081_v34 }
 0xcbf   :  { %v11115_v39 = vmul.f32 %v5091_v16, %v10913_v4  ;;  %v5090_v10 = vadd.f32 1.0, %v5058_v45  ;;  %v4954_v51 = vmul.f32 1.442695, %v4904_v52  ;;  %v4491_v41 = vadd.f32 1.0, %v4459_v48  ;;  %v8813_v18 = vld [vmem:[%s12751_s6 + $0x30] sm:$0xff]  ;;  %v3736_v45 = vpop.f32.mrf.mxu0 }
 0xcc0   :  { %8442 = vmatprep.mubr.msk.f32.mxu1 %vm97_vm0, %v8813_v18  ;;  %v11121_v11 = vpop.eup %8580  ;;  %v5093_v14 = vadd.f32 1.0, %v5061_v3  ;;  %v4458_v0 = vmul.f32 0.3275911, %v4426_v31  ;;  %v11124_v13 = vmul.f32 0.70710677, %v11100_v63  ;;  %v4048_v12 = vadd.f32 %v4047_v55, %v3726_v15  ;;  %v8814_v3 = vld [vmem:[%s12751_s6 + $0x38] sm:$0xff] }
 0xcc1   :  { %12924 = vst [vmem:[#allocation70_spill] sm:$0xff] %v11115_v39  ;;  %12925 = vst [vmem:[#allocation71_spill] sm:$0xff] %v11121_v11  ;;  %v5028_v4 = vsub.f32 1.0, %v4996_v1  ;;  %v4960_v16 = vmul.f32 1.442695, %v4907_v33  ;;  %v4906_v43 = vmul.f32 %v4874_v20, %v4426_v31  ;;  %v4063_v52 = vadd.f32 %v8362_v17, %v8306_v5  ;;  %8443 = vmatmul.mubr.msk.f32.gmra.mxu1 %vm97_vm0, %v8814_v3  ;;  %v8365_v17 = vpop.f32.mrf.mxu1  ;;  %v8815_v1 = vld [vmem:[%s12751_s6 + $0x40] sm:$0xff] }
 0xcc2   :  { %v11126_v48 = vpop.eup %8582  ;;  %8590 = vrcp.f32 %v4488_v46  ;;  %v4461_v53 = vmul.f32 0.3275911, %v11105_v57  ;;  %v4428_v6 = vand.u32 2147483647, %v11108_v38  ;;  %v11131_v61 = vand.u32 2147483647, %v11124_v13  ;;  %8445 = vmatprep.mubr.msk.f32.mxu1 %vm97_vm0, %v8815_v1 }
 0xcc3   :  { %v11138_v55 = vmul.f32 %v5090_v10, %v10930_v36  ;;  %8592 = vpow2.f32 %v4954_v51  ;;  %v11141_v31 = vadd.f32 %v10734_v30, %v4048_v12  ;;  %v11144_v15 = vadd.f32 %v10651_v22, %v4063_v52  ;;  %v8309_v51 = vpop.f32.mrf.mxu0  ;;  %v8818_v30 = vld [vmem:[%s12751_s6 + $0x58] sm:$0xff] }
 0xcc4   :  { %v11151_v33 = vmul.f32 %v5093_v14, %v10959_v9  ;;  %8594 = vrcp.f32 %v4491_v41  ;;  %v4490_v36 = vadd.f32 1.0, %v4458_v0  ;;  %v4463_v20 = vmul.f32 0.3275911, %v11131_v61  ;;  %v8816_v9 = vld [vmem:[%s12751_s6 + $0x48] sm:$0xff] }
 0xcc5   :  { %12926 = vst [vmem:[#allocation72_spill] sm:$0xff] %v11138_v55  ;;  %v5060_v5 = vmul.f32 %v5028_v4, %v11046_v23  ;;  %8596 = vpow2.f32 %v4960_v16  ;;  %v4958_v46 = vmul.f32 1.442695, %v4906_v43  ;;  %v11156_v10 = vmul.f32 0.70710677, %v11141_v31  ;;  %8446 = vmatmul.mubr.msk.f32.gmra.mxu1 %vm97_vm0, %v8816_v9  ;;  %v4067_v4 = vpop.f32.mrf.mxu1  ;;  %v8817_v16 = vld [vmem:[%s12751_s6 + $0x50] sm:$0xff] }
 0xcc6   :  { %v4493_v18 = vadd.f32 1.0, %v4461_v53  ;;  %v4877_v12 = vsub.f32 0.0, %v11105_v57  ;;  %v4460_v52 = vmul.f32 0.3275911, %v4428_v6  ;;  %v11160_v3 = vmul.f32 0.70710677, %v11144_v15  ;;  %8448 = vmatprep.mubr.msk.f32.mxu1 %vm97_vm0, %v8817_v16 }
 0xcc7   :  { %v11167_v23 = vmul.f32 0.5, %v11078_v28  ;;  %v4430_v41 = vand.u32 2147483647, %v11156_v10  ;;  %v4058_v14 = vadd.f32 %v4057_v60, %v3736_v45  ;;  %v4073_v0 = vadd.f32 %v8365_v17, %v8309_v51  ;;  %v3746_v60 = vpop.f32.mrf.mxu0  ;;  %v12929_v45 = vld [vmem:[#allocation29_spill] sm:$0xff] }
 0xcc8   :  { %8598 = vrcp.f32 %v4490_v36  ;;  %v4876_v43 = vsub.f32 0.0, %v4428_v6  ;;  %v4495_v53 = vadd.f32 1.0, %v4463_v20  ;;  %v4433_v1 = vand.u32 2147483647, %v11160_v3 }
 0xcc9   :  { %12927 = vst [vmem:[#allocation73_spill] sm:$0xff] %v11167_v23  ;;  %v11175_v9 = vpop.eup %8584  ;;  %8600 = vpow2.f32 %v4958_v46  ;;  %v4462_v28 = vmul.f32 0.3275911, %v4430_v41  ;;  %v11178_v22 = vadd.f32 %v10673_v7, %v4058_v14  ;;  %v11181_v17 = vadd.f32 %v12929_v45, %v4073_v0  ;;  %8449 = vmatmul.mubr.msk.f32.gmra.mxu1 %vm97_vm0, %v8818_v30  ;;  %v8312_v27 = vpop.f32.mrf.mxu0 }
 0xcca   :  { %12928 = vst [vmem:[#allocation74_spill] sm:$0xff] %v11175_v9  ;;  %v11183_v51 = vpop.eup %8586  ;;  %8602 = vrcp.f32 %v4493_v18  ;;  %v4909_v36 = vmul.f32 %v4877_v12, %v11105_v57  ;;  %v4492_v16 = vadd.f32 1.0, %v4460_v52  ;;  %v4465_v20 = vmul.f32 0.3275911, %v4433_v1  ;;  %v8368_v18 = vpop.f32.mrf.mxu1  ;;  %v8819_v57 = vld [vmem:[%s12751_s6 + $0x60] sm:$0xff] }
 0xccb   :  { %v11190_v46 = vpop.eup %8588  ;;  %v4879_v14 = vsub.f32 0.0, %v11131_v61  ;;  %v4494_v7 = vadd.f32 1.0, %v4462_v28  ;;  %v11194_v0 = vmul.f32 0.70710677, %v11178_v22  ;;  %v4068_v45 = vadd.f32 %v4067_v4, %v3746_v60  ;;  %8451 = vmatprep.mubr.msk.f32.mxu1 %vm97_vm0, %v8819_v57  ;;  %v12931_v57 = vld [vmem:[#allocation32_spill] sm:$0xff] }
 0xccc   :  { %12930 = vst [vmem:[#allocation75_spill] sm:$0xff] %v11190_v46  ;;  %8604 = vrcp.f32 %v4495_v53  ;;  %v4878_v12 = vsub.f32 0.0, %v4430_v41  ;;  %v4497_v52 = vadd.f32 1.0, %v4465_v20  ;;  %v11201_v30 = vmul.f32 0.70710677, %v11181_v17  ;;  %v8820_v53 = vld [vmem:[%s12751_s6 + $0x68] sm:$0xff] }
 0xccd   :  { %v4908_v26 = vmul.f32 %v4876_v43, %v4428_v6  ;;  %8606 = vrcp.f32 %v4494_v7  ;;  %v4881_v28 = vsub.f32 0.0, %v4433_v1  ;;  %v4432_v50 = vand.u32 2147483647, %v11194_v0  ;;  %8452 = vmatmul.mubr.msk.f32.gmra.mxu1 %vm97_vm0, %v8820_v53 }
 0xcce   :  { %v5092_v4 = vadd.f32 1.0, %v5060_v5  ;;  %v4964_v60 = vmul.f32 1.442695, %v4909_v36  ;;  %8608 = vrcp.f32 %v4497_v52  ;;  %v4435_v29 = vand.u32 2147483647, %v11201_v30  ;;  %v4077_v5 = vpop.f32.mrf.mxu1  ;;  %v8821_v36 = vld [vmem:[%s12751_s6 + $0x70] sm:$0xff] }
 0xccf   :  { %v11209_v20 = vpop.eup %8590  ;;  %v4911_v6 = vmul.f32 %v4879_v14, %v11131_v61  ;;  %v4464_v7 = vmul.f32 0.3275911, %v4432_v50  ;;  %v4880_v43 = vsub.f32 0.0, %v4432_v50  ;;  %v11213_v35 = vadd.f32 %v12931_v57, %v4068_v45  ;;  %8454 = vmatprep.mubr.msk.f32.mxu1 %vm97_vm0, %v8821_v36  ;;  %v3756_v57 = vpop.f32.mrf.mxu0  ;;  %v12933_v36 = vld [vmem:[#allocation27_spill] sm:$0xff] }
 0xcd0   :  { %v11219_v52 = vpop.eup %8592  ;;  %8610 = vrcp.f32 %v4492_v16  ;;  %v4910_v53 = vmul.f32 %v4878_v12, %v4430_v41  ;;  %v4467_v37 = vmul.f32 0.3275911, %v4435_v29  ;;  %v4083_v9 = vadd.f32 %v8368_v18, %v8312_v27  ;;  %v8822_v27 = vld [vmem:[%s12751_s6 + $0x78] sm:$0xff] }
 0xcd1   :  { %12932 = vst [vmem:[#allocation76_spill] sm:$0xff] %v11219_v52  ;;  %v11221_v11 = vpop.eup %8594  ;;  %v4962_v61 = vmul.f32 1.442695, %v4908_v26  ;;  %v4913_v14 = vmul.f32 %v4881_v28, %v4433_v1  ;;  %v4496_v42 = vadd.f32 1.0, %v4464_v7  ;;  %v11224_v45 = vmul.f32 0.70710677, %v11213_v35  ;;  %8455 = vmatmul.mubr.msk.f32.gmra.mxu1 %vm97_vm0, %v8822_v27 }
 0xcd2   :  { %v11226_v21 = vpop.eup %8596  ;;  %v4499_v40 = vadd.f32 1.0, %v4467_v37  ;;  %v4883_v32 = vsub.f32 0.0, %v4435_v29  ;;  %v11229_v62 = vadd.f32 %v12933_v36, %v4083_v9  ;;  %v4078_v16 = vadd.f32 %v4077_v5, %v3756_v57  ;;  %v8823_v37 = vld [vmem:[%s12751_s6 + $0x80] sm:$0xff] }
 0xcd3   :  { %v4968_v26 = vmul.f32 1.442695, %v4911_v6  ;;  %8612 = vrcp.f32 %v4496_v42  ;;  %v4912_v41 = vmul.f32 %v4880_v43, %v4432_v50  ;;  %v4434_v1 = vand.u32 2147483647, %v11224_v45  ;;  %8457 = vmatprep.mubr.msk.f32.mxu1 %vm97_vm0, %v8823_v37  ;;  %v12935_v6 = vld [vmem:[#allocation28_spill] sm:$0xff] }
 0xcd4   :  { %v11241_v9 = vmul.f32 %v5092_v4, %v10986_v54  ;;  %v4966_v18 = vmul.f32 1.442695, %v4910_v53  ;;  %8614 = vrcp.f32 %v4499_v40  ;;  %v11244_v12 = vmul.f32 0.70710677, %v11229_v62  ;;  %v8824_v40 = vld [vmem:[%s12751_s6 + $0x88] sm:$0xff] }
 0xcd5   :  { %v11246_v28 = vpop.eup %8598  ;;  %8616 = vpow2.f32 %v4964_v60  ;;  %v11249_v50 = vmul.f32 0.5, %v11100_v63  ;;  %v4466_v42 = vmul.f32 0.3275911, %v4434_v1  ;;  %v4276_v7 = vadd.f32 %v12935_v6, %v4078_v16  ;;  %8458 = vmatmul.mubr.msk.f32.gmra.mxu1 %vm97_vm0, %v8824_v40 }
 0xcd6   :  { %v11252_v43 = vpop.eup %8600  ;;  %8618 = vpow2.f32 %v4962_v61  ;;  %v4972_v57 = vmul.f32 1.442695, %v4913_v14  ;;  %v4915_v54 = vmul.f32 %v4883_v32, %v4435_v29  ;;  %v4437_v4 = vand.u32 2147483647, %v11244_v12  ;;  %v8825_v61 = vld [vmem:[%s12751_s6 + $0x90] sm:$0xff] }
 0xcd7   :  { %12934 = vst [vmem:[#allocation77_spill] sm:$0xff] %v11249_v50  ;;  %12936 = vst [vmem:[#allocation78_spill] sm:$0xff] %v11252_v43  ;;  %v11259_v60 = vpop.eup %8602  ;;  %8620 = vpow2.f32 %v4968_v26  ;;  %v4970_v63 = vmul.f32 1.442695, %v4912_v41  ;;  %v4498_v5 = vadd.f32 1.0, %v4466_v42  ;;  %8460 = vmatprep.mubr.msk.f32.mxu1 %vm97_vm0, %v8825_v61  ;;  %v11268_v29 = vmul.f32 0.5, %v11141_v31 }
 0xcd8   :  { %v11261_v53 = vmul.f32 0.70710677, %v4276_v7  ;;  %8622 = vpow2.f32 %v4966_v18  ;;  %v11271_v32 = vmul.f32 0.5, %v11144_v15  ;;  %v4469_v14 = vmul.f32 0.3275911, %v4437_v4  ;;  %v8826_v42 = vld [vmem:[%s12751_s6 + $0x98] sm:$0xff] }
 0xcd9   :  { %12937 = vst [vmem:[#allocation79_spill] sm:$0xff] %v11268_v29  ;;  %v11273_v16 = vpop.eup %8604  ;;  %v11276_v27 = vmul.f32 0.5, %v11178_v22  ;;  %8624 = vrcp.f32 %v4498_v5  ;;  %v4882_v26 = vsub.f32 0.0, %v4434_v1  ;;  %v11284_v31 = vmul.f32 0.5, %v11181_v17  ;;  %8461 = vmatmul.mubr.msk.f32.gmra.mxu1 %vm97_vm0, %v8826_v42  ;;  %v8827_v17 = vld [vmem:[%s12751_s6 + $0xa0] sm:$0xff] }
 0xcda   :  { %12938 = vst [vmem:[#allocation80_spill] sm:$0xff] %v11271_v32  ;;  %v11279_v41 = vand.u32 2147483647, %v11261_v53  ;;  %v11281_v37 = vpop.eup %8606  ;;  %8626 = vpow2.f32 %v4972_v57  ;;  %v4976_v18 = vmul.f32 1.442695, %v4915_v54  ;;  %v4501_v15 = vadd.f32 1.0, %v4469_v14  ;;  %8463 = vmatprep.mubr.msk.f32.mxu1 %vm97_vm0, %v8827_v17 }
 0xcdb   :  { %12939 = vst [vmem:[#allocation81_spill] sm:$0xff] %v11276_v27  ;;  %v11290_v22 = vpop.eup %8608  ;;  %8628 = vpow2.f32 %v4970_v63  ;;  %vm4371_vm6 = vcmp.ge.f32.partialorder %v11201_v30, 0.0  ;;  %v11294_v40 = vmul.f32 0.5, %v11213_v35  ;;  %vm4370_vm7 = vcmp.ge.f32.partialorder %v11224_v45, 0.0 }
 0xcdc   :  { %v4468_v57 = vmul.f32 0.3275911, %v11279_v41  ;;  %vm4373_vm8 = vcmp.ge.f32.partialorder %v11244_v12, 0.0  ;;  %8630 = vrcp.f32 %v4501_v15  ;;  %v4593_v54 = vmul.f32 1.0614054, %v11290_v22  ;;  %v8828_v15 = vld [vmem:[%s12751_s6 + $0xa8] sm:$0xff] }
 0xcdd   :  { %v11304_v63 = vpop.eup %8610  ;;  %v4914_v5 = vmul.f32 %v4882_v26, %v4434_v1  ;;  %v4885_v35 = vsub.f32 0.0, %v4437_v4  ;;  %v4591_v14 = vmul.f32 1.0614054, %v11273_v16  ;;  %8632 = vpow2.f32 %v4976_v18  ;;  %8464 = vmatmul.mubr.msk.f32.gmra.mxu1 %vm97_vm0, %v8828_v15 }
 0xcde   :  { %v4500_v61 = vadd.f32 1.0, %v4468_v57  ;;  %v11308_v42 = vmul.f32 0.5, %v11229_v62  ;;  %v4625_v6 = vadd.f32 -1.4531521, %v4593_v54  ;;  %v4590_v17 = vmul.f32 1.0614054, %v11281_v37 }
 0xcdf   :  { %v11315_v36 = vmul.f32 0.5, %v4276_v7  ;;  %v11320_v1 = vsel %vm4371_vm6, 1.0, %v12886_v56  ;;  %v4623_v26 = vadd.f32 -1.4531521, %v4591_v14  ;;  %v8829_v62 = vld [vmem:[%s12751_s6 + $0xb0] sm:$0xff]  ;;  %v11331_v7 = vsel %vm4373_vm8, 1.0, %v12886_v56 }
 0xce0   :  { %8634 = vrcp.f32 %v4500_v61  ;;  %8466 = vmatprep.mubr.msk.f32.mxu1 %vm97_vm0, %v8829_v62  ;;  %v11326_v18 = vpop.eup %8612  ;;  %v4657_v57 = vmul.f32 %v11290_v22, %v4625_v6  ;;  %v4622_v54 = vadd.f32 -1.4531521, %v4590_v17  ;;  %v4589_v30 = vmul.f32 1.0614054, %v11259_v60  ;;  %v8830_v17 = vld [vmem:[%s12751_s6 + $0xb8] sm:$0xff] }
 0xce1   :  { %v11335_v61 = vpop.eup %8614  ;;  %v4974_v14 = vmul.f32 1.442695, %v4914_v5  ;;  %v4917_v15 = vmul.f32 %v4885_v35, %v4437_v4  ;;  %v4592_v52 = vmul.f32 1.0614054, %v11326_v18  ;;  %v4655_v62 = vmul.f32 %v11273_v16, %v4623_v26  ;;  %8467 = vmatmul.mubr.msk.f32.gmra.mxu1 %vm97_vm0, %v8830_v17 }
 0xce2   :  { %v11339_v58 = vpop.eup %8616  ;;  %v4595_v23 = vmul.f32 1.0614054, %v11335_v61  ;;  %v4689_v12 = vadd.f32 1.4214138, %v4657_v57  ;;  %v4654_v24 = vmul.f32 %v11281_v37, %v4622_v54  ;;  %v4588_v6 = vmul.f32 1.0614054, %v11304_v63 }
 0xce3   :  { %v11348_v4 = vpop.eup %8618  ;;  %v4884_v5 = vsub.f32 0.0, %v11279_v41  ;;  %v11354_v35 = vsel %vm4370_vm7, 1.0, %v12886_v56  ;;  %v4624_v26 = vadd.f32 -1.4531521, %v4592_v52  ;;  %v4687_v57 = vadd.f32 1.4214138, %v4655_v62 }
 0xce4   :  { %v8831_v54 = vld [vmem:[%s12751_s6 + $0xc0] sm:$0xff]  ;;  %v11360_v34 = vpop.eup %8620  ;;  %v4627_v17 = vadd.f32 -1.4531521, %v4595_v23  ;;  %v4721_v46 = vmul.f32 %v11290_v22, %v4689_v12  ;;  %v4686_v29 = vadd.f32 1.4214138, %v4654_v24  ;;  %vm4372_vm9 = vcmp.ge.f32.partialorder %v11261_v53, 0.0 }
 0xce5   :  { %8469 = vmatprep.mubr.msk.f32.mxu1 %vm97_vm0, %v8831_v54  ;;  %v4621_v8 = vadd.f32 -1.4531521, %v4589_v30  ;;  %v11363_v43 = vpop.eup %8622  ;;  %v4980_v45 = vmul.f32 1.442695, %v4917_v15  ;;  %v4656_v52 = vmul.f32 %v11326_v18, %v4624_v26  ;;  %v4719_v62 = vmul.f32 %v11273_v16, %v4687_v57  ;;  %v8832_v24 = vld [vmem:[%s12751_s6 + $0xc8] sm:$0xff] }
 0xce6   :  { %v11368_v50 = vpop.eup %8624  ;;  %v4659_v54 = vmul.f32 %v11335_v61, %v4627_v17  ;;  %v4753_v2 = vadd.f32 -0.28449672, %v4721_v46  ;;  %v4718_v23 = vmul.f32 %v11281_v37, %v4686_v29  ;;  %v4620_v27 = vadd.f32 -1.4531521, %v4588_v6  ;;  %8470 = vmatmul.mubr.msk.f32.gmra.mxu1 %vm97_vm0, %v8832_v24  ;;  %v8833_v46 = vld [vmem:[%s12751_s6 + $0xd0] sm:$0xff] }
 0xce7   :  { %v11376_v30 = vpop.eup %8626  ;;  %vm4369_vm10 = vcmp.ge.f32.partialorder %v11160_v3, 0.0  ;;  %v4916_v15 = vmul.f32 %v4884_v5, %v11279_v41  ;;  %v4594_v12 = vmul.f32 1.0614054, %v11368_v50  ;;  %v4688_v26 = vadd.f32 1.4214138, %v4656_v52  ;;  %8472 = vmatprep.mubr.msk.f32.mxu1 %vm97_vm0, %v8833_v46 }
 0xce8   :  { %v4751_v57 = vadd.f32 -0.28449672, %v4719_v62  ;;  %v11385_v29 = vpop.eup %8628  ;;  %vm4368_vm11 = vcmp.ge.f32.partialorder %v11194_v0, 0.0  ;;  %v4691_v6 = vadd.f32 1.4214138, %v4659_v54  ;;  %v4785_v17 = vmul.f32 %v11290_v22, %v4753_v2 }
 0xce9   :  { %v4750_v24 = vadd.f32 -0.28449672, %v4718_v23  ;;  %v4653_v41 = vmul.f32 %v11259_v60, %v4621_v8  ;;  %v11390_v5 = vpop.eup %8630  ;;  %vm4367_vm12 = vcmp.ge.f32.partialorder %v11124_v13, 0.0  ;;  %8636 = vpow2.f32 %v4974_v14  ;;  %v8834_v8 = vld [vmem:[%s12751_s6 + $0xd8] sm:$0xff] }
 0xcea   :  { %v4626_v52 = vadd.f32 -1.4531521, %v4594_v12  ;;  %v4720_v62 = vmul.f32 %v11326_v18, %v4688_v26  ;;  %v4783_v46 = vmul.f32 %v11273_v16, %v4751_v57  ;;  %v4597_v47 = vmul.f32 1.0614054, %v11390_v5  ;;  %8473 = vmatmul.mubr.msk.f32.gmra.mxu1 %vm97_vm0, %v8834_v8  ;;  %v11402_v23 = vpop.eup %8632  ;;  %v8835_v57 = vld [vmem:[%s12751_s6 + $0xe0] sm:$0xff] }
 0xceb   :  { %v4723_v55 = vmul.f32 %v11335_v61, %v4691_v6  ;;  %v4817_v54 = vadd.f32 0.2548296, %v4785_v17  ;;  %v4782_v2 = vmul.f32 %v11281_v37, %v4750_v24  ;;  %8638 = vpow2.f32 %v4980_v45  ;;  %8475 = vmatprep.mubr.msk.f32.mxu1 %vm97_vm0, %v8835_v57 }
 0xcec   :  { %v4978_v14 = vmul.f32 1.442695, %v4916_v15  ;;  %v4658_v12 = vmul.f32 %v11368_v50, %v4626_v52  ;;  %v4752_v26 = vadd.f32 -0.28449672, %v4720_v62  ;;  %vm4366_vm13 = vcmp.ge.f32.partialorder %v11156_v10, 0.0 }
 0xced   :  { %v11409_v6 = vpop.eup %8634  ;;  %v4629_v17 = vadd.f32 -1.4531521, %v4597_v47  ;;  %v4755_v24 = vadd.f32 -0.28449672, %v4723_v55  ;;  %v4685_v8 = vadd.f32 1.4214138, %v4653_v41  ;;  %v4652_v32 = vmul.f32 %v11304_v63, %v4620_v27 }
 0xcee   :  { %vm4365_vm14 = vcmp.ge.f32.partialorder %v11089_v44, 0.0  ;;  %vm4364_vm15 = vcmp.ge.f32.partialorder %v11108_v38, 0.0  ;;  %v4596_v45 = vmul.f32 1.0614054, %v11409_v6  ;;  %v4690_v15 = vadd.f32 1.4214138, %v4658_v12 }
 0xcef   :  { %v4784_v52 = vmul.f32 %v11326_v18, %v4752_v26  ;;  %v4815_v62 = vadd.f32 0.2548296, %v4783_v46  ;;  %v4661_v57 = vmul.f32 %v11390_v5, %v4629_v17  ;;  %v4787_v39 = vmul.f32 %v11335_v61, %v4755_v24  ;;  %v8836_v27 = vld [vmem:[%s12751_s6 + $0xe8] sm:$0xff] }
 0xcf0   :  { %v4849_v47 = vmul.f32 %v11290_v22, %v4817_v54  ;;  %v4814_v55 = vadd.f32 0.2548296, %v4782_v2  ;;  %8476 = vmatmul.mubr.msk.f32.gmra.mxu1 %vm97_vm0, %v8836_v27  ;;  %v11427_v41 = vsel %vm4372_vm9, 1.0, %v12886_v56  ;;  %v4628_v12 = vadd.f32 -1.4531521, %v4596_v45  ;;  %v8837_v22 = vld [vmem:[%s12751_s6 + $0xf0] sm:$0xff] }
 0xcf1   :  { %v4722_v46 = vmul.f32 %v11368_v50, %v4690_v15  ;;  %v4816_v26 = vadd.f32 0.2548296, %v4784_v52  ;;  %8478 = vmatprep.mubr.msk.f32.mxu1 %vm97_vm0, %v8837_v22  ;;  %8640 = vpow2.f32 %v4978_v14  ;;  %v4693_v54 = vadd.f32 1.4214138, %v4661_v57 }
 0xcf2   :  { %v4717_v2 = vmul.f32 %v11259_v60, %v4685_v8  ;;  %v4684_v17 = vadd.f32 1.4214138, %v4652_v32  ;;  %vm4363_vm1 = vcmp.ge.f32.partialorder %v11040_v25, 0.0  ;;  %v4660_v53 = vmul.f32 %v11409_v6, %v4628_v12  ;;  %v8838_v32 = vld [vmem:[%s12751_s6 + $0xf8] sm:$0xff]  ;;  %s6760_s6 = sshll.u32 %s8913_s20, 4  ;;  %s6761_s6 = int_to_ptr.vmem [resolvable:$true] %s6760_s6 }
 0xcf3   :  { %v4819_v24 = vadd.f32 0.2548296, %v4787_v39  ;;  %v4754_v45 = vadd.f32 -0.28449672, %v4722_v46  ;;  %v4847_v15 = vmul.f32 %v11273_v16, %v4815_v62  ;;  %v4725_v52 = vmul.f32 %v11390_v5, %v4693_v54  ;;  %s8887_s21 = scalar_lea.vmem %s6761_s6, 1024  ;;  %p8892_p1 = scmp.lt.s32.totalorder %s6761_s6, %s6761_s6 }
 0xcf4   :  { %v4401_v27 = vsel %vm4369_vm10, 1.0, %v12886_v56  ;;  %v5009_v14 = vmul.f32 %v11376_v30, %v4849_v47  ;;  %v4846_v57 = vmul.f32 %v11281_v37, %v4814_v55  ;;  %8479 = vmatmul.mubr.msk.f32.gmra.mxu1 %vm97_vm0, %v8838_v32  ;;  %v4692_v39 = vadd.f32 1.4214138, %v4660_v53  ;;  %p8888_p0 = scmp.ne.s32.totalorder %s6761_s6, %s8887_s21  ;;  %p8893_p2 = scmp.lt.s32.totalorder %s8887_s21, %s8887_s21 }
 0xcf5   :  { %v4786_v8 = vmul.f32 %v11368_v50, %v4754_v45  ;;  %v4400_v16 = vsel %vm4368_vm11, 1.0, %v12886_v56  ;;  %v4848_v3 = vmul.f32 %v11326_v18, %v4816_v26  ;;  %v4757_v62 = vadd.f32 -0.28449672, %v4725_v52 }
 0xcf6   :  { %v4399_v37 = vsel %vm4367_vm12, 1.0, %v12886_v56  ;;  %v4749_v30 = vadd.f32 -0.28449672, %v4717_v2  ;;  %v4716_v47 = vmul.f32 %v11304_v63, %v4684_v17  ;;  %v4724_v55 = vmul.f32 %v11409_v6, %v4692_v39  ;;  %v8637_v54 = vpop.eup %8636  ;;  %p8894_p3 = por %p8893_p2, %p8892_p1 }
 0xcf7   :  { %v4851_v12 = vmul.f32 %v11335_v61, %v4819_v24  ;;  %v4818_v46 = vadd.f32 0.2548296, %v4786_v8  ;;  %v5007_v22 = vmul.f32 %v11360_v34, %v4847_v15  ;;  %v4789_v0 = vmul.f32 %v11390_v5, %v4757_v62 }
 0xcf8   :  { %v5041_v53 = vsub.f32 1.0, %v5009_v14  ;;  %v5006_v18 = vmul.f32 %v11363_v43, %v4846_v57  ;;  %v4587_v26 = vmul.f32 1.0614054, %v11221_v11  ;;  %v4756_v13 = vadd.f32 -0.28449672, %v4724_v55  ;;  %v8639_v24 = vpop.eup %8638  ;;  %p8895_p4 = pnand %p8894_p3, %p8888_p0 }
 0xcf9   :  { %v4850_v2 = vmul.f32 %v11368_v50, %v4818_v46  ;;  %v5008_v17 = vmul.f32 %v11385_v29, %v4848_v3  ;;  %v4398_v61 = vsel %vm4366_vm13, 1.0, %v12886_v56  ;;  %v4821_v45 = vadd.f32 0.2548296, %v4789_v0 }
 0xcfa   :  { %v11471_v34 = vsel %vm4365_vm14, 1.0, %v12886_v56  ;;  %v4781_v43 = vmul.f32 %v11259_v60, %v4749_v30  ;;  %v11477_v15 = vsel %vm4364_vm15, 1.0, %v12886_v56  ;;  %v4788_v50 = vmul.f32 %v11409_v6, %v4756_v13 }
 0xcfb   :  { %v5011_v29 = vmul.f32 %v11402_v23, %v4851_v12  ;;  %v5039_v10 = vsub.f32 1.0, %v5007_v22  ;;  %v4748_v52 = vadd.f32 -0.28449672, %v4716_v47  ;;  %v4853_v14 = vmul.f32 %v11390_v5, %v4821_v45 }
 0xcfc   :  { %v5073_v57 = vmul.f32 %v5041_v53, %v4401_v27  ;;  %v5038_v32 = vsub.f32 1.0, %v5006_v18  ;;  %v4619_v44 = vadd.f32 -1.4531521, %v4587_v26  ;;  %v4820_v39 = vadd.f32 0.2548296, %v4788_v50 }
 0xcfd   :  { %v5010_v8 = vmul.f32 %v8637_v54, %v4850_v2  ;;  %v5040_v3 = vsub.f32 1.0, %v5008_v17  ;;  %v4780_v62 = vmul.f32 %v11304_v63, %v4748_v52  ;;  %v5013_v30 = vmul.f32 %v8639_v24, %v4853_v14 }
 0xcfe   :  { %v4813_v38 = vadd.f32 0.2548296, %v4781_v43  ;;  %v11486_v55 = vsel %vm4363_vm1, 1.0, %v12886_v56  ;;  %v4651_v23 = vmul.f32 %v11221_v11, %v4619_v44  ;;  %v8641_v47 = vpop.eup %8640  ;;  %v4852_v5 = vmul.f32 %v11409_v6, %v4820_v39 }
 0xcff   :  { %v5043_v27 = vsub.f32 1.0, %v5011_v29  ;;  %v5071_v12 = vmul.f32 %v5039_v10, %v4399_v37  ;;  %v4812_v46 = vadd.f32 0.2548296, %v4780_v62  ;;  %v5045_v22 = vsub.f32 1.0, %v5013_v30 }
 0xd00   :  { %v11490_v54 = vadd.f32 1.0, %v5073_v57  ;;  %v4683_v0 = vadd.f32 1.4214138, %v4651_v23  ;;  %v4586_v53 = vmul.f32 1.0614054, %v11246_v28  ;;  %v5012_v18 = vmul.f32 %v8641_v47, %v4852_v5 }
 0xd01   :  { %v5042_v26 = vsub.f32 1.0, %v5010_v8  ;;  %v5072_v13 = vmul.f32 %v5040_v3, %v4400_v16  ;;  %v11493_v25 = vmul.f32 %v5038_v32, %v4398_v61  ;;  %v5077_v2 = vmul.f32 %v5045_v22, %v11331_v7 }
 0xd02   :  { %v4845_v17 = vmul.f32 %v11259_v60, %v4813_v38  ;;  %v4715_v6 = vmul.f32 %v11221_v11, %v4683_v0  ;;  %v4618_v24 = vadd.f32 -1.4531521, %v4586_v53  ;;  %v5044_v37 = vsub.f32 1.0, %v5012_v18 }
 0xd03   :  { %v5075_v45 = vmul.f32 %v5043_v27, %v11320_v1  ;;  %v11499_v43 = vadd.f32 1.0, %v5071_v12  ;;  %v4585_v50 = vmul.f32 1.0614054, %v11183_v51  ;;  %v5109_v29 = vadd.f32 1.0, %v5077_v2  ;;  %v12940_v2 = vld [vmem:[#allocation70_spill] sm:$0xff] }
 0xd04   :  { %v4844_v10 = vmul.f32 %v11304_v63, %v4812_v46  ;;  %v4747_v16 = vadd.f32 -0.28449672, %v4715_v6  ;;  %v4650_v61 = vmul.f32 %v11246_v28, %v4618_v24  ;;  %v5076_v7 = vmul.f32 %v5044_v37, %v11427_v41 }
 0xd05   :  { %v5074_v60 = vmul.f32 %v5042_v26, %v11354_v35  ;;  %v5104_v52 = vadd.f32 1.0, %v5072_v13  ;;  %v4617_v14 = vadd.f32 -1.4531521, %v4585_v50  ;;  %v5141_v57 = vmul.f32 %v5109_v29, %v11308_v42  ;;  %v12942_v29 = vld [vmem:[#allocation72_spill] sm:$0xff] }
 0xd06   :  { %v5005_v1 = vmul.f32 %v11339_v58, %v4845_v17  ;;  %v4779_v32 = vmul.f32 %v11221_v11, %v4747_v16  ;;  %v4682_v44 = vadd.f32 1.4214138, %v4650_v61  ;;  %v5108_v39 = vadd.f32 1.0, %v5076_v7  ;;  %v12941_v17 = vld [vmem:[#allocation80_spill] sm:$0xff]  ;;  %v12944_v7 = vld [vmem:[#allocation81_spill] sm:$0xff] }
 0xd07   :  { %v5107_v8 = vadd.f32 1.0, %v5075_v45  ;;  %v4649_v63 = vmul.f32 %v11183_v51, %v4617_v14  ;;  %v4584_v3 = vmul.f32 1.0614054, %v11209_v20  ;;  %7475 = vmatprep.subr.mxu0 %v5141_v57  ;;  %v5004_v41 = vmul.f32 %v11348_v4, %v4844_v10  ;;  %v12943_v61 = vld [vmem:[#allocation64_spill] sm:$0xff] }
 0xd08   :  { %v4811_v62 = vadd.f32 0.2548296, %v4779_v32  ;;  %v4714_v35 = vmul.f32 %v11246_v28, %v4682_v44  ;;  %v4583_v30 = vmul.f32 1.0614054, %v11102_v59  ;;  %7476 = vmatpush3.msra.mxu0 %v11151_v33  ;;  %v5140_v58 = vmul.f32 %v5108_v39, %v11315_v36  ;;  %v12945_v32 = vld [vmem:[#allocation67_spill] sm:$0xff]  ;;  %v12946_v44 = vld [vmem:[#allocation77_spill] sm:$0xff] }
 0xd09   :  { %v5106_v42 = vadd.f32 1.0, %v5074_v60  ;;  %v4681_v38 = vadd.f32 1.4214138, %v4649_v63  ;;  %v4616_v23 = vadd.f32 -1.4531521, %v4584_v3  ;;  %vm4362_vm2 = vcmp.ge.f32.partialorder %v11068_v19, 0.0 }
 0xd0a   :  { %v5037_v47 = vsub.f32 1.0, %v5005_v1  ;;  %v4843_v5 = vmul.f32 %v11221_v11, %v4811_v62  ;;  %v4746_v27 = vadd.f32 -0.28449672, %v4714_v35  ;;  %v4615_v12 = vadd.f32 -1.4531521, %v4583_v30  ;;  %7477 = vmatprep.subr.mxu0 %v5140_v58  ;;  %v12948_v62 = vld [vmem:[#allocation69_spill] sm:$0xff] }
 0xd0b   :  { %v5139_v4 = vmul.f32 %v5107_v8, %v11284_v31  ;;  %v4713_v46 = vmul.f32 %v11183_v51, %v4681_v38  ;;  %v4648_v22 = vmul.f32 %v11209_v20, %v4616_v23  ;;  %v4582_v33 = vmul.f32 1.0614054, %v11126_v48  ;;  %7478 = vmatpush3.msra.mxu0 %v11241_v9  ;;  %v12947_v8 = vld [vmem:[#allocation78_spill] sm:$0xff]  ;;  %v12949_v35 = vld [vmem:[#allocation79_spill] sm:$0xff] }
 0xd0c   :  { %v5036_v36 = vsub.f32 1.0, %v5004_v41  ;;  %v5003_v0 = vmul.f32 %v11226_v21, %v4843_v5  ;;  %v4778_v53 = vmul.f32 %v11246_v28, %v4746_v27  ;;  %v4647_v11 = vmul.f32 %v11102_v59, %v4615_v12  ;;  %v12951_v5 = vld [vmem:[#allocation68_spill] sm:$0xff]  ;;  %v12952_v12 = vld [vmem:[#allocation55_spill] sm:$0xff] }
 0xd0d   :  { %vm4361_vm3 = vcmp.ge.f32.partialorder %v11012_v49, 0.0  ;;  %7479 = vmatprep.subr.mxu0 %v5139_v4  ;;  %v5138_v31 = vmul.f32 %v5106_v42, %v11294_v40  ;;  %v4745_v18 = vadd.f32 -0.28449672, %v4713_v46  ;;  %v4680_v26 = vadd.f32 1.4214138, %v4648_v22  ;;  %v12953_v4 = vld [vmem:[#allocation73_spill] sm:$0xff] }
 0xd0e   :  { %v4614_v13 = vadd.f32 -1.4531521, %v4582_v33  ;;  %7480 = vmatpush3.msra.mxu0 %v12940_v2  ;;  %v5137_v9 = vmul.f32 %v11490_v54, %v12941_v17  ;;  %v5069_v6 = vmul.f32 %v5037_v47, %v11471_v34  ;;  %v4810_v21 = vadd.f32 0.2548296, %v4778_v53 }
 0xd0f   :  { %v4679_v24 = vadd.f32 1.4214138, %v4647_v11  ;;  %7481 = vmatprep.subr.mxu0 %v5138_v31  ;;  %v5035_v37 = vsub.f32 1.0, %v5003_v0  ;;  %v4777_v45 = vmul.f32 %v11183_v51, %v4745_v18  ;;  %v4712_v50 = vmul.f32 %v11209_v20, %v4680_v26  ;;  %v12954_v11 = vld [vmem:[#allocation63_spill] sm:$0xff]  ;;  %v12955_v18 = vld [vmem:[#allocation66_spill] sm:$0xff] }
 0xd10   :  { %v4646_v40 = vmul.f32 %v11126_v48, %v4614_v13  ;;  %7482 = vmatpush3.msra.mxu0 %v12942_v29  ;;  %v5102_v10 = vadd.f32 1.0, %v11493_v25  ;;  %v5068_v16 = vmul.f32 %v5036_v36, %v11477_v15  ;;  %v4842_v54 = vmul.f32 %v11246_v28, %v4810_v21 }
 0xd11   :  { %v4711_v34 = vmul.f32 %v11102_v59, %v4679_v24  ;;  %vm4360_vm4 = vcmp.ge.f32.partialorder %v12943_v61, 0.0  ;;  %7483 = vmatprep.subr.mxu0 %v5137_v9  ;;  %v5136_v60 = vmul.f32 %v5104_v52, %v12944_v7  ;;  %v4809_v14 = vadd.f32 0.2548296, %v4777_v45 }
 0xd12   :  { %v4744_v57 = vadd.f32 -0.28449672, %v4712_v50  ;;  %v4678_v1 = vadd.f32 1.4214138, %v4646_v40  ;;  %7484 = vmatpush3.msra.mxu0 %v12945_v32  ;;  %v5135_v39 = vmul.f32 %v11499_v43, %v12946_v44  ;;  %v5101_v25 = vadd.f32 1.0, %v5069_v6  ;;  %v12956_v6 = vld [vmem:[#allocation76_spill] sm:$0xff] }
 0xd13   :  { %v5002_v15 = vmul.f32 %v12947_v8, %v4842_v54  ;;  %v4743_v63 = vadd.f32 -0.28449672, %v4711_v34  ;;  %7485 = vmatprep.subr.mxu0 %v5136_v60  ;;  %v5067_v28 = vmul.f32 %v5035_v37, %v11486_v55  ;;  %v4841_v3 = vmul.f32 %v11183_v51, %v4809_v14  ;;  %v12950_v55 = vld [vmem:[#allocation75_spill] sm:$0xff]  ;;  %v12958_v37 = vld [vmem:[#allocation52_spill] sm:$0xff]  ;;  %v12959_v50 = vld [vmem:[#allocation57_spill] sm:$0xff] }
 0xd14   :  { %v4776_v41 = vmul.f32 %v11209_v20, %v4744_v57  ;;  %v4710_v52 = vmul.f32 %v11126_v48, %v4678_v1  ;;  %7486 = vmatpush3.msra.mxu0 %v12948_v62  ;;  %v5134_v30 = vmul.f32 %v5102_v10, %v12949_v35  ;;  %v5100_v58 = vadd.f32 1.0, %v5068_v16  ;;  %v12960_v40 = vld [vmem:[#allocation65_spill] sm:$0xff]  ;;  %v12961_v10 = vld [vmem:[#allocation51_spill] sm:$0xff]  ;;  %v12964_v14 = vld [vmem:[#allocation60_spill] sm:$0xff] }
 0xd15   :  { %v5034_v42 = vsub.f32 1.0, %v5002_v15  ;;  %v4775_v43 = vmul.f32 %v11102_v59, %v4743_v63  ;;  %7487 = vmatprep.subr.mxu0 %v5135_v39  ;;  %v4394_v38 = vsel %vm4362_vm2, 1.0, %v12886_v56  ;;  %v5001_v23 = vmul.f32 %v12950_v55, %v4841_v3  ;;  %v12962_v16 = vld [vmem:[#allocation71_spill] sm:$0xff]  ;;  %v12963_v60 = vld [vmem:[#allocation61_spill] sm:$0xff]  ;;  %v12965_v8 = vld [vmem:[#allocation74_spill] sm:$0xff] }
 0xd16   :  { %v4808_v51 = vadd.f32 0.2548296, %v4776_v41  ;;  %v4742_v47 = vadd.f32 -0.28449672, %v4710_v52  ;;  %v4300_v27 = vmul.f32 0.5, %v12951_v5  ;;  %7488 = vmatpush3.msra.mxu0 %v12952_v12  ;;  %v5133_v46 = vmul.f32 %v5101_v25, %v12953_v4  ;;  %v12967_v63 = vld [vmem:[#allocation41_spill] sm:$0xff] }
 0xd17   :  { %v5066_v22 = vmul.f32 %v5034_v42, %v4394_v38  ;;  %v4807_v33 = vadd.f32 0.2548296, %v4775_v43  ;;  %7489 = vmatprep.subr.mxu0 %v5134_v30  ;;  %v5099_v36 = vadd.f32 1.0, %v5067_v28  ;;  %v5033_v0 = vsub.f32 1.0, %v5001_v23  ;;  %v12969_v41 = vld [vmem:[#allocation46_spill] sm:$0xff]  ;;  %v12970_v62 = vld [vmem:[#allocation35_spill] sm:$0xff] }
 0xd18   :  { %v4840_v53 = vmul.f32 %v11209_v20, %v4808_v51  ;;  %v4774_v19 = vmul.f32 %v11126_v48, %v4742_v47  ;;  %v4299_v31 = vmul.f32 0.5, %v12954_v11  ;;  %7490 = vmatpush3.msra.mxu0 %v12955_v18  ;;  %v5132_v26 = vmul.f32 %v5100_v58, %v4300_v27  ;;  %v12957_v20 = vld [vmem:[#allocation37_spill] sm:$0xff]  ;;  %v12972_v30 = vld [vmem:[#allocation48_spill] sm:$0xff]  ;;  %v12973_v42 = vld [vmem:[#allocation62_spill] sm:$0xff] }
 0xd19   :  { %v4393_v13 = vsel %vm4361_vm3, 1.0, %v12886_v56  ;;  %v4839_v2 = vmul.f32 %v11102_v59, %v4807_v33  ;;  %7491 = vmatprep.subr.mxu0 %v5133_v46  ;;  %v5098_v17 = vadd.f32 1.0, %v5066_v22  ;;  %v5116_v45 = vmul.f32 %v12958_v37, %v12957_v20  ;;  %v12971_v35 = vld [vmem:[#allocation49_spill] sm:$0xff]  ;;  %v12974_v51 = vld [vmem:[#allocation43_spill] sm:$0xff]  ;;  %v12977_v22 = vld [vmem:[#allocation56_spill] sm:$0xff] }
 0xd1a   :  { %v5065_v9 = vmul.f32 %v5033_v0, %v4393_v13  ;;  %v5000_v21 = vmul.f32 %v12956_v6, %v4840_v53  ;;  %v4806_v24 = vadd.f32 0.2548296, %v4774_v19  ;;  %vm4359_vm5 = vcmp.ge.f32.partialorder %v12959_v50, 0.0  ;;  %7492 = vmatpush3.msra.mxu0 %v12961_v10  ;;  %v12975_v5 = vld [vmem:[#allocation31_spill] sm:$0xff]  ;;  %v12976_v27 = vld [vmem:[#allocation45_spill] sm:$0xff]  ;;  %v12978_v53 = vld [vmem:[#allocation24_spill] sm:$0xff] }
 0xd1b   :  { %v4298_v29 = vmul.f32 0.5, %v12960_v40  ;;  %v4999_v49 = vmul.f32 %v12962_v16, %v4839_v2  ;;  %7493 = vmatprep.subr.mxu0 %v5132_v26  ;;  %v5131_v54 = vmul.f32 %v5099_v36, %v4299_v31  ;;  %vm4358_vm6 = vcmp.ge.f32.partialorder %v12963_v60, 0.0  ;;  %v12979_v31 = vld [vmem:[#allocation33_spill] sm:$0xff]  ;;  %v12980_v26 = vld [vmem:[#allocation59_spill] sm:$0xff]  ;;  %v12981_v6 = vld [vmem:[#allocation26_spill] sm:$0xff] }
 0xd1c   :  { %v5097_v59 = vadd.f32 1.0, %v5065_v9  ;;  %v5032_v34 = vsub.f32 1.0, %v5000_v21  ;;  %v4838_v7 = vmul.f32 %v11126_v48, %v4806_v24  ;;  %v4297_v57 = vmul.f32 0.5, %v12964_v14  ;;  %7494 = vmatpush3.msra.mxu0 %v5116_v45  ;;  %v12966_v48 = vld [vmem:[#allocation30_spill] sm:$0xff]  ;;  %v3424_v37 = vld [vmem:[%s12754_s9] sm:$0xff]  ;;  %v3427_v45 = vld [vmem:[%s12754_s9 + $0x18] sm:$0xff] }
 0xd1d   :  { %v4392_v1 = vsel %vm4360_vm4, 1.0, %v12886_v56  ;;  %v5031_v32 = vsub.f32 1.0, %v4999_v49  ;;  %7495 = vmatprep.subr.mxu0 %v5131_v54  ;;  %v5130_v44 = vmul.f32 %v5098_v17, %v4298_v29  ;;  %v4391_v25 = vsel %vm4359_vm5, 1.0, %v12886_v56  ;;  %v12982_v50 = vld [vmem:[#allocation21_spill] sm:$0xff]  ;;  %v3426_v40 = vld [vmem:[%s12754_s9 + $0x10] sm:$0xff]  ;;  %v12983_v29 = vld [vmem:[#allocation8_spill] sm:$0xff] }
 0xd1e   :  { %v5064_v39 = vmul.f32 %v5032_v34, %v4392_v1  ;;  %v4998_v15 = vmul.f32 %v12965_v8, %v4838_v7  ;;  %v12968_v28 = vsub.f32 1.0, %v12967_v63  ;;  %v5080_v52 = vadd.f32 1.0, %v12969_v41  ;;  %7496 = vmatpush3.msra.mxu0 %v12972_v30  ;;  %v3429_v10 = vld [vmem:[%s12754_s9 + $0x28] sm:$0xff]  ;;  %v12984_v16 = vld [vmem:[#allocation20_spill] sm:$0xff]  ;;  %v3428_v49 = vld [vmem:[%s12754_s9 + $0x20] sm:$0xff] }
 0xd1f   :  { %v5114_v61 = vmul.f32 %v12971_v35, %v12970_v62  ;;  %v5063_v58 = vmul.f32 %v5031_v32, %v4391_v25  ;;  %v4296_v43 = vmul.f32 0.5, %v12973_v42  ;;  %7497 = vmatprep.subr.mxu0 %v5130_v44  ;;  %v5129_v38 = vmul.f32 %v5097_v59, %v4297_v57  ;;  %v12985_v54 = vld [vmem:[#allocation6_spill] sm:$0xff]  ;;  %v3431_v59 = vld [vmem:[%s12754_s9 + $0x38] sm:$0xff]  ;;  %v3430_v34 = vld [vmem:[%s12754_s9 + $0x30] sm:$0xff] }
 0xd20   :  { %v5046_v3 = vmul.f32 %v12968_v28, %v12966_v48  ;;  %v5096_v55 = vadd.f32 1.0, %v5064_v39  ;;  %v5030_v23 = vsub.f32 1.0, %v4998_v15  ;;  %v5079_v47 = vadd.f32 1.0, %v12974_v51  ;;  %v8839_v7 = vld [vmem:[%s12752_s7] sm:$0xff]  ;;  %v8840_v60 = vld [vmem:[%s12752_s7 + $0x8] sm:$0xff]  ;;  %v8841_v14 = vld [vmem:[%s12752_s7 + $0x10] sm:$0xff] }
 0xd21   :  { %v5113_v12 = vmul.f32 %v12976_v27, %v12975_v5  ;;  %7498 = vmatpush3.msra.mxu0 %v5114_v61  ;;  %v5095_v4 = vadd.f32 1.0, %v5063_v58  ;;  %v4390_v46 = vsel %vm4358_vm6, 1.0, %v12886_v56  ;;  %v4295_v33 = vmul.f32 0.5, %v12977_v22  ;;  %v8842_v57 = vld [vmem:[%s12752_s7 + $0x18] sm:$0xff]  ;;  %v8843_v1 = vld [vmem:[%s12752_s7 + $0x20] sm:$0xff]  ;;  %v8844_v32 = vld [vmem:[%s12752_s7 + $0x28] sm:$0xff]  ;;  %v11766_v22 = vpop.permute.xlu1 %5149 }
 0xd22   :  { %7499 = vmatprep.subr.mxu0 %v5129_v38  ;;  %v5128_v36 = vmul.f32 %v5096_v55, %v4296_v43  ;;  %v5062_v0 = vmul.f32 %v5030_v23, %v4390_v46  ;;  %v4279_v19 = vmul.f32 0.5, %v12978_v53  ;;  %v5078_v11 = vadd.f32 1.0, %v5046_v3  ;;  %v8845_v44 = vld [vmem:[%s12752_s7 + $0x30] sm:$0xff]  ;;  %v8846_v39 = vld [vmem:[%s12752_s7 + $0x38] sm:$0xff]  ;;  %v8847_v25 = vld [vmem:[%s12752_s7 + $0x40] sm:$0xff]  ;;  %v11764_v46 = vpop.permute.xlu0 %5144  ;;  %12987 = vst [vmem:[#allocation80_spill] sm:$0xff] %v11766_v22 }
 0xd23   :  { %v5112_v18 = vmul.f32 %v5080_v52, %v12979_v31  ;;  %7500 = vmatpush3.msra.mxu0 %v5113_v12  ;;  %v4294_v13 = vmul.f32 0.5, %v12980_v26  ;;  %v5127_v2 = vmul.f32 %v5095_v4, %v4295_v33  ;;  %v4278_v21 = vmul.f32 0.5, %v12981_v6  ;;  %v8848_v8 = vld [vmem:[%s12752_s7 + $0x48] sm:$0xff]  ;;  %v8849_v15 = vld [vmem:[%s12752_s7 + $0x50] sm:$0xff]  ;;  %v8850_v48 = vld [vmem:[%s12752_s7 + $0x58] sm:$0xff]  ;;  %12986 = vst [vmem:[#allocation70_spill] sm:$0xff] %v11764_v46 }
 0xd24   :  { %7501 = vmatprep.subr.mxu0 %v5128_v36  ;;  %v5094_v17 = vadd.f32 1.0, %v5062_v0  ;;  %v5111_v9 = vmul.f32 %v5079_v47, %v4279_v19  ;;  %v8851_v63 = vld [vmem:[%s12752_s7 + $0x60] sm:$0xff]  ;;  %v8852_v28 = vld [vmem:[%s12752_s7 + $0x68] sm:$0xff]  ;;  %v8853_v3 = vld [vmem:[%s12752_s7 + $0x70] sm:$0xff] }
 0xd25   :  { %7502 = vmatpush3.msra.mxu0 %v5112_v18  ;;  %v5110_v20 = vmul.f32 %v5078_v11, %v4278_v21  ;;  %v8854_v41 = vld [vmem:[%s12752_s7 + $0x78] sm:$0xff]  ;;  %v8855_v52 = vld [vmem:[%s12752_s7 + $0x80] sm:$0xff]  ;;  %v8856_v62 = vld [vmem:[%s12752_s7 + $0x88] sm:$0xff]  ;;  %v11770_v36 = vpop.permute.xlu1 %5159 }
 0xd26   :  { %7503 = vmatprep.subr.mxu0 %v5127_v2  ;;  %v5126_v24 = vmul.f32 %v5094_v17, %v4294_v13  ;;  %v8857_v35 = vld [vmem:[%s12752_s7 + $0x90] sm:$0xff]  ;;  %v8858_v61 = vld [vmem:[%s12752_s7 + $0x98] sm:$0xff]  ;;  %v8859_v30 = vld [vmem:[%s12752_s7 + $0xa0] sm:$0xff]  ;;  %v11768_v33 = vpop.permute.xlu0 %5154  ;;  %12989 = vst [vmem:[#allocation64_spill] sm:$0xff] %v11770_v36 }
 0xd27   :  { %7504 = vmatpush3.msra.mxu0 %v5111_v9  ;;  %v8860_v58 = vld [vmem:[%s12752_s7 + $0xa8] sm:$0xff]  ;;  %v8861_v42 = vld [vmem:[%s12752_s7 + $0xb0] sm:$0xff]  ;;  %v8862_v43 = vld [vmem:[%s12752_s7 + $0xb8] sm:$0xff]  ;;  %12988 = vst [vmem:[#allocation72_spill] sm:$0xff] %v11768_v33 }
 0xd28   :  { %7505 = vmatprep.subr.mxu0 %v5126_v24  ;;  %v8863_v38 = vld [vmem:[%s12752_s7 + $0xc0] sm:$0xff]  ;;  %v8864_v55 = vld [vmem:[%s12752_s7 + $0xc8] sm:$0xff]  ;;  %v8865_v23 = vld [vmem:[%s12752_s7 + $0xd0] sm:$0xff] }
 0xd29   :  { %7506 = vmatpush3.msra.mxu0 %v5110_v20  ;;  %v8866_v51 = vld [vmem:[%s12752_s7 + $0xd8] sm:$0xff]  ;;  %v8867_v47 = vld [vmem:[%s12752_s7 + $0xe0] sm:$0xff]  ;;  %v8868_v5 = vld [vmem:[%s12752_s7 + $0xe8] sm:$0xff]  ;;  %v11774_v19 = vpop.permute.xlu1 %5258 }
 0xd2a   :  { %5227 = vmatmul.mubr.f32.vlgmr.msra.gmra.mxu0 %v3424_v37  ;;  %8369 = vmatprep.subr.mxu0 %v12982_v50  ;;  %v8869_v27 = vld [vmem:[%s12752_s7 + $0xf0] sm:$0xff]  ;;  %v8870_v12 = vld [vmem:[%s12752_s7 + $0xf8] sm:$0xff]  ;;  %v8871_v4 = vld [vmem:[%s12754_s9 + $0x8] sm:$0xff]  ;;  %v11772_v0 = vpop.permute.xlu0 %5253  ;;  %12991 = vst [vmem:[#allocation67_spill] sm:$0xff] %v11774_v19 }
 0xd2b   :  { %8370 = vmatpush3.msra.mxu0 %v12982_v50  ;;  %5231 = vmatprep.mubr.f32.mxu0 %v3427_v45  ;;  %12990 = vst [vmem:[#allocation81_spill] sm:$0xff] %v11772_v0  ;;  %v8872_v17 = vld [vmem:[%s12745_s0] sm:$0xff] }
 0xd2c   :  { %8371 = vmatprep.subr.mxu0 %v12983_v29 }
 0xd2d   :  { %8372 = vmatpush3.msra.mxu0 %v12983_v29  ;;  %v11782_v21 = vpop.permute.xlu1 %5268 }
 0xd2e   :  { %5232 = vmatmul.mubr.f32.gmra.mxu0 %v3426_v40  ;;  %8373 = vmatprep.subr.mxu0 %v12984_v16  ;;  %v11776_v18 = vpop.permute.xlu0 %5263  ;;  %12993 = vst [vmem:[#allocation78_spill] sm:$0xff] %v11782_v21 }
 0xd2f   :  { %8374 = vmatpush3.msra.mxu0 %v12984_v16  ;;  %5236 = vmatprep.mubr.f32.mxu0 %v3429_v10  ;;  %12992 = vst [vmem:[#allocation77_spill] sm:$0xff] %v11776_v18  ;;  %v8873_v10 = vld [vmem:[%s12745_s0 + $0x8] sm:$0xff] }
 0xd30   :  { %8375 = vmatprep.subr.mxu0 %v12985_v54 }
 0xd31   :  { %8376 = vmatpush3.msra.mxu0 %v12985_v54 }
 0xd32   :  { %5237 = vmatmul.mubr.f32.gmra.mxu0 %v3428_v49  ;;  %v11786_v50 = vpop.permute.xlu0 %5277 }
 0xd33   :  { %5241 = vmatprep.mubr.f32.mxu0 %v3431_v59  ;;  %12994 = vst [vmem:[#allocation69_spill] sm:$0xff] %v11786_v50 }
 0xd36   :  { %5242 = vmatmul.mubr.f32.gmra.mxu0 %v3430_v34 }
 0xd37   :  { %8377 = vmatprep.mubr.msk.f32.mxu0 %vm97_vm0, %v8839_v7 }
 0xd3a   :  { %8378 = vmatmul.mubr.msk.f32.vlgmr.msra.gmra.mxu0 %vm97_vm0, %v8840_v60  ;;  %v11794_v60 = vpop.permute.xlu1 %5282 }
 0xd3b   :  { %8380 = vmatprep.mubr.msk.f32.mxu0 %vm97_vm0, %v8841_v14  ;;  %12995 = vst [vmem:[#allocation79_spill] sm:$0xff] %v11794_v60 }
 0xd3e   :  { %8381 = vmatmul.mubr.msk.f32.gmra.mxu0 %vm97_vm0, %v8842_v57 }
 0xd3f   :  { %8383 = vmatprep.mubr.msk.f32.mxu0 %vm97_vm0, %v8843_v1  ;;  %v8874_v1 = vld [vmem:[%s12745_s0 + $0x10] sm:$0xff] }
 0xd42   :  { %8384 = vmatmul.mubr.msk.f32.gmra.mxu0 %vm97_vm0, %v8844_v32 }
 0xd43   :  { %8386 = vmatprep.mubr.msk.f32.mxu0 %vm97_vm0, %v8845_v44 }
 0xd46   :  { %8387 = vmatmul.mubr.msk.f32.gmra.mxu0 %vm97_vm0, %v8846_v39 }
 0xd47   :  { %8389 = vmatprep.mubr.msk.f32.mxu0 %vm97_vm0, %v8847_v25 }
 0xd4a   :  { %8390 = vmatmul.mubr.msk.f32.gmra.mxu0 %vm97_vm0, %v8848_v8 }
 0xd4b   :  { %8392 = vmatprep.mubr.msk.f32.mxu0 %vm97_vm0, %v8849_v15 }
 0xd4e   :  { %8393 = vmatmul.mubr.msk.f32.gmra.mxu0 %vm97_vm0, %v8850_v48 }
 0xd4f   :  { %8395 = vmatprep.mubr.msk.f32.mxu0 %vm97_vm0, %v8851_v63  ;;  %v11802_v63 = vpop.permute.xlu0 %5287 }
 0xd50   :  { %12996 = vst [vmem:[#allocation75_spill] sm:$0xff] %v11802_v63 }
 0xd52   :  { %8396 = vmatmul.mubr.msk.f32.gmra.mxu0 %vm97_vm0, %v8852_v28 }
 0xd53   :  { %8398 = vmatprep.mubr.msk.f32.mxu0 %vm97_vm0, %v8853_v3 }
 0xd56   :  { %8399 = vmatmul.mubr.msk.f32.gmra.mxu0 %vm97_vm0, %v8854_v41  ;;  %v8875_v41 = vld [vmem:[%s12745_s0 + $0x18] sm:$0xff] }
 0xd57   :  { %8401 = vmatprep.mubr.msk.f32.mxu0 %vm97_vm0, %v8855_v52 }
 0xd5a   :  { %8402 = vmatmul.mubr.msk.f32.gmra.mxu0 %vm97_vm0, %v8856_v62  ;;  %v12997_v62 = vld [vmem:[#allocation23_spill] sm:$0xff] }
 0xd5b   :  { %8404 = vmatprep.mubr.msk.f32.mxu0 %vm97_vm0, %v8857_v35 }
 0xd5e   :  { %8405 = vmatmul.mubr.msk.f32.gmra.mxu0 %vm97_vm0, %v8858_v61 }
 0xd5f   :  { %8407 = vmatprep.mubr.msk.f32.mxu0 %vm97_vm0, %v8859_v30 }
 0xd62   :  { %8408 = vmatmul.mubr.msk.f32.gmra.mxu0 %vm97_vm0, %v8860_v58 }
 0xd63   :  { %8410 = vmatprep.mubr.msk.f32.mxu0 %vm97_vm0, %v8861_v42 }
 0xd66   :  { %8411 = vmatmul.mubr.msk.f32.gmra.mxu0 %vm97_vm0, %v8862_v43  ;;  %v12999_v43 = vld [vmem:[#allocation25_spill] sm:$0xff] }
 0xd67   :  { %8413 = vmatprep.mubr.msk.f32.mxu0 %vm97_vm0, %v8863_v38 }
 0xd6a   :  { %8414 = vmatmul.mubr.msk.f32.gmra.mxu0 %vm97_vm0, %v8864_v55 }
 0xd6b   :  { %8416 = vmatprep.mubr.msk.f32.mxu0 %vm97_vm0, %v8865_v23  ;;  %v11818_v23 = vpop.permute.xlu1 %5292 }
 0xd6c   :  { %13001 = vst [vmem:[#allocation73_spill] sm:$0xff] %v11818_v23 }
 0xd6e   :  { %8417 = vmatmul.mubr.msk.f32.gmra.mxu0 %vm97_vm0, %v8866_v51 }
 0xd6f   :  { %8419 = vmatprep.mubr.msk.f32.mxu0 %vm97_vm0, %v8867_v47 }
 0xd72   :  { %8420 = vmatmul.mubr.msk.f32.gmra.mxu0 %vm97_vm0, %v8868_v5 }
 0xd73   :  { %8422 = vmatprep.mubr.msk.f32.mxu0 %vm97_vm0, %v8869_v27 }
 0xd74   :  { %v8435_v45 = vpop.f32.mrf.mxu1 }
 0xd76   :  { %8423 = vmatmul.mubr.msk.f32.gmra.mxu0 %vm97_vm0, %v8870_v12  ;;  %v5598_v7 = vpop.f32.mrf.mxu1 }
 0xd77   :  { %6717 = vmatprep.mubr.f32.mxu0 %v8871_v4  ;;  %v13002_v4 = vld [vmem:[#allocation19_spill] sm:$0xff] }
 0xd78   :  { %v8438_v48 = vpop.f32.mrf.mxu1 }
 0xd7a   :  { %v5608_v55 = vpop.f32.mrf.mxu1 }
 0xdea   :  { %v7507_v53 = vpop.f32.mrf.mxu0 }
 0xdec   :  { %v7508_v11 = vpop.f32.mrf.mxu0 }
 0xded   :  { %v7509_v31 = vadd.f32 %v7508_v11, %v7507_v53 }
 0xdee   :  { %v7510_v26 = vpop.f32.mrf.mxu0 }
 0xdef   :  { %v5229_v13 = vadd.f32 %v7509_v31, %v11764_v46 }
 0xdf0   :  { %v7511_v2 = vpop.f32.mrf.mxu0 }
 0xdf1   :  { %v5247_v9 = vadd.f32 %v8872_v17, %v5229_v13  ;;  %v7512_v6 = vadd.f32 %v7511_v2, %v7510_v26  ;;  %v8441_v13 = vpop.f32.mrf.mxu1 }
 0xdf2   :  { %v7513_v24 = vpop.f32.mrf.mxu0 }
 0xdf3   :  { %v5271_v20 = vmul.f32 %v11772_v0, %v5247_v9  ;;  %v5234_v37 = vadd.f32 %v7512_v6, %v11766_v22  ;;  %v13003_v6 = vld [vmem:[#allocation22_spill] sm:$0xff] }
 0xdf4   :  { %v7514_v40 = vpop.f32.mrf.mxu0 }
 0xdf5   :  { %v5295_v29 = vadd.f32 %v11786_v50, %v5271_v20  ;;  %v5248_v16 = vadd.f32 %v8873_v10, %v5234_v37  ;;  %v7515_v49 = vadd.f32 %v7514_v40, %v7513_v24 }
 0xdf6   :  { %v7516_v54 = vpop.f32.mrf.mxu0 }
 0xdf7   :  { %5299 = vst [vmem:[#allocation2] sm:$0xff] %v5295_v29  ;;  %v5272_v59 = vmul.f32 %v11774_v19, %v5248_v16  ;;  %v5239_v34 = vadd.f32 %v7515_v49, %v11768_v33  ;;  %v5618_v29 = vpop.f32.mrf.mxu1 }
 0xdf8   :  { %v7517_v14 = vpop.f32.mrf.mxu0 }
 0xdf9   :  { %v5296_v57 = vadd.f32 %v11794_v60, %v5272_v59  ;;  %v5249_v32 = vadd.f32 %v8874_v1, %v5239_v34  ;;  %v7518_v44 = vadd.f32 %v7517_v14, %v7516_v54  ;;  %v13005_v54 = vld [vmem:[#allocation17_spill] sm:$0xff] }
 0xdfa   :  { %v8379_v39 = vpop.f32.mrf.mxu0 }
 0xdfb   :  { %5300 = vst [vmem:[#allocation2 + $0x8] sm:$0xff] %v5296_v57  ;;  %v5273_v25 = vmul.f32 %v11776_v18, %v5249_v32  ;;  %v5244_v8 = vadd.f32 %v7518_v44, %v11770_v36  ;;  %v5604_v15 = vadd.f32 %v8435_v45, %v8379_v39  ;;  %v8444_v32 = vpop.f32.mrf.mxu1  ;;  %v13006_v44 = vld [vmem:[#allocation18_spill] sm:$0xff] }
 0xdfc   :  { %v5373_v28 = vpop.f32.mrf.mxu0 }
 0xdfd   :  { %v5297_v3 = vadd.f32 %v11802_v63, %v5273_v25  ;;  %v5250_v52 = vadd.f32 %v8875_v41, %v5244_v8  ;;  %v11809_v35 = vadd.f32 %v5604_v15, %v12997_v62  ;;  %v5599_v61 = vadd.f32 %v5598_v7, %v5373_v28  ;;  %v5628_v41 = vpop.f32.mrf.mxu1 }
 0xdfe   :  { %v8382_v30 = vpop.f32.mrf.mxu0 }
 0xdff   :  { %12998 = vst [vmem:[#allocation68_spill] sm:$0xff] %v11809_v35  ;;  %5301 = vst [vmem:[#allocation2 + $0x10] sm:$0xff] %v5297_v3  ;;  %v5274_v58 = vmul.f32 %v11782_v21, %v5250_v52  ;;  %v11813_v42 = vmul.f32 0.70710677, %v11809_v35  ;;  %v11816_v38 = vadd.f32 %v5599_v61, %v12999_v43  ;;  %v5614_v51 = vadd.f32 %v8438_v48, %v8382_v30 }
 0xe00   :  { %v5383_v47 = vpop.f32.mrf.mxu0 }
 0xe01   :  { %13000 = vst [vmem:[#allocation55_spill] sm:$0xff] %v11816_v38  ;;  %v5298_v5 = vadd.f32 %v11818_v23, %v5274_v58  ;;  %v5918_v27 = vand.u32 2147483647, %v11813_v42  ;;  %v11823_v12 = vmul.f32 0.70710677, %v11816_v38  ;;  %v11826_v53 = vadd.f32 %v5614_v51, %v13002_v4  ;;  %v13007_v58 = vld [vmem:[#allocation15_spill] sm:$0xff] }
 0xe02   :  { %v5609_v11 = vadd.f32 %v5608_v55, %v5383_v47  ;;  %v8385_v31 = vpop.f32.mrf.mxu0  ;;  %v13008_v51 = vld [vmem:[#allocation16_spill] sm:$0xff]  ;;  %vm5854_vm0 = vcmp.ge.f32.partialorder %v11813_v42, 0.0 }
 0xe03   :  { %5302 = vst [vmem:[#allocation2 + $0x18] sm:$0xff] %v5298_v5  ;;  %v5950_v26 = vmul.f32 0.3275911, %v5918_v27  ;;  %v5917_v2 = vand.u32 2147483647, %v11823_v12  ;;  %v5624_v20 = vadd.f32 %v8441_v13, %v8385_v31  ;;  %v6366_v4 = vsub.f32 0.0, %v5918_v27  ;;  %v8447_v13 = vpop.f32.mrf.mxu1 }
 0xe04   :  { %v11830_v17 = vmul.f32 0.70710677, %v11826_v53  ;;  %v11833_v24 = vadd.f32 %v5609_v11, %v13003_v6  ;;  %v5393_v37 = vpop.f32.mrf.mxu0  ;;  %vm5853_vm7 = vcmp.ge.f32.partialorder %v11823_v12, 0.0 }
 0xe05   :  { %v5982_v9 = vadd.f32 1.0, %v5950_v26  ;;  %v5949_v45 = vmul.f32 0.3275911, %v5917_v2  ;;  %v11840_v59 = vadd.f32 %v5624_v20, %v13005_v54  ;;  %v5619_v34 = vadd.f32 %v5618_v29, %v5393_v37 }
 0xe06   :  { %13004 = vst [vmem:[#allocation63_spill] sm:$0xff] %v11833_v24  ;;  %v5920_v40 = vand.u32 2147483647, %v11830_v17  ;;  %v11837_v49 = vmul.f32 0.70710677, %v11833_v24  ;;  %v8388_v7 = vpop.f32.mrf.mxu0  ;;  %vm5856_vm8 = vcmp.ge.f32.partialorder %v11830_v17, 0.0 }
 0xe07   :  { %8642 = vrcp.f32 %v5982_v9  ;;  %v5981_v10 = vadd.f32 1.0, %v5949_v45  ;;  %v11846_v1 = vmul.f32 0.70710677, %v11840_v59  ;;  %v11849_v39 = vadd.f32 %v5619_v34, %v13006_v44 }
 0xe08   :  { %v5952_v16 = vmul.f32 0.3275911, %v5920_v40  ;;  %v11843_v57 = vand.u32 2147483647, %v11837_v49  ;;  %v5403_v8 = vpop.f32.mrf.mxu0  ;;  %v5634_v3 = vadd.f32 %v8444_v32, %v8388_v7  ;;  %v6365_v9 = vsub.f32 0.0, %v5917_v2 }
 0xe09   :  { %8644 = vrcp.f32 %v5981_v10  ;;  %v11853_v15 = vand.u32 2147483647, %v11846_v1  ;;  %v11856_v28 = vmul.f32 0.70710677, %v11849_v39  ;;  %v5629_v62 = vadd.f32 %v5628_v41, %v5403_v8 }
 0xe0a   :  { %v5984_v14 = vadd.f32 1.0, %v5952_v16  ;;  %v5951_v25 = vmul.f32 0.3275911, %v11843_v57  ;;  %v11863_v43 = vadd.f32 %v5634_v3, %v13007_v58  ;;  %v8391_v5 = vpop.f32.mrf.mxu0  ;;  %v6368_v29 = vsub.f32 0.0, %v5920_v40 }
 0xe0b   :  { %v5954_v52 = vmul.f32 0.3275911, %v11853_v15  ;;  %v11860_v61 = vand.u32 2147483647, %v11856_v28  ;;  %v11867_v47 = vadd.f32 %v5629_v62, %v13008_v51  ;;  %v5644_v37 = vadd.f32 %v8447_v13, %v8391_v5 }
 0xe0c   :  { %8646 = vrcp.f32 %v5984_v14  ;;  %v5983_v48 = vadd.f32 1.0, %v5951_v25  ;;  %v11870_v11 = vmul.f32 0.70710677, %v11863_v43  ;;  %v6398_v16 = vmul.f32 %v6366_v4, %v5918_v27  ;;  %v13009_v25 = vld [vmem:[#allocation13_spill] sm:$0xff] }
 0xe0d   :  { %v5986_v30 = vadd.f32 1.0, %v5954_v52  ;;  %v5953_v55 = vmul.f32 0.3275911, %v11860_v61  ;;  %v11878_v20 = vmul.f32 0.70710677, %v11867_v47  ;;  %v6397_v32 = vmul.f32 %v6365_v9, %v5917_v2 }
 0xe0e   :  { %8648 = vrcp.f32 %v5983_v48  ;;  %v11875_v6 = vand.u32 2147483647, %v11870_v11  ;;  %v11891_v8 = vadd.f32 %v5644_v37, %v13009_v25  ;;  %v6400_v3 = vmul.f32 %v6368_v29, %v5920_v40 }
 0xe0f   :  { %8650 = vrcp.f32 %v5986_v30  ;;  %v5985_v26 = vadd.f32 1.0, %v5953_v55  ;;  %v11886_v7 = vand.u32 2147483647, %v11878_v20  ;;  %v6431_v52 = vmul.f32 1.442695, %v6398_v16 }
 0xe10   :  { %v5956_v54 = vmul.f32 0.3275911, %v11875_v6  ;;  %v11901_v55 = vsel %vm5854_vm0, 1.0, %v12886_v56  ;;  %v6429_v42 = vmul.f32 1.442695, %v6397_v32  ;;  %v11904_v40 = vmul.f32 0.5, %v11826_v53 }
 0xe11   :  { %8652 = vrcp.f32 %v5985_v26  ;;  %v5955_v27 = vmul.f32 0.3275911, %v11886_v7  ;;  %v11907_v51 = vmul.f32 0.70710677, %v11891_v8  ;;  %v6435_v5 = vmul.f32 1.442695, %v6400_v3 }
 0xe12   :  { %v5988_v44 = vadd.f32 1.0, %v5956_v54  ;;  %13010 = vst [vmem:[#allocation66_spill] sm:$0xff] %v11904_v40  ;;  %v6367_v26 = vsub.f32 0.0, %v11843_v57  ;;  %v11915_v13 = vsel %vm5853_vm7, 1.0, %v12886_v56  ;;  %v11918_v9 = vsel %vm5856_vm8, 1.0, %v12886_v56 }
 0xe13   :  { %v5987_v30 = vadd.f32 1.0, %v5955_v27  ;;  %v11921_v53 = vand.u32 2147483647, %v11907_v51  ;;  %vm5855_vm9 = vcmp.ge.f32.partialorder %v11837_v49, 0.0  ;;  %vm5858_vm10 = vcmp.ge.f32.partialorder %v11846_v1, 0.0 }
 0xe14   :  { %v11872_v31 = vpop.eup %8642  ;;  %8654 = vrcp.f32 %v5988_v44  ;;  %v6370_v32 = vsub.f32 0.0, %v11853_v15  ;;  %v6369_v3 = vsub.f32 0.0, %v11860_v61  ;;  %vm5857_vm11 = vcmp.ge.f32.partialorder %v11856_v28, 0.0 }
 0xe15   :  { %v6078_v10 = vmul.f32 1.0614054, %v11872_v31  ;;  %8656 = vrcp.f32 %v5987_v30  ;;  %v5958_v54 = vmul.f32 0.3275911, %v11921_v53  ;;  %v11944_v30 = vmul.f32 0.5, %v11840_v59 }
 0xe16   :  { %v11880_v45 = vpop.eup %8644  ;;  %8658 = vpow2.f32 %v6431_v52  ;;  %v11955_v49 = vmul.f32 0.5, %v11849_v39  ;;  %v6401_v59 = vmul.f32 %v6369_v3, %v11860_v61  ;;  %v11970_v3 = vmul.f32 0.5, %v11863_v43 }
 0xe17   :  { %v6077_v34 = vmul.f32 1.0614054, %v11880_v45  ;;  %v6110_v41 = vadd.f32 -1.4531521, %v6078_v10  ;;  %8660 = vpow2.f32 %v6429_v42  ;;  %v5990_v27 = vadd.f32 1.0, %v5958_v54 }
 0xe18   :  { %8662 = vpow2.f32 %v6435_v5  ;;  %13011 = vst [vmem:[#allocation76_spill] sm:$0xff] %v11955_v49  ;;  %vm5860_vm12 = vcmp.ge.f32.partialorder %v11870_v11, 0.0  ;;  %vm5859_vm13 = vcmp.ge.f32.partialorder %v11878_v20, 0.0  ;;  %vm5862_vm14 = vcmp.ge.f32.partialorder %v11907_v51, 0.0 }
 0xe19   :  { %v11888_v14 = vpop.eup %8646  ;;  %v6109_v62 = vadd.f32 -1.4531521, %v6077_v34  ;;  %v6142_v17 = vmul.f32 %v11872_v31, %v6110_v41  ;;  %v6399_v34 = vmul.f32 %v6367_v26, %v11843_v57  ;;  %v11941_v57 = vsel %vm5855_vm9, 1.0, %v12886_v56 }
 0xe1a   :  { %v6080_v48 = vmul.f32 1.0614054, %v11888_v14  ;;  %8664 = vrcp.f32 %v5990_v27  ;;  %v11985_v11 = vsel %vm5860_vm12, 1.0, %v12886_v56 }
 0xe1b   :  { %v11898_v58 = vpop.eup %8648  ;;  %v6141_v29 = vmul.f32 %v11880_v45, %v6109_v62  ;;  %v6174_v25 = vadd.f32 1.4214138, %v6142_v17  ;;  %v6433_v5 = vmul.f32 1.442695, %v6399_v34  ;;  %v11952_v17 = vsel %vm5858_vm10, 1.0, %v12886_v56 }
 0xe1c   :  { %v6112_v2 = vadd.f32 -1.4531521, %v6080_v48  ;;  %v6079_v4 = vmul.f32 1.0614054, %v11898_v58  ;;  %v11923_v37 = vpop.eup %8650  ;;  %v11965_v34 = vsel %vm5857_vm11, 1.0, %v12886_v56 }
 0xe1d   :  { %v6082_v12 = vmul.f32 1.0614054, %v11923_v37  ;;  %v6173_v41 = vadd.f32 1.4214138, %v6141_v29  ;;  %v6372_v29 = vsub.f32 0.0, %v11875_v6  ;;  %8666 = vpow2.f32 %v6433_v5 }
 0xe1e   :  { %v6144_v10 = vmul.f32 %v11888_v14, %v6112_v2  ;;  %v6111_v16 = vadd.f32 -1.4531521, %v6079_v4  ;;  %v11933_v44 = vpop.eup %8652  ;;  %v6402_v4 = vmul.f32 %v6370_v32, %v11853_v15  ;;  %v6206_v15 = vmul.f32 %v11872_v31, %v6174_v25  ;;  %v5638_v32 = vpop.f32.mrf.mxu1 }
 0xe1f   :  { %v6114_v48 = vadd.f32 -1.4531521, %v6082_v12  ;;  %v6081_v2 = vmul.f32 1.0614054, %v11933_v44  ;;  %v6205_v28 = vmul.f32 %v11880_v45, %v6173_v41  ;;  %v6437_v41 = vmul.f32 1.442695, %v6401_v59 }
 0xe20   :  { %v6176_v52 = vadd.f32 1.4214138, %v6144_v10  ;;  %v6143_v62 = vmul.f32 %v11898_v58, %v6111_v16  ;;  %v5413_v10 = vpop.f32.mrf.mxu0 }
 0xe21   :  { %v6146_v42 = vmul.f32 %v11923_v37, %v6114_v48  ;;  %v6113_v26 = vadd.f32 -1.4531521, %v6081_v2  ;;  %v11959_v16 = vpop.eup %8654  ;;  %v6439_v48 = vmul.f32 1.442695, %v6402_v4  ;;  %v5639_v25 = vadd.f32 %v5638_v32, %v5413_v10 }
 0xe22   :  { %v6208_v12 = vmul.f32 %v11888_v14, %v6176_v52  ;;  %v6175_v54 = vadd.f32 1.4214138, %v6143_v62  ;;  %v6084_v61 = vmul.f32 1.0614054, %v11959_v16  ;;  %v11972_v27 = vpop.eup %8656  ;;  %v6404_v62 = vmul.f32 %v6372_v29, %v11875_v6  ;;  %v13013_v29 = vld [vmem:[#allocation14_spill] sm:$0xff] }
 0xe23   :  { %v6178_v1 = vadd.f32 1.4214138, %v6146_v42  ;;  %v6145_v39 = vmul.f32 %v11933_v44, %v6113_v26  ;;  %v6238_v2 = vadd.f32 -0.28449672, %v6206_v15  ;;  %v6237_v42 = vadd.f32 -0.28449672, %v6205_v28  ;;  %v11977_v21 = vpop.eup %8658 }
 0xe24   :  { %v6116_v52 = vadd.f32 -1.4531521, %v6084_v61  ;;  %v6240_v26 = vadd.f32 -0.28449672, %v6208_v12  ;;  %v6207_v23 = vmul.f32 %v11898_v58, %v6175_v54  ;;  %v6083_v10 = vmul.f32 1.0614054, %v11972_v27  ;;  %v11982_v59 = vpop.eup %8660 }
 0xe25   :  { %v6210_v5 = vmul.f32 %v11923_v37, %v6178_v1  ;;  %v6177_v43 = vadd.f32 1.4214138, %v6145_v39  ;;  %8668 = vpow2.f32 %v6439_v48  ;;  %v11988_v6 = vmul.f32 0.5, %v11867_v47  ;;  %v8663_v28 = vpop.eup %8662  ;;  %v8394_v1 = vpop.f32.mrf.mxu0 }
 0xe26   :  { %v6148_v4 = vmul.f32 %v11959_v16, %v6116_v52  ;;  %v11991_v15 = vadd.f32 %v5639_v25, %v13013_v29  ;;  %8670 = vpow2.f32 %v6437_v41  ;;  %v6371_v54 = vsub.f32 0.0, %v11886_v7  ;;  %v8450_v29 = vpop.f32.mrf.mxu1 }
 0xe27   :  { %13012 = vst [vmem:[#allocation37_spill] sm:$0xff] %v11988_v6  ;;  %v6272_v39 = vmul.f32 %v11888_v14, %v6240_v26  ;;  %v6239_v61 = vadd.f32 -0.28449672, %v6207_v23  ;;  %v6443_v32 = vmul.f32 1.442695, %v6404_v62  ;;  %v6270_v52 = vmul.f32 %v11872_v31, %v6238_v2  ;;  %v11999_v41 = vpop.eup %8664  ;;  %v5423_v19 = vpop.f32.mrf.mxu0 }
 0xe28   :  { %v6180_v12 = vadd.f32 1.4214138, %v6148_v4  ;;  %v6115_v48 = vadd.f32 -1.4531521, %v6083_v10  ;;  %v6269_v47 = vmul.f32 %v11880_v45, %v6237_v42  ;;  %v6242_v63 = vadd.f32 -0.28449672, %v6210_v5 }
 0xe29   :  { %v6209_v25 = vmul.f32 %v11933_v44, %v6177_v43  ;;  %v12004_v18 = vmul.f32 0.70710677, %v11991_v15  ;;  %v5654_v23 = vadd.f32 %v8450_v29, %v8394_v1  ;;  %v12009_v62 = vsel %vm5859_vm13, 1.0, %v12886_v56 }
 0xe2a   :  { %v6212_v4 = vmul.f32 %v11959_v16, %v6180_v12  ;;  %v6147_v36 = vmul.f32 %v11972_v27, %v6115_v48  ;;  %v6403_v2 = vmul.f32 %v6371_v54, %v11886_v7  ;;  %v6086_v42 = vmul.f32 1.0614054, %v11999_v41  ;;  %v13014_v7 = vld [vmem:[#allocation5_spill] sm:$0xff]  ;;  %v8667_v50 = vpop.eup %8666 }
 0xe2b   :  { %v6374_v26 = vsub.f32 0.0, %v11921_v53  ;;  %v6304_v5 = vadd.f32 0.2548296, %v6272_v39  ;;  %v6271_v43 = vmul.f32 %v11898_v58, %v6239_v61  ;;  %8672 = vpow2.f32 %v6443_v32 }
 0xe2c   :  { %v6179_v10 = vadd.f32 1.4214138, %v6147_v36  ;;  %v6302_v12 = vadd.f32 0.2548296, %v6270_v52  ;;  %v6274_v48 = vmul.f32 %v11923_v37, %v6242_v63  ;;  %v6241_v1 = vadd.f32 -0.28449672, %v6209_v25  ;;  %v5648_v25 = vpop.f32.mrf.mxu1 }
 0xe2d   :  { %v6118_v29 = vadd.f32 -1.4531521, %v6086_v42  ;;  %v6301_v60 = vadd.f32 0.2548296, %v6269_v47  ;;  %v6244_v20 = vadd.f32 -0.28449672, %v6212_v4  ;;  %v12020_v54 = vadd.f32 %v5654_v23, %v13014_v7 }
 0xe2e   :  { %v12017_v33 = vand.u32 2147483647, %v12004_v18  ;;  %v6211_v39 = vmul.f32 %v11972_v27, %v6179_v10  ;;  %v6441_v61 = vmul.f32 1.442695, %v6403_v2  ;;  %v6406_v32 = vmul.f32 %v6374_v26, %v11921_v53 }
 0xe2f   :  { %v6150_v36 = vmul.f32 %v11999_v41, %v6118_v29  ;;  %v6336_v63 = vmul.f32 %v11888_v14, %v6304_v5  ;;  %v6303_v52 = vadd.f32 0.2548296, %v6271_v43  ;;  %v6334_v4 = vmul.f32 %v11872_v31, %v6302_v12  ;;  %v8397_v14 = vpop.f32.mrf.mxu0 }
 0xe30   :  { %v5957_v47 = vmul.f32 0.3275911, %v12017_v33  ;;  %v6306_v23 = vadd.f32 0.2548296, %v6274_v48  ;;  %v6273_v42 = vmul.f32 %v11933_v44, %v6241_v1  ;;  %v6333_v2 = vmul.f32 %v11880_v45, %v6301_v60  ;;  %v8453_v45 = vpop.f32.mrf.mxu1 }
 0xe31   :  { %v6182_v7 = vadd.f32 1.4214138, %v6150_v36  ;;  %v6276_v10 = vmul.f32 %v11959_v16, %v6244_v20  ;;  %v12033_v53 = vmul.f32 0.70710677, %v12020_v54  ;;  %v6243_v5 = vadd.f32 -0.28449672, %v6211_v39 }
 0xe32   :  { %v5989_v29 = vadd.f32 1.0, %v5957_v47  ;;  %v8669_v26 = vpop.eup %8668  ;;  %v12036_v43 = vmul.f32 0.5, %v11891_v8  ;;  %v6447_v12 = vmul.f32 1.442695, %v6406_v32  ;;  %v6496_v1 = vmul.f32 %v8663_v28, %v6336_v63  ;;  %v5433_v63 = vpop.f32.mrf.mxu0 }
 0xe33   :  { %v6214_v31 = vmul.f32 %v11999_v41, %v6182_v7  ;;  %v8671_v48 = vpop.eup %8670  ;;  %v6335_v36 = vmul.f32 %v11898_v58, %v6303_v52  ;;  %v12043_v60 = vsel %vm5862_vm14, 1.0, %v12886_v56  ;;  %v6494_v20 = vmul.f32 %v11977_v21, %v6334_v4 }
 0xe34   :  { %8674 = vrcp.f32 %v5989_v29  ;;  %v6338_v39 = vmul.f32 %v11923_v37, %v6306_v23  ;;  %v6305_v8 = vadd.f32 0.2548296, %v6273_v42  ;;  %v6493_v47 = vmul.f32 %v11982_v59, %v6333_v2  ;;  %v13015_v37 = vld [vmem:[#allocation12_spill] sm:$0xff]  ;;  %v13016_v2 = vld [vmem:[#allocation10_spill] sm:$0xff] }
 0xe35   :  { %8676 = vpow2.f32 %v6441_v61  ;;  %v6308_v32 = vadd.f32 0.2548296, %v6276_v10  ;;  %v12049_v28 = vand.u32 2147483647, %v12033_v53  ;;  %v5649_v58 = vadd.f32 %v5648_v25, %v5423_v19  ;;  %v5658_v61 = vpop.f32.mrf.mxu1 }
 0xe36   :  { %v6275_v51 = vmul.f32 %v11972_v27, %v6243_v5  ;;  %v6246_v52 = vadd.f32 -0.28449672, %v6214_v31  ;;  %8678 = vpow2.f32 %v6447_v12  ;;  %v5664_v7 = vadd.f32 %v8453_v45, %v8397_v14 }
 0xe37   :  { %v6528_v29 = vsub.f32 1.0, %v6496_v1  ;;  %v6495_v22 = vmul.f32 %v8667_v50, %v6335_v36  ;;  %v5960_v21 = vmul.f32 0.3275911, %v12049_v28  ;;  %v12054_v4 = vadd.f32 %v5649_v58, %v13015_v37 }
 0xe38   :  { %v8673_v59 = vpop.eup %8672  ;;  %v6498_v23 = vmul.f32 %v8669_v26, %v6338_v39  ;;  %v6337_v42 = vmul.f32 %v11933_v44, %v6305_v8  ;;  %v12058_v19 = vadd.f32 %v5664_v7, %v13016_v2  ;;  %v5659_v25 = vadd.f32 %v5658_v61, %v5433_v63  ;;  %v13017_v8 = vld [vmem:[#allocation7_spill] sm:$0xff] }
 0xe39   :  { %v6526_v10 = vsub.f32 1.0, %v6494_v20  ;;  %v6525_v5 = vsub.f32 1.0, %v6493_v47  ;;  %v6340_v14 = vmul.f32 %v11959_v16, %v6308_v32  ;;  %v5992_v31 = vadd.f32 1.0, %v5960_v21 }
 0xe3a   :  { %v6307_v50 = vadd.f32 0.2548296, %v6275_v51  ;;  %v6278_v12 = vmul.f32 %v11999_v41, %v6246_v52  ;;  %v12063_v1 = vmul.f32 0.5, %v11991_v15  ;;  %v12066_v36 = vmul.f32 0.70710677, %v12054_v4 }
 0xe3b   :  { %v6560_v44 = vmul.f32 %v6528_v29, %v11918_v9  ;;  %v6527_v26 = vsub.f32 1.0, %v6495_v22  ;;  %8680 = vrcp.f32 %v5992_v31  ;;  %v12070_v45 = vmul.f32 0.70710677, %v12058_v19  ;;  %v8400_v22 = vpop.f32.mrf.mxu0  ;;  %v8456_v29 = vpop.f32.mrf.mxu1 }
 0xe3c   :  { %v6530_v20 = vsub.f32 1.0, %v6498_v23  ;;  %v6497_v39 = vmul.f32 %v8671_v48, %v6337_v42  ;;  %v12073_v16 = vand.u32 2147483647, %v12066_v36  ;;  %v12076_v47 = vadd.f32 %v5659_v25, %v13017_v8  ;;  %v13022_v8 = vld [vmem:[#allocation9_spill] sm:$0xff] }
 0xe3d   :  { %v12079_v15 = vmul.f32 %v6526_v10, %v11901_v55  ;;  %v12082_v32 = vmul.f32 %v6525_v5, %v11915_v13  ;;  %v6500_v9 = vmul.f32 %v8673_v59, %v6340_v14  ;;  %vm5861_vm15 = vcmp.ge.f32.partialorder %v12004_v18, 0.0  ;;  %v5443_v10 = vpop.f32.mrf.mxu0 }
 0xe3e   :  { %v6339_v58 = vmul.f32 %v11972_v27, %v6307_v50  ;;  %v6310_v63 = vadd.f32 0.2548296, %v6278_v12  ;;  %v6373_v48 = vsub.f32 0.0, %v12017_v33  ;;  %v5959_v51 = vmul.f32 0.3275911, %v12073_v16 }
 0xe3f   :  { %13018 = vst [vmem:[#allocation52_spill] sm:$0xff] %v12079_v15  ;;  %13019 = vst [vmem:[#allocation57_spill] sm:$0xff] %v12082_v32  ;;  %v12088_v52 = vadd.f32 1.0, %v6560_v44  ;;  %v12091_v7 = vmul.f32 %v6527_v26, %v11941_v57  ;;  %v12094_v55 = vand.u32 2147483647, %v12070_v45  ;;  %v6562_v27 = vmul.f32 %v6530_v20, %v11952_v17  ;;  %v5668_v26 = vpop.f32.mrf.mxu1  ;;  %v13035_v32 = vld [vmem:[#allocation50_spill] sm:$0xff] }
 0xe40   :  { %v12097_v13 = vmul.f32 0.70710677, %v12076_v47  ;;  %v6529_v37 = vsub.f32 1.0, %v6497_v39  ;;  %v5991_v61 = vadd.f32 1.0, %v5959_v51  ;;  %v5674_v59 = vadd.f32 %v8456_v29, %v8400_v22 }
 0xe41   :  { %13020 = vst [vmem:[#allocation65_spill] sm:$0xff] %v12088_v52  ;;  %13021 = vst [vmem:[#allocation51_spill] sm:$0xff] %v12091_v7  ;;  %v12099_v21 = vpop.eup %8674  ;;  %v6532_v42 = vsub.f32 1.0, %v6500_v9  ;;  %v12105_v57 = vsel %vm5861_vm15, 1.0, %v12886_v56  ;;  %v5962_v25 = vmul.f32 0.3275911, %v12094_v55  ;;  %v6342_v14 = vmul.f32 %v11999_v41, %v6310_v63 }
 0xe42   :  { %v8677_v23 = vpop.eup %8676  ;;  %v6085_v2 = vmul.f32 1.0614054, %v12099_v21  ;;  %v6405_v17 = vmul.f32 %v6373_v48, %v12017_v33  ;;  %8682 = vrcp.f32 %v5991_v61  ;;  %v6376_v12 = vsub.f32 0.0, %v12049_v28 }
 0xe43   :  { %v6499_v5 = vmul.f32 %v8677_v23, %v6339_v58  ;;  %v8679_v31 = vpop.eup %8678  ;;  %v5994_v44 = vadd.f32 1.0, %v5962_v25  ;;  %v12113_v18 = vand.u32 2147483647, %v12097_v13  ;;  %v6594_v20 = vadd.f32 1.0, %v6562_v27 }
 0xe44   :  { %v6117_v50 = vadd.f32 -1.4531521, %v6085_v2  ;;  %v6561_v39 = vmul.f32 %v6529_v37, %v11965_v34  ;;  %v12117_v9 = vadd.f32 %v5674_v59, %v13022_v8  ;;  %v5669_v22 = vadd.f32 %v5668_v26, %v5443_v10  ;;  %v13023_v37 = vld [vmem:[#allocation11_spill] sm:$0xff] }
 0xe45   :  { %v6564_v41 = vmul.f32 %v6532_v42, %v11985_v11  ;;  %8684 = vrcp.f32 %v5994_v44  ;;  %v5961_v58 = vmul.f32 0.3275911, %v12113_v18  ;;  %v6502_v63 = vmul.f32 %v8679_v31, %v6342_v14 }
 0xe46   :  { %v6149_v33 = vmul.f32 %v12099_v21, %v6117_v50  ;;  %v6445_v48 = vmul.f32 1.442695, %v6405_v17  ;;  %vm5864_vm1 = vcmp.ge.f32.partialorder %v12033_v53, 0.0  ;;  %v12124_v51 = vmul.f32 0.70710677, %v12117_v9 }
 0xe47   :  { %v6531_v29 = vsub.f32 1.0, %v6499_v5  ;;  %v6408_v34 = vmul.f32 %v6376_v12, %v12049_v28  ;;  %v5993_v27 = vadd.f32 1.0, %v5961_v58  ;;  %v12128_v61 = vadd.f32 %v5669_v22, %v13023_v37 }
 0xe48   :  { %v12130_v11 = vpop.eup %8680  ;;  %v12133_v59 = vmul.f32 %v6594_v20, %v11944_v30  ;;  %v6181_v23 = vadd.f32 1.4214138, %v6149_v33  ;;  %v12136_v42 = vmul.f32 0.5, %v12020_v54  ;;  %v12139_v2 = vand.u32 2147483647, %v12124_v51 }
 0xe49   :  { %v12141_v25 = vadd.f32 1.0, %v6561_v39  ;;  %v6596_v10 = vadd.f32 1.0, %v6564_v41  ;;  %v6088_v28 = vmul.f32 1.0614054, %v12130_v11  ;;  %8686 = vrcp.f32 %v5993_v27  ;;  %v8459_v27 = vpop.f32.mrf.mxu1 }
 0xe4a   :  { %13024 = vst [vmem:[#allocation71_spill] sm:$0xff] %v12133_v59  ;;  %v6534_v5 = vsub.f32 1.0, %v6502_v63  ;;  %8688 = vpow2.f32 %v6445_v48  ;;  %v12147_v30 = vsel %vm5864_vm1, 1.0, %v12886_v56  ;;  %v5964_v14 = vmul.f32 0.3275911, %v12139_v2 }
 0xe4b   :  { %13025 = vst [vmem:[#allocation61_spill] sm:$0xff] %v12141_v25  ;;  %v6563_v54 = vmul.f32 %v6531_v29, %v12009_v62  ;;  %v6120_v17 = vadd.f32 -1.4531521, %v6088_v28  ;;  %v6451_v31 = vmul.f32 1.442695, %v6408_v34  ;;  %v6213_v12 = vmul.f32 %v12099_v21, %v6181_v23 }
 0xe4c   :  { %v12152_v50 = vmul.f32 0.70710677, %v12128_v61  ;;  %v12156_v44 = vmul.f32 0.5, %v12054_v4  ;;  %v6375_v26 = vsub.f32 0.0, %v12073_v16  ;;  %v5996_v20 = vadd.f32 1.0, %v5964_v14 }
 0xe4d   :  { %v12160_v53 = vmul.f32 %v6596_v10, %v11970_v3  ;;  %v6152_v39 = vmul.f32 %v12130_v11, %v6120_v17  ;;  %vm5863_vm2 = vcmp.ge.f32.partialorder %v12066_v36, 0.0  ;;  %v6566_v8 = vmul.f32 %v6534_v5, %v12043_v60  ;;  %v8403_v36 = vpop.f32.mrf.mxu0 }
 0xe4e   :  { %v12165_v62 = vand.u32 2147483647, %v12152_v50  ;;  %v12169_v22 = vmul.f32 0.5, %v12058_v19  ;;  %v6378_v4 = vsub.f32 0.0, %v12094_v55  ;;  %8690 = vrcp.f32 %v5996_v20 }
 0xe4f   :  { %13026 = vst [vmem:[#allocation60_spill] sm:$0xff] %v12160_v53  ;;  %v12172_v41 = vpop.eup %8682  ;;  %v12174_v33 = vadd.f32 1.0, %v6563_v54  ;;  %v6184_v3 = vadd.f32 1.4214138, %v6152_v39  ;;  %8692 = vpow2.f32 %v6451_v31  ;;  %v6245_v63 = vadd.f32 -0.28449672, %v6213_v12  ;;  %v5453_v17 = vpop.f32.mrf.mxu0 }
 0xe50   :  { %v5963_v58 = vmul.f32 0.3275911, %v12165_v62  ;;  %v12178_v48 = vsel %vm5863_vm2, 1.0, %v12886_v56  ;;  %v6087_v60 = vmul.f32 1.0614054, %v12172_v41  ;;  %v6407_v19 = vmul.f32 %v6375_v26, %v12073_v16  ;;  %v13063_v53 = vld [vmem:[#allocation32_spill] sm:$0xff] }
 0xe51   :  { %13027 = vst [vmem:[#allocation74_spill] sm:$0xff] %v12174_v33  ;;  %v6216_v29 = vmul.f32 %v12130_v11, %v6184_v3  ;;  %vm5866_vm3 = vcmp.ge.f32.partialorder %v12070_v45, 0.0  ;;  %vm5865_vm4 = vcmp.ge.f32.partialorder %v12097_v13, 0.0  ;;  %v6598_v23 = vadd.f32 1.0, %v6566_v8  ;;  %v5678_v3 = vpop.f32.mrf.mxu1  ;;  %v13029_v13 = vld [vmem:[#allocation54_spill] sm:$0xff] }
 0xe52   :  { %v5995_v34 = vadd.f32 1.0, %v5963_v58  ;;  %v12185_v37 = vpop.eup %8684  ;;  %v6119_v10 = vadd.f32 -1.4531521, %v6087_v60  ;;  %v6410_v28 = vmul.f32 %v6378_v4, %v12094_v55  ;;  %v6377_v5 = vsub.f32 0.0, %v12113_v18 }
 0xe53   :  { %v6090_v14 = vmul.f32 1.0614054, %v12185_v37  ;;  %v6380_v16 = vsub.f32 0.0, %v12139_v2  ;;  %v5684_v54 = vadd.f32 %v8459_v27, %v8403_v36  ;;  %v6277_v31 = vmul.f32 %v12099_v21, %v6245_v63 }
 0xe54   :  { %8694 = vrcp.f32 %v5995_v34  ;;  %v6151_v12 = vmul.f32 %v12172_v41, %v6119_v10  ;;  %v6449_v26 = vmul.f32 1.442695, %v6407_v19  ;;  %v12196_v20 = vsel %vm5866_vm3, 1.0, %v12886_v56  ;;  %v8406_v10 = vpop.f32.mrf.mxu0 }
 0xe55   :  { %v6248_v55 = vadd.f32 -0.28449672, %v6216_v29  ;;  %v6122_v39 = vadd.f32 -1.4531521, %v6090_v14  ;;  %v12199_v8 = vmul.f32 0.5, %v12076_v47  ;;  %v12204_v4 = vsel %vm5865_vm4, 1.0, %v12886_v56 }
 0xe56   :  { %v12206_v58 = vpop.eup %8686  ;;  %v12209_v36 = vmul.f32 %v6598_v23, %v12036_v43  ;;  %v6183_v63 = vadd.f32 1.4214138, %v6151_v12  ;;  %v6455_v45 = vmul.f32 1.442695, %v6410_v28  ;;  %v6409_v60 = vmul.f32 %v6377_v5, %v12113_v18  ;;  %v8462_v12 = vpop.f32.mrf.mxu1 }
 0xe57   :  { %v8689_v19 = vpop.eup %8688  ;;  %v6154_v29 = vmul.f32 %v12185_v37, %v6122_v39  ;;  %v6089_v47 = vmul.f32 1.0614054, %v12206_v58  ;;  %v6412_v34 = vmul.f32 %v6380_v16, %v12139_v2  ;;  %v12216_v27 = vadd.f32 %v5684_v54, %v13029_v13 }
 0xe58   :  { %13028 = vst [vmem:[#allocation30_spill] sm:$0xff] %v12209_v36  ;;  %v6309_v14 = vadd.f32 0.2548296, %v6277_v31  ;;  %v6215_v0 = vmul.f32 %v12172_v41, %v6183_v63  ;;  %8696 = vpow2.f32 %v6449_v26  ;;  %v5679_v43 = vadd.f32 %v5678_v3, %v5453_v17 }
 0xe59   :  { %13030 = vst [vmem:[#allocation41_spill] sm:$0xff] %v12216_v27  ;;  %v6280_v23 = vmul.f32 %v12130_v11, %v6248_v55  ;;  %v6186_v28 = vadd.f32 1.4214138, %v6154_v29  ;;  %v6121_v18 = vadd.f32 -1.4531521, %v6089_v47  ;;  %v12221_v5 = vmul.f32 0.5, %v12117_v9  ;;  %v5463_v55 = vpop.f32.mrf.mxu0 }
 0xe5a   :  { %v6247_v39 = vadd.f32 -0.28449672, %v6215_v0  ;;  %8698 = vpow2.f32 %v6455_v45  ;;  %v6453_v2 = vmul.f32 1.442695, %v6409_v60  ;;  %vm5868_vm5 = vcmp.ge.f32.partialorder %v12124_v51, 0.0  ;;  %v13032_v45 = vld [vmem:[#allocation58_spill] sm:$0xff] }
 0xe5b   :  { %v12224_v16 = vpop.eup %8690  ;;  %v6218_v54 = vmul.f32 %v12185_v37, %v6186_v28  ;;  %v6153_v31 = vmul.f32 %v12206_v58, %v6121_v18  ;;  %v6459_v17 = vmul.f32 1.442695, %v6412_v34  ;;  %v12229_v26 = vmul.f32 0.70710677, %v12216_v27  ;;  %v5688_v34 = vpop.f32.mrf.mxu1 }
 0xe5c   :  { %v8693_v3 = vpop.eup %8692  ;;  %v6341_v9 = vmul.f32 %v12099_v21, %v6309_v14  ;;  %v6092_v0 = vmul.f32 1.0614054, %v12224_v16  ;;  %v6379_v63 = vsub.f32 0.0, %v12165_v62  ;;  %v12235_v60 = vadd.f32 %v5679_v43, %v13032_v45 }
 0xe5d   :  { %13031 = vst [vmem:[#allocation46_spill] sm:$0xff] %v12229_v26  ;;  %v6312_v29 = vadd.f32 0.2548296, %v6280_v23  ;;  %v6279_v47 = vmul.f32 %v12172_v41, %v6247_v39  ;;  %v6250_v13 = vadd.f32 -0.28449672, %v6218_v54  ;;  %8700 = vpow2.f32 %v6453_v2  ;;  %v12249_v39 = vpop.f32.mrf.mxu0  ;;  %v8465_v45 = vpop.f32.mrf.mxu1 }
 0xe5e   :  { %13033 = vst [vmem:[#allocation35_spill] sm:$0xff] %v12235_v60  ;;  %v6185_v28 = vadd.f32 1.4214138, %v6153_v31  ;;  %v6124_v18 = vadd.f32 -1.4531521, %v6092_v0  ;;  %v12239_v46 = vmul.f32 0.5, %v12128_v61  ;;  %v5694_v38 = vadd.f32 %v8462_v12, %v8406_v10 }
 0xe5f   :  { %v6282_v21 = vmul.f32 %v12185_v37, %v6250_v13  ;;  %v12246_v43 = vsel %vm5868_vm5, 1.0, %v12886_v56  ;;  %v5934_v23 = vand.u32 2147483647, %v12229_v26  ;;  %v6501_v2 = vmul.f32 %v8689_v19, %v6341_v9  ;;  %v13064_v26 = vld [vmem:[#allocation27_spill] sm:$0xff] }
 0xe60   :  { %v6217_v14 = vmul.f32 %v12206_v58, %v6185_v28  ;;  %v6156_v61 = vmul.f32 %v12224_v16, %v6124_v18  ;;  %8702 = vpow2.f32 %v6459_v17  ;;  %v6411_v10 = vmul.f32 %v6379_v63, %v12165_v62  ;;  %v5473_v63 = vpop.f32.mrf.mxu0 }
 0xe61   :  { %v12251_v54 = vpop.eup %8694  ;;  %v6344_v12 = vmul.f32 %v12130_v11, %v6312_v29  ;;  %v6311_v31 = vadd.f32 0.2548296, %v6279_v47  ;;  %v12257_v51 = vmul.f32 0.70710677, %v12235_v60  ;;  %v12261_v35 = vadd.f32 %v5694_v38, %v13035_v32  ;;  %v5698_v32 = vpop.f32.mrf.mxu1 }
 0xe62   :  { %v6249_v0 = vadd.f32 -0.28449672, %v6217_v14  ;;  %v6188_v13 = vadd.f32 1.4214138, %v6156_v61  ;;  %v6091_v28 = vmul.f32 1.0614054, %v12251_v54  ;;  %v5689_v19 = vadd.f32 %v5688_v34, %v5463_v55 }
 0xe63   :  { %13034 = vst [vmem:[#allocation49_spill] sm:$0xff] %v12257_v51  ;;  %13036 = vst [vmem:[#allocation48_spill] sm:$0xff] %v12261_v35  ;;  %v6314_v9 = vadd.f32 0.2548296, %v6282_v21  ;;  %v5966_v18 = vmul.f32 0.3275911, %v5934_v23  ;;  %v6504_v27 = vmul.f32 %v8693_v3, %v6344_v12  ;;  %v6343_v61 = vmul.f32 %v12172_v41, %v6311_v31  ;;  %v8412_v12 = vpop.f32.mrf.mxu0 }
 0xe64   :  { %v6281_v17 = vmul.f32 %v12206_v58, %v6249_v0  ;;  %v6382_v62 = vsub.f32 0.0, %v5934_v23  ;;  %v6533_v11 = vsub.f32 1.0, %v6501_v2  ;;  %v6220_v29 = vmul.f32 %v12224_v16, %v6188_v13  ;;  %v13038_v0 = vld [vmem:[#allocation53_spill] sm:$0xff] }
 0xe65   :  { %v6123_v47 = vadd.f32 -1.4531521, %v6091_v28  ;;  %v6457_v14 = vmul.f32 1.442695, %v6411_v10  ;;  %v8697_v60 = vpop.eup %8696  ;;  %v5933_v38 = vand.u32 2147483647, %v12257_v51  ;;  %v12272_v2 = vadd.f32 %v5689_v19, %v13038_v0  ;;  %v8468_v0 = vpop.f32.mrf.mxu1 }
 0xe66   :  { %v6313_v24 = vadd.f32 0.2548296, %v6281_v17  ;;  %v6252_v55 = vadd.f32 -0.28449672, %v6220_v29  ;;  %v12269_v21 = vmul.f32 0.70710677, %v12261_v35  ;;  %v6346_v10 = vmul.f32 %v12185_v37, %v6314_v9 }
 0xe67   :  { %v6155_v34 = vmul.f32 %v12251_v54, %v6123_v47  ;;  %13039 = vst [vmem:[#allocation43_spill] sm:$0xff] %v12272_v2  ;;  %v8699_v13 = vpop.eup %8698  ;;  %vm5867_vm6 = vcmp.ge.f32.partialorder %v12152_v50, 0.0  ;;  %v5998_v3 = vadd.f32 1.0, %v5966_v18  ;;  %v6414_v41 = vmul.f32 %v6382_v62, %v5934_v23 }
 0xe68   :  { %13037 = vst [vmem:[#allocation62_spill] sm:$0xff] %v12269_v21  ;;  %v6565_v31 = vmul.f32 %v6533_v11, %v12105_v57  ;;  %v6345_v28 = vmul.f32 %v12206_v58, %v6313_v24  ;;  %v6284_v17 = vmul.f32 %v12224_v16, %v6252_v55  ;;  %v6536_v47 = vsub.f32 1.0, %v6504_v27  ;;  %v5483_v27 = vpop.f32.mrf.mxu0 }
 0xe69   :  { %v6187_v29 = vadd.f32 1.4214138, %v6155_v34  ;;  %v6503_v52 = vmul.f32 %v8697_v60, %v6343_v61  ;;  %8704 = vpow2.f32 %v6457_v14  ;;  %v6381_v19 = vsub.f32 0.0, %v5933_v38 }
 0xe6a   :  { %v6316_v40 = vadd.f32 0.2548296, %v6284_v17  ;;  %v5936_v9 = vand.u32 2147483647, %v12269_v21  ;;  %v12282_v23 = vmul.f32 0.70710677, %v12272_v2  ;;  %v8701_v18 = vpop.eup %8700  ;;  %v6506_v57 = vmul.f32 %v8699_v13, %v6346_v10  ;;  %v5708_v13 = vpop.f32.mrf.mxu1 }
 0xe6b   :  { %v6219_v37 = vmul.f32 %v12251_v54, %v6187_v29  ;;  %v12287_v24 = vsel %vm5867_vm6, 1.0, %v12886_v56  ;;  %8706 = vrcp.f32 %v5998_v3  ;;  %v6463_v58 = vmul.f32 1.442695, %v6414_v41  ;;  %v8415_v59 = vpop.f32.mrf.mxu0  ;;  %v13060_v2 = vld [vmem:[#allocation29_spill] sm:$0xff] }
 0xe6c   :  { %13040 = vst [vmem:[#allocation31_spill] sm:$0xff] %v12282_v23  ;;  %v6597_v60 = vadd.f32 1.0, %v6565_v31  ;;  %v6505_v62 = vmul.f32 %v8701_v18, %v6345_v28  ;;  %v5965_v14 = vmul.f32 0.3275911, %v5933_v38  ;;  %v6568_v55 = vmul.f32 %v6536_v47, %v12147_v30  ;;  %v13041_v31 = vld [vmem:[#allocation44_spill] sm:$0xff] }
 0xe6d   :  { %v6251_v11 = vadd.f32 -0.28449672, %v6219_v37  ;;  %v8703_v61 = vpop.eup %8702  ;;  %v6535_v34 = vsub.f32 1.0, %v6503_v52  ;;  %v6413_v17 = vmul.f32 %v6381_v19, %v5933_v38  ;;  %v5704_v29 = vadd.f32 %v8465_v45, %v12249_v39  ;;  %v8471_v19 = vpop.f32.mrf.mxu1 }
 0xe6e   :  { %v6348_v10 = vmul.f32 %v12224_v16, %v6316_v40  ;;  %v6384_v15 = vsub.f32 0.0, %v5936_v9  ;;  %v5935_v3 = vand.u32 2147483647, %v12282_v23  ;;  %v6538_v41 = vsub.f32 1.0, %v6506_v57  ;;  %v13043_v16 = vld [vmem:[#allocation47_spill] sm:$0xff] }
 0xe6f   :  { %v6283_v50 = vmul.f32 %v12251_v54, %v6251_v11  ;;  %v12295_v28 = vadd.f32 %v5704_v29, %v13041_v31  ;;  %v5699_v37 = vadd.f32 %v5698_v32, %v5473_v63  ;;  %v5714_v18 = vadd.f32 %v8468_v0, %v8412_v12  ;;  %v13045_v63 = vld [vmem:[#allocation40_spill] sm:$0xff] }
 0xe70   :  { %v6537_v30 = vsub.f32 1.0, %v6505_v62  ;;  %8708 = vpow2.f32 %v6463_v58  ;;  %v5997_v38 = vadd.f32 1.0, %v5965_v14  ;;  %v6567_v39 = vmul.f32 %v6535_v34, %v12178_v48  ;;  %v5493_v62 = vpop.f32.mrf.mxu0 }
 0xe71   :  { %13042 = vst [vmem:[#allocation45_spill] sm:$0xff] %v12295_v28  ;;  %v6315_v52 = vadd.f32 0.2548296, %v6283_v50  ;;  %v5968_v45 = vmul.f32 0.3275911, %v5936_v9  ;;  %v12302_v47 = vadd.f32 %v5699_v37, %v13043_v16  ;;  %v6508_v57 = vmul.f32 %v8703_v61, %v6348_v10 }
 0xe72   :  { %v12299_v40 = vmul.f32 0.70710677, %v12295_v28  ;;  %v6416_v11 = vmul.f32 %v6384_v15, %v5936_v9  ;;  %v6383_v29 = vsub.f32 0.0, %v5935_v3  ;;  %v12305_v32 = vadd.f32 %v5714_v18, %v13045_v63 }
 0xe73   :  { %13044 = vst [vmem:[#allocation56_spill] sm:$0xff] %v12302_v47  ;;  %v6600_v12 = vadd.f32 1.0, %v6568_v55  ;;  %v6570_v0 = vmul.f32 %v6538_v41, %v12196_v20  ;;  %v6461_v58 = vmul.f32 1.442695, %v6413_v17  ;;  %v12309_v48 = vmul.f32 0.70710677, %v12302_v47  ;;  %v5718_v20 = vpop.f32.mrf.mxu1 }
 0xe74   :  { %v12312_v14 = vmul.f32 %v6597_v60, %v12063_v1  ;;  %v6569_v34 = vmul.f32 %v6537_v30, %v12204_v4  ;;  %v6347_v61 = vmul.f32 %v12251_v54, %v6315_v52  ;;  %v5967_v15 = vmul.f32 0.3275911, %v5935_v3  ;;  %v8418_v60 = vpop.f32.mrf.mxu0 }
 0xe75   :  { %v6599_v9 = vadd.f32 1.0, %v6567_v39  ;;  %v6000_v10 = vadd.f32 1.0, %v5968_v45  ;;  %v5938_v50 = vand.u32 2147483647, %v12299_v40  ;;  %v12318_v55 = vmul.f32 0.70710677, %v12305_v32 }
 0xe76   :  { %13046 = vst [vmem:[#allocation24_spill] sm:$0xff] %v12312_v14  ;;  %v8705_v17 = vpop.eup %8704  ;;  %v6540_v41 = vsub.f32 1.0, %v6508_v57  ;;  %8710 = vrcp.f32 %v5997_v38  ;;  %v6467_v31 = vmul.f32 1.442695, %v6416_v11  ;;  %v6415_v37 = vmul.f32 %v6383_v29, %v5935_v3 }
 0xe77   :  { %v12321_v1 = vmul.f32 %v6600_v12, %v12136_v42  ;;  %v6602_v4 = vadd.f32 1.0, %v6570_v0  ;;  %8712 = vpow2.f32 %v6461_v58  ;;  %v5937_v54 = vand.u32 2147483647, %v12309_v48  ;;  %v8474_v42 = vpop.f32.mrf.mxu1  ;;  %v13049_v12 = vld [vmem:[#allocation42_spill] sm:$0xff] }
 0xe78   :  { %v12324_v18 = vpop.eup %8706  ;;  %v6601_v30 = vadd.f32 1.0, %v6569_v34  ;;  %v6507_v52 = vmul.f32 %v8705_v17, %v6347_v61  ;;  %v5999_v39 = vadd.f32 1.0, %v5967_v15  ;;  %v5709_v45 = vadd.f32 %v5708_v13, %v5483_v27  ;;  %v5503_v27 = vpop.f32.mrf.mxu0 }
 0xe79   :  { %13047 = vst [vmem:[#allocation33_spill] sm:$0xff] %v12321_v1  ;;  %v12327_v16 = vmul.f32 %v6599_v9, %v12156_v44  ;;  %8714 = vrcp.f32 %v6000_v10  ;;  %v6386_v38 = vsub.f32 0.0, %v5938_v50  ;;  %v5940_v3 = vand.u32 2147483647, %v12318_v55  ;;  %v13054_v10 = vld [vmem:[#allocation38_spill] sm:$0xff] }
 0xe7a   :  { %v6572_v57 = vmul.f32 %v6540_v41, %v12246_v43  ;;  %8716 = vpow2.f32 %v6467_v31  ;;  %v6465_v11 = vmul.f32 1.442695, %v6415_v37  ;;  %v5970_v29 = vmul.f32 0.3275911, %v5938_v50  ;;  %v13055_v41 = vld [vmem:[#allocation39_spill] sm:$0xff] }
 0xe7b   :  { %13048 = vst [vmem:[#allocation59_spill] sm:$0xff] %v12327_v16  ;;  %v6385_v63 = vsub.f32 0.0, %v5937_v54  ;;  %v12332_v0 = vadd.f32 %v5709_v45, %v13049_v12  ;;  %v5724_v58 = vadd.f32 %v8471_v19, %v8415_v59  ;;  %v5719_v34 = vadd.f32 %v5718_v20, %v5493_v62  ;;  %v5728_v59 = vpop.f32.mrf.mxu1 }
 0xe7c   :  { %v12335_v44 = vmul.f32 %v6602_v4, %v12169_v22  ;;  %v12338_v13 = vmul.f32 %v6601_v30, %v12199_v8  ;;  %v6539_v61 = vsub.f32 1.0, %v6507_v52  ;;  %8718 = vrcp.f32 %v5999_v39  ;;  %v8421_v30 = vpop.f32.mrf.mxu0  ;;  %v13056_v39 = vld [vmem:[#allocation34_spill] sm:$0xff] }
 0xe7d   :  { %13050 = vst [vmem:[#allocation26_spill] sm:$0xff] %v12332_v0  ;;  %v12340_v15 = vpop.eup %8708  ;;  %v6418_v43 = vmul.f32 %v6386_v38, %v5938_v50  ;;  %v6388_v9 = vsub.f32 0.0, %v5940_v3  ;;  %v12343_v17 = vadd.f32 %v5724_v58, %v13054_v10  ;;  %v12346_v31 = vadd.f32 %v5719_v34, %v13055_v41  ;;  %v13059_v41 = vld [vmem:[#allocation36_spill] sm:$0xff] }
 0xe7e   :  { %13051 = vst [vmem:[#allocation21_spill] sm:$0xff] %v12335_v44  ;;  %13052 = vst [vmem:[#allocation8_spill] sm:$0xff] %v12338_v13  ;;  %v6604_v19 = vadd.f32 1.0, %v6572_v57  ;;  %8720 = vpow2.f32 %v6465_v11  ;;  %v5969_v22 = vmul.f32 0.3275911, %v5937_v54  ;;  %v5734_v62 = vadd.f32 %v8474_v42, %v8418_v60  ;;  %v8477_v11 = vpop.f32.mrf.mxu1 }
 0xe7f   :  { %13053 = vst [vmem:[#allocation20_spill] sm:$0xff] %v12340_v15  ;;  %v6002_v20 = vadd.f32 1.0, %v5970_v29  ;;  %v6417_v8 = vmul.f32 %v6385_v63, %v5937_v54  ;;  %v5972_v37 = vmul.f32 0.3275911, %v5940_v3  ;;  %v12349_v4 = vmul.f32 0.70710677, %v12332_v0 }
 0xe80   :  { %v12352_v50 = vmul.f32 0.70710677, %v12343_v17  ;;  %v12355_v52 = vmul.f32 0.70710677, %v12346_v31  ;;  %v12358_v45 = vadd.f32 %v5734_v62, %v13056_v39  ;;  %v5729_v38 = vadd.f32 %v5728_v59, %v5503_v27 }
 0xe81   :  { %v6571_v57 = vmul.f32 %v6539_v61, %v12287_v24  ;;  %v6471_v60 = vmul.f32 1.442695, %v6418_v43  ;;  %v12362_v54 = vmul.f32 0.5, %v12305_v32  ;;  %v6420_v42 = vmul.f32 %v6388_v9, %v5940_v3  ;;  %v5513_v61 = vpop.f32.mrf.mxu0 }
 0xe82   :  { %v6001_v29 = vadd.f32 1.0, %v5969_v22  ;;  %v5942_v63 = vand.u32 2147483647, %v12352_v50  ;;  %v5941_v12 = vand.u32 2147483647, %v12355_v52  ;;  %v5744_v58 = vadd.f32 %v8477_v11, %v8421_v30 }
 0xe83   :  { %13057 = vst [vmem:[#allocation6_spill] sm:$0xff] %v12362_v54  ;;  %v12366_v34 = vpop.eup %8710  ;;  %8722 = vrcp.f32 %v6002_v20  ;;  %v6469_v10 = vmul.f32 1.442695, %v6417_v8  ;;  %v5939_v27 = vand.u32 2147483647, %v12349_v4  ;;  %v6004_v3 = vadd.f32 1.0, %v5972_v37  ;;  %v5738_v8 = vpop.f32.mrf.mxu1 }
 0xe84   :  { %v12370_v24 = vmul.f32 0.70710677, %v12358_v45  ;;  %v12372_v32 = vpop.eup %8712  ;;  %v5974_v43 = vmul.f32 0.3275911, %v5942_v63  ;;  %v5973_v9 = vmul.f32 0.3275911, %v5941_v12  ;;  %v12375_v59 = vadd.f32 %v5729_v38, %v13059_v41  ;;  %v8424_v41 = vpop.f32.mrf.mxu0 }
 0xe85   :  { %13058 = vst [vmem:[#allocation23_spill] sm:$0xff] %v12372_v32  ;;  %8724 = vpow2.f32 %v6471_v60  ;;  %v6475_v22 = vmul.f32 1.442695, %v6420_v42  ;;  %v6390_v62 = vsub.f32 0.0, %v5942_v63  ;;  %v12381_v39 = vmul.f32 %v6604_v19, %v12221_v5 }
 0xe86   :  { %v5944_v20 = vand.u32 2147483647, %v12370_v24  ;;  %v12378_v30 = vpop.eup %8714  ;;  %8726 = vrcp.f32 %v6001_v29  ;;  %v6006_v11 = vadd.f32 1.0, %v5974_v43  ;;  %v12384_v37 = vadd.f32 %v5744_v58, %v13060_v2  ;;  %v8480_v58 = vpop.f32.mrf.mxu1 }
 0xe87   :  { %v12386_v25 = vpop.eup %8716  ;;  %8728 = vpow2.f32 %v6469_v10  ;;  %v5971_v38 = vmul.f32 0.3275911, %v5939_v27  ;;  %v6005_v60 = vadd.f32 1.0, %v5973_v9  ;;  %v6603_v49 = vadd.f32 1.0, %v6571_v57  ;;  %v5523_v15 = vpop.f32.mrf.mxu0 }
 0xe88   :  { %13061 = vst [vmem:[#allocation25_spill] sm:$0xff] %v12386_v25  ;;  %v5976_v42 = vmul.f32 0.3275911, %v5944_v20  ;;  %8730 = vrcp.f32 %v6004_v3  ;;  %v6389_v7 = vsub.f32 0.0, %v5941_v12  ;;  %v12389_v32 = vmul.f32 0.70710677, %v12375_v59  ;;  %v5748_v6 = vpop.f32.mrf.mxu1 }
 0xe89   :  { %v12391_v5 = vpop.eup %8718  ;;  %8732 = vpow2.f32 %v6475_v22  ;;  %v6387_v19 = vsub.f32 0.0, %v5939_v27  ;;  %v6422_v29 = vmul.f32 %v6390_v62, %v5942_v63  ;;  %v6392_v43 = vsub.f32 0.0, %v5944_v20 }
 0xe8a   :  { %v6008_v2 = vadd.f32 1.0, %v5976_v42  ;;  %8734 = vrcp.f32 %v6006_v11  ;;  %v5943_v10 = vand.u32 2147483647, %v12389_v32  ;;  %v12395_v9 = vmul.f32 0.70710677, %v12384_v37 }
 0xe8b   :  { %v12397_v57 = vpop.eup %8720  ;;  %v6003_v3 = vadd.f32 1.0, %v5971_v38  ;;  %8736 = vrcp.f32 %v6005_v60  ;;  %v5739_v35 = vadd.f32 %v5738_v8, %v5513_v61  ;;  %v5754_v51 = vadd.f32 %v8480_v58, %v8424_v41 }
 0xe8c   :  { %13062 = vst [vmem:[#allocation19_spill] sm:$0xff] %v12397_v57  ;;  %v12400_v22 = vmul.f32 %v6603_v49, %v12239_v46  ;;  %v6421_v63 = vmul.f32 %v6389_v7, %v5941_v12  ;;  %8738 = vrcp.f32 %v6008_v2  ;;  %v5975_v62 = vmul.f32 0.3275911, %v5943_v10 }
 0xe8d   :  { %v6479_v11 = vmul.f32 1.442695, %v6422_v29  ;;  %v5946_v42 = vand.u32 2147483647, %v12395_v9  ;;  %v5785_v47 = vadd.f32 %v5739_v35, %v13063_v53  ;;  %v5788_v33 = vadd.f32 %v5754_v51, %v13064_v26 }
 0xe8e   :  { %v12406_v38 = vmul.f32 0.5, %v12343_v17  ;;  %v6424_v61 = vmul.f32 %v6392_v43, %v5944_v20  ;;  %v6007_v8 = vadd.f32 1.0, %v5975_v62  ;;  %v5749_v60 = vadd.f32 %v5748_v6, %v5523_v15 }
 0xe8f   :  { %8740 = vrcp.f32 %v6003_v3  ;;  %v6419_v46 = vmul.f32 %v6387_v19, %v5939_v27  ;;  %v5978_v49 = vmul.f32 0.3275911, %v5946_v42  ;;  %v12408_v7 = vmul.f32 0.70710677, %v5785_v47  ;;  %v13067_v19 = vld [vmem:[#allocation28_spill] sm:$0xff] }
 0xe90   :  { %13065 = vst [vmem:[#allocation22_spill] sm:$0xff] %v12406_v38  ;;  %v12410_v12 = vpop.eup %8722  ;;  %v12413_v41 = vmul.f32 0.5, %v12346_v31  ;;  %8742 = vrcp.f32 %v6007_v8  ;;  %v6391_v35 = vsub.f32 0.0, %v5943_v10  ;;  %v5852_v53 = vmul.f32 0.70710677, %v5788_v33 }
 0xe91   :  { %8744 = vpow2.f32 %v6479_v11  ;;  %v6477_v26 = vmul.f32 1.442695, %v6421_v63  ;;  %v6010_v51 = vadd.f32 1.0, %v5978_v49  ;;  %v5945_v17 = vand.u32 2147483647, %v12408_v7 }
 0xe92   :  { %13066 = vst [vmem:[#allocation17_spill] sm:$0xff] %v12413_v41  ;;  %v12416_v20 = vpop.eup %8724  ;;  %v6483_v6 = vmul.f32 1.442695, %v6424_v61  ;;  %v6394_v15 = vsub.f32 0.0, %v5946_v42  ;;  %v5948_v27 = vand.u32 2147483647, %v5852_v53  ;;  %v5787_v29 = vadd.f32 %v5749_v60, %v13067_v19 }
 0xe93   :  { %v12419_v2 = vpop.eup %8726  ;;  %v12421_v58 = vmul.f32 1.442695, %v6419_v46  ;;  %v12424_v31 = vmul.f32 0.5, %v12358_v45  ;;  %8746 = vrcp.f32 %v6010_v51  ;;  %v5977_v43 = vmul.f32 0.3275911, %v5945_v17 }
 0xe94   :  { %v12426_v3 = vpop.eup %8728  ;;  %v6423_v63 = vmul.f32 %v6391_v35, %v5943_v10  ;;  %vm5882_vm0 = vcmp.ge.f32.partialorder %v12395_v9, 0.0  ;;  %v5980_v62 = vmul.f32 0.3275911, %v5948_v27  ;;  %v5851_v11 = vmul.f32 0.70710677, %v5787_v29 }
 0xe95   :  { %13068 = vst [vmem:[#allocation18_spill] sm:$0xff] %v12424_v31  ;;  %13069 = vst [vmem:[#allocation15_spill] sm:$0xff] %v12426_v3  ;;  %v12429_v61 = vpop.eup %8730  ;;  %8748 = vpow2.f32 %v6477_v26  ;;  %v12432_v8 = vmul.f32 0.5, %v12375_v59  ;;  %v6009_v60 = vadd.f32 1.0, %v5977_v43  ;;  %v6393_v46 = vsub.f32 0.0, %v5945_v17 }
 0xe96   :  { %v12434_v49 = vpop.eup %8732  ;;  %8750 = vpow2.f32 %v6483_v6  ;;  %v6426_v45 = vmul.f32 %v6394_v15, %v5946_v42  ;;  %v6012_v51 = vadd.f32 1.0, %v5980_v62  ;;  %v5947_v19 = vand.u32 2147483647, %v5851_v11 }
 0xe97   :  { %13070 = vst [vmem:[#allocation16_spill] sm:$0xff] %v12432_v8  ;;  %v12436_v57 = vpop.eup %8734  ;;  %vm5880_vm7 = vcmp.ge.f32.partialorder %v12370_v24, 0.0  ;;  %v12440_v10 = vmul.f32 0.5, %v12384_v37  ;;  %8752 = vrcp.f32 %v6009_v60  ;;  %v6396_v35 = vsub.f32 0.0, %v5948_v27 }
 0xe98   :  { %v12445_v59 = vsel %vm5882_vm0, 1.0, %v12886_v56  ;;  %v12447_v26 = vpop.eup %8736  ;;  %vm5879_vm8 = vcmp.ge.f32.partialorder %v12389_v32, 0.0  ;;  %v6481_v42 = vmul.f32 1.442695, %v6423_v63  ;;  %v12450_v6 = vmul.f32 0.5, %v5785_v47 }
 0xe99   :  { %8754 = vrcp.f32 %v6012_v51  ;;  %v5979_v15 = vmul.f32 0.3275911, %v5947_v19  ;;  %v12452_v43 = vpop.eup %8738  ;;  %vm5878_vm9 = vcmp.ge.f32.partialorder %v12352_v50, 0.0  ;;  %vm5881_vm10 = vcmp.ge.f32.partialorder %v12408_v7, 0.0 }
 0xe9a   :  { %13071 = vst [vmem:[#allocation13_spill] sm:$0xff] %v12450_v6  ;;  %v6425_v37 = vmul.f32 %v6393_v46, %v5945_v17  ;;  %v12456_v62 = vmul.f32 0.5, %v5788_v33  ;;  %vm5884_vm11 = vcmp.ge.f32.partialorder %v5852_v53, 0.0  ;;  %v6487_v9 = vmul.f32 1.442695, %v6426_v45 }
 0xe9b   :  { %v12458_v60 = vmul.f32 0.5, %v5787_v29  ;;  %v6011_v14 = vadd.f32 1.0, %v5979_v15  ;;  %v6104_v63 = vmul.f32 1.0614054, %v12452_v43  ;;  %v6428_v47 = vmul.f32 %v6396_v35, %v5948_v27 }
 0xe9c   :  { %vm5883_vm12 = vcmp.ge.f32.partialorder %v5851_v11, 0.0  ;;  %v6102_v51 = vmul.f32 1.0614054, %v12436_v57  ;;  %v6101_v28 = vmul.f32 1.0614054, %v12447_v26  ;;  %v12463_v25 = vpop.eup %8740  ;;  %v12466_v17 = vsel %vm5884_vm11, 1.0, %v12886_v56 }
 0xe9d   :  { %8756 = vrcp.f32 %v6011_v14  ;;  %v6136_v33 = vadd.f32 -1.4531521, %v6104_v63  ;;  %v6100_v53 = vmul.f32 1.0614054, %v12429_v61  ;;  %v12469_v29 = vpop.eup %8742  ;;  %v6485_v46 = vmul.f32 1.442695, %v6425_v37 }
 0xe9e   :  { %8758 = vpow2.f32 %v6481_v42  ;;  %v6134_v45 = vadd.f32 -1.4531521, %v6102_v51  ;;  %v6133_v27 = vadd.f32 -1.4531521, %v6101_v28  ;;  %v12471_v11 = vpop.eup %8744  ;;  %v6395_v35 = vsub.f32 0.0, %v5947_v19 }
 0xe9f   :  { %v12474_v15 = vsel %vm5883_vm12, 1.0, %v12886_v56  ;;  %v6168_v14 = vmul.f32 %v12452_v43, %v6136_v33  ;;  %v6103_v54 = vmul.f32 1.0614054, %v12469_v29  ;;  %vm5877_vm13 = vcmp.ge.f32.partialorder %v12355_v52, 0.0 }
 0xea0   :  { %v6491_v63 = vmul.f32 1.442695, %v6428_v47  ;;  %v12482_v42 = vsel %vm5881_vm10, 1.0, %v12886_v56  ;;  %v6166_v28 = vmul.f32 %v12436_v57, %v6134_v45  ;;  %v6165_v37 = vmul.f32 %v12447_v26, %v6133_v27  ;;  %v12486_v51 = vpop.eup %8746 }
 0xea1   :  { %8760 = vpow2.f32 %v6487_v9  ;;  %v6200_v36 = vadd.f32 1.4214138, %v6168_v14  ;;  %v6135_v0 = vadd.f32 -1.4531521, %v6103_v54  ;;  %v6132_v33 = vadd.f32 -1.4531521, %v6100_v53 }
 0xea2   :  { %8762 = vpow2.f32 %v6485_v46  ;;  %v6106_v23 = vmul.f32 1.0614054, %v12486_v51  ;;  %v6198_v41 = vadd.f32 1.4214138, %v6166_v28  ;;  %v6197_v47 = vadd.f32 1.4214138, %v6165_v37  ;;  %v12489_v16 = vpop.eup %8748 }
 0xea3   :  { %v6427_v7 = vmul.f32 %v6395_v35, %v5947_v19  ;;  %v12494_v45 = vsel %vm5880_vm7, 1.0, %v12886_v56  ;;  %v6232_v27 = vmul.f32 %v12452_v43, %v6200_v36  ;;  %v6167_v9 = vmul.f32 %v12469_v29, %v6135_v0  ;;  %v8751_v14 = vpop.eup %8750 }
 0xea4   :  { %v6138_v54 = vadd.f32 -1.4531521, %v6106_v23  ;;  %v12501_v53 = vsel %vm5879_vm8, 1.0, %v12886_v56  ;;  %v6230_v46 = vmul.f32 %v12436_v57, %v6198_v41  ;;  %v6229_v19 = vmul.f32 %v12447_v26, %v6197_v47  ;;  %v12505_v35 = vpop.eup %8752 }
 0xea5   :  { %v6264_v24 = vadd.f32 -0.28449672, %v6232_v27  ;;  %v6199_v28 = vadd.f32 1.4214138, %v6167_v9  ;;  %v12510_v36 = vsel %vm5878_vm9, 1.0, %v12886_v56  ;;  %v6164_v23 = vmul.f32 %v12429_v61, %v6132_v33 }
 0xea6   :  { %v12513_v0 = vpop.eup %8754  ;;  %v6170_v32 = vmul.f32 %v12486_v51, %v6138_v54  ;;  %v6105_v37 = vmul.f32 1.0614054, %v12505_v35  ;;  %v6262_v41 = vadd.f32 -0.28449672, %v6230_v46  ;;  %v6261_v38 = vadd.f32 -0.28449672, %v6229_v19 }
 0xea7   :  { %v6489_v47 = vmul.f32 1.442695, %v6427_v7  ;;  %v6108_v1 = vmul.f32 1.0614054, %v12513_v0  ;;  %v6296_v27 = vmul.f32 %v12452_v43, %v6264_v24  ;;  %v6231_v9 = vmul.f32 %v12469_v29, %v6199_v28 }
 0xea8   :  { %vm5876_vm14 = vcmp.ge.f32.partialorder %v12318_v55, 0.0  ;;  %v6202_v50 = vadd.f32 1.4214138, %v6170_v32  ;;  %v6137_v3 = vadd.f32 -1.4531521, %v6105_v37  ;;  %v6294_v33 = vmul.f32 %v12436_v57, %v6262_v41 }
 0xea9   :  { %v6293_v8 = vmul.f32 %v12447_v26, %v6261_v38  ;;  %8764 = vpow2.f32 %v6491_v63  ;;  %v6140_v54 = vadd.f32 -1.4531521, %v6108_v1  ;;  %v6328_v13 = vadd.f32 0.2548296, %v6296_v27 }
 0xeaa   :  { %v6263_v46 = vadd.f32 -0.28449672, %v6231_v9  ;;  %v12523_v19 = vpop.eup %8756  ;;  %v6234_v7 = vmul.f32 %v12486_v51, %v6202_v50  ;;  %v6169_v24 = vmul.f32 %v12505_v35, %v6137_v3  ;;  %v6326_v31 = vadd.f32 0.2548296, %v6294_v33 }
 0xeab   :  { %v6196_v28 = vadd.f32 1.4214138, %v6164_v23  ;;  %v12527_v44 = vpop.eup %8758  ;;  %vm5875_vm15 = vcmp.ge.f32.partialorder %v12349_v4, 0.0  ;;  %v6172_v32 = vmul.f32 %v12513_v0, %v6140_v54  ;;  %v6107_v38 = vmul.f32 1.0614054, %v12523_v19 }
 0xeac   :  { %v12535_v1 = vsel %vm5877_vm13, 1.0, %v12886_v56  ;;  %v6325_v63 = vadd.f32 0.2548296, %v6293_v8  ;;  %vm5874_vm1 = vcmp.ge.f32.partialorder %v12299_v40, 0.0  ;;  %v6266_v37 = vadd.f32 -0.28449672, %v6234_v7 }
 0xead   :  { %v6201_v3 = vadd.f32 1.4214138, %v6169_v24  ;;  %v6360_v23 = vmul.f32 %v12452_v43, %v6328_v13  ;;  %v6099_v41 = vmul.f32 1.0614054, %v12463_v25  ;;  %8766 = vpow2.f32 %v6489_v47 }
 0xeae   :  { %v6204_v27 = vadd.f32 1.4214138, %v6172_v32  ;;  %v6139_v9 = vadd.f32 -1.4531521, %v6107_v38  ;;  %v6295_v50 = vmul.f32 %v12469_v29, %v6263_v46  ;;  %v8761_v33 = vpop.eup %8760  ;;  %v6298_v54 = vmul.f32 %v12486_v51, %v6266_v37 }
 0xeaf   :  { %v6233_v52 = vmul.f32 %v12505_v35, %v6201_v3  ;;  %v6358_v8 = vmul.f32 %v12436_v57, %v6326_v31  ;;  %v6228_v21 = vmul.f32 %v12429_v61, %v6196_v28  ;;  %v8763_v7 = vpop.eup %8762  ;;  %v6357_v43 = vmul.f32 %v12447_v26, %v6325_v63 }
 0xeb0   :  { %v6236_v24 = vmul.f32 %v12513_v0, %v6204_v27  ;;  %v6171_v13 = vmul.f32 %v12523_v19, %v6139_v9  ;;  %v6098_v47 = vmul.f32 1.0614054, %v12410_v12  ;;  %v6330_v32 = vadd.f32 0.2548296, %v6298_v54 }
 0xeb1   :  { %v6265_v46 = vadd.f32 -0.28449672, %v6233_v52  ;;  %v6520_v38 = vmul.f32 %v8751_v14, %v6360_v23  ;;  %v6131_v6 = vadd.f32 -1.4531521, %v6099_v41  ;;  %8768 = vpow2.f32 %v12421_v58 }
 0xeb2   :  { %v6268_v37 = vadd.f32 -0.28449672, %v6236_v24  ;;  %v6203_v3 = vadd.f32 1.4214138, %v6171_v13  ;;  %v6327_v57 = vadd.f32 0.2548296, %v6295_v50  ;;  %v6362_v31 = vmul.f32 %v12486_v51, %v6330_v32 }
 0xeb3   :  { %v6297_v28 = vmul.f32 %v12505_v35, %v6265_v46  ;;  %v6518_v27 = vmul.f32 %v12471_v11, %v6358_v8  ;;  %v6260_v9 = vadd.f32 -0.28449672, %v6228_v21  ;;  %v6517_v54 = vmul.f32 %v12489_v16, %v6357_v43 }
 0xeb4   :  { %v6300_v26 = vmul.f32 %v12513_v0, %v6268_v37  ;;  %v6235_v63 = vmul.f32 %v12523_v19, %v6203_v3  ;;  %v12559_v58 = vsel %vm5876_vm14, 1.0, %v12886_v56  ;;  %v6552_v23 = vsub.f32 1.0, %v6520_v38 }
 0xeb5   :  { %v6329_v14 = vadd.f32 0.2548296, %v6297_v28  ;;  %v6163_v51 = vmul.f32 %v12463_v25, %v6131_v6  ;;  %v6130_v41 = vadd.f32 -1.4531521, %v6098_v47  ;;  %v6522_v11 = vmul.f32 %v8761_v33, %v6362_v31 }
 0xeb6   :  { %v6332_v50 = vadd.f32 0.2548296, %v6300_v26  ;;  %v6267_v52 = vadd.f32 -0.28449672, %v6235_v63  ;;  %v6359_v21 = vmul.f32 %v12469_v29, %v6327_v57  ;;  %v8765_v8 = vpop.eup %8764  ;;  %v6550_v13 = vsub.f32 1.0, %v6518_v27 }
 0xeb7   :  { %v6361_v24 = vmul.f32 %v12505_v35, %v6329_v14  ;;  %v6292_v16 = vmul.f32 %v12429_v61, %v6260_v9  ;;  %v12568_v55 = vsel %vm5875_vm15, 1.0, %v12886_v56  ;;  %v6549_v47 = vsub.f32 1.0, %v6517_v54 }
 0xeb8   :  { %v6364_v43 = vmul.f32 %v12513_v0, %v6332_v50  ;;  %v6299_v6 = vmul.f32 %v12523_v19, %v6267_v52  ;;  %v12575_v29 = vsel %vm5874_vm1, 1.0, %v12886_v56  ;;  %v6584_v35 = vmul.f32 %v6552_v23, %v12494_v45 }
 0xeb9   :  { %v6521_v33 = vmul.f32 %v8763_v7, %v6361_v24  ;;  %v6195_v32 = vadd.f32 1.4214138, %v6163_v51  ;;  %v6162_v46 = vmul.f32 %v12410_v12, %v6130_v41  ;;  %v6554_v37 = vsub.f32 1.0, %v6522_v11 }
 0xeba   :  { %v6524_v38 = vmul.f32 %v8765_v8, %v6364_v43  ;;  %v6331_v4 = vadd.f32 0.2548296, %v6299_v6  ;;  %v6519_v3 = vmul.f32 %v12527_v44, %v6359_v21  ;;  %v8767_v0 = vpop.eup %8766  ;;  %v6582_v57 = vmul.f32 %v6550_v13, %v12510_v36 }
 0xebb   :  { %v6324_v31 = vadd.f32 0.2548296, %v6292_v16  ;;  %v6227_v28 = vmul.f32 %v12463_v25, %v6195_v32  ;;  %v6194_v40 = vadd.f32 1.4214138, %v6162_v46  ;;  %v12584_v45 = vmul.f32 %v6549_v47, %v12535_v1 }
 0xebc   :  { %v6556_v27 = vsub.f32 1.0, %v6524_v38  ;;  %v6363_v7 = vmul.f32 %v12523_v19, %v6331_v4  ;;  %v6097_v9 = vmul.f32 1.0614054, %v12419_v2  ;;  %v6553_v26 = vsub.f32 1.0, %v6521_v33 }
 0xebd   :  { %v12587_v63 = vadd.f32 1.0, %v6584_v35  ;;  %v6259_v54 = vadd.f32 -0.28449672, %v6227_v28  ;;  %v6226_v44 = vmul.f32 %v12410_v12, %v6194_v40  ;;  %v6586_v23 = vmul.f32 %v6554_v37, %v12445_v59 }
 0xebe   :  { %v6588_v36 = vmul.f32 %v6556_v27, %v12466_v17  ;;  %v6523_v14 = vmul.f32 %v8767_v0, %v6363_v7  ;;  %v6129_v51 = vadd.f32 -1.4531521, %v6097_v9  ;;  %v8769_v41 = vpop.eup %8768  ;;  %v6551_v50 = vsub.f32 1.0, %v6519_v3 }
 0xebf   :  { %v6356_v19 = vmul.f32 %v12429_v61, %v6324_v31  ;;  %v6291_v1 = vmul.f32 %v12463_v25, %v6259_v54  ;;  %v6258_v52 = vadd.f32 -0.28449672, %v6226_v44  ;;  %v12594_v8 = vadd.f32 1.0, %v6582_v57 }
 0xec0   :  { %v6620_v11 = vadd.f32 1.0, %v6588_v36  ;;  %v6555_v21 = vsub.f32 1.0, %v6523_v14  ;;  %v6161_v24 = vmul.f32 %v12419_v2, %v6129_v51  ;;  %v6585_v13 = vmul.f32 %v6553_v26, %v12482_v42  ;;  %v13073_v36 = vld [vmem:[#allocation62_spill] sm:$0xff] }
 0xec1   :  { %v6323_v17 = vadd.f32 0.2548296, %v6291_v1  ;;  %v6290_v16 = vmul.f32 %v12410_v12, %v6258_v52  ;;  %v6096_v59 = vmul.f32 1.0614054, %v12378_v30  ;;  %v6618_v6 = vadd.f32 1.0, %v6586_v23 }
 0xec2   :  { %v6652_v43 = vmul.f32 %v6620_v11, %v12456_v62  ;;  %v6587_v61 = vmul.f32 %v6555_v21, %v12474_v15  ;;  %v6193_v47 = vadd.f32 1.4214138, %v6161_v24  ;;  %v6516_v33 = vmul.f32 %v12434_v49, %v6356_v19 }
 0xec3   :  { %v6355_v35 = vmul.f32 %v12463_v25, %v6323_v17  ;;  %v6322_v32 = vadd.f32 0.2548296, %v6290_v16  ;;  %v6128_v46 = vadd.f32 -1.4531521, %v6096_v59  ;;  %v6583_v42 = vmul.f32 %v6551_v50, %v12501_v53  ;;  %v13075_v50 = vld [vmem:[#allocation18_spill] sm:$0xff]  ;;  %v13076_v17 = vld [vmem:[#allocation8_spill] sm:$0xff] }
 0xec4   :  { %7591 = vmatprep.subr.mxu0 %v6652_v43  ;;  %v6619_v38 = vadd.f32 1.0, %v6587_v61  ;;  %v6225_v4 = vmul.f32 %v12419_v2, %v6193_v47  ;;  %v6095_v37 = vmul.f32 1.0614054, %v12391_v5  ;;  %v6617_v62 = vadd.f32 1.0, %v6585_v13  ;;  %v13077_v16 = vld [vmem:[#allocation16_spill] sm:$0xff]  ;;  %v13078_v61 = vld [vmem:[#allocation15_spill] sm:$0xff] }
 0xec5   :  { %7592 = vmatpush3.msra.mxu0 %v12381_v39  ;;  %v6515_v15 = vmul.f32 %v8769_v41, %v6355_v35  ;;  %v6354_v3 = vmul.f32 %v12410_v12, %v6322_v32  ;;  %v6160_v49 = vmul.f32 %v12378_v30, %v6128_v46  ;;  %vm5873_vm2 = vcmp.ge.f32.partialorder %v12309_v48, 0.0  ;;  %v13074_v41 = vld [vmem:[#allocation21_spill] sm:$0xff]  ;;  %v13080_v32 = vld [vmem:[#allocation22_spill] sm:$0xff] }
 0xec6   :  { %v6651_v25 = vmul.f32 %v6619_v38, %v12458_v60  ;;  %v6257_v0 = vadd.f32 -0.28449672, %v6225_v4  ;;  %v6127_v57 = vadd.f32 -1.4531521, %v6095_v37  ;;  %v6094_v53 = vmul.f32 1.0614054, %v12324_v18 }
 0xec7   :  { %v6650_v31 = vmul.f32 %v6618_v6, %v12440_v10  ;;  %v6548_v28 = vsub.f32 1.0, %v6516_v33  ;;  %v6514_v40 = vmul.f32 %v12416_v20, %v6354_v3  ;;  %v6192_v39 = vadd.f32 1.4214138, %v6160_v49  ;;  %v13072_v60 = vld [vmem:[#allocation13_spill] sm:$0xff] }
 0xec8   :  { %7593 = vmatprep.subr.mxu0 %v6651_v25  ;;  %v6289_v27 = vmul.f32 %v12419_v2, %v6257_v0  ;;  %v6159_v12 = vmul.f32 %v12391_v5, %v6127_v57  ;;  %v6126_v7 = vadd.f32 -1.4531521, %v6094_v53  ;;  %v6093_v9 = vmul.f32 1.0614054, %v12366_v34  ;;  %v13079_v35 = vld [vmem:[#allocation33_spill] sm:$0xff] }
 0xec9   :  { %7594 = vmatpush3.msra.mxu0 %v12400_v22  ;;  %v6649_v26 = vmul.f32 %v6617_v62, %v13072_v60  ;;  %v6615_v54 = vadd.f32 1.0, %v6583_v42  ;;  %v6547_v44 = vsub.f32 1.0, %v6515_v15  ;;  %v6224_v10 = vmul.f32 %v12378_v30, %v6192_v39  ;;  %v13081_v15 = vld [vmem:[#allocation59_spill] sm:$0xff]  ;;  %v13082_v3 = vld [vmem:[#allocation17_spill] sm:$0xff] }
 0xeca   :  { %vm5872_vm3 = vcmp.ge.f32.partialorder %v13073_v36, 0.0  ;;  %7595 = vmatprep.subr.mxu0 %v6650_v31  ;;  %v6321_v20 = vadd.f32 0.2548296, %v6289_v27  ;;  %v6191_v14 = vadd.f32 1.4214138, %v6159_v12  ;;  %v6158_v23 = vmul.f32 %v12324_v18, %v6126_v7  ;;  %v13085_v27 = vld [vmem:[#allocation30_spill] sm:$0xff] }
 0xecb   :  { %v6125_v51 = vadd.f32 -1.4531521, %v6093_v9  ;;  %7596 = vmatpush3.msra.mxu0 %v13074_v41  ;;  %v6648_v19 = vmul.f32 %v12587_v63, %v13075_v50  ;;  %v6580_v22 = vmul.f32 %v6548_v28, %v12559_v58  ;;  %v6546_v1 = vsub.f32 1.0, %v6514_v40  ;;  %v13083_v28 = vld [vmem:[#allocation31_spill] sm:$0xff]  ;;  %v13084_v40 = vld [vmem:[#allocation26_spill] sm:$0xff]  ;;  %v13087_v9 = vld [vmem:[#allocation25_spill] sm:$0xff] }
 0xecc   :  { %v6256_v52 = vadd.f32 -0.28449672, %v6224_v10  ;;  %7597 = vmatprep.subr.mxu0 %v6649_v26  ;;  %v6353_v11 = vmul.f32 %v12419_v2, %v6321_v20  ;;  %v6223_v21 = vmul.f32 %v12391_v5, %v6191_v14  ;;  %v6190_v24 = vadd.f32 1.4214138, %v6158_v23  ;;  %v13086_v12 = vld [vmem:[#allocation6_spill] sm:$0xff]  ;;  %v13089_v20 = vld [vmem:[#allocation24_spill] sm:$0xff] }
 0xecd   :  { %v6157_v13 = vmul.f32 %v12366_v34, %v6125_v51  ;;  %7598 = vmatpush3.msra.mxu0 %v13076_v17  ;;  %v6647_v59 = vmul.f32 %v6615_v54, %v13077_v16  ;;  %v6613_v43 = vadd.f32 1.0, %v12584_v45  ;;  %v6579_v63 = vmul.f32 %v6547_v44, %v12568_v55  ;;  %v13088_v44 = vld [vmem:[#allocation45_spill] sm:$0xff]  ;;  %v13090_v50 = vld [vmem:[#allocation19_spill] sm:$0xff]  ;;  %v13095_v17 = vld [vmem:[#allocation60_spill] sm:$0xff] }
 0xece   :  { %v6288_v58 = vmul.f32 %v12378_v30, %v6256_v52  ;;  %7599 = vmatprep.subr.mxu0 %v6648_v19  ;;  %v6513_v6 = vmul.f32 %v13078_v61, %v6353_v11  ;;  %v6255_v47 = vadd.f32 -0.28449672, %v6223_v21  ;;  %v6222_v2 = vmul.f32 %v12324_v18, %v6190_v24  ;;  %v13092_v52 = vld [vmem:[#allocation74_spill] sm:$0xff]  ;;  %v13094_v24 = vld [vmem:[#allocation56_spill] sm:$0xff]  ;;  %v13097_v61 = vld [vmem:[#allocation49_spill] sm:$0xff] }
 0xecf   :  { %v6189_v33 = vadd.f32 1.4214138, %v6157_v13  ;;  %7600 = vmatpush3.msra.mxu0 %v13079_v35  ;;  %v6646_v46 = vmul.f32 %v12594_v8, %v13080_v32  ;;  %v6612_v38 = vadd.f32 1.0, %v6580_v22  ;;  %v6578_v42 = vmul.f32 %v6546_v1, %v12575_v29  ;;  %v13091_v1 = vld [vmem:[#allocation37_spill] sm:$0xff]  ;;  %v13093_v21 = vld [vmem:[#allocation46_spill] sm:$0xff] }
 0xed0   :  { %v6320_v45 = vadd.f32 0.2548296, %v6288_v58  ;;  %7601 = vmatprep.subr.mxu0 %v6647_v59  ;;  %v6545_v55 = vsub.f32 1.0, %v6513_v6  ;;  %v6287_v4 = vmul.f32 %v12391_v5, %v6255_v47  ;;  %v6254_v37 = vadd.f32 -0.28449672, %v6222_v2 }
 0xed1   :  { %v6221_v62 = vmul.f32 %v12366_v34, %v6189_v33  ;;  %7602 = vmatpush3.msra.mxu0 %v13081_v15  ;;  %v6645_v49 = vmul.f32 %v6613_v43, %v13082_v3  ;;  %v6611_v25 = vadd.f32 1.0, %v6579_v63  ;;  %v5905_v8 = vsel %vm5873_vm2, 1.0, %v12886_v56  ;;  %v13096_v43 = vld [vmem:[#allocation20_spill] sm:$0xff]  ;;  %v13104_v15 = vld [vmem:[#allocation71_spill] sm:$0xff] }
 0xed2   :  { %v6352_v0 = vmul.f32 %v12378_v30, %v6320_v45  ;;  %7603 = vmatprep.subr.mxu0 %v6646_v46  ;;  %v6577_v29 = vmul.f32 %v6545_v55, %v5905_v8  ;;  %v6319_v57 = vadd.f32 0.2548296, %v6287_v4  ;;  %v6286_v53 = vmul.f32 %v12324_v18, %v6254_v37  ;;  %v13099_v46 = vld [vmem:[#allocation23_spill] sm:$0xff]  ;;  %v13101_v55 = vld [vmem:[#allocation76_spill] sm:$0xff] }
 0xed3   :  { %v6253_v31 = vadd.f32 -0.28449672, %v6221_v62  ;;  %vm5871_vm4 = vcmp.ge.f32.partialorder %v13083_v28, 0.0  ;;  %v5811_v39 = vmul.f32 0.5, %v13084_v40  ;;  %7604 = vmatpush3.msra.mxu0 %v13085_v27  ;;  %v6644_v7 = vmul.f32 %v6612_v38, %v13086_v12  ;;  %v13103_v37 = vld [vmem:[#allocation43_spill] sm:$0xff]  ;;  %v13109_v12 = vld [vmem:[#allocation41_spill] sm:$0xff] }
 0xed4   :  { %v6512_v60 = vmul.f32 %v13087_v9, %v6352_v0  ;;  %7605 = vmatprep.subr.mxu0 %v6645_v49  ;;  %v6610_v48 = vadd.f32 1.0, %v6578_v42  ;;  %v6351_v30 = vmul.f32 %v12391_v5, %v6319_v57  ;;  %v6318_v26 = vadd.f32 0.2548296, %v6286_v53  ;;  %v13100_v42 = vld [vmem:[#allocation51_spill] sm:$0xff]  ;;  %v13106_v53 = vld [vmem:[#allocation66_spill] sm:$0xff] }
 0xed5   :  { %v6285_v54 = vmul.f32 %v12366_v34, %v6253_v31  ;;  %v5810_v10 = vmul.f32 0.5, %v13088_v44  ;;  %7606 = vmatpush3.msra.mxu0 %v13089_v20  ;;  %v6643_v14 = vmul.f32 %v6611_v25, %v5811_v39  ;;  %v5904_v23 = vsel %vm5872_vm3, 1.0, %v12886_v56  ;;  %v13107_v31 = vld [vmem:[#allocation65_spill] sm:$0xff]  ;;  %v13108_v40 = vld [vmem:[#allocation63_spill] sm:$0xff] }
 0xed6   :  { %v6544_v51 = vsub.f32 1.0, %v6512_v60  ;;  %7607 = vmatprep.subr.mxu0 %v6644_v7  ;;  %v6609_v41 = vadd.f32 1.0, %v6577_v29  ;;  %v6511_v19 = vmul.f32 %v13090_v50, %v6351_v30  ;;  %v6350_v22 = vmul.f32 %v12324_v18, %v6318_v26  ;;  %v13098_v18 = vld [vmem:[#allocation48_spill] sm:$0xff]  ;;  %v13112_v20 = vld [vmem:[#allocation35_spill] sm:$0xff] }
 0xed7   :  { %v6317_v5 = vadd.f32 0.2548296, %v6285_v54  ;;  %v6627_v11 = vmul.f32 %v13092_v52, %v13091_v1  ;;  %vm5870_vm5 = vcmp.ge.f32.partialorder %v13093_v21, 0.0  ;;  %v5809_v13 = vmul.f32 0.5, %v13094_v24  ;;  %7608 = vmatpush3.msra.mxu0 %v13095_v17  ;;  %v13105_v29 = vld [vmem:[#allocation52_spill] sm:$0xff]  ;;  %v13111_v54 = vld [vmem:[#allocation57_spill] sm:$0xff] }
 0xed8   :  { %v6576_v16 = vmul.f32 %v6544_v51, %v5904_v23  ;;  %7609 = vmatprep.subr.mxu0 %v6643_v14  ;;  %v6642_v36 = vmul.f32 %v6610_v48, %v5810_v10  ;;  %v6543_v59 = vsub.f32 1.0, %v6511_v19  ;;  %v6510_v63 = vmul.f32 %v13096_v43, %v6350_v22  ;;  %v13110_v30 = vld [vmem:[#allocation68_spill] sm:$0xff]  ;;  %v13113_v50 = vld [vmem:[#allocation55_spill] sm:$0xff]  ;;  %v8880_v21 = vld [vmem:[%s12754_s9 + $0x20] sm:$0xff] }
 0xed9   :  { %v6349_v58 = vmul.f32 %v12366_v34, %v6317_v5  ;;  %vm5869_vm6 = vcmp.ge.f32.partialorder %v13097_v61, 0.0  ;;  %v5808_v6 = vmul.f32 0.5, %v13098_v18  ;;  %7610 = vmatpush3.msra.mxu0 %v6627_v11  ;;  %v5903_v2 = vsel %vm5871_vm4, 1.0, %v12886_v56  ;;  %v13102_v34 = vld [vmem:[#allocation61_spill] sm:$0xff]  ;;  %v8877_v1 = vld [vmem:[%s12754_s9 + $0x18] sm:$0xff]  ;;  %v8878_v52 = vld [vmem:[%s12754_s9 + $0x10] sm:$0xff] }
 0xeda   :  { %v6608_v47 = vadd.f32 1.0, %v6576_v16  ;;  %7611 = vmatprep.subr.mxu0 %v6642_v36  ;;  %v6641_v33 = vmul.f32 %v6609_v41, %v5809_v13  ;;  %v6575_v35 = vmul.f32 %v6543_v59, %v5903_v2  ;;  %v6542_v32 = vsub.f32 1.0, %v6510_v63  ;;  %v8876_v5 = vld [vmem:[%s12754_s9] sm:$0xff]  ;;  %v8879_v11 = vld [vmem:[%s12754_s9 + $0x28] sm:$0xff]  ;;  %v8881_v24 = vld [vmem:[%s12754_s9 + $0x38] sm:$0xff] }
 0xedb   :  { %v6509_v38 = vmul.f32 %v13099_v46, %v6349_v58  ;;  %v6591_v45 = vadd.f32 1.0, %v13100_v42  ;;  %v6625_v4 = vmul.f32 %v13102_v34, %v13101_v55  ;;  %v5807_v62 = vmul.f32 0.5, %v13103_v37  ;;  %7612 = vmatpush3.msra.mxu0 %v13104_v15  ;;  %v8882_v13 = vld [vmem:[%s12754_s9 + $0x30] sm:$0xff]  ;;  %v13114_v43 = vld [vmem:[#allocation70_spill] sm:$0xff]  ;;  %v8883_v61 = vld [vmem:[%s12745_s0 + $0x20] sm:$0xff] }
 0xedc   :  { %v5902_v3 = vsel %vm5870_vm5, 1.0, %v12886_v56  ;;  %7613 = vmatprep.subr.mxu0 %v6641_v33  ;;  %v6640_v49 = vmul.f32 %v6608_v47, %v5808_v6  ;;  %v6607_v25 = vadd.f32 1.0, %v6575_v35  ;;  %v6590_v57 = vadd.f32 1.0, %v13105_v29  ;;  %v13115_v2 = vld [vmem:[#allocation81_spill] sm:$0xff]  ;;  %v13116_v35 = vld [vmem:[#allocation80_spill] sm:$0xff]  ;;  %v13118_v37 = vld [vmem:[#allocation67_spill] sm:$0xff] }
 0xedd   :  { %v6574_v8 = vmul.f32 %v6542_v32, %v5902_v3  ;;  %v6541_v0 = vsub.f32 1.0, %v6509_v38  ;;  %v6624_v28 = vmul.f32 %v13107_v31, %v13106_v53  ;;  %v5791_v39 = vmul.f32 0.5, %v13108_v40  ;;  %7614 = vmatpush3.msra.mxu0 %v6625_v4  ;;  %v13117_v38 = vld [vmem:[#allocation69_spill] sm:$0xff]  ;;  %v13119_v15 = vld [vmem:[#allocation72_spill] sm:$0xff] }
 0xede   :  { %v5901_v27 = vsel %vm5869_vm6, 1.0, %v12886_v56  ;;  %v5806_v7 = vmul.f32 0.5, %v13109_v12  ;;  %7615 = vmatprep.subr.mxu0 %v6640_v49  ;;  %v6639_v9 = vmul.f32 %v6607_v25, %v5807_v62  ;;  %v5790_v26 = vmul.f32 0.5, %v13110_v30  ;;  %v13120_v25 = vld [vmem:[#allocation79_spill] sm:$0xff]  ;;  %v13121_v53 = vld [vmem:[#allocation77_spill] sm:$0xff]  ;;  %v8886_v12 = vld [vmem:[%s12745_s0 + $0x38] sm:$0xff] }
 0xedf   :  { %v6606_v60 = vadd.f32 1.0, %v6574_v8  ;;  %v6573_v48 = vmul.f32 %v6541_v0, %v5901_v27  ;;  %v6589_v44 = vadd.f32 1.0, %v13111_v54  ;;  %v6623_v10 = vmul.f32 %v6591_v45, %v5791_v39  ;;  %7616 = vmatpush3.msra.mxu0 %v6624_v28  ;;  %v8884_v45 = vld [vmem:[%s12745_s0 + $0x28] sm:$0xff]  ;;  %v8885_v0 = vld [vmem:[%s12745_s0 + $0x30] sm:$0xff]  ;;  %v13122_v28 = vld [vmem:[#allocation64_spill] sm:$0xff] }
 0xee0   :  { %v5805_v14 = vmul.f32 0.5, %v13112_v20  ;;  %7617 = vmatprep.subr.mxu0 %v6639_v9  ;;  %v6622_v41 = vmul.f32 %v6590_v57, %v5790_v26  ;;  %v5789_v56 = vmul.f32 0.5, %v13113_v50  ;;  %v13123_v39 = vld [vmem:[#allocation75_spill] sm:$0xff]  ;;  %v13124_v9 = vld [vmem:[#allocation78_spill] sm:$0xff] }
 0xee1   :  { %v6638_v23 = vmul.f32 %v6606_v60, %v5806_v7  ;;  %v6605_v51 = vadd.f32 1.0, %v6573_v48  ;;  %7618 = vmatpush3.msra.mxu0 %v6623_v10  ;;  %v13125_v48 = vld [vmem:[#allocation73_spill] sm:$0xff] }
 0xee2   :  { %v6621_v22 = vmul.f32 %v6589_v44, %v5789_v56 }
 0xee3   :  { %7619 = vmatprep.subr.mxu0 %v6638_v23  ;;  %v6637_v19 = vmul.f32 %v6605_v51, %v5805_v14 }
 0xee4   :  { %7620 = vmatpush3.msra.mxu0 %v6622_v41 }
 0xee5   :  { %7621 = vmatprep.subr.mxu0 %v6637_v19 }
 0xee6   :  { %7622 = vmatpush3.msra.mxu0 %v6621_v22 }
 0xee7   :  { %6718 = vmatmul.mubr.f32.vlgmr.msra.gmra.mxu0 %v8876_v5 }
 0xee8   :  { %6722 = vmatprep.mubr.f32.mxu0 %v8877_v1 }
 0xeeb   :  { %6723 = vmatmul.mubr.f32.gmra.mxu0 %v8878_v52 }
 0xeec   :  { %6727 = vmatprep.mubr.f32.mxu0 %v8879_v11 }
 0xeef   :  { %6728 = vmatmul.mubr.f32.gmra.mxu0 %v8880_v21 }
 0xef0   :  { %6732 = vmatprep.mubr.f32.mxu0 %v8881_v24 }
 0xef3   :  { %6733 = vmatmul.mubr.f32.gmra.mxu0 %v8882_v13 }
 0xfa7   :  { %v7623_v17 = vpop.f32.mrf.mxu0 }
 0xfa9   :  { %v7624_v16 = vpop.f32.mrf.mxu0 }
 0xfaa   :  { %v7625_v36 = vadd.f32 %v7624_v16, %v7623_v17 }
 0xfab   :  { %v7626_v59 = vpop.f32.mrf.mxu0 }
 0xfac   :  { %v6720_v63 = vadd.f32 %v7625_v36, %v13114_v43 }
 0xfad   :  { %v7627_v58 = vpop.f32.mrf.mxu0 }
 0xfae   :  { %v6738_v18 = vadd.f32 %v8883_v61, %v6720_v63  ;;  %v7628_v6 = vadd.f32 %v7627_v58, %v7626_v59 }
 0xfaf   :  { %v7629_v47 = vpop.f32.mrf.mxu0 }
 0xfb0   :  { %v6742_v33 = vmul.f32 %v6738_v18, %v13115_v2  ;;  %v6725_v32 = vadd.f32 %v7628_v6, %v13116_v35 }
 0xfb1   :  { %v7630_v46 = vpop.f32.mrf.mxu0 }
 0xfb2   :  { %v6746_v42 = vadd.f32 %v6742_v33, %v13117_v38  ;;  %v6739_v55 = vadd.f32 %v8884_v45, %v6725_v32  ;;  %v7631_v34 = vadd.f32 %v7630_v46, %v7629_v47 }
 0xfb3   :  { %v7632_v4 = vpop.f32.mrf.mxu0 }
 0xfb4   :  { %6751 = vst [vmem:[#allocation2 + $0x20] sm:$0xff] %v6746_v42  ;;  %v6743_v62 = vmul.f32 %v6739_v55, %v13118_v37  ;;  %v6730_v3 = vadd.f32 %v7631_v34, %v13119_v15 }
 0xfb5   :  { %v7633_v49 = vpop.f32.mrf.mxu0 }
 0xfb6   :  { %v6747_v8 = vadd.f32 %v6743_v62, %v13120_v25  ;;  %v6740_v29 = vadd.f32 %v8885_v0, %v6730_v3  ;;  %v7634_v57 = vadd.f32 %v7633_v49, %v7632_v4 }
 0xfb8   :  { %6752 = vst [vmem:[#allocation2 + $0x28] sm:$0xff] %v6747_v8  ;;  %v6744_v31 = vmul.f32 %v6740_v29, %v13121_v53  ;;  %v6735_v40 = vadd.f32 %v7634_v57, %v13122_v28 }
 0xfba   :  { %v6748_v27 = vadd.f32 %v6744_v31, %v13123_v39  ;;  %v6741_v7 = vadd.f32 %v8886_v12, %v6735_v40 }
 0xfbc   :  { %6753 = vst [vmem:[#allocation2 + $0x30] sm:$0xff] %v6748_v27  ;;  %v6745_v60 = vmul.f32 %v6741_v7, %v13124_v9 }
 0xfbe   :  { %v6749_v30 = vadd.f32 %v6745_v60, %v13125_v48 }
 0xfc0   :  { %6754 = vst [vmem:[#allocation2 + $0x38] sm:$0xff] %v6749_v30 }
 0xfc1   :  { %8898 = shalt.err (!%p8895_p4)
}
 0xfc2   :  { %s8914_s22 = smov 128   ;;  %s8915_s23 = smov 8  }
 0xfc3   :  { %6766 = dma.vmem_to_hbm [thread:$0]  %s6761_s6, 1024, %s12758_s13, [#allocation3], %s8914_s22, %s8914_s22, %s8915_s23  }
 0xfc4   :  { %8907 = dma.done.wait [#allocation3], 1024  }
 0xfc5   :  { %8908 = vsyncadd [#allocation3], 4294966272 }
 0xfc6   :  { %6770 = vsyncpa [#allocation3], 1 }

</bundles_post_ra>
